<compile_context>
chip_gen: v6e
topology: v6e:2x2x1
jax: 0.10.0
libtpu: 0.0.40
codegen_flags: <defaults>
</compile_context>

<pallas_src>
import functools

import jax
import jax.numpy as jnp
from jax.experimental import pallas as pl
from jax.experimental.pallas import tpu as pltpu


# ---------------------------------------------------------------------------
# Kernel 1: fused transformer layer
#   x = x + proj(MultiHeadCausalAttention(LN1(x)))
#   x = x + FF2(relu(FF1(LN2(x))))
# ---------------------------------------------------------------------------

def _layer_kernel(x_ref, ln1g_ref, ln1b_ref, wqkv_ref, wproj_ref, bproj_ref,
                  ln2g_ref, ln2b_ref, w1_ref, b1_ref, w2_ref, b2_ref, o_ref,
                  *, n_heads, seq_len, eps):
    x = x_ref[...]                                       # (R, E) f32, R = nb*T
    R, E = x.shape
    T = seq_len
    nb = R // T
    Hs = E // n_heads
    scale = Hs ** (-0.5)
    cdt = wqkv_ref.dtype                                 # MXU operand dtype

    def layer_norm(z, g, b):
        m = jnp.mean(z, axis=-1, keepdims=True)
        zc = z - m
        v = jnp.mean(zc * zc, axis=-1, keepdims=True)
        return zc * jax.lax.rsqrt(v + eps) * g + b       # rsqrt -> EUP

    # ---- LayerNorm(ln1) + fused Q/K/V projection: one (E, 3E) MXU matmul ----
    h = layer_norm(x, ln1g_ref[...], ln1b_ref[...])
    qkv = jnp.dot(h.astype(cdt), wqkv_ref[...],
                  preferred_element_type=jnp.float32)    # (R, 3E) f32

    # causal mask shared by every batch element / head in this block
    row = jax.lax.broadcasted_iota(jnp.int32, (T, T), 0)
    col = jax.lax.broadcasted_iota(jnp.int32, (T, T), 1)
    causal = col <= row

    # ---- per-(batch, head) causal softmax attention ----
    # TODO(synk): switch to flash-style KV tiling (online softmax) before
    # scaling T; the (T, T) f32 score matrix hits v7x's 64 MiB VMEM first.
    att_rows = []
    for bi in range(nb):
        qkv_b = qkv[bi * T:(bi + 1) * T, :]              # (T, 3E)
        head_outs = []
        for hd in range(n_heads):
            q = qkv_b[:, hd * Hs:(hd + 1) * Hs]
            k = qkv_b[:, E + hd * Hs:E + (hd + 1) * Hs]
            v = qkv_b[:, 2 * E + hd * Hs:2 * E + (hd + 1) * Hs]
            s = jnp.dot(q.astype(cdt), k.astype(cdt).T,
                        preferred_element_type=jnp.float32) * scale
            s = jnp.where(causal, s, -1e30)              # finite: NaN-safe
            s = s - jnp.max(s, axis=-1, keepdims=True)
            p = jnp.exp(s)
            p = p * pl.reciprocal(jnp.sum(p, axis=-1, keepdims=True),
                                  approx=True)           # divide -> EUP
            head_outs.append(jnp.dot(p.astype(cdt), v.astype(cdt),
                                     preferred_element_type=jnp.float32))
        att_rows.append(jnp.concatenate(head_outs, axis=-1))   # (T, E)
    att = jnp.concatenate(att_rows, axis=0)              # (R, E)

    # ---- single full-width (E, E) output projection + bias + residual ----
    x = x + jnp.dot(att.astype(cdt), wproj_ref[...],
                    preferred_element_type=jnp.float32) + bproj_ref[...]

    # ---- LayerNorm(ln2) + FFN (4E hidden never leaves VMEM) + residual ----
    h2 = layer_norm(x, ln2g_ref[...], ln2b_ref[...])
    hid = jnp.maximum(
        jnp.dot(h2.astype(cdt), w1_ref[...],
                preferred_element_type=jnp.float32) + b1_ref[...], 0.0)
    x = x + jnp.dot(hid.astype(cdt), w2_ref[...],
                    preferred_element_type=jnp.float32) + b2_ref[...]

    o_ref[...] = x                                       # f32, lane-dense (E)


def _rows_per_step(B, T):
    """Batch elements per grid step: fill the MXU M-dim while keeping the
    parallel grid extent >= 2 so both v7x TensorCores get work."""
    nb = 1
    while B % (2 * nb) == 0 and B // (2 * nb) >= 2 and 2 * nb * T <= 128:
        nb *= 2
    return nb


def transformer_layer(x, blk, *, n_heads, seq_len, compute_dtype=jnp.float32,
                      eps=1e-5):
    """x: (B*T, E) f32. blk['wqkv']: (E, 3E) = [q heads | k heads | v heads]."""
    M, E = x.shape
    T = seq_len
    assert M % T == 0
    B = M // T
    H = blk["w_ff1"].shape[1]
    assert E % 128 == 0 and T % 8 == 0 and H % 128 == 0

    nb = _rows_per_step(B, T)
    R = nb * T
    cdt = compute_dtype
    kernel = functools.partial(_layer_kernel, n_heads=n_heads, seq_len=T,
                               eps=eps)
    return pl.pallas_call(
        kernel,
        out_shape=jax.ShapeDtypeStruct((M, E), jnp.float32),
        grid_spec=pltpu.PrefetchScalarGridSpec(
            num_scalar_prefetch=0,
            grid=(M // R,),
            in_specs=[
                pl.BlockSpec((R, E), lambda i: (i, 0)),          # x slab
                pl.BlockSpec((1, E), lambda i: (0, 0)),          # ln1 gamma
                pl.BlockSpec((1, E), lambda i: (0, 0)),          # ln1 beta
                pl.BlockSpec((E, 3 * E), lambda i: (0, 0)),      # fused Wqkv
                pl.BlockSpec((E, E), lambda i: (0, 0)),          # w_proj
                pl.BlockSpec((1, E), lambda i: (0, 0)),          # b_proj
                pl.BlockSpec((1, E), lambda i: (0, 0)),          # ln2 gamma
                pl.BlockSpec((1, E), lambda i: (0, 0)),          # ln2 beta
                pl.BlockSpec((E, H), lambda i: (0, 0)),          # w_ff1
                pl.BlockSpec((1, H), lambda i: (0, 0)),          # b_ff1
                pl.BlockSpec((H, E), lambda i: (0, 0)),          # w_ff2
                pl.BlockSpec((1, E), lambda i: (0, 0)),          # b_ff2
            ],
            out_specs=pl.BlockSpec((R, E), lambda i: (i, 0)),
        ),
        compiler_params=pltpu.CompilerParams(
            dimension_semantics=("parallel",),
            vmem_limit_bytes=64 * 1024 * 1024),
    )(x,
      blk["ln1_g"].reshape(1, E), blk["ln1_b"].reshape(1, E),
      blk["wqkv"].astype(cdt), blk["w_proj"].astype(cdt),
      blk["b_proj"].reshape(1, E),
      blk["ln2_g"].reshape(1, E), blk["ln2_b"].reshape(1, E),
      blk["w_ff1"].astype(cdt), blk["b_ff1"].reshape(1, H),
      blk["w_ff2"].astype(cdt), blk["b_ff2"].reshape(1, E))


# ---------------------------------------------------------------------------
# Kernel 2: tiled lm_head matmul, accumulating directly into the f32 output.
# ---------------------------------------------------------------------------

def _lm_head_kernel(x_ref, w_ref, b_ref, o_ref):
    k = pl.program_id(2)

    @pl.when(k == 0)
    def _():
        o_ref[...] = jnp.broadcast_to(b_ref[...], o_ref.shape)

    o_ref[...] += jnp.dot(x_ref[...], w_ref[...],
                          preferred_element_type=jnp.float32)


def lm_head(x, w, b, *, compute_dtype=jnp.float32, tm=None, tn=None, tk=None):
    M, K = x.shape
    Kw, N = w.shape
    assert K == Kw

    # Pad vocab up to a lane multiple so output stores stay unmasked;
    # slice back at the end (handles e.g. vocab=50257).
    Np = ((N + 127) // 128) * 128
    if Np != N:
        w = jnp.pad(w, ((0, 0), (0, Np - N)))
        b = jnp.pad(b, (0, Np - N))

    if tm is None:
        tm = M
        for cand in (256, 128, 64, 32, 16, 8):
            if M % cand == 0:
                tm = cand
                break
    if tn is None:
        tn = 512 if Np % 512 == 0 else (256 if Np % 256 == 0 else 128)
        while Np // tn < 2 and tn > 128:        # keep >=2 N-tiles for v7x TCs
            tn //= 2
    if tk is None:
        tk = 512 if K % 512 == 0 else (256 if K % 256 == 0 else 128)
    assert M % tm == 0 and Np % tn == 0 and K % tk == 0
    assert tn % 128 == 0 and tk % 128 == 0

    itemsize = jnp.dtype(compute_dtype).itemsize
    cost = pl.CostEstimate(
        flops=2 * M * K * Np,
        transcendentals=0,
        bytes_accessed=(M * K + K * Np) * itemsize + M * Np * 4)

    out = pl.pallas_call(
        _lm_head_kernel,
        out_shape=jax.ShapeDtypeStruct((M, Np), jnp.float32),
        grid_spec=pltpu.PrefetchScalarGridSpec(
            num_scalar_prefetch=0,
            grid=(M // tm, Np // tn, K // tk),
            in_specs=[
                pl.BlockSpec((tm, tk), lambda i, j, k: (i, k)),
                pl.BlockSpec((tk, tn), lambda i, j, k: (k, j)),
                pl.BlockSpec((1, tn), lambda i, j, k: (0, j)),
            ],
            out_specs=pl.BlockSpec((tm, tn), lambda i, j, k: (i, j)),
        ),
        compiler_params=pltpu.CompilerParams(
            dimension_semantics=("parallel", "parallel", "arbitrary"),
            vmem_limit_bytes=64 * 1024 * 1024),
        cost_estimate=cost,
    )(x.astype(compute_dtype), w.astype(compute_dtype), b.reshape(1, Np))
    return out[:, :N] if Np != N else out


# ------------------------------ model glue ------------------------------

def init_params(key, *, vocab_size, embed_dim, n_heads, n_blocks):
    E = embed_dim
    ks = iter(jax.random.split(key, 2 + n_blocks * 4))

    def w(shape, scale=0.02):
        return jax.random.normal(next(ks), shape, jnp.float32) * scale

    params = {
        "tok_emb": w((vocab_size, E)),
        "blocks": [],
        "w_out": w((E, vocab_size)),
        "b_out": jnp.zeros((vocab_size,), jnp.float32),
    }
    for _ in range(n_blocks):
        params["blocks"].append({
            # Fused QKV weight, columns = [q_head0..q_headH | k heads | v heads],
            # each head Hs=E//n_heads wide. Head linears have no bias.
            "wqkv": w((E, 3 * E)),
            "w_proj": w((E, E)), "b_proj": jnp.zeros((E,), jnp.float32),
            "ln1_g": jnp.ones((E,), jnp.float32), "ln1_b": jnp.zeros((E,), jnp.float32),
            "ln2_g": jnp.ones((E,), jnp.float32), "ln2_b": jnp.zeros((E,), jnp.float32),
            "w_ff1": w((E, 4 * E)), "b_ff1": jnp.zeros((4 * E,), jnp.float32),
            "w_ff2": w((4 * E, E)), "b_ff2": jnp.zeros((E,), jnp.float32),
        })
    return params


def transformer_forward(params, tokens, *, n_heads, compute_dtype=jnp.float32):
    B, T = tokens.shape
    # TODO(synk): token-embedding row gather kept in plain JAX (data-dependent
    # gather; a Pallas version needs scalar-prefetch / DMA gather).
    x = jnp.take(params["tok_emb"], tokens.reshape(-1), axis=0)   # (B*T, E) f32

    for blk in params["blocks"]:
        x = transformer_layer(x, blk, n_heads=n_heads, seq_len=T,
                              compute_dtype=compute_dtype)

    # NOTE: the reference forward never applies self.lnorm, so neither do we.
    logits = lm_head(x, params["w_out"], params["b_out"],
                     compute_dtype=compute_dtype)
    return logits.reshape(B, T, -1)


# --------------------------- pure-JAX reference ---------------------------

def reference_forward(params, tokens, *, n_heads):
    B, T = tokens.shape
    E = params["tok_emb"].shape[1]
    Hs = E // n_heads
    x = jnp.take(params["tok_emb"], tokens.reshape(-1), axis=0).reshape(B, T, E)

    def ln(z, g, b):
        m = jnp.mean(z, -1, keepdims=True)
        v = jnp.mean((z - m) ** 2, -1, keepdims=True)
        return (z - m) / jnp.sqrt(v + 1e-5) * g + b

    mask = jnp.tril(jnp.ones((T, T), bool))
    for blk in params["blocks"]:
        h = ln(x, blk["ln1_g"], blk["ln1_b"])
        heads = []
        for hd in range(n_heads):
            q = h @ blk["wqkv"][:, hd * Hs:(hd + 1) * Hs]
            k = h @ blk["wqkv"][:, E + hd * Hs:E + (hd + 1) * Hs]
            v = h @ blk["wqkv"][:, 2 * E + hd * Hs:2 * E + (hd + 1) * Hs]
            s = jnp.einsum("btd,bsd->bts", q, k) * Hs ** (-0.5)
            s = jnp.where(mask, s, -jnp.inf)
            p = jax.nn.softmax(s, axis=-1)
            heads.append(jnp.einsum("bts,bsd->btd", p, v))
        att = jnp.concatenate(heads, axis=-1)
        x = x + (att @ blk["w_proj"] + blk["b_proj"])
        h2 = ln(x, blk["ln2_g"], blk["ln2_b"])
        ff = jnp.maximum(h2 @ blk["w_ff1"] + blk["b_ff1"], 0.0)
        x = x + (ff @ blk["w_ff2"] + blk["b_ff2"])
    logits = x.reshape(B * T, E) @ params["w_out"] + params["b_out"]
    return logits.reshape(B, T, -1)


# --------------------------------- main ---------------------------------

if __name__ == "__main__":
    # Make the pure-JAX reference use full-f32 matmuls so the tolerance check
    # measures the kernel, not XLA's default bf16 matmul truncation.
    jax.config.update("jax_default_matmul_precision", "highest")

    # Small shapes consistent with the module (scaled down from defaults).
    VOCAB, EMBED, N_HEADS, N_BLOCKS = 512, 128, 2, 2
    B, T = 2, 16

    key = jax.random.PRNGKey(0)
    kp, kt = jax.random.split(key)
    params = init_params(kp, vocab_size=VOCAB, embed_dim=EMBED,
                         n_heads=N_HEADS, n_blocks=N_BLOCKS)
    tokens = jax.random.randint(kt, (B, T), 0, VOCAB, dtype=jnp.int32)

    # f32 path: must match the pure-JAX reference closely.
    out = transformer_forward(params, tokens, n_heads=N_HEADS,
                              compute_dtype=jnp.float32)
    out = jax.block_until_ready(out)
    assert out.shape == (B, T, VOCAB) and out.dtype == jnp.float32

    ref = jax.block_until_ready(reference_forward(params, tokens,
                                                  n_heads=N_HEADS))
    assert jnp.allclose(out, ref, rtol=2e-3, atol=2e-3), "mismatch vs reference"

    # bf16 MXU-operand path (v6e/v7x fast path): exercise and sanity-check.
    out_bf16 = jax.block_until_ready(
        transformer_forward(params, tokens, n_heads=N_HEADS,
                            compute_dtype=jnp.bfloat16))
    assert out_bf16.shape == (B, T, VOCAB)
    assert bool(jnp.all(jnp.isfinite(out_bf16)))

    print("KERNEL_OK")
</pallas_src>

<mosaic_0001>
module attributes {stable_mosaic.version = 11 : i64} {
  func.func @_layer_kernel(%arg0: i32, %arg1: memref<16x128xf32, #tpu.memory_space<vmem>>, %arg2: memref<1x128xf32, #tpu.memory_space<vmem>>, %arg3: memref<1x128xf32, #tpu.memory_space<vmem>>, %arg4: memref<128x384xf32, #tpu.memory_space<vmem>>, %arg5: memref<128x128xf32, #tpu.memory_space<vmem>>, %arg6: memref<1x128xf32, #tpu.memory_space<vmem>>, %arg7: memref<1x128xf32, #tpu.memory_space<vmem>>, %arg8: memref<1x128xf32, #tpu.memory_space<vmem>>, %arg9: memref<128x512xf32, #tpu.memory_space<vmem>>, %arg10: memref<1x512xf32, #tpu.memory_space<vmem>>, %arg11: memref<512x128xf32, #tpu.memory_space<vmem>>, %arg12: memref<1x128xf32, #tpu.memory_space<vmem>>, %arg13: memref<16x128xf32, #tpu.memory_space<vmem>>) attributes {dimension_semantics = [#tpu.dimension_semantics<parallel>], iteration_bounds = array<i64: 2>, scalar_prefetch = 0 : i64, scratch_operands = 0 : i64, tpu.core_type = #tpu.core_type<tc>, window_params = [{transform_indices = @transform_0, window_bounds = array<i64: 16, 128>}, {pipeline_mode = #tpu.pipeline_mode<synchronous>, transform_indices = @transform_1, window_bounds = array<i64: 1, 128>}, {pipeline_mode = #tpu.pipeline_mode<synchronous>, transform_indices = @transform_2, window_bounds = array<i64: 1, 128>}, {pipeline_mode = #tpu.pipeline_mode<synchronous>, transform_indices = @transform_3, window_bounds = array<i64: 128, 384>}, {pipeline_mode = #tpu.pipeline_mode<synchronous>, transform_indices = @transform_4, window_bounds = array<i64: 128, 128>}, {pipeline_mode = #tpu.pipeline_mode<synchronous>, transform_indices = @transform_5, window_bounds = array<i64: 1, 128>}, {pipeline_mode = #tpu.pipeline_mode<synchronous>, transform_indices = @transform_6, window_bounds = array<i64: 1, 128>}, {pipeline_mode = #tpu.pipeline_mode<synchronous>, transform_indices = @transform_7, window_bounds = array<i64: 1, 128>}, {pipeline_mode = #tpu.pipeline_mode<synchronous>, transform_indices = @transform_8, window_bounds = array<i64: 128, 512>}, {pipeline_mode = #tpu.pipeline_mode<synchronous>, transform_indices = @transform_9, window_bounds = array<i64: 1, 512>}, {pipeline_mode = #tpu.pipeline_mode<synchronous>, transform_indices = @transform_10, window_bounds = array<i64: 512, 128>}, {pipeline_mode = #tpu.pipeline_mode<synchronous>, transform_indices = @transform_11, window_bounds = array<i64: 1, 128>}, {transform_indices = @transform_12, window_bounds = array<i64: 16, 128>}]} {
    %c0 = arith.constant 0 : index
    %c0_0 = arith.constant 0 : index
    %0 = vector.load %arg1[%c0, %c0_0] : memref<16x128xf32, #tpu.memory_space<vmem>>, vector<16x128xf32>
    %c0_1 = arith.constant 0 : index
    %c0_2 = arith.constant 0 : index
    %1 = vector.load %arg2[%c0_1, %c0_2] : memref<1x128xf32, #tpu.memory_space<vmem>>, vector<1x128xf32>
    %c0_3 = arith.constant 0 : index
    %c0_4 = arith.constant 0 : index
    %2 = vector.load %arg3[%c0_3, %c0_4] : memref<1x128xf32, #tpu.memory_space<vmem>>, vector<1x128xf32>
    %cst = arith.constant dense<0.000000e+00> : vector<16xf32>
    %3 = vector.multi_reduction <add>, %0, %cst [1] : vector<16x128xf32> to vector<16xf32>
    %4 = vector.shape_cast %3 : vector<16xf32> to vector<16x1xf32>
    %cst_5 = arith.constant 1.280000e+02 : f32
    %5 = vector.broadcast %cst_5 : f32 to vector<16x1xf32>
    %6 = arith.divf %4, %5 : vector<16x1xf32>
    %7 = vector.broadcast %6 : vector<16x1xf32> to vector<16x128xf32>
    %8 = arith.subf %0, %7 : vector<16x128xf32>
    %9 = arith.mulf %8, %8 : vector<16x128xf32>
    %cst_6 = arith.constant dense<0.000000e+00> : vector<16xf32>
    %10 = vector.multi_reduction <add>, %9, %cst_6 [1] : vector<16x128xf32> to vector<16xf32>
    %11 = vector.shape_cast %10 : vector<16xf32> to vector<16x1xf32>
    %cst_7 = arith.constant 1.280000e+02 : f32
    %12 = vector.broadcast %cst_7 : f32 to vector<16x1xf32>
    %13 = arith.divf %11, %12 : vector<16x1xf32>
    %cst_8 = arith.constant 9.99999974E-6 : f32
    %14 = vector.broadcast %cst_8 : f32 to vector<16x1xf32>
    %15 = arith.addf %13, %14 : vector<16x1xf32>
    %16 = math.rsqrt %15 : vector<16x1xf32>
    %17 = vector.broadcast %16 : vector<16x1xf32> to vector<16x128xf32>
    %18 = arith.mulf %8, %17 : vector<16x128xf32>
    %19 = vector.broadcast %1 : vector<1x128xf32> to vector<16x128xf32>
    %20 = arith.mulf %18, %19 : vector<16x128xf32>
    %21 = vector.broadcast %2 : vector<1x128xf32> to vector<16x128xf32>
    %22 = arith.addf %20, %21 : vector<16x128xf32>
    %c0_9 = arith.constant 0 : index
    %c0_10 = arith.constant 0 : index
    %23 = vector.load %arg4[%c0_9, %c0_10] : memref<128x384xf32, #tpu.memory_space<vmem>>, vector<128x384xf32>
    %cst_11 = arith.constant dense<0.000000e+00> : vector<16x384xf32>
    %24 = tpu.matmul %22, %23, %cst_11 {dimension_numbers = #tpu.dot_dimension_numbers<[1], [0], [0], [1], [0, 0, 1, 1], [], []>, precision = #tpu.contract_precision<fp32>} : vector<16x128xf32>, vector<128x384xf32>, vector<16x384xf32> -> vector<16x384xf32>
    %25 = tpu.iota {dimensions = array<i32: 0>} : vector<16x16xi32>
    %26 = tpu.iota {dimensions = array<i32: 1>} : vector<16x16xi32>
    %27 = arith.cmpi sle, %26, %25 : vector<16x16xi32>
    %28 = vector.extract_strided_slice %24 {offsets = [0, 0], sizes = [16, 64], strides = [1, 1]} : vector<16x384xf32> to vector<16x64xf32>
    %29 = vector.extract_strided_slice %24 {offsets = [0, 128], sizes = [16, 64], strides = [1, 1]} : vector<16x384xf32> to vector<16x64xf32>
    %30 = vector.extract_strided_slice %24 {offsets = [0, 256], sizes = [16, 64], strides = [1, 1]} : vector<16x384xf32> to vector<16x64xf32>
    %31 = tpu.transpose %29, [1, 0] : vector<16x64xf32> -> vector<64x16xf32>
    %cst_12 = arith.constant dense<0.000000e+00> : vector<16x16xf32>
    %32 = tpu.matmul %28, %31, %cst_12 {dimension_numbers = #tpu.dot_dimension_numbers<[1], [0], [0], [1], [0, 0, 1, 1], [], []>, precision = #tpu.contract_precision<fp32>} : vector<16x64xf32>, vector<64x16xf32>, vector<16x16xf32> -> vector<16x16xf32>
    %cst_13 = arith.constant 1.250000e-01 : f32
    %33 = vector.broadcast %cst_13 : f32 to vector<16x16xf32>
    %34 = arith.mulf %32, %33 : vector<16x16xf32>
    %cst_14 = arith.constant -1.000000e+30 : f32
    %35 = vector.broadcast %cst_14 : f32 to vector<16x16xf32>
    %36 = arith.select %27, %34, %35 : vector<16x16xi1>, vector<16x16xf32>
    %cst_15 = arith.constant dense<0xFF800000> : vector<16xf32>
    %37 = vector.multi_reduction <maximumf>, %36, %cst_15 [1] : vector<16x16xf32> to vector<16xf32>
    %38 = vector.shape_cast %37 : vector<16xf32> to vector<16x1xf32>
    %39 = vector.broadcast %38 : vector<16x1xf32> to vector<16x16xf32>
    %40 = arith.subf %36, %39 : vector<16x16xf32>
    %41 = math.exp %40 : vector<16x16xf32>
    %cst_16 = arith.constant dense<0.000000e+00> : vector<16xf32>
    %42 = vector.multi_reduction <add>, %41, %cst_16 [1] : vector<16x16xf32> to vector<16xf32>
    %43 = vector.shape_cast %42 : vector<16xf32> to vector<16x1xf32>
    %44 = tpu.reciprocal %43 {approx = true} : vector<16x1xf32> -> vector<16x1xf32>
    %45 = vector.broadcast %44 : vector<16x1xf32> to vector<16x16xf32>
    %46 = arith.mulf %41, %45 : vector<16x16xf32>
    %cst_17 = arith.constant dense<0.000000e+00> : vector<16x64xf32>
    %47 = tpu.matmul %46, %30, %cst_17 {dimension_numbers = #tpu.dot_dimension_numbers<[1], [0], [0], [1], [0, 0, 1, 1], [], []>, precision = #tpu.contract_precision<fp32>} : vector<16x16xf32>, vector<16x64xf32>, vector<16x64xf32> -> vector<16x64xf32>
    %48 = vector.extract_strided_slice %24 {offsets = [0, 64], sizes = [16, 64], strides = [1, 1]} : vector<16x384xf32> to vector<16x64xf32>
    %49 = vector.extract_strided_slice %24 {offsets = [0, 192], sizes = [16, 64], strides = [1, 1]} : vector<16x384xf32> to vector<16x64xf32>
    %50 = vector.extract_strided_slice %24 {offsets = [0, 320], sizes = [16, 64], strides = [1, 1]} : vector<16x384xf32> to vector<16x64xf32>
    %51 = tpu.transpose %49, [1, 0] : vector<16x64xf32> -> vector<64x16xf32>
    %cst_18 = arith.constant dense<0.000000e+00> : vector<16x16xf32>
    %52 = tpu.matmul %48, %51, %cst_18 {dimension_numbers = #tpu.dot_dimension_numbers<[1], [0], [0], [1], [0, 0, 1, 1], [], []>, precision = #tpu.contract_precision<fp32>} : vector<16x64xf32>, vector<64x16xf32>, vector<16x16xf32> -> vector<16x16xf32>
    %cst_19 = arith.constant 1.250000e-01 : f32
    %53 = vector.broadcast %cst_19 : f32 to vector<16x16xf32>
    %54 = arith.mulf %52, %53 : vector<16x16xf32>
    %cst_20 = arith.constant -1.000000e+30 : f32
    %55 = vector.broadcast %cst_20 : f32 to vector<16x16xf32>
    %56 = arith.select %27, %54, %55 : vector<16x16xi1>, vector<16x16xf32>
    %cst_21 = arith.constant dense<0xFF800000> : vector<16xf32>
    %57 = vector.multi_reduction <maximumf>, %56, %cst_21 [1] : vector<16x16xf32> to vector<16xf32>
    %58 = vector.shape_cast %57 : vector<16xf32> to vector<16x1xf32>
    %59 = vector.broadcast %58 : vector<16x1xf32> to vector<16x16xf32>
    %60 = arith.subf %56, %59 : vector<16x16xf32>
    %61 = math.exp %60 : vector<16x16xf32>
    %cst_22 = arith.constant dense<0.000000e+00> : vector<16xf32>
    %62 = vector.multi_reduction <add>, %61, %cst_22 [1] : vector<16x16xf32> to vector<16xf32>
    %63 = vector.shape_cast %62 : vector<16xf32> to vector<16x1xf32>
    %64 = tpu.reciprocal %63 {approx = true} : vector<16x1xf32> -> vector<16x1xf32>
    %65 = vector.broadcast %64 : vector<16x1xf32> to vector<16x16xf32>
    %66 = arith.mulf %61, %65 : vector<16x16xf32>
    %cst_23 = arith.constant dense<0.000000e+00> : vector<16x64xf32>
    %67 = tpu.matmul %66, %50, %cst_23 {dimension_numbers = #tpu.dot_dimension_numbers<[1], [0], [0], [1], [0, 0, 1, 1], [], []>, precision = #tpu.contract_precision<fp32>} : vector<16x16xf32>, vector<16x64xf32>, vector<16x64xf32> -> vector<16x64xf32>
    %68 = tpu.concatenate %47, %67 in 1 : vector<16x64xf32>, vector<16x64xf32> -> vector<16x128xf32>
    %c0_24 = arith.constant 0 : index
    %c0_25 = arith.constant 0 : index
    %69 = vector.load %arg5[%c0_24, %c0_25] : memref<128x128xf32, #tpu.memory_space<vmem>>, vector<128x128xf32>
    %cst_26 = arith.constant dense<0.000000e+00> : vector<16x128xf32>
    %70 = tpu.matmul %68, %69, %cst_26 {dimension_numbers = #tpu.dot_dimension_numbers<[1], [0], [0], [1], [0, 0, 1, 1], [], []>, precision = #tpu.contract_precision<fp32>} : vector<16x128xf32>, vector<128x128xf32>, vector<16x128xf32> -> vector<16x128xf32>
    %71 = arith.addf %0, %70 : vector<16x128xf32>
    %c0_27 = arith.constant 0 : index
    %c0_28 = arith.constant 0 : index
    %72 = vector.load %arg6[%c0_27, %c0_28] : memref<1x128xf32, #tpu.memory_space<vmem>>, vector<1x128xf32>
    %73 = vector.broadcast %72 : vector<1x128xf32> to vector<16x128xf32>
    %74 = arith.addf %71, %73 : vector<16x128xf32>
    %c0_29 = arith.constant 0 : index
    %c0_30 = arith.constant 0 : index
    %75 = vector.load %arg7[%c0_29, %c0_30] : memref<1x128xf32, #tpu.memory_space<vmem>>, vector<1x128xf32>
    %c0_31 = arith.constant 0 : index
    %c0_32 = arith.constant 0 : index
    %76 = vector.load %arg8[%c0_31, %c0_32] : memref<1x128xf32, #tpu.memory_space<vmem>>, vector<1x128xf32>
    %cst_33 = arith.constant dense<0.000000e+00> : vector<16xf32>
    %77 = vector.multi_reduction <add>, %74, %cst_33 [1] : vector<16x128xf32> to vector<16xf32>
    %78 = vector.shape_cast %77 : vector<16xf32> to vector<16x1xf32>
    %cst_34 = arith.constant 1.280000e+02 : f32
    %79 = vector.broadcast %cst_34 : f32 to vector<16x1xf32>
    %80 = arith.divf %78, %79 : vector<16x1xf32>
    %81 = vector.broadcast %80 : vector<16x1xf32> to vector<16x128xf32>
    %82 = arith.subf %74, %81 : vector<16x128xf32>
    %83 = arith.mulf %82, %82 : vector<16x128xf32>
    %cst_35 = arith.constant dense<0.000000e+00> : vector<16xf32>
    %84 = vector.multi_reduction <add>, %83, %cst_35 [1] : vector<16x128xf32> to vector<16xf32>
    %85 = vector.shape_cast %84 : vector<16xf32> to vector<16x1xf32>
    %cst_36 = arith.constant 1.280000e+02 : f32
    %86 = vector.broadcast %cst_36 : f32 to vector<16x1xf32>
    %87 = arith.divf %85, %86 : vector<16x1xf32>
    %cst_37 = arith.constant 9.99999974E-6 : f32
    %88 = vector.broadcast %cst_37 : f32 to vector<16x1xf32>
    %89 = arith.addf %87, %88 : vector<16x1xf32>
    %90 = math.rsqrt %89 : vector<16x1xf32>
    %91 = vector.broadcast %90 : vector<16x1xf32> to vector<16x128xf32>
    %92 = arith.mulf %82, %91 : vector<16x128xf32>
    %93 = vector.broadcast %75 : vector<1x128xf32> to vector<16x128xf32>
    %94 = arith.mulf %92, %93 : vector<16x128xf32>
    %95 = vector.broadcast %76 : vector<1x128xf32> to vector<16x128xf32>
    %96 = arith.addf %94, %95 : vector<16x128xf32>
    %c0_38 = arith.constant 0 : index
    %c0_39 = arith.constant 0 : index
    %97 = vector.load %arg9[%c0_38, %c0_39] : memref<128x512xf32, #tpu.memory_space<vmem>>, vector<128x512xf32>
    %cst_40 = arith.constant dense<0.000000e+00> : vector<16x512xf32>
    %98 = tpu.matmul %96, %97, %cst_40 {dimension_numbers = #tpu.dot_dimension_numbers<[1], [0], [0], [1], [0, 0, 1, 1], [], []>, precision = #tpu.contract_precision<fp32>} : vector<16x128xf32>, vector<128x512xf32>, vector<16x512xf32> -> vector<16x512xf32>
    %c0_41 = arith.constant 0 : index
    %c0_42 = arith.constant 0 : index
    %99 = vector.load %arg10[%c0_41, %c0_42] : memref<1x512xf32, #tpu.memory_space<vmem>>, vector<1x512xf32>
    %100 = vector.broadcast %99 : vector<1x512xf32> to vector<16x512xf32>
    %101 = arith.addf %98, %100 : vector<16x512xf32>
    %cst_43 = arith.constant 0.000000e+00 : f32
    %102 = vector.broadcast %cst_43 : f32 to vector<16x512xf32>
    %103 = arith.maximumf %101, %102 : vector<16x512xf32>
    %c0_44 = arith.constant 0 : index
    %c0_45 = arith.constant 0 : index
    %104 = vector.load %arg11[%c0_44, %c0_45] : memref<512x128xf32, #tpu.memory_space<vmem>>, vector<512x128xf32>
    %cst_46 = arith.constant dense<0.000000e+00> : vector<16x128xf32>
    %105 = tpu.matmul %103, %104, %cst_46 {dimension_numbers = #tpu.dot_dimension_numbers<[1], [0], [0], [1], [0, 0, 1, 1], [], []>, precision = #tpu.contract_precision<fp32>} : vector<16x512xf32>, vector<512x128xf32>, vector<16x128xf32> -> vector<16x128xf32>
    %106 = arith.addf %74, %105 : vector<16x128xf32>
    %c0_47 = arith.constant 0 : index
    %c0_48 = arith.constant 0 : index
    %107 = vector.load %arg12[%c0_47, %c0_48] : memref<1x128xf32, #tpu.memory_space<vmem>>, vector<1x128xf32>
    %108 = vector.broadcast %107 : vector<1x128xf32> to vector<16x128xf32>
    %109 = arith.addf %106, %108 : vector<16x128xf32>
    %c0_49 = arith.constant 0 : index
    %c0_50 = arith.constant 0 : index
    %110 = vector.load %arg13[%c0_49, %c0_50] : memref<16x128xf32, #tpu.memory_space<vmem>>, vector<16x128xf32>
    tpu.vector_store %arg13[%c0_49, %c0_50], %109 {strides = array<i32>} : memref<16x128xf32, #tpu.memory_space<vmem>>, vector<16x128xf32>,
    return
  }
  func.func @transform_0(%arg0: i32) -> (i32, i32) {
    %c0_i32 = arith.constant 0 : i32
    %c0_i32_0 = arith.constant 0 : i32
    return %arg0, %c0_i32 : i32, i32
  }
  func.func @transform_1(%arg0: i32) -> (i32, i32) {
    %c0_i32 = arith.constant 0 : i32
    %c0_i32_0 = arith.constant 0 : i32
    %c0_i32_1 = arith.constant 0 : i32
    return %c0_i32, %c0_i32_0 : i32, i32
  }
  func.func @transform_2(%arg0: i32) -> (i32, i32) {
    %c0_i32 = arith.constant 0 : i32
    %c0_i32_0 = arith.constant 0 : i32
    %c0_i32_1 = arith.constant 0 : i32
    return %c0_i32, %c0_i32_0 : i32, i32
  }
  func.func @transform_3(%arg0: i32) -> (i32, i32) {
    %c0_i32 = arith.constant 0 : i32
    %c0_i32_0 = arith.constant 0 : i32
    %c0_i32_1 = arith.constant 0 : i32
    return %c0_i32, %c0_i32_0 : i32, i32
  }
  func.func @transform_4(%arg0: i32) -> (i32, i32) {
    %c0_i32 = arith.constant 0 : i32
    %c0_i32_0 = arith.constant 0 : i32
    %c0_i32_1 = arith.constant 0 : i32
    return %c0_i32, %c0_i32_0 : i32, i32
  }
  func.func @transform_5(%arg0: i32) -> (i32, i32) {
    %c0_i32 = arith.constant 0 : i32
    %c0_i32_0 = arith.constant 0 : i32
    %c0_i32_1 = arith.constant 0 : i32
    return %c0_i32, %c0_i32_0 : i32, i32
  }
  func.func @transform_6(%arg0: i32) -> (i32, i32) {
    %c0_i32 = arith.constant 0 : i32
    %c0_i32_0 = arith.constant 0 : i32
    %c0_i32_1 = arith.constant 0 : i32
    return %c0_i32, %c0_i32_0 : i32, i32
  }
  func.func @transform_7(%arg0: i32) -> (i32, i32) {
    %c0_i32 = arith.constant 0 : i32
    %c0_i32_0 = arith.constant 0 : i32
    %c0_i32_1 = arith.constant 0 : i32
    return %c0_i32, %c0_i32_0 : i32, i32
  }
  func.func @transform_8(%arg0: i32) -> (i32, i32) {
    %c0_i32 = arith.constant 0 : i32
    %c0_i32_0 = arith.constant 0 : i32
    %c0_i32_1 = arith.constant 0 : i32
    return %c0_i32, %c0_i32_0 : i32, i32
  }
  func.func @transform_9(%arg0: i32) -> (i32, i32) {
    %c0_i32 = arith.constant 0 : i32
    %c0_i32_0 = arith.constant 0 : i32
    %c0_i32_1 = arith.constant 0 : i32
    return %c0_i32, %c0_i32_0 : i32, i32
  }
  func.func @transform_10(%arg0: i32) -> (i32, i32) {
    %c0_i32 = arith.constant 0 : i32
    %c0_i32_0 = arith.constant 0 : i32
    %c0_i32_1 = arith.constant 0 : i32
    return %c0_i32, %c0_i32_0 : i32, i32
  }
  func.func @transform_11(%arg0: i32) -> (i32, i32) {
    %c0_i32 = arith.constant 0 : i32
    %c0_i32_0 = arith.constant 0 : i32
    %c0_i32_1 = arith.constant 0 : i32
    return %c0_i32, %c0_i32_0 : i32, i32
  }
  func.func @transform_12(%arg0: i32) -> (i32, i32) {
    %c0_i32 = arith.constant 0 : i32
    %c0_i32_0 = arith.constant 0 : i32
    return %arg0, %c0_i32 : i32, i32
  }
}

</mosaic_0001>

<bundles_post_ra>
// kernel: tpu_custom_call.1
= control target key start
LH: loop header
LB: loop body
LE: loop exit
PB: predicated region body
PF: predicated region fallthrough
CT: control target
= control target key end

     0   :  { %s14736_s0 = inlined_call_operand.hbm [shape: f32[32,128], index: 0, kind: input, shape index: {}]   ;;  %s14737_s1 = inlined_call_operand.vmem [shape: f32[1,128], index: 1, kind: input, shape index: {}]   ;;  %s14738_s2 = inlined_call_operand.vmem [shape: f32[1,128], index: 2, kind: input, shape index: {}]   ;;  %s14739_s3 = inlined_call_operand.hbm [shape: f32[128,384], index: 3, kind: input, shape index: {}]   ;;  %s14740_s4 = inlined_call_operand.hbm [shape: f32[128,128], index: 4, kind: input, shape index: {}]   ;;  %s14741_s5 = inlined_call_operand.vmem [shape: f32[1,128], index: 5, kind: input, shape index: {}]   ;;  %s14742_s6 = inlined_call_operand.vmem [shape: f32[1,128], index: 6, kind: input, shape index: {}]   ;;  %s14743_s7 = inlined_call_operand.vmem [shape: f32[1,128], index: 7, kind: input, shape index: {}]   ;;  %s14744_s8 = inlined_call_operand.hbm [shape: f32[128,512], index: 8, kind: input, shape index: {}]   ;;  %s14745_s9 = inlined_call_operand.vmem [shape: f32[1,512], index: 9, kind: input, shape index: {}]   ;;  %s14746_s10 = inlined_call_operand.hbm [shape: f32[512,128], index: 10, kind: input, shape index: {}]   ;;  %s14747_s11 = inlined_call_operand.vmem [shape: f32[1,128], index: 11, kind: input, shape index: {}]   ;;  %s14748_s12 = inlined_call_operand.hbm [shape: f32[32,128], index: 12, kind: output, shape index: {}]  }
   0x1   :  { %15149 = sst [smem:[#allocation60_spill]] %s14739_s3 }
   0x2   :  { %15150 = sst [smem:[#allocation61_spill]] %s14740_s4 }
   0x3   :  { %15151 = sst [smem:[#allocation62_spill]] %s14744_s8 }
   0x4   :  { %15152 = sst [smem:[#allocation63_spill]] %s14746_s10 }
   0x5   :  { %17 = vsyncpa [#allocation3], 0 }
   0x6   :  { %19 = vsyncpa [#allocation3 + $0x1], 0 }
   0x7   :  { %20 = vsyncpa [#allocation6], 0 }
   0x8   :  { %21 = vsyncpa [#allocation9], 0 }
   0x9   :  { %22 = vsyncpa [#allocation4], 0 }
   0xa   :  { %24 = vsyncpa [#allocation4 + $0x1], 0  ;;  %s10785_s21 = smov 0   ;;  %s10787_s22 = smov 0  }
   0xb   :  { %s10789_s23 = smov 0   ;;  %s10791_s24 = smov 0  }
   0xc LB: > { %15153 = sst [smem:[#allocation16_spill]] %s10690_s21  ;;  %s10806_s25 = sadd.s32 4294967295, %s10702_s24   ;;  %s10702_s24 = sphi %s10791_s24, %s15754_s24   ;;  %s10698_s23 = sphi %s10789_s23, %s15753_s23   ;;  %s10694_s22 = sphi %s10787_s22, %s15752_s22   ;;  %s10690_s21 = sphi %s10785_s21, %s15751_s21  }
   0xd   : > { %s8989_s26 = sadd.s32 4294967294, %s10702_s24   ;;  %p50_p0 = scmp.ne.s32.totalorder %s10694_s22, %s10690_s21 }
   0xe   : > { %p14749_p1 = scmp.eq.s32.totalorder %s10806_s25, 0  ;;  %p311_p3 = scmp.eq.s32.totalorder %s8989_s26, 1 }
   0xf   : > { %p8990_p5 = scmp.ge.s32.totalorder %s10702_s24, 1  ;;  %p318_p7 = scmp.lt.s32.totalorder %s10702_s24, 3 }
  0x10   : > { %p10815_p4 = por %p14749_p1, %p50_p0  ;;  %p10820_p6 = por %p311_p3, %p50_p0 }
  0x11   : > { %p10825_p8 = pnand %p8990_p5, %p318_p7  ;;  %s10704_s30 = smov [#allocation5]  }
  0x12   : > { %s15154_s27 = scalar_select %p10815_p4, 1, 0 }
  0x13   : > { %s15155_s28 = scalar_select %p10820_p6, 1, 0 }
  0x14   : > { %s15157_s29 = scalar_select %p10825_p8, 1, 0 }
  0x15   : > { %15156 = sst [smem:[#allocation17_spill]] %s15155_s28  ;;  %s336_s13 = sshll.u32 %s10704_s30, 4  ;;  %s337_s13 = int_to_ptr.vmem [resolvable:$true] %s336_s13 }
  0x16   : > { %p10395_p9 = pneg %p10825_p8  ;;  %s10705_s15 = smov [#allocation8]  }
  0x17   : > { %s371_s16 = sshll.u32 %s10705_s15, 4  ;;  %s10509_s17 = scalar_lea.vmem %s337_s13, 6144  ;;  %s372_s16 = int_to_ptr.vmem [resolvable:$true] %s371_s16 }
  0x18   : > { %p10834_p11 = pnand %p10395_p9, %p14749_p1  ;;  %p10510_p13 = scmp.ne.s32.totalorder %s337_s13, %s10509_s17 }
  0x19   : > { %p10517_p5 = scmp.lt.s32.totalorder %s337_s13, %s337_s13  ;;  %p10518_p7 = scmp.lt.s32.totalorder %s10509_s17, %s10509_s17 }
  0x1a   : > { %p10500_p12 = pneg %p10834_p11 }
  0x1b   : > { %p10519_p10 = por %p10518_p7, %p10517_p5 }
  0x1c   : > { %p10512_p0 = pnand %p10510_p13, %p10500_p12 }
  0x1e   : > { %p10513_p3 = pneg %p10512_p0 }
  0x20   : > { %p10520_p9 = pnand %p10519_p10, %p10513_p3 }
  0x22   : > { %10523 = shalt.err (!%p10520_p9)
}
  0x23   : > { %s10706_s18 = smov 384   ;;  %s10707_s19 = smov 24  }
  0x24   : > { %s15159_s3 = sld [smem:[#allocation60_spill]]  ;;  %s10535_s30 = scalar_lea.vmem %s372_s16, 8192 }
  0x25   : > { %p10536_p1 = scmp.ne.s32.totalorder %s372_s16, %s10535_s30  ;;  %p10543_p2 = scmp.lt.s32.totalorder %s372_s16, %s372_s16 }
  0x26   : > { %p10544_p6 = scmp.lt.s32.totalorder %s10535_s30, %s10535_s30 }
  0x27   : > { %p10538_p13 = pnand %p10536_p1, %p10500_p12 }
  0x28   : > { %p10545_p5 = por %p10544_p6, %p10543_p2 }
  0x29   : > { %p10539_p0 = pneg %p10538_p13 }
  0x2a   : > { %10398 = dma.hbm_to_vmem [thread:$0]  (!%p10834_p11), %s15159_s3, 6144, %s337_s13, [#allocation6], %s10706_s18, %s10706_s18, %s10707_s19  }
  0x2b   : > { %p10546_p10 = pnand %p10545_p5, %p10539_p0 }
  0x2d   : > { %10549 = shalt.err (!%p10546_p10)
}
  0x2e   : > { %s10708_s15 = smov 512   ;;  %s10709_s17 = smov 32  }
  0x2f   : > { %s15160_s8 = sld [smem:[#allocation62_spill]]  ;;  %s10710_s13 = smov [#allocation7]  }
  0x30   : > { %s349_s18 = sshll.u32 %s10710_s13, 4  ;;  %s350_s18 = int_to_ptr.vmem [resolvable:$true] %s349_s18 }
  0x31   : > { %s10561_s19 = scalar_lea.vmem %s350_s18, 2048  ;;  %p10569_p6 = scmp.lt.s32.totalorder %s350_s18, %s350_s18 }
  0x32   : > { %p10562_p1 = scmp.ne.s32.totalorder %s350_s18, %s10561_s19  ;;  %p10570_p7 = scmp.lt.s32.totalorder %s10561_s19, %s10561_s19 }
  0x34   : > { %p10564_p3 = pnand %p10562_p1, %p10500_p12  ;;  %p10571_p9 = por %p10570_p7, %p10569_p6 }
  0x35   : > { %10404 = dma.hbm_to_vmem [thread:$0]  (!%p10834_p11), %s15160_s8, 8192, %s372_s16, [#allocation9], %s10708_s15, %s10708_s15, %s10709_s17  }
  0x36   : > { %p10565_p2 = pneg %p10564_p3 }
  0x38   : > { %p10572_p13 = pnand %p10571_p9, %p10565_p2 }
  0x3a   : > { %10575 = shalt.err (!%p10572_p13)
}
  0x3b   : > { %s14752_s20 = smov 128   ;;  %s14753_s26 = smov 8  }
  0x3c   : > { %s15161_s4 = sld [smem:[#allocation61_spill]]  ;;  %s10713_s16 = smov [#allocation10]  }
  0x3d   : > { %s387_s30 = sshll.u32 %s10713_s16, 4  ;;  %s388_s30 = int_to_ptr.vmem [resolvable:$true] %s387_s30 }
  0x3e   : > { %s10587_s15 = scalar_lea.vmem %s388_s30, 8192  ;;  %p10595_p1 = scmp.lt.s32.totalorder %s388_s30, %s388_s30 }
  0x3f   : > { %p10588_p0 = scmp.ne.s32.totalorder %s388_s30, %s10587_s15  ;;  %p10596_p3 = scmp.lt.s32.totalorder %s10587_s15, %s10587_s15 }
  0x41   : > { %p10590_p5 = pnand %p10588_p0, %p10500_p12  ;;  %p10597_p2 = por %p10596_p3, %p10595_p1 }
  0x42   : > { %10401 = dma.hbm_to_vmem [thread:$0]  (!%p10834_p11), %s15161_s4, 2048, %s350_s18, [#allocation6], %s14752_s20, %s14752_s20, %s14753_s26  }
  0x43   : > { %p10591_p10 = pneg %p10590_p5 }
  0x45   : > { %p10598_p6 = pnand %p10597_p2, %p10591_p10 }
  0x47   : > { %10601 = shalt.err (!%p10598_p6)
}
  0x48   : > { %s15162_s10 = sld [smem:[#allocation63_spill]]  ;;  %s10879_s18 = sadd.s32 1, %s10702_s24  }
  0x49   : > { %s37_s14 = sadd.s32 1, %s10698_s23  ;;  %s34_s19 = ssub.s32 %s10702_s24, %s10879_s18 }
  0x4a   : > { %p44_p12 = scmp.ne.s32.totalorder %s10698_s23, %s10694_s22  ;;  %p35_p7 = scmp.eq.s32.totalorder %s34_s19, 0 }
  0x4b   : > { %p45_p9 = scmp.eq.s32.totalorder %s10702_s24, 0  ;;  %p15163_p13 = scmp.eq.s32.totalorder %s10806_s25, 1 }
  0x4c   : > { %p10420_p5 = scmp.lt.s32.totalorder %s10702_s24, 2  ;;  %s404_s16 = sand.u32 1, %s10698_s23  }
  0x4d   : > { %p10889_p0 = por %p15163_p13, %p44_p12  ;;  %p46_p10 = por %p45_p9, %p44_p12 }
  0x4e   : > { %10407 = dma.hbm_to_vmem [thread:$0]  (!%p10834_p11), %s15162_s10, 8192, %s388_s30, [#allocation9], %s14752_s20, %s14752_s20, %s14753_s26  }
  0x4f   : > { %s15164_s21 = scalar_select %p10889_p0, 1, 0 }
  0x50   : > { %s10895_s28 = scalar_select %p35_p7, %s10698_s23, %s37_s14  }
  0x51   : > { %s8996_s15 = sshll.u32 %s404_s16, 4  ;;  %s9017_s30 = sshll.u32 %s10702_s24, 8 }
  0x52   : > { %s10902_s20 = scalar_lea.hbm %s14736_s0, %s9017_s30  ;;  %s408_s19 = scalar_lea.vmem [#allocation2], %s8996_s15 }
  0x53   : > { %s415_s26 = sshll.u32 %s408_s19, 4  ;;  %p10906_p11 = pnand %p10420_p5, %p46_p10  ;;  %s10904_s26 = int_to_ptr.vmem [resolvable:$true] %s415_s26 }
  0x54   : > { %s10910_s14 = scalar_lea.sflag [#allocation3], %s404_s16  ;;  %s10602_s4 = scalar_lea.hbm %s10902_s20, 256 }
  0x55   : > { %p10603_p1 = scmp.ne.s32.totalorder %s10902_s20, %s10602_s4  ;;  %p10604_p3 = pneg %p10906_p11 }
  0x56   : > { %s10607_s15 = scalar_lea.hbm %s14736_s0, 512  ;;  %p10608_p12 = scmp.lt.s32.totalorder %s10902_s20, %s14736_s0 }
  0x57   : > { %p10605_p2 = pnand %p10604_p3, %p10603_p1  ;;  %p10609_p7 = scmp.lt.s32.totalorder %s10607_s15, %s10602_s4 }
  0x59   : > { %p10606_p6 = pneg %p10605_p2  ;;  %p10610_p9 = por %p10609_p7, %p10608_p12 }
  0x5b   : > { %p10611_p13 = pnand %p10610_p9, %p10606_p6 }
  0x5d   : > { %10614 = shalt.err (!%p10611_p13)
}
  0x5e   : > { %s10615_s16 = scalar_lea.vmem %s10904_s26, 256  ;;  %s10714_s8 = smov [#allocation2]  }
  0x5f   : > { %p10616_p5 = scmp.ne.s32.totalorder %s10904_s26, %s10615_s16  ;;  %s10620_s10 = sshll.u32 %s10714_s8, 4  ;;  %s10621_s10 = int_to_ptr.vmem [resolvable:$false] %s10620_s10 }
  0x60   : > { %s10622_s30 = scalar_lea.vmem %s10621_s10, 512  ;;  %p10623_p2 = scmp.lt.s32.totalorder %s10904_s26, %s10621_s10 }
  0x61   : > { %p10618_p10 = pnand %p10616_p5, %p10604_p3  ;;  %p10624_p0 = scmp.lt.s32.totalorder %s10622_s30, %s10615_s16 }
  0x63   : > { %p10619_p1 = pneg %p10618_p10  ;;  %p10625_p4 = por %p10624_p0, %p10623_p2 }
  0x65   : > { %p10626_p8 = pnand %p10625_p4, %p10619_p1 }
  0x67   : > { %10629 = shalt.err (!%p10626_p8)
}
  0x68   : > { %s15166_s4 = smov 8   ;;  %s15167_s17 = smov 128  }
  0x69   : > { %10411 = dma.hbm_to_vmem [thread:$0]  (!%p10906_p11), %s10902_s20, 256, %s10904_s26, %s10910_s14, %s15167_s17, %s15167_s17, %s15166_s4  }
  0x6a   : > { %p15168_p3 = scmp.ne.s32.totalorder %s15157_s29, 0 }
  0x6c   : > { %427 = sbr.rel (%p15168_p3) target bundleno = 3447 (0xd77), region = 68 }
  0x71   : > { %s10937_s8 = sand.u32 1, %s10694_s22   ;;  %p15169_p4 = scmp.ne.s32.totalorder %s15154_s27, 0 }
  0x72   : > { %s9000_s10 = sshll.u32 %s10937_s8, 4  ;;  %s430_s15 = scalar_lea.sflag [#allocation3], %s10937_s8 }
  0x73   : > { %s10943_s3 = scalar_lea.vmem [#allocation2], %s9000_s10 }
  0x74   : > { %10673 = dma.done.wait (%p15169_p4), %s430_s15, 256  }
  0x75   : > { %10675 = vsyncadd (%p15169_p4), %s430_s15, 4294967040  ;;  %p15170_p8 = scmp.eq.s32.totalorder %s10806_s25, 0 }
  0x77   : > { %10677 = dma.done.wait (%p15170_p8), [#allocation6], 8192   ;;  %p15171_p0 = pmov %p15170_p8 }
  0x79   : > { %10679 = vsyncadd (%p15171_p0), [#allocation6], 4294959104  ;;  %p15172_p11 = pmov %p15171_p0 }
  0x7a   : > { %p15173_p6 = pmov %p15171_p0 }
  0x7b   : > { %10681 = dma.done.wait (%p15172_p11), [#allocation9], 16384  }
  0x7c   : > { %10683 = vsyncadd (%p15173_p6), [#allocation9], 4294950912  ;;  %v492_v0 = vld [vmem:[%s10943_s3] sm:$0xff]  ;;  %v10959_v1 = vld [vmem:[%s10943_s3 + $0x8] sm:$0xff]  ;;  %vm2178_vm0 = vcmask 523264   ;;  %vm2697_vm2 = vcmask 130048  }
  0x7d   : > { %496 = vadd.xlane.f32.xlu0 %v492_v0  ;;  %v581_v2 = vld [vmem:[#allocation5 + $0x170] sm:$0xff]  ;;  %v580_v3 = vld [vmem:[#allocation5 + $0x168] sm:$0xff]  ;;  %v578_v4 = vld [vmem:[#allocation5 + $0x158] sm:$0xff]  ;;  %s10716_s14 = smov 64   ;;  %s9018_s20 = sshll.u32 %s10806_s25, 8 }
  0x7e   : > { %v10962_v5 = vand.u32 4294901760, %v581_v2  ;;  %v10964_v6 = vand.u32 4294901760, %v580_v3  ;;  %v10966_v7 = vand.u32 4294901760, %v578_v4  ;;  %v577_v8 = vld [vmem:[#allocation5 + $0x150] sm:$0xff]  ;;  %v575_v9 = vld [vmem:[#allocation5 + $0x140] sm:$0xff]  ;;  %v574_v10 = vld [vmem:[#allocation5 + $0x138] sm:$0xff]  ;;  %s14691_s16 = scalar_lea.hbm %s14748_s12, %s9018_s20 }
  0x7f   : > { %v10968_v11 = vand.u32 4294901760, %v577_v8  ;;  %v10970_v12 = vand.u32 4294901760, %v575_v9  ;;  %v10972_v13 = vand.u32 4294901760, %v574_v10  ;;  %v572_v14 = vld [vmem:[#allocation5 + $0x128] sm:$0xff]  ;;  %v571_v50 = vld [vmem:[#allocation5 + $0x120] sm:$0xff]  ;;  %v569_v53 = vld [vmem:[#allocation5 + $0x110] sm:$0xff] }
  0x80   : > { %v10975_v15 = vsub.f32 %v581_v2, %v10962_v5  ;;  %v10978_v16 = vsub.f32 %v580_v3, %v10964_v6  ;;  %v10981_v17 = vsub.f32 %v578_v4, %v10966_v7  ;;  %v10983_v18 = vand.u32 4294901760, %v572_v14  ;;  %584 = vmatprep.subr.mxu0 %v10962_v5  ;;  %v568_v55 = vld [vmem:[#allocation5 + $0x108] sm:$0xff]  ;;  %v566_v59 = vld [vmem:[#allocation5 + $0xf8] sm:$0xff]  ;;  %v565_v62 = vld [vmem:[#allocation5 + $0xf0] sm:$0xff]  ;;  %s489_s26 = scalar_lea.vmem [#allocation11], %s9000_s10  ;;  %s8865_s30 = scalar_lea.sflag [#allocation4], %s10937_s8 }
  0x81   : > { %498 = vadd.xlane.f32.xlu0 %v10959_v1  ;;  %v10987_v19 = vsub.f32 %v577_v8, %v10968_v11  ;;  %v10990_v20 = vsub.f32 %v575_v9, %v10970_v12  ;;  %v10993_v21 = vsub.f32 %v574_v10, %v10972_v13  ;;  %586 = vmatpush1.msra.mxu0 %v10964_v6  ;;  %v11039_v52 = vand.u32 4294901760, %v571_v50  ;;  %v563_v2 = vld [vmem:[#allocation5 + $0xe0] sm:$0xff]  ;;  %v562_v9 = vld [vmem:[#allocation5 + $0xd8] sm:$0xff]  ;;  %p15746_p7 = scmp.ne.s32.totalorder %s15164_s21, 0  ;;  %s10717_s10 = smov [#allocation11]  }
  0x82   : > { %v14774_v22 = vand.u32 4294901760, %v10975_v15  ;;  %v14773_v23 = vand.u32 4294901760, %v10978_v16  ;;  %v14771_v24 = vand.u32 4294901760, %v10981_v17  ;;  %v11000_v25 = vsub.f32 %v572_v14, %v10983_v18  ;;  %588 = vmatprep.subr.mxu0 %v10966_v7  ;;  %s10634_s4 = sshll.u32 %s10717_s10, 4  ;;  %s10635_s4 = int_to_ptr.vmem [resolvable:$false] %s10634_s4 }
  0x83   : > { %v14770_v26 = vand.u32 4294901760, %v10987_v19  ;;  %v14769_v27 = vand.u32 4294901760, %v10990_v20  ;;  %v14767_v28 = vand.u32 4294901760, %v10993_v21  ;;  %590 = vmatpush1.msra.mxu0 %v10968_v11  ;;  %v11041_v54 = vand.u32 4294901760, %v569_v53  ;;  %s10636_s17 = scalar_lea.vmem %s10635_s4, 512 }
  0x84   : > { %v705_v29 = vsub.f32 %v10975_v15, %v14774_v22  ;;  %v711_v30 = vsub.f32 %v10978_v16, %v14773_v23  ;;  %v717_v31 = vsub.f32 %v10981_v17, %v14771_v24  ;;  %v14766_v32 = vand.u32 4294901760, %v11000_v25  ;;  %592 = vmatprep.subr.mxu0 %v10970_v12  ;;  %v544_v24 = vld [vmem:[#allocation5 + $0x48] sm:$0xff]  ;;  %v542_v22 = vld [vmem:[#allocation5 + $0x38] sm:$0xff] }
  0x85   : > { %v723_v33 = vsub.f32 %v10987_v19, %v14770_v26  ;;  %v729_v34 = vsub.f32 %v10990_v20, %v14769_v27  ;;  %v735_v35 = vsub.f32 %v10993_v21, %v14767_v28  ;;  %594 = vmatpush1.msra.mxu0 %v10972_v13  ;;  %v11046_v57 = vsub.f32 %v571_v50, %v11039_v52 }
  0x86   : > { %v706_v36 = vand.u32 4294901760, %v705_v29  ;;  %v712_v37 = vand.u32 4294901760, %v711_v30  ;;  %v718_v38 = vand.u32 4294901760, %v717_v31  ;;  %v741_v39 = vsub.f32 %v11000_v25, %v14766_v32  ;;  %596 = vmatprep.subr.mxu0 %v10983_v18  ;;  %v560_v31 = vld [vmem:[#allocation5 + $0xc8] sm:$0xff] }
  0x87   : > { %v724_v40 = vand.u32 4294901760, %v723_v33  ;;  %v730_v41 = vand.u32 4294901760, %v729_v34  ;;  %v736_v42 = vand.u32 4294901760, %v735_v35  ;;  %v11048_v58 = vand.u32 4294901760, %v568_v55  ;;  %598 = vmatpush1.msra.mxu0 %v11039_v52 }
  0x88   : > { %707 = vmatprep.subr.mxu1 %v706_v36  ;;  %v742_v43 = vand.u32 4294901760, %v741_v39  ;;  %v11052_v60 = vsub.f32 %v569_v53, %v11041_v54  ;;  %v11054_v61 = vand.u32 4294901760, %v566_v59  ;;  %600 = vmatprep.subr.mxu0 %v11041_v54  ;;  %v14765_v63 = vand.u32 4294901760, %v11046_v57 }
  0x89   : > { %713 = vmatpush1.msra.mxu1 %v712_v37  ;;  %602 = vmatpush1.msra.mxu0 %v11048_v58  ;;  %v11068_v8 = vand.u32 4294901760, %v563_v2  ;;  %v11078_v30 = vand.u32 4294901760, %v562_v9  ;;  %v11088_v36 = vand.u32 4294901760, %v560_v31  ;;  %v559_v37 = vld [vmem:[#allocation5 + $0xc0] sm:$0xff] }
  0x8a   : > { %719 = vmatprep.subr.mxu1 %v718_v38  ;;  %v14763_v3 = vand.u32 4294901760, %v11052_v60  ;;  %v11066_v4 = vsub.f32 %v566_v59, %v11054_v61  ;;  %604 = vmatprep.subr.mxu0 %v11054_v61  ;;  %v747_v10 = vsub.f32 %v11046_v57, %v14765_v63  ;;  %v547_v63 = vld [vmem:[#allocation5 + $0x60] sm:$0xff] }
  0x8b   : > { %725 = vmatpush1.msra.mxu1 %v724_v40  ;;  %v11086_v35 = vsub.f32 %v563_v2, %v11068_v8  ;;  %v11191_v23 = vand.u32 4294901760, %v547_v63 }
  0x8c   : > { %731 = vmatprep.subr.mxu1 %v730_v41  ;;  %v753_v33 = vsub.f32 %v11052_v60, %v14763_v3  ;;  %v14760_v34 = vand.u32 4294901760, %v11066_v4  ;;  %v748_v38 = vand.u32 4294901760, %v747_v10  ;;  %v11096_v41 = vsub.f32 %v562_v9, %v11078_v30  ;;  %v553_v10 = vld [vmem:[#allocation5 + $0x90] sm:$0xff] }
  0x8d   : > { %737 = vmatpush1.msra.mxu1 %v736_v42  ;;  %v557_v42 = vld [vmem:[#allocation5 + $0xb0] sm:$0xff] }
  0x8e   : > { %743 = vmatprep.subr.mxu1 %v742_v43  ;;  %v754_v43 = vand.u32 4294901760, %v753_v33  ;;  %v14758_v53 = vand.u32 4294901760, %v11096_v41  ;;  %v11117_v9 = vand.u32 4294901760, %v557_v42 }
  0x8f   : > { %749 = vmatpush1.msra.mxu1 %v748_v38 }
  0x90   : > { %755 = vmatprep.subr.mxu1 %v754_v43  ;;  %v783_v33 = vsub.f32 %v11096_v41, %v14758_v53  ;;  %v551_v43 = vld [vmem:[#allocation5 + $0x80] sm:$0xff]  ;;  %v550_v53 = vld [vmem:[#allocation5 + $0x78] sm:$0xff] }
  0x91   : > { %v11148_v3 = vand.u32 4294901760, %v551_v43 }
 0x106   : > { %v497_v44 = vpop.xlane.xlu0 %496 }
 0x107   : > { %v501_v45 = vmul.f32 0.0078125, %v497_v44  ;;  %v765_v44 = vsub.f32 %v11066_v4, %v14760_v34 }
 0x109   : > { %v11032_v46 = vsub.f32 %v492_v0, %v501_v45  ;;  %v11059_v0 = vsub.f32 %v568_v55, %v11048_v58  ;;  %v14757_v45 = vand.u32 4294901760, %v11086_v35  ;;  %v11111_v55 = vand.u32 4294901760, %v559_v37 }
 0x10a   : > { %v499_v47 = vpop.xlane.xlu0 %498  ;;  %v766_v59 = vand.u32 4294901760, %v765_v44 }
 0x10b   : > { %v502_v48 = vmul.f32 0.0078125, %v499_v47  ;;  %v505_v49 = vmul.f32 %v11032_v46, %v11032_v46  ;;  %v14762_v14 = vand.u32 4294901760, %v11059_v0  ;;  %v11104_v47 = vsub.f32 %v560_v31, %v11088_v36 }
 0x10c   : > { %v11123_v38 = vsub.f32 %v559_v37, %v11111_v55  ;;  %v784_v37 = vand.u32 4294901760, %v783_v33 }
 0x10d   : > { %v11037_v51 = vsub.f32 %v10959_v1, %v502_v48  ;;  %507 = vadd.xlane.f32.xlu1 %v505_v49  ;;  %v11061_v1 = vand.u32 4294901760, %v565_v62  ;;  %v759_v39 = vsub.f32 %v11059_v0, %v14762_v14  ;;  %v556_v48 = vld [vmem:[#allocation5 + $0xa8] sm:$0xff]  ;;  %v14761_v2 = vand.u32 4294901760, %v11104_v47 }
 0x10f   : > { %v506_v56 = vmul.f32 %v11037_v51, %v11037_v51  ;;  %v11076_v29 = vsub.f32 %v565_v62, %v11061_v1  ;;  %606 = vmatpush1.msra.mxu0 %v11061_v1  ;;  %v760_v49 = vand.u32 4294901760, %v759_v39  ;;  %v777_v62 = vsub.f32 %v11086_v35, %v14757_v45 }
 0x110   : > { %608 = vmatprep.subr.mxu0 %v11068_v8  ;;  %v11125_v39 = vand.u32 4294901760, %v556_v48  ;;  %v789_v45 = vsub.f32 %v11104_v47, %v14761_v2 }
 0x111   : > { %509 = vadd.xlane.f32.xlu1 %v506_v56  ;;  %v14759_v40 = vand.u32 4294901760, %v11076_v29  ;;  %610 = vmatpush1.msra.mxu0 %v11078_v30  ;;  %v554_v56 = vld [vmem:[#allocation5 + $0x98] sm:$0xff]  ;;  %v778_v44 = vand.u32 4294901760, %v777_v62  ;;  %v548_v62 = vld [vmem:[#allocation5 + $0x68] sm:$0xff] }
 0x112   : > { %612 = vmatprep.subr.mxu0 %v11088_v36  ;;  %761 = vmatpush1.msra.mxu1 %v760_v49  ;;  %v11132_v49 = vsub.f32 %v557_v42, %v11117_v9  ;;  %v11139_v34 = vsub.f32 %v556_v48, %v11125_v39  ;;  %v790_v42 = vand.u32 4294901760, %v789_v45  ;;  %v11158_v45 = vand.u32 4294901760, %v550_v53 }
 0x113   : > { %v771_v50 = vsub.f32 %v11076_v29, %v14759_v40  ;;  %614 = vmatpush1.msra.mxu0 %v11111_v55  ;;  %767 = vmatprep.subr.mxu1 %v766_v59  ;;  %v14764_v40 = vand.u32 4294901760, %v11123_v38  ;;  %v11141_v59 = vand.u32 4294901760, %v553_v10 }
 0x114   : > { %15174 = vst [vmem:[#allocation18_spill] sm:$0xff] %v11132_v49  ;;  %616 = vmatprep.subr.mxu0 %v11117_v9  ;;  %15175 = vst [vmem:[#allocation19_spill] sm:$0xff] %v11139_v34  ;;  %v14768_v2 = vand.u32 4294901760, %v11132_v49  ;;  %v11176_v28 = vsub.f32 %v550_v53, %v11158_v45 }
 0x115   : > { %v772_v31 = vand.u32 4294901760, %v771_v50  ;;  %v11134_v50 = vand.u32 4294901760, %v554_v56  ;;  %618 = vmatpush1.msra.mxu0 %v11125_v39  ;;  %v795_v48 = vsub.f32 %v11123_v38, %v14764_v40  ;;  %v11156_v33 = vsub.f32 %v553_v10, %v11141_v59 }
 0x116   : > { %v11168_v40 = vand.u32 4294901760, %v548_v62  ;;  %15179 = vst [vmem:[#allocation23_spill] sm:$0xff] %v11176_v28 }
 0x117   : > { %773 = vmatpush1.msra.mxu1 %v772_v31  ;;  %v11146_v14 = vsub.f32 %v554_v56, %v11134_v50  ;;  %620 = vmatprep.subr.mxu0 %v11134_v50  ;;  %v14772_v31 = vand.u32 4294901760, %v11139_v34  ;;  %15177 = vst [vmem:[#allocation21_spill] sm:$0xff] %v11156_v33  ;;  %v801_v56 = vsub.f32 %v11132_v49, %v14768_v2  ;;  %v796_v10 = vand.u32 4294901760, %v795_v48  ;;  %v545_v2 = vld [vmem:[#allocation5 + $0x50] sm:$0xff] }
 0x118   : > { %779 = vmatprep.subr.mxu1 %v778_v44  ;;  %622 = vmatpush1.msra.mxu0 %v11141_v59  ;;  %v11184_v48 = vsub.f32 %v548_v62, %v11168_v40 }
 0x119   : > { %15176 = vst [vmem:[#allocation20_spill] sm:$0xff] %v11146_v14  ;;  %785 = vmatpush1.msra.mxu1 %v784_v37  ;;  %v14775_v44 = vand.u32 4294901760, %v11146_v14  ;;  %v11166_v37 = vsub.f32 %v551_v43, %v11148_v3  ;;  %624 = vmatprep.subr.mxu0 %v11148_v3  ;;  %v807_v32 = vsub.f32 %v11139_v34, %v14772_v31  ;;  %v802_v43 = vand.u32 4294901760, %v801_v56 }
 0x11a   : > { %791 = vmatprep.subr.mxu1 %v790_v42  ;;  %v14780_v42 = vand.u32 4294901760, %v11156_v33  ;;  %626 = vmatpush1.msra.mxu0 %v11158_v45  ;;  %15180 = vst [vmem:[#allocation24_spill] sm:$0xff] %v11184_v48  ;;  %v14786_v56 = vand.u32 4294901760, %v11176_v28  ;;  %v11197_v34 = vand.u32 4294901760, %v545_v2 }
 0x11b   : > { %15178 = vst [vmem:[#allocation22_spill] sm:$0xff] %v11166_v37  ;;  %v813_v27 = vsub.f32 %v11146_v14, %v14775_v44  ;;  %v14783_v26 = vand.u32 4294901760, %v11166_v37  ;;  %628 = vmatprep.subr.mxu0 %v11168_v40  ;;  %797 = vmatpush1.msra.mxu1 %v796_v10  ;;  %v808_v31 = vand.u32 4294901760, %v807_v32  ;;  %v14791_v14 = vand.u32 4294901760, %v11184_v48  ;;  %v541_v32 = vld [vmem:[#allocation5 + $0x30] sm:$0xff] }
 0x11c   : > { %v819_v53 = vsub.f32 %v11156_v33, %v14780_v42  ;;  %803 = vmatprep.subr.mxu1 %v802_v43  ;;  %15181 = vst [vmem:[#allocation25_spill] sm:$0xff] %v11197_v34  ;;  %v831_v42 = vsub.f32 %v11176_v28, %v14786_v56  ;;  %v11203_v33 = vsub.f32 %v547_v63, %v11191_v23  ;;  %v11205_v43 = vand.u32 4294901760, %v544_v24  ;;  %v538_v56 = vld [vmem:[#allocation5 + $0x18] sm:$0xff] }
 0x11d   : > { %v814_v44 = vand.u32 4294901760, %v813_v27  ;;  %v825_v62 = vsub.f32 %v11166_v37, %v14783_v26  ;;  %809 = vmatpush1.msra.mxu1 %v808_v31  ;;  %v539_v27 = vld [vmem:[#allocation5 + $0x20] sm:$0xff]  ;;  %630 = vmatpush1.msra.mxu0 %v11191_v23  ;;  %v837_v37 = vsub.f32 %v11184_v48, %v14791_v14  ;;  %v11212_v31 = vsub.f32 %v545_v2, %v11197_v34 }
 0x11e   : > { %v820_v10 = vand.u32 4294901760, %v819_v53  ;;  %15182 = vst [vmem:[#allocation26_spill] sm:$0xff] %v11203_v33  ;;  %15183 = vst [vmem:[#allocation27_spill] sm:$0xff] %v11205_v43  ;;  %v11214_v53 = vand.u32 4294901760, %v542_v22  ;;  %632 = vmatprep.subr.mxu0 %v11197_v34  ;;  %v832_v63 = vand.u32 4294901760, %v831_v42  ;;  %v14796_v28 = vand.u32 4294901760, %v11203_v33 }
 0x11f   : > { %815 = vmatprep.subr.mxu1 %v814_v44  ;;  %v826_v26 = vand.u32 4294901760, %v825_v62  ;;  %15184 = vst [vmem:[#allocation28_spill] sm:$0xff] %v11212_v31  ;;  %v11219_v49 = vsub.f32 %v544_v24, %v11205_v43  ;;  %v11221_v44 = vand.u32 4294901760, %v541_v32  ;;  %v536_v62 = vld [vmem:[#allocation5 + $0x8] sm:$0xff]  ;;  %634 = vmatpush1.msra.mxu0 %v11205_v43  ;;  %v838_v2 = vand.u32 4294901760, %v837_v37  ;;  %v535_v42 = vld [vmem:[#allocation5] sm:$0xff] }
 0x120   : > { %15185 = vst [vmem:[#allocation29_spill] sm:$0xff] %v11214_v53  ;;  %821 = vmatpush1.msra.mxu1 %v820_v10  ;;  %v14803_v14 = vand.u32 4294901760, %v11212_v31  ;;  %v11226_v48 = vsub.f32 %v542_v22, %v11214_v53  ;;  %v11228_v34 = vand.u32 4294901760, %v539_v27  ;;  %636 = vmatprep.subr.mxu0 %v11214_v53  ;;  %v843_v24 = vsub.f32 %v11203_v33, %v14796_v28 }
 0x121   : > { %15186 = vst [vmem:[#allocation30_spill] sm:$0xff] %v11219_v49  ;;  %15187 = vst [vmem:[#allocation31_spill] sm:$0xff] %v11221_v44  ;;  %827 = vmatprep.subr.mxu1 %v826_v26  ;;  %v11236_v10 = vsub.f32 %v541_v32, %v11221_v44  ;;  %v11238_v26 = vand.u32 4294901760, %v538_v56  ;;  %638 = vmatpush1.msra.mxu0 %v11221_v44  ;;  %v11248_v28 = vand.u32 4294901760, %v536_v62  ;;  %v15191_v33 = vand.u32 4294901760, %v11219_v49 }
 0x122   : > { %15188 = vst [vmem:[#allocation32_spill] sm:$0xff] %v11226_v48  ;;  %833 = vmatpush1.msra.mxu1 %v832_v63  ;;  %v849_v22 = vsub.f32 %v11212_v31, %v14803_v14  ;;  %v14810_v37 = vand.u32 4294901760, %v11226_v48  ;;  %v11246_v63 = vsub.f32 %v539_v27, %v11228_v34  ;;  %640 = vmatprep.subr.mxu0 %v11228_v34  ;;  %v844_v32 = vand.u32 4294901760, %v843_v24 }
 0x123   : > { %15189 = vst [vmem:[#allocation33_spill] sm:$0xff] %v11238_v26  ;;  %839 = vmatprep.subr.mxu1 %v838_v2  ;;  %15190 = vst [vmem:[#allocation34_spill] sm:$0xff] %v11248_v28  ;;  %v855_v44 = vsub.f32 %v11219_v49, %v15191_v33  ;;  %v14817_v2 = vand.u32 4294901760, %v11236_v10  ;;  %v11256_v53 = vsub.f32 %v538_v56, %v11238_v26  ;;  %642 = vmatpush1.msra.mxu0 %v11238_v26 }
 0x124   : > { %v850_v14 = vand.u32 4294901760, %v849_v22  ;;  %v861_v27 = vsub.f32 %v11226_v48, %v14810_v37  ;;  %v14813_v31 = vand.u32 4294901760, %v11246_v63  ;;  %v11264_v24 = vsub.f32 %v536_v62, %v11248_v28  ;;  %644 = vmatprep.subr.mxu0 %v11248_v28  ;;  %845 = vmatpush1.msra.mxu1 %v844_v32 }
 0x125   : > { %v856_v33 = vand.u32 4294901760, %v855_v44  ;;  %v867_v56 = vsub.f32 %v11236_v10, %v14817_v2  ;;  %v14814_v49 = vand.u32 4294901760, %v11256_v53  ;;  %v11271_v22 = vand.u32 4294901760, %v535_v42 }
 0x126   : > { %851 = vmatprep.subr.mxu1 %v850_v14  ;;  %v862_v26 = vand.u32 4294901760, %v861_v27  ;;  %v873_v37 = vsub.f32 %v11246_v63, %v14813_v31  ;;  %v14815_v62 = vand.u32 4294901760, %v11264_v24 }
 0x127   : > { %857 = vmatpush1.msra.mxu1 %v856_v33  ;;  %v868_v48 = vand.u32 4294901760, %v867_v56  ;;  %v879_v44 = vsub.f32 %v11256_v53, %v14814_v49  ;;  %v11281_v32 = vsub.f32 %v535_v42, %v11271_v22  ;;  %646 = vmatpush1.msra.mxu0 %v11271_v22  ;;  %v14818_v49 = vmov 0.0  }
 0x128   : > { %863 = vmatprep.subr.mxu1 %v862_v26  ;;  %v874_v14 = vand.u32 4294901760, %v873_v37  ;;  %v885_v27 = vsub.f32 %v11264_v24, %v14815_v62  ;;  %943 = vmatprep.subr.mxu0 %v10975_v15 }
 0x129   : > { %869 = vmatpush1.msra.mxu1 %v868_v48  ;;  %v880_v33 = vand.u32 4294901760, %v879_v44  ;;  %v14816_v56 = vand.u32 4294901760, %v11281_v32  ;;  %926 = vmatprep.mubr.f32.mxu1 %v14818_v49 }
 0x12a   : > { %875 = vmatprep.subr.mxu1 %v874_v14  ;;  %v886_v31 = vand.u32 4294901760, %v885_v27  ;;  %679 = vmatprep.mubr.f32.mxu0 %v14818_v49 }
 0x12b   : > { %881 = vmatpush1.msra.mxu1 %v880_v33  ;;  %v891_v42 = vsub.f32 %v11281_v32, %v14816_v56  ;;  %v9006_v56 = vld [vmem:[%s14737_s1] ss:$0 sm:$0xff] }
 0x12c   : > { %887 = vmatprep.subr.mxu1 %v886_v31  ;;  %v9007_v31 = vld [vmem:[%s14738_s2] ss:$0 sm:$0xff] }
 0x12d   : > { %v892_v26 = vand.u32 4294901760, %v891_v42 }
 0x12f   : > { %893 = vmatpush1.msra.mxu1 %v892_v26 }
 0x130   : > { %1087 = vmatprep.subr.mxu1 %v10962_v5 }
 0x196   : > { %v508_v48 = vpop.xlane.xlu1 %507 }
 0x197   : > { %v511_v37 = vmul.f32 0.0078125, %v508_v48 }
 0x199   : > { %v513_v44 = vadd.f32 1e-05, %v511_v37 }
 0x19a   : > { %v510_v14 = vpop.xlane.xlu1 %509 }
 0x19b   : > { %10472 = vrsqrt.f32 %v513_v44  ;;  %v512_v27 = vmul.f32 0.0078125, %v510_v14 }
 0x19d   : > { %v514_v62 = vadd.f32 1e-05, %v512_v27 }
 0x19f   : > { %10474 = vrsqrt.f32 %v514_v62 }
 0x1a8   : > { %v10473_v33 = vpop.eup %10472 }
 0x1a9   : > { %v517_v2 = vmul.f32 %v10473_v33, %v11032_v46 }
 0x1ab   : > { %v525_v42 = vmul.f32 %v9006_v56, %v517_v2 }
 0x1ac   : > { %v10475_v26 = vpop.eup %10474 }
 0x1ad   : > { %v533_v48 = vadd.f32 %v9007_v31, %v525_v42  ;;  %v518_v37 = vmul.f32 %v10475_v26, %v11037_v51 }
 0x1af   : > { %v11303_v44 = vand.u32 4294901760, %v533_v48  ;;  %v526_v14 = vmul.f32 %v9006_v56, %v518_v37  ;;  %v15197_v37 = vld [vmem:[#allocation25_spill] sm:$0xff] }
 0x1b1   : > { %15192 = vst [vmem:[#allocation35_spill] sm:$0xff] %v11303_v44  ;;  %v534_v62 = vadd.f32 %v9007_v31, %v526_v14  ;;  %928 = vmatmul.mubr.f32.vlgmr.msra.gmra.mxu1 %v11303_v44  ;;  %v11307_v27 = vsub.f32 %v533_v48, %v11303_v44  ;;  %v15196_v48 = vld [vmem:[#allocation18_spill] sm:$0xff]  ;;  %v15198_v14 = vld [vmem:[#allocation19_spill] sm:$0xff]  ;;  %v15206_v44 = vld [vmem:[#allocation24_spill] sm:$0xff] }
 0x1b2   : > { %1089 = vmatpush1.msra.mxu1 %v10964_v6  ;;  %933 = vmatprep.mubr.f32.mxu1 %v14818_v49 }
 0x1b3   : > { %v11311_v46 = vand.u32 4294901760, %v534_v62  ;;  %1091 = vmatprep.subr.mxu1 %v10966_v7  ;;  %v11315_v2 = vand.u32 4294901760, %v11307_v27 }
 0x1b4   : > { %1093 = vmatpush1.msra.mxu1 %v10968_v11 }
 0x1b5   : > { %15193 = vst [vmem:[#allocation36_spill] sm:$0xff] %v11311_v46  ;;  %1095 = vmatprep.subr.mxu1 %v10970_v12  ;;  %935 = vmatmul.mubr.f32.gmra.mxu1 %v11311_v46  ;;  %v683_v51 = vsub.f32 %v11307_v27, %v11315_v2  ;;  %v11323_v56 = vsub.f32 %v534_v62, %v11311_v46  ;;  %v15199_v62 = vld [vmem:[#allocation20_spill] sm:$0xff]  ;;  %v15205_v46 = vld [vmem:[#allocation33_spill] sm:$0xff] }
 0x1b6   : > { %1097 = vmatpush1.msra.mxu1 %v10972_v13  ;;  %1182 = vmatprep.mubr.f32.mxu1 %v14818_v49 }
 0x1b7   : > { %1099 = vmatprep.subr.mxu1 %v10983_v18  ;;  %v11328_v33 = vand.u32 4294901760, %v683_v51  ;;  %v11331_v31 = vand.u32 4294901760, %v11323_v56  ;;  %v15200_v51 = vld [vmem:[#allocation29_spill] sm:$0xff] }
 0x1b8   : > { %1101 = vmatpush1.msra.mxu1 %v11039_v52 }
 0x1b9   : > { %15194 = vst [vmem:[#allocation37_spill] sm:$0xff] %v11328_v33  ;;  %1103 = vmatprep.subr.mxu1 %v11041_v54  ;;  %685 = vmatmul.mubr.f32.vlgmr.msra.gmra.mxu0 %v11328_v33  ;;  %v694_v42 = vsub.f32 %v11323_v56, %v11331_v31  ;;  %v15204_v33 = vld [vmem:[#allocation23_spill] sm:$0xff] }
 0x1ba   : > { %946 = vmatpush1.msra.mxu0 %v10978_v16  ;;  %1105 = vmatpush1.msra.mxu1 %v11048_v58 }
 0x1bb   : > { %949 = vmatprep.subr.mxu0 %v10981_v17  ;;  %1107 = vmatprep.subr.mxu1 %v11054_v61  ;;  %v11342_v26 = vand.u32 4294901760, %v694_v42  ;;  %v15201_v42 = vld [vmem:[#allocation21_spill] sm:$0xff] }
 0x1bc   : > { %952 = vmatpush1.msra.mxu0 %v10987_v19  ;;  %1109 = vmatpush1.msra.mxu1 %v11061_v1 }
 0x1bd   : > { %15195 = vst [vmem:[#allocation38_spill] sm:$0xff] %v11342_v26  ;;  %690 = vmatprep.mubr.f32.mxu0 %v14818_v49  ;;  %955 = vmatprep.subr.mxu0 %v10990_v20  ;;  %v15202_v49 = vld [vmem:[#allocation31_spill] sm:$0xff] }
 0x1be   : > { %1111 = vmatprep.subr.mxu1 %v11068_v8  ;;  %696 = vmatmul.mubr.f32.gmra.mxu0 %v11342_v26  ;;  %v15203_v26 = vld [vmem:[#allocation22_spill] sm:$0xff] }
 0x1bf   : > { %958 = vmatpush1.msra.mxu0 %v10993_v21  ;;  %1113 = vmatpush1.msra.mxu1 %v11078_v30 }
 0x1c0   : > { %961 = vmatprep.subr.mxu0 %v11000_v25  ;;  %1115 = vmatprep.subr.mxu1 %v11088_v36 }
 0x1c1   : > { %964 = vmatpush1.msra.mxu0 %v11046_v57  ;;  %1117 = vmatpush1.msra.mxu1 %v11111_v55 }
 0x1c2   : > { %967 = vmatprep.subr.mxu0 %v11052_v60  ;;  %1119 = vmatprep.subr.mxu1 %v11117_v9 }
 0x1c3   : > { %970 = vmatpush1.msra.mxu0 %v11059_v0  ;;  %1121 = vmatpush1.msra.mxu1 %v11125_v39 }
 0x1c4   : > { %973 = vmatprep.subr.mxu0 %v11066_v4  ;;  %1123 = vmatprep.subr.mxu1 %v11134_v50 }
 0x1c5   : > { %976 = vmatpush1.msra.mxu0 %v11076_v29  ;;  %1125 = vmatpush1.msra.mxu1 %v11141_v59 }
 0x1c6   : > { %979 = vmatprep.subr.mxu0 %v11086_v35  ;;  %1127 = vmatprep.subr.mxu1 %v11148_v3 }
 0x1c7   : > { %982 = vmatpush1.msra.mxu0 %v11096_v41  ;;  %1129 = vmatpush1.msra.mxu1 %v11158_v45 }
 0x1c8   : > { %985 = vmatprep.subr.mxu0 %v11104_v47  ;;  %1131 = vmatprep.subr.mxu1 %v11168_v40 }
 0x1c9   : > { %988 = vmatpush1.msra.mxu0 %v11123_v38  ;;  %1133 = vmatpush1.msra.mxu1 %v11191_v23 }
 0x1ca   : > { %991 = vmatprep.subr.mxu0 %v15196_v48  ;;  %1135 = vmatprep.subr.mxu1 %v15197_v37 }
 0x1cb   : > { %994 = vmatpush1.msra.mxu0 %v15198_v14  ;;  %1137 = vmatpush1.msra.mxu1 %v11205_v43  ;;  %v15207_v43 = vld [vmem:[#allocation26_spill] sm:$0xff] }
 0x1cc   : > { %997 = vmatprep.subr.mxu0 %v15199_v62  ;;  %1139 = vmatprep.subr.mxu1 %v15200_v51  ;;  %v15208_v51 = vld [vmem:[#allocation28_spill] sm:$0xff] }
 0x1cd   : > { %1000 = vmatpush1.msra.mxu0 %v15201_v42  ;;  %1141 = vmatpush1.msra.mxu1 %v15202_v49 }
 0x1ce   : > { %1003 = vmatprep.subr.mxu0 %v15203_v26  ;;  %1143 = vmatprep.subr.mxu1 %v11228_v34  ;;  %v15209_v26 = vld [vmem:[#allocation30_spill] sm:$0xff] }
 0x1cf   : > { %1006 = vmatpush1.msra.mxu0 %v15204_v33  ;;  %1145 = vmatpush1.msra.mxu1 %v15205_v46  ;;  %v15210_v33 = vld [vmem:[#allocation32_spill] sm:$0xff] }
 0x1d0   : > { %1009 = vmatprep.subr.mxu0 %v15206_v44  ;;  %1147 = vmatprep.subr.mxu1 %v11248_v28  ;;  %v15211_v28 = vmov 0.0  }
 0x1d1   : > { %1012 = vmatpush1.msra.mxu0 %v15207_v43  ;;  %1149 = vmatpush1.msra.mxu1 %v11271_v22 }
 0x1d2   : > { %1015 = vmatprep.subr.mxu0 %v15208_v51  ;;  %1186 = vmatmul.mubr.f32.vlgmr.msra.gmra.mxu1 %v11315_v2 }
 0x1d3   : > { %1377 = vmatprep.subr.mxu1 %v10962_v5  ;;  %1018 = vmatpush1.msra.mxu0 %v15209_v26  ;;  %v15212_v5 = vand.u32 4294901760, %v10975_v15  ;;  %v15217_v15 = vand.u32 4294901760, %v10993_v21 }
 0x1d4   : > { %1379 = vmatpush1.msra.mxu1 %v10964_v6  ;;  %1021 = vmatprep.subr.mxu0 %v15210_v33  ;;  %v15213_v6 = vand.u32 4294901760, %v10978_v16  ;;  %v579_v16 = vld [vmem:[#allocation5 + $0x160] sm:$0xff] }
 0x1d5   : > { %1381 = vmatprep.subr.mxu1 %v10966_v7  ;;  %1024 = vmatpush1.msra.mxu0 %v11236_v10  ;;  %v15214_v7 = vand.u32 4294901760, %v10981_v17  ;;  %v15218_v17 = vand.u32 4294901760, %v11000_v25  ;;  %v11439_v21 = vand.u32 4294901760, %v579_v16  ;;  %v15221_v25 = vand.u32 4294901760, %v11059_v0 }
 0x1d6   : > { %1191 = vmatprep.mubr.f32.mxu1 %v15211_v28  ;;  %1383 = vmatpush1.msra.mxu1 %v10968_v11  ;;  %v15215_v11 = vand.u32 4294901760, %v10987_v19  ;;  %v15219_v19 = vand.u32 4294901760, %v11046_v57  ;;  %v15224_v0 = vand.u32 4294901760, %v11086_v35  ;;  %v15227_v35 = vand.u32 4294901760, %v11123_v38 }
 0x1d7   : > { %1027 = vmatprep.subr.mxu0 %v11246_v63  ;;  %1195 = vmatmul.mubr.f32.gmra.mxu1 %v11331_v31 }
 0x1d8   : > { %1385 = vmatprep.subr.mxu1 %v10970_v12  ;;  %1030 = vmatpush1.msra.mxu0 %v11256_v53  ;;  %v582_v12 = vld [vmem:[#allocation5 + $0x178] sm:$0xff] }
 0x1d9   : > { %1387 = vmatpush1.msra.mxu1 %v10972_v13  ;;  %1033 = vmatprep.subr.mxu0 %v11264_v24  ;;  %v15216_v13 = vand.u32 4294901760, %v10990_v20  ;;  %v15220_v20 = vand.u32 4294901760, %v11052_v60  ;;  %v15223_v60 = vand.u32 4294901760, %v11076_v29  ;;  %v15226_v29 = vand.u32 4294901760, %v11104_v47 }
 0x1da   : > { %1389 = vmatprep.subr.mxu1 %v10983_v18  ;;  %1036 = vmatpush1.msra.mxu0 %v11281_v32  ;;  %v11431_v18 = vand.u32 4294901760, %v582_v12 }
 0x1db   : > { %1069 = vmatprep.mubr.f32.mxu0 %v15211_v28  ;;  %1391 = vmatpush1.msra.mxu1 %v11039_v52  ;;  %v576_v52 = vld [vmem:[#allocation5 + $0x148] sm:$0xff] }
 0x1dc   : > { %1072 = vmatmul.mubr.f32.vlgmr.msra.gmra.mxu0 %v11307_v27  ;;  %1204 = vmatprep.subr.mxu0 %v15212_v5  ;;  %v11448_v57 = vsub.f32 %v582_v12, %v11431_v18  ;;  %v15234_v5 = vld [vmem:[#allocation22_spill] sm:$0xff]  ;;  %v15236_v12 = vld [vmem:[#allocation23_spill] sm:$0xff] }
 0x1dd   : > { %1393 = vmatprep.subr.mxu1 %v11041_v54  ;;  %1208 = vmatpush1.msra.mxu0 %v15213_v6  ;;  %v15222_v54 = vand.u32 4294901760, %v11066_v4  ;;  %v15225_v4 = vand.u32 4294901760, %v11096_v41  ;;  %v567_v41 = vld [vmem:[#allocation5 + $0x100] sm:$0xff]  ;;  %v15235_v6 = vand.u32 4294901760, %v15234_v5  ;;  %v15248_v5 = vand.u32 4294901760, %v11256_v53 }
 0x1de   : > { %1395 = vmatpush1.msra.mxu1 %v11048_v58  ;;  %1212 = vmatprep.subr.mxu0 %v15214_v7  ;;  %v573_v58 = vld [vmem:[#allocation5 + $0x130] sm:$0xff] }
 0x1df   : > { %1397 = vmatprep.subr.mxu1 %v11054_v61  ;;  %1077 = vmatprep.mubr.f32.mxu0 %v15211_v28  ;;  %v11453_v61 = vand.u32 4294901760, %v576_v52 }
 0x1e0   : > { %1216 = vmatpush1.msra.mxu0 %v15215_v11  ;;  %1399 = vmatpush1.msra.mxu1 %v11061_v1  ;;  %v11459_v1 = vsub.f32 %v579_v16, %v11439_v21  ;;  %v561_v11 = vld [vmem:[#allocation5 + $0xd0] sm:$0xff] }
 0x1e1   : > { %1080 = vmatmul.mubr.f32.gmra.mxu0 %v11323_v56  ;;  %1220 = vmatprep.subr.mxu0 %v15216_v13 }
 0x1e2   : > { %1401 = vmatprep.subr.mxu1 %v11068_v8  ;;  %1224 = vmatpush1.msra.mxu0 %v15217_v15  ;;  %v11464_v8 = vand.u32 4294901760, %v573_v58  ;;  %v11482_v47 = vand.u32 4294901760, %v11459_v1 }
 0x1e3   : > { %1403 = vmatpush1.msra.mxu1 %v11078_v30  ;;  %1228 = vmatprep.subr.mxu0 %v15218_v17  ;;  %v570_v30 = vld [vmem:[#allocation5 + $0x118] sm:$0xff] }
 0x1e4   : > { %1405 = vmatprep.subr.mxu1 %v11088_v36  ;;  %1232 = vmatpush1.msra.mxu0 %v15219_v19  ;;  %v11470_v36 = vand.u32 4294901760, %v11448_v57  ;;  %v11490_v38 = vsub.f32 %v573_v58, %v11464_v8  ;;  %v15239_v19 = vld [vmem:[#allocation34_spill] sm:$0xff]  ;;  %v15242_v58 = vld [vmem:[#allocation35_spill] sm:$0xff] }
 0x1e5   : > { %1407 = vmatpush1.msra.mxu1 %v11111_v55  ;;  %1236 = vmatprep.subr.mxu0 %v15220_v20  ;;  %v15228_v55 = vand.u32 4294901760, %v15196_v48  ;;  %v15232_v48 = vld [vmem:[#allocation29_spill] sm:$0xff] }
 0x1e6   : > { %1409 = vmatprep.subr.mxu1 %v11117_v9  ;;  %1240 = vmatpush1.msra.mxu0 %v15221_v25  ;;  %v11484_v9 = vand.u32 4294901760, %v570_v30  ;;  %v11517_v13 = vand.u32 4294901760, %v11490_v38  ;;  %v558_v25 = vld [vmem:[#allocation5 + $0xb8] sm:$0xff] }
 0x1e7   : > { %1411 = vmatpush1.msra.mxu1 %v11125_v39  ;;  %1244 = vmatprep.subr.mxu0 %v15222_v54  ;;  %v15230_v39 = vld [vmem:[#allocation27_spill] sm:$0xff]  ;;  %v15241_v54 = vand.u32 4294901760, %v15208_v51  ;;  %v15244_v51 = vand.u32 4294901760, %v15210_v33 }
 0x1e8   : > { %1413 = vmatprep.subr.mxu1 %v11134_v50  ;;  %1248 = vmatpush1.msra.mxu0 %v15223_v60  ;;  %v1592_v50 = vsub.f32 %v11448_v57, %v11470_v36  ;;  %v11511_v7 = vsub.f32 %v570_v30, %v11484_v9  ;;  %v11552_v30 = vand.u32 4294901760, %v558_v25 }
 0x1e9   : > { %1415 = vmatpush1.msra.mxu1 %v11141_v59  ;;  %1252 = vmatprep.subr.mxu0 %v15224_v0  ;;  %v11497_v59 = vand.u32 4294901760, %v567_v41  ;;  %v555_v0 = vld [vmem:[#allocation5 + $0xa0] sm:$0xff] }
 0x1ea   : > { %1417 = vmatprep.subr.mxu1 %v11148_v3  ;;  %1256 = vmatpush1.msra.mxu0 %v15225_v4  ;;  %v11476_v3 = vsub.f32 %v576_v52, %v11453_v61  ;;  %v1593_v16 = vand.u32 4294901760, %v1592_v50  ;;  %v11532_v52 = vand.u32 4294901760, %v561_v11  ;;  %v15246_v50 = vand.u32 4294901760, %v11246_v63 }
 0x1eb   : > { %1419 = vmatpush1.msra.mxu1 %v11158_v45  ;;  %1260 = vmatprep.subr.mxu0 %v15226_v29  ;;  %v564_v45 = vld [vmem:[#allocation5 + $0xe8] sm:$0xff]  ;;  %v11525_v17 = vsub.f32 %v567_v41, %v11497_v59 }
 0x1ec   : > { %1421 = vmatprep.subr.mxu1 %v11168_v40  ;;  %1264 = vmatpush1.msra.mxu0 %v15227_v35  ;;  %v15229_v40 = vand.u32 4294901760, %v15198_v14  ;;  %v11503_v14 = vand.u32 4294901760, %v11476_v3  ;;  %v11519_v15 = vand.u32 4294901760, %v564_v45  ;;  %v11557_v35 = vsub.f32 %v561_v11, %v11532_v52  ;;  %v552_v41 = vld [vmem:[#allocation5 + $0x88] sm:$0xff] }
 0x1ed   : > { %1423 = vmatpush1.msra.mxu1 %v11191_v23  ;;  %1268 = vmatprep.subr.mxu0 %v15228_v55  ;;  %v15231_v23 = vand.u32 4294901760, %v15199_v62  ;;  %v1599_v62 = vsub.f32 %v11459_v1, %v11482_v47  ;;  %v11550_v4 = vand.u32 4294901760, %v11525_v17  ;;  %v15245_v55 = vand.u32 4294901760, %v11236_v10 }
 0x1ee   : > { %1425 = vmatprep.subr.mxu1 %v15197_v37  ;;  %1272 = vmatpush1.msra.mxu0 %v15229_v40  ;;  %v15233_v37 = vand.u32 4294901760, %v15201_v42  ;;  %v15237_v42 = vand.u32 4294901760, %v15236_v12  ;;  %v1606_v20 = vsub.f32 %v11476_v3, %v11503_v14  ;;  %v11545_v60 = vsub.f32 %v564_v45, %v11519_v15  ;;  %v15247_v45 = vld [vmem:[#allocation36_spill] sm:$0xff] }
 0x1ef   : > { %1427 = vmatpush1.msra.mxu1 %v15230_v39  ;;  %1276 = vmatprep.subr.mxu0 %v15231_v23  ;;  %v11563_v40 = vand.u32 4294901760, %v555_v0  ;;  %v549_v23 = vld [vmem:[#allocation5 + $0x70] sm:$0xff]  ;;  %v1627_v10 = vsub.f32 %v11525_v17, %v11550_v4 }
 0x1f0   : > { %1429 = vmatprep.subr.mxu1 %v15232_v48  ;;  %1280 = vmatpush1.msra.mxu0 %v15233_v37  ;;  %v1607_v29 = vand.u32 4294901760, %v1606_v20  ;;  %v11567_v33 = vand.u32 4294901760, %v11545_v60  ;;  %v11575_v48 = vsub.f32 %v558_v25, %v11552_v30  ;;  %v11577_v37 = vand.u32 4294901760, %v552_v41 }
 0x1f1   : > { %1431 = vmatpush1.msra.mxu1 %v15202_v49  ;;  %1284 = vmatprep.subr.mxu0 %v15235_v6  ;;  %v15238_v49 = vand.u32 4294901760, %v15206_v44  ;;  %v1600_v44 = vand.u32 4294901760, %v1599_v62  ;;  %v11582_v6 = vand.u32 4294901760, %v11557_v35  ;;  %v546_v62 = vld [vmem:[#allocation5 + $0x58] sm:$0xff]  ;;  %v11586_v11 = vsub.f32 %v555_v0, %v11563_v40 }
 0x1f2   : > { %1433 = vmatprep.subr.mxu1 %v11228_v34  ;;  %1288 = vmatpush1.msra.mxu0 %v15237_v42  ;;  %v15240_v34 = vand.u32 4294901760, %v15207_v43  ;;  %v1613_v43 = vsub.f32 %v11490_v38, %v11517_v13  ;;  %v11588_v12 = vand.u32 4294901760, %v549_v23  ;;  %v15249_v42 = vand.u32 4294901760, %v11264_v24 }
 0x1f3   : > { %1435 = vmatpush1.msra.mxu1 %v15205_v46  ;;  %1292 = vmatprep.subr.mxu0 %v15238_v49  ;;  %v11537_v46 = vand.u32 4294901760, %v11511_v7  ;;  %v1634_v53 = vsub.f32 %v11545_v60, %v11567_v33  ;;  %v543_v49 = vld [vmem:[#allocation5 + $0x40] sm:$0xff]  ;;  %v11601_v20 = vsub.f32 %v552_v41, %v11577_v37  ;;  %v11603_v25 = vand.u32 4294901760, %v546_v62 }
 0x1f4   : > { %1437 = vmatprep.subr.mxu1 %v15239_v19  ;;  %1296 = vmatpush1.msra.mxu0 %v15240_v34  ;;  %v1614_v39 = vand.u32 4294901760, %v1613_v43  ;;  %v1628_v19 = vand.u32 4294901760, %v1627_v10  ;;  %v11598_v34 = vand.u32 4294901760, %v11575_v48  ;;  %v1641_v24 = vsub.f32 %v11557_v35, %v11582_v6 }
 0x1f5   : > { %1439 = vmatpush1.msra.mxu1 %v11271_v22  ;;  %1472 = vmatprep.mubr.f32.mxu1 %v15211_v28  ;;  %v15243_v22 = vand.u32 4294901760, %v15209_v26  ;;  %v1620_v26 = vsub.f32 %v11511_v7, %v11537_v46  ;;  %v11615_v43 = vand.u32 4294901760, %v543_v49  ;;  %v1635_v0 = vand.u32 4294901760, %v1634_v53 }
 0x1f6   : > { %1300 = vmatprep.subr.mxu0 %v15241_v54  ;;  %1474 = vmatmul.mubr.f32.vlgmr.msra.gmra.mxu1 %v15242_v58  ;;  %v11613_v54 = vsub.f32 %v549_v23, %v11588_v12  ;;  %v11625_v41 = vsub.f32 %v546_v62, %v11603_v25 }
 0x1f7   : > { %9822 = vmatprep.subr.mxu1 %v1593_v16  ;;  %1304 = vmatpush1.msra.mxu0 %v15243_v22  ;;  %v1621_v63 = vand.u32 4294901760, %v1620_v26  ;;  %v537_v22 = vld [vmem:[#allocation5 + $0x10] sm:$0xff]  ;;  %v1642_v26 = vand.u32 4294901760, %v1641_v24 }
 0x1f8   : > { %9823 = vmatpush3.msra.mxu1 %v1593_v16  ;;  %1308 = vmatprep.subr.mxu0 %v15244_v51  ;;  %v15250_v16 = vand.u32 4294901760, %v11281_v32  ;;  %v11610_v32 = vand.u32 4294901760, %v11586_v11  ;;  %v1648_v51 = vsub.f32 %v11575_v48, %v11598_v34  ;;  %v11635_v23 = vand.u32 4294901760, %v11613_v54 }
 0x1f9   : > { %9824 = vmatprep.subr.mxu1 %v1600_v44  ;;  %1312 = vmatpush1.msra.mxu0 %v15245_v55  ;;  %v11640_v10 = vand.u32 4294901760, %v537_v22 }
 0x1fa   : > { %1479 = vmatprep.mubr.f32.mxu1 %v15211_v28  ;;  %9825 = vmatpush3.msra.mxu1 %v1600_v44  ;;  %v540_v44 = vld [vmem:[#allocation5 + $0x28] sm:$0xff]  ;;  %v1649_v62 = vand.u32 4294901760, %v1648_v51 }
 0x1fb   : > { %1316 = vmatprep.subr.mxu0 %v15246_v50  ;;  %1481 = vmatmul.mubr.f32.gmra.mxu1 %v15247_v45  ;;  %v11627_v55 = vand.u32 4294901760, %v540_v44  ;;  %v11638_v50 = vsub.f32 %v543_v49, %v11615_v43  ;;  %v11661_v24 = vsub.f32 %v537_v22, %v11640_v10 }
 0x1fc   : > { %9826 = vmatprep.subr.mxu1 %v1607_v29  ;;  %1320 = vmatpush1.msra.mxu0 %v15248_v5  ;;  %v15251_v5 = vld [vmem:[#allocation37_spill] sm:$0xff] }
 0x1fd   : > { %9827 = vmatpush3.msra.mxu1 %v1607_v29  ;;  %9854 = vmatprep.mubr.f32.mxu1 %v15242_v58  ;;  %v11622_v29 = vand.u32 4294901760, %v11601_v20  ;;  %v11651_v53 = vsub.f32 %v540_v44, %v11627_v55 }
 0x1fe   : > { %1324 = vmatprep.subr.mxu0 %v15249_v42  ;;  %9828 = vmatprep.subr.mxu1 %v1614_v39  ;;  %v11648_v42 = vand.u32 4294901760, %v11625_v41 }
 0x1ff   : > { %1328 = vmatpush1.msra.mxu0 %v15250_v16  ;;  %1361 = vmatprep.mubr.f32.mxu0 %v15211_v28  ;;  %v1669_v16 = vsub.f32 %v11613_v54, %v11635_v23  ;;  %v11668_v51 = vand.u32 4294901760, %v11651_v53 }
 0x200   : > { %9829 = vmatpush3.msra.mxu1 %v1614_v39  ;;  %1363 = vmatmul.mubr.f32.vlgmr.msra.gmra.mxu0 %v15242_v58  ;;  %v1655_v39 = vsub.f32 %v11586_v11, %v11610_v32 }
 0x201   : > { %9787 = vmatprep.subr.mxu0 %v11431_v18  ;;  %9830 = vmatprep.subr.mxu1 %v1621_v63  ;;  %v1670_v22 = vand.u32 4294901760, %v1669_v16 }
 0x202   : > { %9788 = vmatpush3.msra.mxu0 %v11431_v18  ;;  %9831 = vmatpush3.msra.mxu1 %v1621_v63  ;;  %v1662_v63 = vsub.f32 %v11601_v20, %v11622_v29  ;;  %v1656_v49 = vand.u32 4294901760, %v1655_v39  ;;  %v11675_v39 = vand.u32 4294901760, %v11661_v24 }
 0x203   : > { %9789 = vmatprep.subr.mxu0 %v11439_v21  ;;  %9832 = vmatprep.subr.mxu1 %v1628_v19 }
 0x204   : > { %1368 = vmatprep.mubr.f32.mxu0 %v15211_v28  ;;  %9790 = vmatpush3.msra.mxu0 %v11439_v21  ;;  %v1663_v44 = vand.u32 4294901760, %v1662_v63  ;;  %v1697_v16 = vsub.f32 %v11661_v24, %v11675_v39 }
 0x205   : > { %9833 = vmatpush3.msra.mxu1 %v1628_v19  ;;  %1370 = vmatmul.mubr.f32.gmra.mxu0 %v15247_v45  ;;  %v11658_v19 = vand.u32 4294901760, %v11638_v50 }
 0x206   : > { %9791 = vmatprep.subr.mxu0 %v11453_v61  ;;  %9834 = vmatprep.subr.mxu1 %v1635_v0 }
 0x207   : > { %9792 = vmatpush3.msra.mxu0 %v11453_v61  ;;  %9819 = vmatprep.mubr.f32.mxu0 %v15251_v5 }
 0x208   : > { %9835 = vmatpush3.msra.mxu1 %v1635_v0  ;;  %9793 = vmatprep.subr.mxu0 %v11464_v8  ;;  %v1676_v0 = vsub.f32 %v11625_v41, %v11648_v42 }
 0x209   : > { %9836 = vmatprep.subr.mxu1 %v1642_v26  ;;  %9794 = vmatpush3.msra.mxu0 %v11464_v8 }
 0x20a   : > { %9837 = vmatpush3.msra.mxu1 %v1642_v26  ;;  %9795 = vmatprep.subr.mxu0 %v11484_v9  ;;  %v1683_v26 = vsub.f32 %v11638_v50, %v11658_v19  ;;  %v1677_v5 = vand.u32 4294901760, %v1676_v0 }
 0x20b   : > { %9838 = vmatprep.subr.mxu1 %v1649_v62  ;;  %9796 = vmatpush3.msra.mxu0 %v11484_v9 }
 0x20c   : > { %9839 = vmatpush3.msra.mxu1 %v1649_v62  ;;  %9797 = vmatprep.subr.mxu0 %v11497_v59  ;;  %v1690_v62 = vsub.f32 %v11651_v53, %v11668_v51  ;;  %v1684_v63 = vand.u32 4294901760, %v1683_v26 }
 0x20d   : > { %9840 = vmatprep.subr.mxu1 %v1656_v49  ;;  %9798 = vmatpush3.msra.mxu0 %v11497_v59 }
 0x20e   : > { %9841 = vmatpush3.msra.mxu1 %v1656_v49  ;;  %9799 = vmatprep.subr.mxu0 %v11519_v15  ;;  %v1691_v49 = vand.u32 4294901760, %v1690_v62 }
 0x20f   : > { %9842 = vmatprep.subr.mxu1 %v1663_v44  ;;  %9800 = vmatpush3.msra.mxu0 %v11519_v15 }
 0x210   : > { %9843 = vmatpush3.msra.mxu1 %v1663_v44  ;;  %9801 = vmatprep.subr.mxu0 %v11532_v52  ;;  %v1698_v44 = vand.u32 4294901760, %v1697_v16 }
 0x211   : > { %9844 = vmatprep.subr.mxu1 %v1670_v22  ;;  %9802 = vmatpush3.msra.mxu0 %v11532_v52 }
 0x212   : > { %9845 = vmatpush3.msra.mxu1 %v1670_v22  ;;  %9803 = vmatprep.subr.mxu0 %v11552_v30 }
 0x213   : > { %9846 = vmatprep.subr.mxu1 %v1677_v5  ;;  %9804 = vmatpush3.msra.mxu0 %v11552_v30 }
 0x214   : > { %9847 = vmatpush3.msra.mxu1 %v1677_v5  ;;  %9805 = vmatprep.subr.mxu0 %v11563_v40 }
 0x215   : > { %9848 = vmatprep.subr.mxu1 %v1684_v63  ;;  %9806 = vmatpush3.msra.mxu0 %v11563_v40 }
 0x216   : > { %9849 = vmatpush3.msra.mxu1 %v1684_v63  ;;  %9807 = vmatprep.subr.mxu0 %v11577_v37 }
 0x217   : > { %9850 = vmatprep.subr.mxu1 %v1691_v49  ;;  %9808 = vmatpush3.msra.mxu0 %v11577_v37 }
 0x218   : > { %9851 = vmatpush3.msra.mxu1 %v1691_v49  ;;  %9809 = vmatprep.subr.mxu0 %v11588_v12 }
 0x219   : > { %9852 = vmatprep.subr.mxu1 %v1698_v44  ;;  %9810 = vmatpush3.msra.mxu0 %v11588_v12 }
 0x21a   : > { %9853 = vmatpush3.msra.mxu1 %v1698_v44  ;;  %9811 = vmatprep.subr.mxu0 %v11603_v25 }
 0x21b   : > { %9855 = vmatmul.mubr.f32.vlgmr.msra.gmra.mxu1 %v15247_v45  ;;  %9892 = vmatprep.subr.mxu1 %v11431_v18 }
 0x21c   : > { %9812 = vmatpush3.msra.mxu0 %v11603_v25  ;;  %9893 = vmatpush3.msra.mxu1 %v11431_v18 }
 0x21d   : > { %9924 = vmatprep.mubr.f32.mxu1 %v11315_v2  ;;  %9813 = vmatprep.subr.mxu0 %v11615_v43  ;;  %v15252_v2 = vld [vmem:[#allocation38_spill] sm:$0xff] }
 0x21e   : > { %9894 = vmatprep.subr.mxu1 %v11439_v21  ;;  %9814 = vmatpush3.msra.mxu0 %v11615_v43 }
 0x21f   : > { %9895 = vmatpush3.msra.mxu1 %v11439_v21  ;;  %9815 = vmatprep.subr.mxu0 %v11627_v55 }
 0x220   : > { %9896 = vmatprep.subr.mxu1 %v11453_v61  ;;  %9816 = vmatpush3.msra.mxu0 %v11627_v55 }
 0x221   : > { %9897 = vmatpush3.msra.mxu1 %v11453_v61  ;;  %9817 = vmatprep.subr.mxu0 %v11640_v10 }
 0x222   : > { %9898 = vmatprep.subr.mxu1 %v11464_v8  ;;  %9818 = vmatpush3.msra.mxu0 %v11640_v10 }
 0x223   : > { %9899 = vmatpush3.msra.mxu1 %v11464_v8  ;;  %9820 = vmatmul.mubr.f32.vlgmr.msra.gmra.mxu0 %v15252_v2 }
 0x224   : > { %9857 = vmatprep.subr.mxu0 %v11448_v57  ;;  %9900 = vmatprep.subr.mxu1 %v11484_v9 }
 0x225   : > { %9858 = vmatpush3.msra.mxu0 %v11448_v57  ;;  %9889 = vmatprep.mubr.f32.mxu0 %v11307_v27 }
 0x226   : > { %9901 = vmatpush3.msra.mxu1 %v11484_v9  ;;  %9859 = vmatprep.subr.mxu0 %v11459_v1 }
 0x227   : > { %9902 = vmatprep.subr.mxu1 %v11497_v59  ;;  %9860 = vmatpush3.msra.mxu0 %v11459_v1 }
 0x228   : > { %9903 = vmatpush3.msra.mxu1 %v11497_v59  ;;  %9861 = vmatprep.subr.mxu0 %v11476_v3 }
 0x229   : > { %9904 = vmatprep.subr.mxu1 %v11519_v15  ;;  %9862 = vmatpush3.msra.mxu0 %v11476_v3 }
 0x22a   : > { %9905 = vmatpush3.msra.mxu1 %v11519_v15  ;;  %9863 = vmatprep.subr.mxu0 %v11490_v38 }
 0x22b   : > { %9906 = vmatprep.subr.mxu1 %v11532_v52  ;;  %9864 = vmatpush3.msra.mxu0 %v11490_v38 }
 0x22c   : > { %9907 = vmatpush3.msra.mxu1 %v11532_v52  ;;  %9865 = vmatprep.subr.mxu0 %v11511_v7 }
 0x22d   : > { %9908 = vmatprep.subr.mxu1 %v11552_v30  ;;  %9866 = vmatpush3.msra.mxu0 %v11511_v7 }
 0x22e   : > { %9909 = vmatpush3.msra.mxu1 %v11552_v30  ;;  %9867 = vmatprep.subr.mxu0 %v11525_v17 }
 0x22f   : > { %9910 = vmatprep.subr.mxu1 %v11563_v40  ;;  %9868 = vmatpush3.msra.mxu0 %v11525_v17 }
 0x230   : > { %9911 = vmatpush3.msra.mxu1 %v11563_v40  ;;  %9869 = vmatprep.subr.mxu0 %v11545_v60 }
 0x231   : > { %9912 = vmatprep.subr.mxu1 %v11577_v37  ;;  %9870 = vmatpush3.msra.mxu0 %v11545_v60 }
 0x232   : > { %9913 = vmatpush3.msra.mxu1 %v11577_v37  ;;  %9871 = vmatprep.subr.mxu0 %v11557_v35 }
 0x233   : > { %9914 = vmatprep.subr.mxu1 %v11588_v12  ;;  %9872 = vmatpush3.msra.mxu0 %v11557_v35 }
 0x234   : > { %9915 = vmatpush3.msra.mxu1 %v11588_v12  ;;  %9873 = vmatprep.subr.mxu0 %v11575_v48 }
 0x235   : > { %9916 = vmatprep.subr.mxu1 %v11603_v25  ;;  %9874 = vmatpush3.msra.mxu0 %v11575_v48 }
 0x236   : > { %9917 = vmatpush3.msra.mxu1 %v11603_v25  ;;  %9875 = vmatprep.subr.mxu0 %v11586_v11 }
 0x237   : > { %9918 = vmatprep.subr.mxu1 %v11615_v43  ;;  %9876 = vmatpush3.msra.mxu0 %v11586_v11 }
 0x238   : > { %9919 = vmatpush3.msra.mxu1 %v11615_v43  ;;  %9877 = vmatprep.subr.mxu0 %v11601_v20 }
 0x239   : > { %9920 = vmatprep.subr.mxu1 %v11627_v55  ;;  %9878 = vmatpush3.msra.mxu0 %v11601_v20 }
 0x23a   : > { %9921 = vmatpush3.msra.mxu1 %v11627_v55  ;;  %9879 = vmatprep.subr.mxu0 %v11613_v54 }
 0x23b   : > { %9922 = vmatprep.subr.mxu1 %v11640_v10  ;;  %9880 = vmatpush3.msra.mxu0 %v11613_v54 }
 0x23c   : > { %9923 = vmatpush3.msra.mxu1 %v11640_v10  ;;  %9881 = vmatprep.subr.mxu0 %v11625_v41 }
 0x23d   : > { %9925 = vmatmul.mubr.f32.vlgmr.msra.gmra.mxu1 %v11331_v31  ;;  %9962 = vmatprep.subr.mxu1 %v11431_v18 }
 0x23e   : > { %9882 = vmatpush3.msra.mxu0 %v11625_v41  ;;  %9963 = vmatpush3.msra.mxu1 %v11431_v18 }
 0x23f   : > { %9994 = vmatprep.mubr.f32.mxu1 %v15242_v58  ;;  %9883 = vmatprep.subr.mxu0 %v11638_v50 }
 0x240   : > { %9964 = vmatprep.subr.mxu1 %v11439_v21  ;;  %9884 = vmatpush3.msra.mxu0 %v11638_v50 }
 0x241   : > { %9965 = vmatpush3.msra.mxu1 %v11439_v21  ;;  %9885 = vmatprep.subr.mxu0 %v11651_v53 }
 0x242   : > { %9966 = vmatprep.subr.mxu1 %v11453_v61  ;;  %9886 = vmatpush3.msra.mxu0 %v11651_v53 }
 0x243   : > { %9967 = vmatpush3.msra.mxu1 %v11453_v61  ;;  %9887 = vmatprep.subr.mxu0 %v11661_v24 }
 0x244   : > { %9968 = vmatprep.subr.mxu1 %v11464_v8  ;;  %9888 = vmatpush3.msra.mxu0 %v11661_v24 }
 0x245   : > { %9969 = vmatpush3.msra.mxu1 %v11464_v8  ;;  %9890 = vmatmul.mubr.f32.vlgmr.msra.gmra.mxu0 %v11323_v56 }
 0x246   : > { %9927 = vmatprep.subr.mxu0 %v11470_v36  ;;  %9970 = vmatprep.subr.mxu1 %v11484_v9 }
 0x247   : > { %9928 = vmatpush3.msra.mxu0 %v11470_v36  ;;  %9959 = vmatprep.mubr.f32.mxu0 %v15242_v58 }
 0x248   : > { %9971 = vmatpush3.msra.mxu1 %v11484_v9  ;;  %9929 = vmatprep.subr.mxu0 %v11482_v47 }
 0x249   : > { %9972 = vmatprep.subr.mxu1 %v11497_v59  ;;  %9930 = vmatpush3.msra.mxu0 %v11482_v47 }
 0x24a   : > { %9973 = vmatpush3.msra.mxu1 %v11497_v59  ;;  %9931 = vmatprep.subr.mxu0 %v11503_v14 }
 0x24b   : > { %9974 = vmatprep.subr.mxu1 %v11519_v15  ;;  %9932 = vmatpush3.msra.mxu0 %v11503_v14 }
 0x24c   : > { %9975 = vmatpush3.msra.mxu1 %v11519_v15  ;;  %9933 = vmatprep.subr.mxu0 %v11517_v13 }
 0x24d   : > { %9976 = vmatprep.subr.mxu1 %v11532_v52  ;;  %9934 = vmatpush3.msra.mxu0 %v11517_v13 }
 0x24e   : > { %9977 = vmatpush3.msra.mxu1 %v11532_v52  ;;  %9935 = vmatprep.subr.mxu0 %v11537_v46 }
 0x24f   : > { %9978 = vmatprep.subr.mxu1 %v11552_v30  ;;  %9936 = vmatpush3.msra.mxu0 %v11537_v46 }
 0x250   : > { %9979 = vmatpush3.msra.mxu1 %v11552_v30  ;;  %9937 = vmatprep.subr.mxu0 %v11550_v4 }
 0x251   : > { %9980 = vmatprep.subr.mxu1 %v11563_v40  ;;  %9938 = vmatpush3.msra.mxu0 %v11550_v4 }
 0x252   : > { %9981 = vmatpush3.msra.mxu1 %v11563_v40  ;;  %9939 = vmatprep.subr.mxu0 %v11567_v33 }
 0x253   : > { %9982 = vmatprep.subr.mxu1 %v11577_v37  ;;  %9940 = vmatpush3.msra.mxu0 %v11567_v33 }
 0x254   : > { %9983 = vmatpush3.msra.mxu1 %v11577_v37  ;;  %9941 = vmatprep.subr.mxu0 %v11582_v6 }
 0x255   : > { %9984 = vmatprep.subr.mxu1 %v11588_v12  ;;  %9942 = vmatpush3.msra.mxu0 %v11582_v6 }
 0x256   : > { %9985 = vmatpush3.msra.mxu1 %v11588_v12  ;;  %9943 = vmatprep.subr.mxu0 %v11598_v34 }
 0x257   : > { %9986 = vmatprep.subr.mxu1 %v11603_v25  ;;  %9944 = vmatpush3.msra.mxu0 %v11598_v34 }
 0x258   : > { %9987 = vmatpush3.msra.mxu1 %v11603_v25  ;;  %9945 = vmatprep.subr.mxu0 %v11610_v32 }
 0x259   : > { %9988 = vmatprep.subr.mxu1 %v11615_v43  ;;  %9946 = vmatpush3.msra.mxu0 %v11610_v32 }
 0x25a   : > { %9989 = vmatpush3.msra.mxu1 %v11615_v43  ;;  %9947 = vmatprep.subr.mxu0 %v11622_v29 }
 0x25b   : > { %9990 = vmatprep.subr.mxu1 %v11627_v55  ;;  %9948 = vmatpush3.msra.mxu0 %v11622_v29 }
 0x25c   : > { %9991 = vmatpush3.msra.mxu1 %v11627_v55  ;;  %9949 = vmatprep.subr.mxu0 %v11635_v23 }
 0x25d   : > { %9992 = vmatprep.subr.mxu1 %v11640_v10  ;;  %9950 = vmatpush3.msra.mxu0 %v11635_v23 }
 0x25e   : > { %9993 = vmatpush3.msra.mxu1 %v11640_v10  ;;  %9951 = vmatprep.subr.mxu0 %v11648_v42 }
 0x25f   : > { %9995 = vmatmul.mubr.f32.vlgmr.msra.gmra.mxu1 %v15247_v45  ;;  %9952 = vmatpush3.msra.mxu0 %v11648_v42 }
 0x260   : > { %9953 = vmatprep.subr.mxu0 %v11658_v19 }
 0x261   : > { %9954 = vmatpush3.msra.mxu0 %v11658_v19 }
 0x262   : > { %9955 = vmatprep.subr.mxu0 %v11668_v51 }
 0x263   : > { %9956 = vmatpush3.msra.mxu0 %v11668_v51 }
 0x264   : > { %9957 = vmatprep.subr.mxu0 %v11675_v39 }
 0x265   : > { %9958 = vmatpush3.msra.mxu0 %v11675_v39 }
 0x266   : > { %9960 = vmatmul.mubr.f32.vlgmr.msra.gmra.mxu0 %v15247_v45 }
 0x271   : > { %v929_v27 = vpop.f32.mrf.mxu1 }
 0x273   : > { %v931_v31 = vpop.f32.mrf.mxu1 }
 0x275   : > { %v936_v21 = vpop.f32.mrf.mxu1 }
 0x277   : > { %v938_v61 = vpop.f32.mrf.mxu1 }
 0x279   : > { %v686_v56 = vpop.f32.mrf.mxu0 }
 0x27a   : > { %v930_v38 = vadd.f32 %v929_v27, %v686_v56 }
 0x27b   : > { %v688_v18 = vpop.f32.mrf.mxu0 }
 0x27c   : > { %v932_v14 = vadd.f32 %v931_v31, %v688_v18 }
 0x27e   : > { %v697_v57 = vpop.f32.mrf.mxu0 }
 0x27f   : > { %v937_v52 = vadd.f32 %v936_v21, %v697_v57 }
 0x280   : > { %v699_v8 = vpop.f32.mrf.mxu0 }
 0x281   : > { %v939_v60 = vadd.f32 %v938_v61, %v699_v8 }
 0x292   : > { %v1187_v1 = vpop.f32.mrf.mxu1 }
 0x294   : > { %v1189_v3 = vpop.f32.mrf.mxu1 }
 0x297   : > { %v1196_v9 = vpop.f32.mrf.mxu1 }
 0x299   : > { %v1198_v7 = vpop.f32.mrf.mxu1 }
 0x29c   : > { %v1073_v36 = vpop.f32.mrf.mxu0 }
 0x29d   : > { %v1074_v13 = vadd.f32 %v1073_v36, %v930_v38 }
 0x29e   : > { %v1075_v47 = vpop.f32.mrf.mxu0 }
 0x29f   : > { %v1076_v15 = vadd.f32 %v1075_v47, %v932_v14  ;;  %v1188_v58 = vadd.f32 %v1187_v1, %v1074_v13 }
 0x2a1   : > { %v1081_v59 = vpop.f32.mrf.mxu0  ;;  %v1190_v33 = vadd.f32 %v1189_v3, %v1076_v15 }
 0x2a2   : > { %v1082_v4 = vadd.f32 %v1081_v59, %v937_v52 }
 0x2a3   : > { %v1083_v46 = vpop.f32.mrf.mxu0 }
 0x2a4   : > { %v1084_v45 = vadd.f32 %v1083_v46, %v939_v60  ;;  %v1197_v11 = vadd.f32 %v1196_v9, %v1082_v4 }
 0x2a6   : > { %v1199_v43 = vadd.f32 %v1198_v7, %v1084_v45 }
 0x2b6   : > { %v1475_v17 = vpop.f32.mrf.mxu1 }
 0x2b8   : > { %v1477_v35 = vpop.f32.mrf.mxu1 }
 0x2bb   : > { %v1482_v12 = vpop.f32.mrf.mxu1 }
 0x2bd   : > { %v1484_v42 = vpop.f32.mrf.mxu1 }
 0x2c0   : > { %v1364_v30 = vpop.f32.mrf.mxu0 }
 0x2c1   : > { %v1365_v40 = vadd.f32 %v1364_v30, %v1188_v58 }
 0x2c2   : > { %v1366_v48 = vpop.f32.mrf.mxu0 }
 0x2c3   : > { %v11839_v37 = vadd.f32 %v1475_v17, %v1365_v40  ;;  %v1367_v6 = vadd.f32 %v1366_v48, %v1190_v33 }
 0x2c5   : > { %v2180_v34 = vsel %vm2178_vm0, %v11839_v37, 0  ;;  %v11843_v20 = vadd.f32 %v1477_v35, %v1367_v6  ;;  %v1371_v25 = vpop.f32.mrf.mxu0 }
 0x2c6   : > { %v2258_v32 = vand.u32 4294901760, %v2180_v34  ;;  %v1372_v54 = vadd.f32 %v1371_v25, %v1197_v11 }
 0x2c7   : > { %v2186_v29 = vsel %vm2178_vm0, %v11843_v20, 0  ;;  %v1373_v41 = vpop.f32.mrf.mxu0 }
 0x2c8   : > { %v2259_v55 = vsub.f32 %v2180_v34, %v2258_v32  ;;  %v2223_v23 = vand.u32 4294901760, %v2186_v29  ;;  %v11847_v50 = vadd.f32 %v1482_v12, %v1372_v54  ;;  %v1374_v10 = vadd.f32 %v1373_v41, %v1199_v43  ;;  %10008 = vmatprep.mubr.f32.mxu1 %v2258_v32 }
 0x2ca   : > { %v2183_v53 = vsel %vm2178_vm0, %v11847_v50, 0  ;;  %v11851_v19 = vadd.f32 %v1484_v42, %v1374_v10  ;;  %v2260_v24 = vand.u32 4294901760, %v2259_v55  ;;  %v2315_v0 = vsub.f32 %v2186_v29, %v2223_v23 }
 0x2cb   : > { %v2268_v51 = vand.u32 4294901760, %v2183_v53  ;;  %v2171_v10 = vlaneseq }
 0x2cc   : > { %v2189_v22 = vsel %vm2178_vm0, %v11851_v19, 0  ;;  %v2261_v26 = vsub.f32 %v2259_v55, %v2260_v24  ;;  %v2316_v49 = vand.u32 4294901760, %v2315_v0 }
 0x2cd   : > { %v2269_v39 = vsub.f32 %v2183_v53, %v2268_v51  ;;  %v2220_v5 = vand.u32 4294901760, %v2189_v22 }
 0x2ce   : > { %v2262_v62 = vand.u32 4294901760, %v2261_v26  ;;  %v2317_v56 = vsub.f32 %v2315_v0, %v2316_v49 }
 0x2cf   : > { %v2308_v63 = vsub.f32 %v2189_v22, %v2220_v5  ;;  %9997 = vmatprep.subr.mxu0 %v2220_v5  ;;  %v2270_v16 = vand.u32 4294901760, %v2269_v39  ;;  %v11889_v22 = vshrl.u32 %v2171_v10, 7 }
 0x2d0   : > { %9998 = vmatpush3.xpose.msra.mxu0 %v2220_v5  ;;  %10001 = vmatprep.mubr.f32.mxu0 %v2262_v62  ;;  %v2318_v21 = vand.u32 4294901760, %v2317_v56 }
 0x2d1   : > { %9999 = vmatprep.subr.mxu0 %v2223_v23  ;;  %v2271_v44 = vsub.f32 %v2269_v39, %v2270_v16  ;;  %v2309_v2 = vand.u32 4294901760, %v2308_v63  ;;  %15253 = vst [vmem:[#allocation18_spill] sm:$0xff] %v11889_v22 }
 0x2d3   : > { %v2310_v27 = vsub.f32 %v2308_v63, %v2309_v2  ;;  %v2272_v31 = vand.u32 4294901760, %v2271_v44 }
 0x2d4   : > { %10000 = vmatpush3.xpose.msra.mxu0 %v2223_v23 }
 0x2d5   : > { %10011 = vmatprep.subr.mxu0 %v2308_v63  ;;  %v2311_v18 = vand.u32 4294901760, %v2310_v27 }
 0x2d7   : > { %10002 = vmatmul.mubr.f32.vlgmr.msra.gmra.mxu0 %v2272_v31  ;;  %10004 = vmatprep.subr.mxu1 %v2311_v18 }
 0x2d8   : > { %10005 = vmatpush3.xpose.msra.mxu1 %v2311_v18  ;;  %10012 = vmatpush3.xpose.msra.mxu0 %v2308_v63  ;;  %v11892_v63 = vadd.s32 8, %v11889_v22 }
 0x2d9   : > { %10015 = vmatprep.mubr.f32.mxu0 %v2259_v55  ;;  %10006 = vmatprep.subr.mxu1 %v2318_v21 }
 0x2da   : > { %10013 = vmatprep.subr.mxu0 %v2315_v0 }
 0x2db   : > { %v9856_v61 = vpop.f32.mrf.mxu1 }
 0x2dc   : > { %10007 = vmatpush3.xpose.msra.mxu1 %v2318_v21  ;;  %10014 = vmatpush3.xpose.msra.mxu0 %v2315_v0 }
 0x2dd   : > { %10018 = vmatprep.subr.mxu1 %v2220_v5  ;;  %10025 = vmatprep.subr.mxu0 %v2309_v2  ;;  %v1735_v36 = vpop.f32.mrf.mxu1 }
 0x2df   : > { %10009 = vmatmul.mubr.f32.vlgmr.msra.gmra.mxu1 %v2268_v51  ;;  %10016 = vmatmul.mubr.f32.vlgmr.msra.gmra.mxu0 %v2269_v39 }
 0x2e0   : > { %10019 = vmatpush3.xpose.msra.mxu1 %v2220_v5  ;;  %10022 = vmatprep.mubr.f32.mxu1 %v2260_v24 }
 0x2e1   : > { %10026 = vmatpush3.xpose.msra.mxu0 %v2309_v2  ;;  %10029 = vmatprep.mubr.f32.mxu0 %v2258_v32 }
 0x2e2   : > { %10020 = vmatprep.subr.mxu1 %v2223_v23  ;;  %10027 = vmatprep.subr.mxu0 %v2316_v49 }
 0x2e3   : > { %v9821_v57 = vpop.f32.mrf.mxu0 }
 0x2e4   : > { %10021 = vmatpush3.xpose.msra.mxu1 %v2223_v23  ;;  %v1742_v3 = vadd.f32 %v9856_v61, %v9821_v57 }
 0x2e5   : > { %10028 = vmatpush3.xpose.msra.mxu0 %v2316_v49  ;;  %10032 = vmatprep.subr.mxu1 %v2220_v5  ;;  %v1574_v1 = vpop.f32.mrf.mxu0 }
 0x2e6   : > { %v1736_v38 = vadd.f32 %v1735_v36, %v1574_v1 }
 0x2e7   : > { %10023 = vmatmul.mubr.f32.vlgmr.msra.gmra.mxu1 %v2270_v16  ;;  %v11894_v16 = vand.u32 127, %v2171_v10 }
 0x2e8   : > { %10030 = vmatmul.mubr.f32.vlgmr.msra.gmra.mxu0 %v2268_v51  ;;  %10033 = vmatpush3.xpose.msra.mxu1 %v2220_v5 }
 0x2e9   : > { %10036 = vmatprep.mubr.f32.mxu1 %v2258_v32  ;;  %10034 = vmatprep.subr.mxu1 %v2223_v23  ;;  %vm2177_vm1 = vcmp.le.s32.totalorder %v11894_v16, %v11892_v63  ;;  %vm2176_vm3 = vcmp.le.s32.totalorder %v11894_v16, %v11889_v22 }
 0x2ec   : > { %10035 = vmatpush3.xpose.msra.mxu1 %v2223_v23 }
 0x2ef   : > { %10037 = vmatmul.mubr.f32.vlgmr.msra.gmra.mxu1 %v2268_v51 }
 0x2fd   : > { %v9926_v47 = vpop.f32.mrf.mxu1 }
 0x2ff   : > { %v1941_v7 = vpop.f32.mrf.mxu1 }
 0x305   : > { %v9891_v8 = vpop.f32.mrf.mxu0 }
 0x306   : > { %v1853_v59 = vadd.f32 %v9891_v8, %v1742_v3 }
 0x307   : > { %v1845_v9 = vpop.f32.mrf.mxu0 }
 0x308   : > { %v1846_v14 = vadd.f32 %v1845_v9, %v1736_v38  ;;  %v1950_v13 = vadd.f32 %v9926_v47, %v1853_v59 }
 0x30a   : > { %v1942_v46 = vadd.f32 %v1941_v7, %v1846_v14 }
 0x31f   : > { %v9996_v15 = vpop.f32.mrf.mxu1 }
 0x321   : > { %v2161_v30 = vpop.f32.mrf.mxu1 }
 0x326   : > { %v9961_v17 = vpop.f32.mrf.mxu0 }
 0x327   : > { %v2075_v52 = vadd.f32 %v9961_v17, %v1950_v13 }
 0x328   : > { %v2068_v58 = vpop.f32.mrf.mxu0 }
 0x329   : > { %v11855_v60 = vadd.f32 %v9996_v15, %v2075_v52  ;;  %v2069_v4 = vadd.f32 %v2068_v58, %v1942_v46 }
 0x32b   : > { %v11858_v35 = vand.u32 4294901760, %v11855_v60  ;;  %v11860_v40 = vadd.f32 %v2161_v30, %v2069_v4 }
 0x32d   : > { %v11864_v33 = vsub.f32 %v11855_v60, %v11858_v35  ;;  %v11867_v45 = vand.u32 4294901760, %v11860_v40  ;;  %10039 = vmatprep.subr.mxu0 %v11858_v35 }
 0x32e   : > { %10040 = vmatpush3.msra.mxu0 %v11858_v35 }
 0x32f   : > { %v11873_v48 = vsub.f32 %v11860_v40, %v11867_v45  ;;  %10041 = vmatprep.subr.mxu0 %v11867_v45  ;;  %v11877_v6 = vand.u32 4294901760, %v11864_v33 }
 0x330   : > { %10042 = vmatpush3.msra.mxu0 %v11867_v45 }
 0x331   : > { %10053 = vmatprep.subr.mxu0 %v11864_v33  ;;  %v2845_v11 = vsub.f32 %v11864_v33, %v11877_v6  ;;  %v11884_v12 = vand.u32 4294901760, %v11873_v48 }
 0x333   : > { %v2846_v34 = vand.u32 4294901760, %v2845_v11  ;;  %v2852_v25 = vsub.f32 %v11873_v48, %v11884_v12 }
 0x335   : > { %10046 = vmatprep.subr.mxu1 %v2846_v34  ;;  %v2853_v32 = vand.u32 4294901760, %v2852_v25 }
 0x336   : > { %10047 = vmatpush3.msra.mxu1 %v2846_v34 }
 0x337   : > { %10048 = vmatprep.subr.mxu1 %v2853_v32 }
 0x338   : > { %10049 = vmatpush3.msra.mxu1 %v2853_v32 }
 0x339   : > { %10060 = vmatprep.subr.mxu1 %v11858_v35 }
 0x397   : > { %v10003_v54 = vpop.f32.mrf.mxu0 }
 0x399   : > { %v2264_v29 = vpop.f32.mrf.mxu0 }
 0x39f   : > { %v10010_v43 = vpop.f32.mrf.mxu1  ;;  %v10017_v23 = vpop.f32.mrf.mxu0 }
 0x3a0   : > { %v2362_v55 = vadd.f32 %v10010_v43, %v10003_v54 }
 0x3a1   : > { %v2355_v41 = vpop.f32.mrf.mxu1  ;;  %v2437_v0 = vpop.f32.mrf.mxu0 }
 0x3a2   : > { %v2356_v42 = vadd.f32 %v2355_v41, %v2264_v29  ;;  %v2445_v24 = vadd.f32 %v10017_v23, %v2362_v55 }
 0x3a4   : > { %v2438_v26 = vadd.f32 %v2437_v0, %v2356_v42 }
 0x3a7   : > { %v10024_v53 = vpop.f32.mrf.mxu1 }
 0x3a8   : > { %v2528_v39 = vadd.f32 %v10024_v53, %v2445_v24  ;;  %v10031_v5 = vpop.f32.mrf.mxu0 }
 0x3a9   : > { %v2519_v51 = vpop.f32.mrf.mxu1 }
 0x3aa   : > { %v2520_v62 = vadd.f32 %v2519_v51, %v2438_v26  ;;  %v2611_v49 = vadd.f32 %v10031_v5, %v2528_v39  ;;  %v2604_v44 = vpop.f32.mrf.mxu0 }
 0x3ac   : > { %v2605_v27 = vadd.f32 %v2604_v44, %v2520_v62 }
 0x3af   : > { %v10038_v2 = vpop.f32.mrf.mxu1 }
 0x3b0   : > { %v2690_v56 = vadd.f32 %v10038_v2, %v2611_v49 }
 0x3b1   : > { %v2683_v31 = vpop.f32.mrf.mxu1 }
 0x3b2   : > { %v2694_v18 = vmul.f32 0.125, %v2690_v56  ;;  %v2684_v21 = vadd.f32 %v2683_v31, %v2605_v27 }
 0x3b4   : > { %v2693_v57 = vmul.f32 0.125, %v2684_v21  ;;  %v2696_v61 = vsel %vm2177_vm1, %v2694_v18, -1e+30 }
 0x3b5   : > { %v2701_v1 = vsel %vm2697_vm2, %v2696_v61, -inf }
 0x3b6   : > { %2702 = vmax.xlane.f32.xlu1 %v2701_v1  ;;  %v2695_v8 = vsel %vm2176_vm3, %v2693_v57, -1e+30 }
 0x3b7   : > { %v2698_v36 = vsel %vm2697_vm2, %v2695_v8, -inf }
 0x3b8   : > { %2699 = vmax.xlane.f32.xlu0 %v2698_v36 }
 0x43f   : > { %v2703_v3 = vpop.xlane.xlu1 %2702 }
 0x440   : > { %v2705_v47 = vsub.f32 %v2696_v61, %v2703_v3 }
 0x441   : > { %v2700_v9 = vpop.xlane.xlu0 %2699 }
 0x442   : > { %v2708_v38 = vmul.f32 1.442695, %v2705_v47  ;;  %v2704_v59 = vsub.f32 %v2695_v8, %v2700_v9 }
 0x444   : > { %10476 = vpow2.f32 %v2708_v38  ;;  %v2706_v14 = vmul.f32 1.442695, %v2704_v59 }
 0x446   : > { %10478 = vpow2.f32 %v2706_v14 }
 0x451   : > { %v10477_v7 = vpop.eup %10476 }
 0x452   : > { %v2713_v13 = vsel %vm2697_vm2, %v10477_v7, 0.0 }
 0x453   : > { %v10479_v15 = vpop.eup %10478  ;;  %2714 = vadd.xlane.f32.xlu1 %v2713_v13 }
 0x454   : > { %v2710_v17 = vsel %vm2697_vm2, %v10479_v15, 0.0 }
 0x455   : > { %2711 = vadd.xlane.f32.xlu0 %v2710_v17 }
 0x464   : > { %3232 = vrot.lane.b32.xlu1 %v11843_v20, %s10716_s14 }
 0x468   : > { %3228 = vrot.lane.b32.xlu1 %v11839_v37, %s10716_s14 }
 0x46b   : > { %3234 = vrot.lane.b32.xlu0 %v11851_v19, %s10716_s14 }
 0x46c   : > { %3230 = vrot.lane.b32.xlu1 %v11847_v50, %s10716_s14 }
 0x4dc   : > { %v2715_v52 = vpop.xlane.xlu1 %2714 }
 0x4dd   : > { %10480 = vrcp.f32 %v2715_v52 }
 0x4de   : > { %v2712_v46 = vpop.xlane.xlu0 %2711 }
 0x4df   : > { %10482 = vrcp.f32 %v2712_v46 }
 0x4e0   : > { %v3233_v4 = vpop.permute.xlu1 %3232 }
 0x4e1   : > { %v3240_v11 = vsel %vm2178_vm0, %v3233_v4, 0 }
 0x4e2   : > { %v3235_v58 = vpop.permute.xlu0 %3234  ;;  %v11922_v32 = vand.u32 4294901760, %v3240_v11 }
 0x4e3   : > { %v3242_v30 = vsel %vm2178_vm0, %v3235_v58, 0 }
 0x4e4   : > { %v11920_v20 = vand.u32 4294901760, %v3242_v30  ;;  %v3229_v29 = vpop.permute.xlu1 %3228  ;;  %v11930_v55 = vsub.f32 %v3240_v11, %v11922_v32 }
 0x4e5   : > { %v3236_v53 = vsel %vm2178_vm0, %v3229_v29, 0 }
 0x4e6   : > { %v11925_v19 = vsub.f32 %v3242_v30, %v11920_v20  ;;  %v11938_v26 = vand.u32 4294901760, %v11930_v55  ;;  %v11940_v39 = vand.u32 4294901760, %v3236_v53 }
 0x4e8   : > { %v11933_v42 = vand.u32 4294901760, %v11925_v19  ;;  %v3231_v5 = vpop.permute.xlu1 %3230  ;;  %v3370_v56 = vsub.f32 %v11930_v55, %v11938_v26  ;;  %v3312_v31 = vsub.f32 %v3236_v53, %v11940_v39 }
 0x4e9   : > { %v3238_v2 = vsel %vm2178_vm0, %v3231_v5, 0 }
 0x4ea   : > { %v10481_v34 = vpop.eup %10480  ;;  %v3363_v62 = vsub.f32 %v11925_v19, %v11933_v42  ;;  %v3321_v57 = vand.u32 4294901760, %v3238_v2  ;;  %v3313_v61 = vand.u32 4294901760, %v3312_v31 }
 0x4eb   : > { %v2719_v37 = vmul.f32 %v10481_v34, %v10477_v7 }
 0x4ec   : > { %v10483_v25 = vpop.eup %10482  ;;  %v3364_v18 = vand.u32 4294901760, %v3363_v62  ;;  %v3322_v1 = vsub.f32 %v3238_v2, %v3321_v57 }
 0x4ed   : > { %v2718_v50 = vmul.f32 %v10483_v25, %v10479_v15  ;;  %v2724_v54 = vsel %vm2697_vm2, %v2719_v37, 0 }
 0x4ee   : > { %v2803_v43 = vand.u32 4294901760, %v2724_v54 }
 0x4ef   : > { %v2721_v41 = vsel %vm2697_vm2, %v2718_v50, 0 }
 0x4f0   : > { %v2793_v23 = vand.u32 4294901760, %v2721_v41  ;;  %v2804_v10 = vsub.f32 %v2724_v54, %v2803_v43 }
 0x4f2   : > { %10050 = vmatprep.mubr.f32.mxu1 %v2793_v23  ;;  %v2794_v24 = vsub.f32 %v2721_v41, %v2793_v23  ;;  %v2805_v0 = vand.u32 4294901760, %v2804_v10 }
 0x4f3   : > { %10051 = vmatmul.mubr.f32.vlgmr.msra.gmra.mxu1 %v2803_v43 }
 0x4f4   : > { %10061 = vmatpush3.msra.mxu1 %v11858_v35  ;;  %v2795_v51 = vand.u32 4294901760, %v2794_v24  ;;  %v2806_v49 = vsub.f32 %v2804_v10, %v2805_v0 }
 0x4f5   : > { %10062 = vmatprep.subr.mxu1 %v11867_v45 }
 0x4f6   : > { %10063 = vmatpush3.msra.mxu1 %v11867_v45  ;;  %10064 = vmatprep.mubr.f32.mxu1 %v2795_v51  ;;  %v2796_v44 = vsub.f32 %v2794_v24, %v2795_v51  ;;  %v2807_v21 = vand.u32 4294901760, %v2806_v49 }
 0x4f7   : > { %10074 = vmatprep.subr.mxu1 %v11858_v35  ;;  %10065 = vmatmul.mubr.f32.vlgmr.msra.gmra.mxu1 %v2805_v0 }
 0x4f8   : > { %10075 = vmatpush3.msra.mxu1 %v11858_v35  ;;  %10078 = vmatprep.mubr.f32.mxu1 %v2793_v23  ;;  %v2797_v27 = vand.u32 4294901760, %v2796_v44  ;;  %v3371_v35 = vand.u32 4294901760, %v3370_v56 }
 0x4f9   : > { %10076 = vmatprep.subr.mxu1 %v11867_v45 }
 0x4fa   : > { %10077 = vmatpush3.msra.mxu1 %v11867_v45  ;;  %10043 = vmatprep.mubr.f32.mxu0 %v2797_v27  ;;  %v3323_v45 = vand.u32 4294901760, %v3322_v1 }
 0x4fb   : > { %10088 = vmatprep.subr.mxu1 %v3364_v18  ;;  %10044 = vmatmul.mubr.f32.vlgmr.msra.gmra.mxu0 %v2807_v21 }
 0x4fc   : > { %10054 = vmatpush3.msra.mxu0 %v11864_v33  ;;  %10079 = vmatmul.mubr.f32.vlgmr.msra.gmra.mxu1 %v2803_v43  ;;  %v3314_v33 = vsub.f32 %v3312_v31, %v3313_v61 }
 0x4fd   : > { %10089 = vmatpush3.xpose.msra.mxu1 %v3364_v18  ;;  %10055 = vmatprep.subr.mxu0 %v11873_v48 }
 0x4fe   : > { %10057 = vmatprep.mubr.f32.mxu0 %v2794_v24  ;;  %10090 = vmatprep.subr.mxu1 %v3371_v35 }
 0x4ff   : > { %10092 = vmatprep.mubr.f32.mxu1 %v11940_v39  ;;  %10056 = vmatpush3.msra.mxu0 %v11873_v48  ;;  %v3315_v48 = vand.u32 4294901760, %v3314_v33 }
 0x500   : > { %10067 = vmatprep.subr.mxu0 %v11877_v6  ;;  %10058 = vmatmul.mubr.f32.vlgmr.msra.gmra.mxu0 %v2804_v10 }
 0x501   : > { %10068 = vmatpush3.msra.mxu0 %v11877_v6  ;;  %10091 = vmatpush3.xpose.msra.mxu1 %v3371_v35  ;;  %v3324_v6 = vsub.f32 %v3322_v1, %v3323_v45 }
 0x502   : > { %10069 = vmatprep.subr.mxu0 %v11884_v12  ;;  %10071 = vmatprep.mubr.f32.mxu0 %v2793_v23 }
 0x503   : > { %10102 = vmatprep.subr.mxu1 %v11920_v20  ;;  %10070 = vmatpush3.msra.mxu0 %v11884_v12  ;;  %v3325_v12 = vand.u32 4294901760, %v3324_v6 }
 0x504   : > { %10081 = vmatprep.subr.mxu0 %v11920_v20  ;;  %10093 = vmatmul.mubr.f32.vlgmr.msra.gmra.mxu1 %v3321_v57 }
 0x505   : > { %10072 = vmatmul.mubr.f32.vlgmr.msra.gmra.mxu0 %v2803_v43  ;;  %10103 = vmatpush3.xpose.msra.mxu1 %v11920_v20 }
 0x506   : > { %10082 = vmatpush3.xpose.msra.mxu0 %v11920_v20  ;;  %10106 = vmatprep.mubr.f32.mxu1 %v3313_v61 }
 0x507   : > { %10083 = vmatprep.subr.mxu0 %v11922_v32  ;;  %10085 = vmatprep.mubr.f32.mxu0 %v3315_v48 }
 0x508   : > { %10104 = vmatprep.subr.mxu1 %v11922_v32 }
 0x509   : > { %10105 = vmatpush3.xpose.msra.mxu1 %v11922_v32 }
 0x50a   : > { %10084 = vmatpush3.xpose.msra.mxu0 %v11922_v32  ;;  %10116 = vmatprep.subr.mxu1 %v11920_v20 }
 0x50b   : > { %10095 = vmatprep.subr.mxu0 %v11925_v19 }
 0x50c   : > { %10107 = vmatmul.mubr.f32.vlgmr.msra.gmra.mxu1 %v3323_v45 }
 0x50d   : > { %10086 = vmatmul.mubr.f32.vlgmr.msra.gmra.mxu0 %v3325_v12  ;;  %10117 = vmatpush3.xpose.msra.mxu1 %v11920_v20 }
 0x50e   : > { %10096 = vmatpush3.xpose.msra.mxu0 %v11925_v19  ;;  %10099 = vmatprep.mubr.f32.mxu0 %v3312_v31 }
 0x50f   : > { %10120 = vmatprep.mubr.f32.mxu1 %v11940_v39  ;;  %10097 = vmatprep.subr.mxu0 %v11930_v55 }
 0x510   : > { %10118 = vmatprep.subr.mxu1 %v11922_v32 }
 0x511   : > { %10119 = vmatpush3.xpose.msra.mxu1 %v11922_v32 }
 0x512   : > { %10098 = vmatpush3.xpose.msra.mxu0 %v11930_v55 }
 0x513   : > { %10109 = vmatprep.subr.mxu0 %v11933_v42 }
 0x514   : > { %10121 = vmatmul.mubr.f32.vlgmr.msra.gmra.mxu1 %v3321_v57 }
 0x515   : > { %10100 = vmatmul.mubr.f32.vlgmr.msra.gmra.mxu0 %v3322_v1 }
 0x516   : > { %10110 = vmatpush3.xpose.msra.mxu0 %v11933_v42  ;;  %10113 = vmatprep.mubr.f32.mxu0 %v11940_v39 }
 0x517   : > { %10111 = vmatprep.subr.mxu0 %v11938_v26 }
 0x51a   : > { %10112 = vmatpush3.xpose.msra.mxu0 %v11938_v26 }
 0x51d   : > { %10114 = vmatmul.mubr.f32.vlgmr.msra.gmra.mxu0 %v3321_v57 }
 0x5b3   : > { %v10052_v8 = vpop.f32.mrf.mxu1 }
 0x5b5   : > { %v2890_v36 = vpop.f32.mrf.mxu1 }
 0x5b7   : > { %v10066_v9 = vpop.f32.mrf.mxu1 }
 0x5b9   : > { %v3054_v7 = vpop.f32.mrf.mxu1 }
 0x5bb   : > { %v10045_v3 = vpop.f32.mrf.mxu0 }
 0x5bc   : > { %v2897_v47 = vadd.f32 %v10052_v8, %v10045_v3  ;;  %v10080_v46 = vpop.f32.mrf.mxu1 }
 0x5bd   : > { %v2799_v38 = vpop.f32.mrf.mxu0 }
 0x5be   : > { %v2891_v59 = vadd.f32 %v2890_v36, %v2799_v38  ;;  %v3218_v37 = vpop.f32.mrf.mxu1 }
 0x5c0   : > { %v10059_v14 = vpop.f32.mrf.mxu0 }
 0x5c1   : > { %v2980_v13 = vadd.f32 %v10059_v14, %v2897_v47 }
 0x5c2   : > { %v2972_v15 = vpop.f32.mrf.mxu0 }
 0x5c3   : > { %v2973_v17 = vadd.f32 %v2972_v15, %v2891_v59  ;;  %v3063_v52 = vadd.f32 %v10066_v9, %v2980_v13 }
 0x5c4   : > { %v10094_v19 = vpop.f32.mrf.mxu1 }
 0x5c5   : > { %v10073_v58 = vpop.f32.mrf.mxu0  ;;  %v3055_v4 = vadd.f32 %v3054_v7, %v2973_v17 }
 0x5c6   : > { %v3146_v30 = vadd.f32 %v10073_v58, %v3063_v52  ;;  %v3408_v54 = vpop.f32.mrf.mxu1 }
 0x5c7   : > { %v3139_v11 = vpop.f32.mrf.mxu0 }
 0x5c8   : > { %v11984_v20 = vadd.f32 %v10080_v46, %v3146_v30  ;;  %v3140_v34 = vadd.f32 %v3139_v11, %v3055_v4 }
 0x5ca   : > { %v11986_v25 = vadd.f32 %v3218_v37, %v3140_v34 }
 0x5cc   : > { %v10108_v41 = vpop.f32.mrf.mxu1 }
 0x5cd   : > { %v10087_v32 = vpop.f32.mrf.mxu0 }
 0x5ce   : > { %v3415_v29 = vadd.f32 %v10094_v19, %v10087_v32  ;;  %v3572_v53 = vpop.f32.mrf.mxu1 }
 0x5cf   : > { %v3317_v50 = vpop.f32.mrf.mxu0 }
 0x5d0   : > { %v3409_v23 = vadd.f32 %v3408_v54, %v3317_v50 }
 0x5d4   : > { %v10122_v0 = vpop.f32.mrf.mxu1 }
 0x5d5   : > { %v10101_v43 = vpop.f32.mrf.mxu0 }
 0x5d6   : > { %v3498_v10 = vadd.f32 %v10101_v43, %v3415_v29  ;;  %v3736_v44 = vpop.f32.mrf.mxu1 }
 0x5d7   : > { %v3490_v55 = vpop.f32.mrf.mxu0 }
 0x5d8   : > { %v3491_v42 = vadd.f32 %v3490_v55, %v3409_v23  ;;  %v3581_v24 = vadd.f32 %v10108_v41, %v3498_v10  ;;  %v4313_v23 = vld [vmem:[#allocation7 + $0x78] sm:$0xff]  ;;  %v4312_v10 = vld [vmem:[#allocation7 + $0x70] sm:$0xff] }
 0x5da   : > { %v3573_v39 = vadd.f32 %v3572_v53, %v3491_v42  ;;  %v4311_v42 = vld [vmem:[#allocation7 + $0x68] sm:$0xff]  ;;  %v12004_v53 = vand.u32 4294901760, %v4313_v23 }
 0x5dd   : > { %v10115_v51 = vpop.f32.mrf.mxu0 }
 0x5de   : > { %v3664_v26 = vadd.f32 %v10115_v51, %v3581_v24  ;;  %v12006_v24 = vand.u32 4294901760, %v4312_v10  ;;  %v4310_v51 = vld [vmem:[#allocation7 + $0x60] sm:$0xff] }
 0x5df   : > { %v3657_v5 = vpop.f32.mrf.mxu0 }
 0x5e0   : > { %v3743_v62 = vadd.f32 %v10122_v0, %v3664_v26  ;;  %v3658_v49 = vadd.f32 %v3657_v5, %v3573_v39  ;;  %v12008_v0 = vand.u32 4294901760, %v4311_v42  ;;  %v4309_v26 = vld [vmem:[#allocation7 + $0x58] sm:$0xff]  ;;  %v4308_v39 = vld [vmem:[#allocation7 + $0x50] sm:$0xff]  ;;  %v12010_v5 = vand.u32 4294901760, %v4310_v51 }
 0x5e2   : > { %v3747_v2 = vmul.f32 0.125, %v3743_v62  ;;  %v3737_v27 = vadd.f32 %v3736_v44, %v3658_v49  ;;  %v12012_v62 = vand.u32 4294901760, %v4309_v26  ;;  %v12014_v49 = vand.u32 4294901760, %v4308_v39  ;;  %v4307_v44 = vld [vmem:[#allocation7 + $0x48] sm:$0xff] }
 0x5e4   : > { %v3746_v56 = vmul.f32 0.125, %v3737_v27  ;;  %v3749_v31 = vsel %vm2177_vm1, %v3747_v2, -1e+30  ;;  %v4306_v2 = vld [vmem:[#allocation7 + $0x40] sm:$0xff]  ;;  %v12017_v27 = vsub.f32 %v4313_v23, %v12004_v53 }
 0x5e5   : > { %v3753_v18 = vsel %vm2697_vm2, %v3749_v31, -inf }
 0x5e6   : > { %3754 = vmax.xlane.f32.xlu1 %v3753_v18  ;;  %v3748_v21 = vsel %vm2176_vm3, %v3746_v56, -1e+30  ;;  %v12020_v56 = vsub.f32 %v4312_v10, %v12006_v24  ;;  %v12026_v18 = vand.u32 4294901760, %v4307_v44 }
 0x5e7   : > { %v3750_v57 = vsel %vm2697_vm2, %v3748_v21, -inf }
 0x5e8   : > { %3751 = vmax.xlane.f32.xlu0 %v3750_v57  ;;  %v12032_v57 = vsub.f32 %v4309_v26, %v12012_v62 }
 0x5f7   : > { %3774 = vrot.lane.b32.xlu1 %v11860_v40, %s10716_s14 }
 0x66f   : > { %v3755_v35 = vpop.xlane.xlu1 %3754 }
 0x670   : > { %v3757_v61 = vsub.f32 %v3749_v31, %v3755_v35  ;;  %v12023_v31 = vsub.f32 %v4311_v42, %v12008_v0  ;;  %v12036_v35 = vsub.f32 %v4308_v39, %v12014_v49 }
 0x671   : > { %v3752_v1 = vpop.xlane.xlu0 %3751 }
 0x672   : > { %v3760_v33 = vmul.f32 1.442695, %v3757_v61  ;;  %v3756_v45 = vsub.f32 %v3748_v21, %v3752_v1  ;;  %v12029_v21 = vsub.f32 %v4310_v51, %v12010_v5  ;;  %v12038_v61 = vand.u32 4294901760, %v4306_v2 }
 0x673   : > { %v3775_v40 = vpop.permute.xlu1 %3774  ;;  %v12041_v1 = vand.u32 4294901760, %v12017_v27 }
 0x674   : > { %10484 = vpow2.f32 %v3760_v33  ;;  %v3758_v63 = vmul.f32 1.442695, %v3756_v45  ;;  %v3818_v36 = vand.u32 4294901760, %v3775_v40  ;;  %v12044_v33 = vand.u32 4294901760, %v12020_v56 }
 0x675   : > { %v12047_v45 = vand.u32 4294901760, %v12023_v31 }
 0x676   : > { %10486 = vpow2.f32 %v3758_v63  ;;  %v3910_v47 = vsub.f32 %v3775_v40, %v3818_v36  ;;  %v12051_v63 = vand.u32 4294901760, %v12029_v21 }
 0x677   : > { %v4433_v40 = vsub.f32 %v12023_v31, %v12047_v45 }
 0x678   : > { %v3911_v14 = vand.u32 4294901760, %v3910_v47 }
 0x681   : > { %v10485_v48 = vpop.eup %10484 }
 0x682   : > { %v3765_v6 = vsel %vm2697_vm2, %v10485_v48, 0.0 }
 0x683   : > { %v10487_v12 = vpop.eup %10486  ;;  %3766 = vadd.xlane.f32.xlu0 %v3765_v6  ;;  %v12058_v6 = vsub.f32 %v4307_v44, %v12026_v18 }
 0x684   : > { %v3762_v16 = vsel %vm2697_vm2, %v10487_v12, 0.0 }
 0x687   : > { %3763 = vadd.xlane.f32.xlu0 %v3762_v16  ;;  %v4426_v16 = vsub.f32 %v12020_v56, %v12044_v33 }
 0x69d   : > { %3776 = vrot.lane.b32.xlu0 %v11855_v60, %s10716_s14  ;;  %v3912_v60 = vsub.f32 %v3910_v47, %v3911_v14 }
 0x69f   : > { %v3913_v30 = vand.u32 4294901760, %v3912_v60  ;;  %v4434_v60 = vand.u32 4294901760, %v4433_v40 }
 0x70c   : > { %v3767_v8 = vpop.xlane.xlu0 %3766 }
 0x70d   : > { %10488 = vrcp.f32 %v3767_v8  ;;  %v12068_v8 = vand.u32 4294901760, %v12036_v35 }
 0x710   : > { %v3764_v3 = vpop.xlane.xlu0 %3763 }
 0x711   : > { %10490 = vrcp.f32 %v3764_v3  ;;  %v4305_v3 = vld [vmem:[#allocation7 + $0x38] sm:$0xff] }
 0x714   : > { %v3777_v9 = vpop.permute.xlu0 %3776 }
 0x715   : > { %v3815_v38 = vand.u32 4294901760, %v3777_v9 }
 0x717   : > { %v3903_v59 = vsub.f32 %v3777_v9, %v3815_v38  ;;  %10123 = vmatprep.subr.mxu0 %v3815_v38  ;;  %v4303_v9 = vld [vmem:[#allocation7 + $0x28] sm:$0xff] }
 0x718   : > { %10124 = vmatpush3.msra.mxu0 %v3815_v38 }
 0x719   : > { %10125 = vmatprep.subr.mxu0 %v3818_v36  ;;  %v3904_v7 = vand.u32 4294901760, %v3903_v59 }
 0x71a   : > { %v10489_v13 = vpop.eup %10488  ;;  %10126 = vmatpush3.msra.mxu0 %v3818_v36 }
 0x71b   : > { %10137 = vmatprep.subr.mxu0 %v3903_v59  ;;  %v3905_v15 = vsub.f32 %v3903_v59, %v3904_v7  ;;  %v3771_v17 = vmul.f32 %v10489_v13, %v10485_v48  ;;  %v12054_v48 = vand.u32 4294901760, %v12032_v57  ;;  %v12080_v13 = vand.u32 4294901760, %v12058_v6 }
 0x71d   : > { %v3906_v52 = vand.u32 4294901760, %v3905_v15  ;;  %v3784_v46 = vsel %vm2697_vm2, %v3771_v17, 0  ;;  %v4302_v15 = vld [vmem:[#allocation7 + $0x20] sm:$0xff]  ;;  %v12084_v17 = vand.u32 4294901760, %v4305_v3 }
 0x71e   : > { %v10491_v58 = vpop.eup %10490  ;;  %v3863_v4 = vand.u32 4294901760, %v3784_v46 }
 0x71f   : > { %10130 = vmatprep.subr.mxu1 %v3906_v52  ;;  %v3770_v11 = vmul.f32 %v10491_v58, %v10487_v12  ;;  %v4419_v12 = vsub.f32 %v12017_v27, %v12041_v1  ;;  %v4454_v58 = vsub.f32 %v12036_v35, %v12068_v8 }
 0x720   : > { %10131 = vmatpush3.msra.mxu1 %v3906_v52  ;;  %v3864_v34 = vsub.f32 %v3784_v46, %v3863_v4  ;;  %v12088_v46 = vand.u32 4294901760, %v4303_v9 }
 0x721   : > { %10132 = vmatprep.subr.mxu1 %v3913_v30  ;;  %v3781_v37 = vsel %vm2697_vm2, %v3770_v11, 0 }
 0x722   : > { %10133 = vmatpush3.msra.mxu1 %v3913_v30  ;;  %v3853_v32 = vand.u32 4294901760, %v3781_v37  ;;  %v3865_v19 = vand.u32 4294901760, %v3864_v34  ;;  %v4301_v30 = vld [vmem:[#allocation7 + $0x18] sm:$0xff] }
 0x723   : > { %10144 = vmatprep.subr.mxu1 %v3815_v38 }
 0x724   : > { %10134 = vmatprep.mubr.f32.mxu1 %v3853_v32  ;;  %v3854_v50 = vsub.f32 %v3781_v37, %v3853_v32  ;;  %v3866_v43 = vsub.f32 %v3864_v34, %v3865_v19 }
 0x725   : > { %10135 = vmatmul.mubr.f32.vlgmr.msra.gmra.mxu1 %v3863_v4 }
 0x726   : > { %10145 = vmatpush3.msra.mxu1 %v3815_v38  ;;  %v3855_v54 = vand.u32 4294901760, %v3854_v50  ;;  %v3867_v55 = vand.u32 4294901760, %v3866_v43  ;;  %v12113_v43 = vsub.f32 %v4303_v9, %v12088_v46 }
 0x727   : > { %10146 = vmatprep.subr.mxu1 %v3818_v36 }
 0x728   : > { %10147 = vmatpush3.msra.mxu1 %v3818_v36  ;;  %10148 = vmatprep.mubr.f32.mxu1 %v3855_v54  ;;  %v3856_v29 = vsub.f32 %v3854_v50, %v3855_v54  ;;  %v12131_v26 = vand.u32 4294901760, %v12113_v43 }
 0x729   : > { %10158 = vmatprep.subr.mxu1 %v3815_v38  ;;  %10149 = vmatmul.mubr.f32.vlgmr.msra.gmra.mxu1 %v3865_v19  ;;  %v4461_v19 = vsub.f32 %v12058_v6, %v12080_v13 }
 0x72a   : > { %10159 = vmatpush3.msra.mxu1 %v3815_v38  ;;  %10162 = vmatprep.mubr.f32.mxu1 %v3853_v32  ;;  %v3857_v41 = vand.u32 4294901760, %v3856_v29  ;;  %v4420_v38 = vand.u32 4294901760, %v4419_v12  ;;  %v12115_v29 = vand.u32 4294901760, %v4301_v30  ;;  %15255 = vst [vmem:[#allocation19_spill] sm:$0xff] %v12131_v26  ;;  %v4489_v40 = vsub.f32 %v12113_v43, %v12131_v26 }
 0x72b   : > { %10160 = vmatprep.subr.mxu1 %v3818_v36  ;;  %v4462_v42 = vand.u32 4294901760, %v4461_v19 }
 0x72c   : > { %10161 = vmatpush3.msra.mxu1 %v3818_v36  ;;  %10127 = vmatprep.mubr.f32.mxu0 %v3857_v41  ;;  %v12072_v36 = vsub.f32 %v4306_v2, %v12038_v61  ;;  %v4455_v41 = vand.u32 4294901760, %v4454_v58  ;;  %v12135_v39 = vsub.f32 %v4301_v30, %v12115_v29 }
 0x72d   : > { %10128 = vmatmul.mubr.f32.vlgmr.msra.gmra.mxu0 %v3867_v55  ;;  %10163 = vmatmul.mubr.f32.vlgmr.msra.gmra.mxu1 %v3863_v4 }
 0x72e   : > { %10138 = vmatpush3.msra.mxu0 %v3903_v59  ;;  %10141 = vmatprep.mubr.f32.mxu0 %v3854_v50  ;;  %v4427_v59 = vand.u32 4294901760, %v4426_v16 }
 0x72f   : > { %10139 = vmatprep.subr.mxu0 %v3910_v47  ;;  %10200 = vmatprep.subr.mxu1 %v4420_v38 }
 0x730   : > { %10140 = vmatpush3.msra.mxu0 %v3910_v47  ;;  %v4304_v47 = vld [vmem:[#allocation7 + $0x30] sm:$0xff]  ;;  %10201 = vmatpush3.msra.mxu1 %v4420_v38  ;;  %v4490_v38 = vand.u32 4294901760, %v4489_v40 }
 0x731   : > { %10151 = vmatprep.subr.mxu0 %v3904_v7  ;;  %10142 = vmatmul.mubr.f32.vlgmr.msra.gmra.mxu0 %v3864_v34  ;;  %v12086_v52 = vand.u32 4294901760, %v4304_v47  ;;  %v12097_v34 = vsub.f32 %v4305_v3, %v12084_v17  ;;  %v12148_v3 = vand.u32 4294901760, %v12135_v39 }
 0x732   : > { %10152 = vmatpush3.msra.mxu0 %v3904_v7  ;;  %10155 = vmatprep.mubr.f32.mxu0 %v3853_v32  ;;  %v4447_v7 = vsub.f32 %v12032_v57, %v12054_v48  ;;  %v12103_v32 = vand.u32 4294901760, %v4302_v15 }
 0x733   : > { %10153 = vmatprep.subr.mxu0 %v3911_v14  ;;  %10202 = vmatprep.subr.mxu1 %v4427_v59  ;;  %v12101_v37 = vsub.f32 %v4304_v47, %v12086_v52  ;;  %v12109_v54 = vand.u32 4294901760, %v12097_v34  ;;  %15257 = vst [vmem:[#allocation21_spill] sm:$0xff] %v12148_v3 }
 0x734   : > { %10154 = vmatpush3.msra.mxu0 %v3911_v14  ;;  %v4440_v14 = vsub.f32 %v12029_v21, %v12051_v63  ;;  %10203 = vmatpush3.msra.mxu1 %v4427_v59  ;;  %v4448_v50 = vand.u32 4294901760, %v4447_v7  ;;  %v12125_v10 = vsub.f32 %v4302_v15, %v12103_v32  ;;  %v4503_v59 = vsub.f32 %v12135_v39, %v12148_v3 }
 0x735   : > { %10156 = vmatmul.mubr.f32.vlgmr.msra.gmra.mxu0 %v3863_v4  ;;  %10165 = vmatprep.subr.mxu0 %v12004_v53  ;;  %v12093_v4 = vand.u32 4294901760, %v12072_v36  ;;  %v12121_v23 = vand.u32 4294901760, %v12101_v37  ;;  %v4475_v51 = vsub.f32 %v12097_v34, %v12109_v54 }
 0x736   : > { %10166 = vmatpush3.msra.mxu0 %v12004_v53  ;;  %v4441_v11 = vand.u32 4294901760, %v4440_v14  ;;  %10204 = vmatprep.subr.mxu1 %v4434_v60  ;;  %v12141_v12 = vand.u32 4294901760, %v12125_v10  ;;  %v4504_v7 = vand.u32 4294901760, %v4503_v59 }
 0x737   : > { %10167 = vmatprep.subr.mxu0 %v12006_v24  ;;  %10205 = vmatpush3.msra.mxu1 %v4434_v60  ;;  %v4468_v55 = vsub.f32 %v12072_v36, %v12093_v4  ;;  %15254 = vst [vmem:[#allocation25_spill] sm:$0xff] %v12121_v23  ;;  %v4482_v2 = vsub.f32 %v12101_v37, %v12121_v23  ;;  %v4476_v16 = vand.u32 4294901760, %v4475_v51  ;;  %v4300_v60 = vld [vmem:[#allocation7 + $0x10] sm:$0xff] }
 0x738   : > { %10168 = vmatpush3.msra.mxu0 %v12006_v24  ;;  %10206 = vmatprep.subr.mxu1 %v4441_v11  ;;  %15256 = vst [vmem:[#allocation20_spill] sm:$0xff] %v12141_v12  ;;  %v4496_v9 = vsub.f32 %v12125_v10, %v12141_v12  ;;  %v12160_v58 = vand.u32 4294901760, %v4300_v60 }
 0x739   : > { %10169 = vmatprep.subr.mxu0 %v12008_v0  ;;  %10207 = vmatpush3.msra.mxu1 %v4441_v11  ;;  %v4469_v44 = vand.u32 4294901760, %v4468_v55  ;;  %v4483_v47 = vand.u32 4294901760, %v4482_v2  ;;  %v4299_v11 = vld [vmem:[#allocation7 + $0x8] sm:$0xff] }
 0x73a   : > { %10170 = vmatpush3.msra.mxu0 %v12008_v0  ;;  %10208 = vmatprep.subr.mxu1 %v4448_v50  ;;  %v4497_v14 = vand.u32 4294901760, %v4496_v9  ;;  %v12163_v19 = vsub.f32 %v4300_v60, %v12160_v58 }
 0x73b   : > { %10171 = vmatprep.subr.mxu0 %v12010_v5  ;;  %10209 = vmatpush3.msra.mxu1 %v4448_v50  ;;  %v12165_v50 = vand.u32 4294901760, %v4299_v11 }
 0x73c   : > { %10172 = vmatpush3.msra.mxu0 %v12010_v5  ;;  %10210 = vmatprep.subr.mxu1 %v4455_v41  ;;  %v12170_v55 = vand.u32 4294901760, %v12163_v19 }
 0x73d   : > { %10173 = vmatprep.subr.mxu0 %v12012_v62  ;;  %10211 = vmatpush3.msra.mxu1 %v4455_v41  ;;  %v4298_v41 = vld [vmem:[#allocation7] sm:$0xff] }
 0x73e   : > { %10174 = vmatpush3.msra.mxu0 %v12012_v62  ;;  %10212 = vmatprep.subr.mxu1 %v4462_v42  ;;  %15258 = vst [vmem:[#allocation31_spill] sm:$0xff] %v12170_v55  ;;  %v12175_v51 = vand.u32 4294901760, %v4298_v41 }
 0x73f   : > { %10175 = vmatprep.subr.mxu0 %v12014_v49  ;;  %10213 = vmatpush3.msra.mxu1 %v4462_v42  ;;  %v12173_v42 = vsub.f32 %v4299_v11, %v12165_v50 }
 0x740   : > { %10176 = vmatpush3.msra.mxu0 %v12014_v49  ;;  %10214 = vmatprep.subr.mxu1 %v4469_v44 }
 0x741   : > { %10177 = vmatprep.subr.mxu0 %v12026_v18  ;;  %10215 = vmatpush3.msra.mxu1 %v4469_v44  ;;  %v12182_v40 = vand.u32 4294901760, %v12173_v42 }
 0x742   : > { %10178 = vmatpush3.msra.mxu0 %v12026_v18  ;;  %10216 = vmatprep.subr.mxu1 %v4476_v16 }
 0x743   : > { %10179 = vmatprep.subr.mxu0 %v12038_v61  ;;  %10217 = vmatpush3.msra.mxu1 %v4476_v16  ;;  %v4510_v16 = vsub.f32 %v12163_v19, %v12170_v55  ;;  %15259 = vst [vmem:[#allocation33_spill] sm:$0xff] %v12182_v40 }
 0x744   : > { %10180 = vmatpush3.msra.mxu0 %v12038_v61  ;;  %10218 = vmatprep.subr.mxu1 %v4483_v47 }
 0x745   : > { %10181 = vmatprep.subr.mxu0 %v12084_v17  ;;  %10219 = vmatpush3.msra.mxu1 %v4483_v47  ;;  %v12185_v47 = vsub.f32 %v4298_v41, %v12175_v51  ;;  %v4511_v59 = vand.u32 4294901760, %v4510_v16 }
 0x746   : > { %10182 = vmatpush3.msra.mxu0 %v12084_v17  ;;  %10220 = vmatprep.subr.mxu1 %v4490_v38 }
 0x747   : > { %10183 = vmatprep.subr.mxu0 %v12086_v52  ;;  %10221 = vmatpush3.msra.mxu1 %v4490_v38 }
 0x748   : > { %10184 = vmatpush3.msra.mxu0 %v12086_v52  ;;  %10222 = vmatprep.subr.mxu1 %v4497_v14 }
 0x749   : > { %10185 = vmatprep.subr.mxu0 %v12088_v46  ;;  %10223 = vmatpush3.msra.mxu1 %v4497_v14  ;;  %v4517_v14 = vsub.f32 %v12173_v42, %v12182_v40 }
 0x74a   : > { %10186 = vmatpush3.msra.mxu0 %v12088_v46  ;;  %10224 = vmatprep.subr.mxu1 %v4504_v7 }
 0x74b   : > { %10187 = vmatprep.subr.mxu0 %v12103_v32  ;;  %10225 = vmatpush3.msra.mxu1 %v4504_v7  ;;  %v12192_v7 = vand.u32 4294901760, %v12185_v47  ;;  %v4518_v28 = vand.u32 4294901760, %v4517_v14 }
 0x74c   : > { %10188 = vmatpush3.msra.mxu0 %v12103_v32  ;;  %10226 = vmatprep.subr.mxu1 %v4511_v59 }
 0x74d   : > { %10189 = vmatprep.subr.mxu0 %v12115_v29  ;;  %v4524_v55 = vsub.f32 %v12185_v47, %v12192_v7  ;;  %10227 = vmatpush3.msra.mxu1 %v4511_v59 }
 0x74e   : > { %10190 = vmatpush3.msra.mxu0 %v12115_v29  ;;  %10228 = vmatprep.subr.mxu1 %v4518_v28 }
 0x74f   : > { %10191 = vmatprep.subr.mxu0 %v12160_v58  ;;  %10229 = vmatpush3.msra.mxu1 %v4518_v28 }
 0x750   : > { %10192 = vmatpush3.msra.mxu0 %v12160_v58 }
 0x751   : > { %10193 = vmatprep.subr.mxu0 %v12165_v50 }
 0x752   : > { %10194 = vmatpush3.msra.mxu0 %v12165_v50 }
 0x753   : > { %10195 = vmatprep.subr.mxu0 %v12175_v51 }
 0x754   : > { %10196 = vmatpush3.msra.mxu0 %v12175_v51 }
 0x755   : > { %10235 = vmatprep.subr.mxu0 %v12017_v27 }
 0x7e5   : > { %v10136_v15 = vpop.f32.mrf.mxu1 }
 0x7e7   : > { %v3950_v30 = vpop.f32.mrf.mxu1 }
 0x7e9   : > { %v10150_v44 = vpop.f32.mrf.mxu1 }
 0x7eb   : > { %v4114_v60 = vpop.f32.mrf.mxu1 }
 0x7ed   : > { %v10129_v2 = vpop.f32.mrf.mxu0  ;;  %v10164_v16 = vpop.f32.mrf.mxu1 }
 0x7ee   : > { %v3957_v38 = vadd.f32 %v10136_v15, %v10129_v2  ;;  %v4525_v2 = vand.u32 4294901760, %v4524_v55 }
 0x7ef   : > { %v3859_v9 = vpop.f32.mrf.mxu0 }
 0x7f0   : > { %v3951_v22 = vadd.f32 %v3950_v30, %v3859_v9  ;;  %10230 = vmatprep.subr.mxu1 %v4525_v2  ;;  %v4278_v9 = vpop.f32.mrf.mxu1 }
 0x7f1   : > { %v10143_v11 = vpop.f32.mrf.mxu0  ;;  %10231 = vmatpush3.msra.mxu1 %v4525_v2  ;;  %v5102_v2 = vld [vmem:[#allocation8 + $0x1a8] sm:$0xff] }
 0x7f2   : > { %v4040_v41 = vadd.f32 %v10143_v11, %v3957_v38  ;;  %10270 = vmatprep.subr.mxu1 %v12004_v53 }
 0x7f3   : > { %v4032_v3 = vpop.f32.mrf.mxu0 }
 0x7f4   : > { %v4033_v15 = vadd.f32 %v4032_v3, %v3951_v22  ;;  %v4123_v12 = vadd.f32 %v10150_v44, %v4040_v41 }
 0x7f5   : > { %v10157_v40 = vpop.f32.mrf.mxu0 }
 0x7f6   : > { %v4115_v26 = vadd.f32 %v4114_v60, %v4033_v15  ;;  %v4206_v38 = vadd.f32 %v10157_v40, %v4123_v12  ;;  %v5105_v15 = vld [vmem:[#allocation8 + $0x1c0] sm:$0xff] }
 0x7f7   : > { %v4199_v23 = vpop.f32.mrf.mxu0 }
 0x7f8   : > { %v4200_v30 = vadd.f32 %v4199_v23, %v4115_v26  ;;  %v4285_v59 = vadd.f32 %v10164_v16, %v4206_v38  ;;  %v5101_v16 = vld [vmem:[#allocation8 + $0x1a0] sm:$0xff] }
 0x7f9   : > { %v12370_v38 = vand.u32 4294901760, %v5101_v16 }
 0x7fa   : > { %v4279_v14 = vadd.f32 %v4278_v9, %v4200_v30  ;;  %v12366_v30 = vand.u32 4294901760, %v5105_v15  ;;  %v12368_v9 = vand.u32 4294901760, %v5102_v2 }
 0x7fc   : > { %4290 = vrot.lane.b32.xlu1 %v4279_v14, %s10716_s14  ;;  %v5098_v14 = vld [vmem:[#allocation8 + $0x188] sm:$0xff] }
 0x800   : > { %4292 = vrot.lane.b32.xlu1 %v4285_v59, %s10716_s14  ;;  %s8878_s14 = sshll.u32 %s489_s26, 4  ;;  %s14693_s14 = int_to_ptr.vmem [resolvable:$true] %s8878_s14 }
 0x801   : > { %s10630_s25 = scalar_lea.vmem %s14693_s14, 256  ;;  %p10637_p5 = scmp.lt.s32.totalorder %s14693_s14, %s10635_s4 }
 0x802   : > { %p10631_p12 = scmp.ne.s32.totalorder %s14693_s14, %s10630_s25  ;;  %p10638_p10 = scmp.lt.s32.totalorder %s10636_s17, %s10630_s25 }
 0x804   : > { %p10632_p9 = pnand %p10631_p12, %p15746_p7  ;;  %p10639_p1 = por %p10638_p10, %p10637_p5 }
 0x806   : > { %p10633_p13 = pneg %p10632_p9 }
 0x808   : > { %p10640_p2 = pnand %p10639_p1, %p10633_p13 }
 0x86e   : > { %v4291_v22 = vpop.permute.xlu1 %4290 }
 0x86f   : > { %v4296_v28 = vsel %vm2178_vm0, %v11986_v25, %v4291_v22 }
 0x870   : > { %v12202_v3 = vand.u32 4294901760, %v4296_v28 }
 0x872   : > { %v4396_v55 = vsub.f32 %v4296_v28, %v12202_v3  ;;  %10232 = vmatprep.mubr.f32.mxu1 %v12202_v3  ;;  %v4293_v23 = vpop.permute.xlu1 %4292 }
 0x873   : > { %v4297_v26 = vsel %vm2178_vm0, %v11984_v20, %v4293_v23  ;;  %v12388_v23 = vsub.f32 %v5102_v2, %v12368_v9 }
 0x874   : > { %v12208_v12 = vand.u32 4294901760, %v4297_v26  ;;  %v4397_v44 = vand.u32 4294901760, %v4396_v55 }
 0x876   : > { %v12211_v40 = vsub.f32 %v4297_v26, %v12208_v12  ;;  %10233 = vmatmul.mubr.f32.vlgmr.msra.gmra.mxu1 %v12208_v12  ;;  %v4398_v60 = vsub.f32 %v4396_v55, %v4397_v44  ;;  %v12391_v26 = vsub.f32 %v5101_v16, %v12370_v38 }
 0x877   : > { %10271 = vmatpush3.msra.mxu1 %v12004_v53  ;;  %10302 = vmatprep.mubr.f32.mxu1 %v4397_v44 }
 0x878   : > { %v4407_v25 = vand.u32 4294901760, %v12211_v40  ;;  %10272 = vmatprep.subr.mxu1 %v12006_v24  ;;  %v4399_v11 = vand.u32 4294901760, %v4398_v60 }
 0x879   : > { %10273 = vmatpush3.msra.mxu1 %v12006_v24 }
 0x87a   : > { %v4408_v20 = vsub.f32 %v12211_v40, %v4407_v25  ;;  %10274 = vmatprep.subr.mxu1 %v12008_v0  ;;  %10197 = vmatprep.mubr.f32.mxu0 %v4399_v11  ;;  %v14854_v11 = vand.u32 4294901760, %v12388_v23 }
 0x87b   : > { %10275 = vmatpush3.msra.mxu1 %v12008_v0 }
 0x87c   : > { %10276 = vmatprep.subr.mxu1 %v12010_v5  ;;  %v4409_v41 = vand.u32 4294901760, %v4408_v20  ;;  %v14852_v20 = vand.u32 4294901760, %v12391_v26 }
 0x87d   : > { %10277 = vmatpush3.msra.mxu1 %v12010_v5 }
 0x87e   : > { %10278 = vmatprep.subr.mxu1 %v12012_v62  ;;  %10198 = vmatmul.mubr.f32.vlgmr.msra.gmra.mxu0 %v4409_v41 }
 0x87f   : > { %10236 = vmatpush3.msra.mxu0 %v12017_v27  ;;  %10279 = vmatpush3.msra.mxu1 %v12012_v62  ;;  %v15266_v27 = vld [vmem:[#allocation33_spill] sm:$0xff] }
 0x880   : > { %10237 = vmatprep.subr.mxu0 %v12020_v56  ;;  %10267 = vmatprep.mubr.f32.mxu0 %v4396_v55  ;;  %v12385_v55 = vsub.f32 %v5105_v15, %v12366_v30  ;;  %v5086_v15 = vld [vmem:[#allocation8 + $0x128] sm:$0xff] }
 0x881   : > { %10280 = vmatprep.subr.mxu1 %v12014_v49  ;;  %10238 = vmatpush3.msra.mxu0 %v12020_v56 }
 0x882   : > { %10281 = vmatpush3.msra.mxu1 %v12014_v49  ;;  %10239 = vmatprep.subr.mxu0 %v12023_v31 }
 0x883   : > { %10282 = vmatprep.subr.mxu1 %v12026_v18  ;;  %10240 = vmatpush3.msra.mxu0 %v12023_v31 }
 0x884   : > { %10283 = vmatpush3.msra.mxu1 %v12026_v18  ;;  %10241 = vmatprep.subr.mxu0 %v12029_v21 }
 0x885   : > { %10284 = vmatprep.subr.mxu1 %v12038_v61  ;;  %10242 = vmatpush3.msra.mxu0 %v12029_v21 }
 0x886   : > { %10285 = vmatpush3.msra.mxu1 %v12038_v61  ;;  %10243 = vmatprep.subr.mxu0 %v12032_v57 }
 0x887   : > { %10286 = vmatprep.subr.mxu1 %v12084_v17  ;;  %10244 = vmatpush3.msra.mxu0 %v12032_v57 }
 0x888   : > { %10287 = vmatpush3.msra.mxu1 %v12084_v17  ;;  %10245 = vmatprep.subr.mxu0 %v12036_v35 }
 0x889   : > { %10288 = vmatprep.subr.mxu1 %v12086_v52  ;;  %10246 = vmatpush3.msra.mxu0 %v12036_v35 }
 0x88a   : > { %10289 = vmatpush3.msra.mxu1 %v12086_v52  ;;  %10247 = vmatprep.subr.mxu0 %v12058_v6 }
 0x88b   : > { %10290 = vmatprep.subr.mxu1 %v12088_v46  ;;  %10248 = vmatpush3.msra.mxu0 %v12058_v6 }
 0x88c   : > { %10291 = vmatpush3.msra.mxu1 %v12088_v46  ;;  %10249 = vmatprep.subr.mxu0 %v12072_v36 }
 0x88d   : > { %10292 = vmatprep.subr.mxu1 %v12103_v32  ;;  %10250 = vmatpush3.msra.mxu0 %v12072_v36 }
 0x88e   : > { %10293 = vmatpush3.msra.mxu1 %v12103_v32  ;;  %10251 = vmatprep.subr.mxu0 %v12097_v34 }
 0x88f   : > { %10294 = vmatprep.subr.mxu1 %v12115_v29  ;;  %10252 = vmatpush3.msra.mxu0 %v12097_v34 }
 0x890   : > { %10295 = vmatpush3.msra.mxu1 %v12115_v29  ;;  %10253 = vmatprep.subr.mxu0 %v12101_v37 }
 0x891   : > { %10296 = vmatprep.subr.mxu1 %v12160_v58  ;;  %10254 = vmatpush3.msra.mxu0 %v12101_v37  ;;  %v9008_v37 = vld [vmem:[%s14741_s5] ss:$0 sm:$0xff] }
 0x892   : > { %10297 = vmatpush3.msra.mxu1 %v12160_v58  ;;  %10255 = vmatprep.subr.mxu0 %v12113_v43 }
 0x893   : > { %10298 = vmatprep.subr.mxu1 %v12165_v50  ;;  %10256 = vmatpush3.msra.mxu0 %v12113_v43 }
 0x894   : > { %10299 = vmatpush3.msra.mxu1 %v12165_v50  ;;  %10257 = vmatprep.subr.mxu0 %v12125_v10 }
 0x895   : > { %10300 = vmatprep.subr.mxu1 %v12175_v51  ;;  %10258 = vmatpush3.msra.mxu0 %v12125_v10 }
 0x896   : > { %10301 = vmatpush3.msra.mxu1 %v12175_v51  ;;  %10259 = vmatprep.subr.mxu0 %v12135_v39 }
 0x897   : > { %10303 = vmatmul.mubr.f32.vlgmr.msra.gmra.mxu1 %v4407_v25  ;;  %10340 = vmatprep.subr.mxu1 %v12004_v53  ;;  %v14855_v25 = vand.u32 4294901760, %v12385_v55 }
 0x898   : > { %10260 = vmatpush3.msra.mxu0 %v12135_v39  ;;  %10341 = vmatpush3.msra.mxu1 %v12004_v53  ;;  %v15260_v53 = vld [vmem:[#allocation25_spill] sm:$0xff] }
 0x899   : > { %10372 = vmatprep.mubr.f32.mxu1 %v12202_v3  ;;  %10261 = vmatprep.subr.mxu0 %v12163_v19 }
 0x89a   : > { %10342 = vmatprep.subr.mxu1 %v12006_v24  ;;  %10262 = vmatpush3.msra.mxu0 %v12163_v19  ;;  %v5110_v19 = vld [vmem:[#allocation8 + $0x1e8] sm:$0xff] }
 0x89b   : > { %10343 = vmatpush3.msra.mxu1 %v12006_v24  ;;  %10263 = vmatprep.subr.mxu0 %v12173_v42  ;;  %v15261_v24 = vld [vmem:[#allocation19_spill] sm:$0xff] }
 0x89c   : > { %10344 = vmatprep.subr.mxu1 %v12008_v0  ;;  %10264 = vmatpush3.msra.mxu0 %v12173_v42  ;;  %v5106_v42 = vld [vmem:[#allocation8 + $0x1c8] sm:$0xff] }
 0x89d   : > { %10345 = vmatpush3.msra.mxu1 %v12008_v0  ;;  %10265 = vmatprep.subr.mxu0 %v12185_v47  ;;  %v15262_v0 = vld [vmem:[#allocation20_spill] sm:$0xff] }
 0x89e   : > { %10346 = vmatprep.subr.mxu1 %v12010_v5  ;;  %10266 = vmatpush3.msra.mxu0 %v12185_v47 }
 0x89f   : > { %10347 = vmatpush3.msra.mxu1 %v12010_v5  ;;  %10268 = vmatmul.mubr.f32.vlgmr.msra.gmra.mxu0 %v12211_v40  ;;  %v15263_v5 = vld [vmem:[#allocation21_spill] sm:$0xff] }
 0x8a0   : > { %10305 = vmatprep.subr.mxu0 %v12041_v1  ;;  %10348 = vmatprep.subr.mxu1 %v12012_v62 }
 0x8a1   : > { %10306 = vmatpush3.msra.mxu0 %v12041_v1  ;;  %10337 = vmatprep.mubr.f32.mxu0 %v12202_v3  ;;  %v12381_v3 = vand.u32 4294901760, %v5098_v14 }
 0x8a2   : > { %10349 = vmatpush3.msra.mxu1 %v12012_v62  ;;  %10307 = vmatprep.subr.mxu0 %v12044_v33  ;;  %v15264_v62 = vld [vmem:[#allocation31_spill] sm:$0xff] }
 0x8a3   : > { %10350 = vmatprep.subr.mxu1 %v12014_v49  ;;  %10308 = vmatpush3.msra.mxu0 %v12044_v33  ;;  %v12398_v60 = vsub.f32 %v5098_v14, %v12381_v3  ;;  %v12467_v14 = vand.u32 4294901760, %v5086_v15 }
 0x8a4   : > { %10351 = vmatpush3.msra.mxu1 %v12014_v49  ;;  %10309 = vmatprep.subr.mxu0 %v12047_v45  ;;  %v15265_v49 = vmov 0.0  }
 0x8a5   : > { %10352 = vmatprep.subr.mxu1 %v12026_v18  ;;  %10310 = vmatpush3.msra.mxu0 %v12047_v45 }
 0x8a6   : > { %10353 = vmatpush3.msra.mxu1 %v12026_v18  ;;  %10311 = vmatprep.subr.mxu0 %v12051_v63 }
 0x8a7   : > { %10354 = vmatprep.subr.mxu1 %v12038_v61  ;;  %10312 = vmatpush3.msra.mxu0 %v12051_v63 }
 0x8a8   : > { %10355 = vmatpush3.msra.mxu1 %v12038_v61  ;;  %10313 = vmatprep.subr.mxu0 %v12054_v48 }
 0x8a9   : > { %10356 = vmatprep.subr.mxu1 %v12084_v17  ;;  %10314 = vmatpush3.msra.mxu0 %v12054_v48 }
 0x8aa   : > { %10357 = vmatpush3.msra.mxu1 %v12084_v17  ;;  %10315 = vmatprep.subr.mxu0 %v12068_v8 }
 0x8ab   : > { %10358 = vmatprep.subr.mxu1 %v12086_v52  ;;  %10316 = vmatpush3.msra.mxu0 %v12068_v8 }
 0x8ac   : > { %10359 = vmatpush3.msra.mxu1 %v12086_v52  ;;  %10317 = vmatprep.subr.mxu0 %v12080_v13 }
 0x8ad   : > { %10360 = vmatprep.subr.mxu1 %v12088_v46  ;;  %10318 = vmatpush3.msra.mxu0 %v12080_v13 }
 0x8ae   : > { %10361 = vmatpush3.msra.mxu1 %v12088_v46  ;;  %10319 = vmatprep.subr.mxu0 %v12093_v4 }
 0x8af   : > { %10362 = vmatprep.subr.mxu1 %v12103_v32  ;;  %10320 = vmatpush3.msra.mxu0 %v12093_v4 }
 0x8b0   : > { %10363 = vmatpush3.msra.mxu1 %v12103_v32  ;;  %10321 = vmatprep.subr.mxu0 %v12109_v54  ;;  %v10496_v32 = vld [vmem:[%s10943_s3 + $0x8] sm:$0xff] }
 0x8b1   : > { %10364 = vmatprep.subr.mxu1 %v12115_v29  ;;  %10322 = vmatpush3.msra.mxu0 %v12109_v54 }
 0x8b2   : > { %10365 = vmatpush3.msra.mxu1 %v12115_v29  ;;  %10323 = vmatprep.subr.mxu0 %v15260_v53  ;;  %v10497_v29 = vld [vmem:[%s10943_s3] sm:$0xff] }
 0x8b3   : > { %10366 = vmatprep.subr.mxu1 %v12160_v58  ;;  %10324 = vmatpush3.msra.mxu0 %v15260_v53 }
 0x8b4   : > { %10367 = vmatpush3.msra.mxu1 %v12160_v58  ;;  %10325 = vmatprep.subr.mxu0 %v15261_v24 }
 0x8b5   : > { %10368 = vmatprep.subr.mxu1 %v12165_v50  ;;  %10326 = vmatpush3.msra.mxu0 %v15261_v24 }
 0x8b6   : > { %10369 = vmatpush3.msra.mxu1 %v12165_v50  ;;  %10327 = vmatprep.subr.mxu0 %v15262_v0  ;;  %v5109_v50 = vld [vmem:[#allocation8 + $0x1e0] sm:$0xff] }
 0x8b7   : > { %10370 = vmatprep.subr.mxu1 %v12175_v51  ;;  %10328 = vmatpush3.msra.mxu0 %v15262_v0  ;;  %v12362_v47 = vand.u32 4294901760, %v5109_v50  ;;  %v14851_v0 = vand.u32 4294901760, %v12398_v60 }
 0x8b8   : > { %10371 = vmatpush3.msra.mxu1 %v12175_v51  ;;  %10329 = vmatprep.subr.mxu0 %v15263_v5  ;;  %v12360_v51 = vand.u32 4294901760, %v5110_v19 }
 0x8b9   : > { %10373 = vmatmul.mubr.f32.vlgmr.msra.gmra.mxu1 %v12208_v12  ;;  %10330 = vmatpush3.msra.mxu0 %v15263_v5  ;;  %v12376_v22 = vsub.f32 %v5109_v50, %v12362_v47  ;;  %v5275_v5 = vsub.f32 %v12385_v55, %v14855_v25 }
 0x8ba   : > { %10331 = vmatprep.subr.mxu0 %v15264_v62  ;;  %5478 = vmatprep.mubr.f32.mxu1 %v15265_v49  ;;  %v12373_v59 = vsub.f32 %v5110_v19, %v12360_v51 }
 0x8bb   : > { %10332 = vmatpush3.msra.mxu0 %v15264_v62  ;;  %v14858_v44 = vand.u32 4294901760, %v12376_v22  ;;  %v5281_v62 = vsub.f32 %v12388_v23, %v14854_v11  ;;  %v5065_v11 = vld [vmem:[#allocation8 + $0x80] sm:$0xff] }
 0x8bc   : > { %10333 = vmatprep.subr.mxu0 %v15266_v27 }
 0x8bd   : > { %10334 = vmatpush3.msra.mxu0 %v15266_v27  ;;  %v5263_v53 = vsub.f32 %v12376_v22, %v14858_v44  ;;  %v5287_v27 = vsub.f32 %v12391_v26, %v14852_v20 }
 0x8be   : > { %10335 = vmatprep.subr.mxu0 %v12192_v7 }
 0x8bf   : > { %10336 = vmatpush3.msra.mxu0 %v12192_v7  ;;  %v12364_v7 = vand.u32 4294901760, %v5106_v42 }
 0x8c0   : > { %10338 = vmatmul.mubr.f32.vlgmr.msra.gmra.mxu0 %v12208_v12  ;;  %5136 = vmatprep.subr.mxu0 %v12360_v51  ;;  %v14859_v12 = vand.u32 4294901760, %v12373_v59 }
 0x8c1   : > { %5231 = vmatprep.mubr.f32.mxu0 %v15265_v49  ;;  %v12379_v28 = vsub.f32 %v5106_v42, %v12364_v7  ;;  %5138 = vmatpush1.msra.mxu0 %v12362_v47 }
 0x8c2   : > { %5140 = vmatprep.subr.mxu0 %v12364_v7  ;;  %v5257_v41 = vsub.f32 %v12373_v59, %v14859_v12 }
 0x8c3   : > { %v14856_v40 = vand.u32 4294901760, %v12379_v28  ;;  %5142 = vmatpush1.msra.mxu0 %v12366_v30 }
 0x8c4   : > { %5144 = vmatprep.subr.mxu0 %v12368_v9 }
 0x8c5   : > { %v5269_v24 = vsub.f32 %v12379_v28, %v14856_v40  ;;  %5146 = vmatpush1.msra.mxu0 %v12370_v38 }
 0x8c6   : > { %5148 = vmatprep.subr.mxu0 %v12381_v3 }
 0x936   : > { %v10234_v31 = vpop.f32.mrf.mxu1 }
 0x938   : > { %v4562_v57 = vpop.f32.mrf.mxu1 }
 0x93e   : > { %v10199_v56 = vpop.f32.mrf.mxu0 }
 0x93f   : > { %v4569_v35 = vadd.f32 %v10234_v31, %v10199_v56  ;;  %v5258_v56 = vand.u32 4294901760, %v5257_v41  ;;  %v5264_v31 = vand.u32 4294901760, %v5263_v53  ;;  %v5085_v41 = vld [vmem:[#allocation8 + $0x120] sm:$0xff] }
 0x940   : > { %v4401_v18 = vpop.f32.mrf.mxu0 }
 0x941   : > { %v4563_v33 = vadd.f32 %v4562_v57, %v4401_v18  ;;  %v5270_v18 = vand.u32 4294901760, %v5269_v24  ;;  %v5276_v57 = vand.u32 4294901760, %v5275_v5  ;;  %5259 = vmatprep.subr.mxu1 %v5258_v56 }
 0x942   : > { %5265 = vmatpush1.msra.mxu1 %v5264_v31 }
 0x943   : > { %5271 = vmatprep.subr.mxu1 %v5270_v18  ;;  %v12485_v18 = vsub.f32 %v5086_v15, %v12467_v14  ;;  %v5074_v15 = vld [vmem:[#allocation8 + $0xc8] sm:$0xff] }
 0x944   : > { %5277 = vmatpush1.msra.mxu1 %v5276_v57  ;;  %v5081_v57 = vld [vmem:[#allocation8 + $0x100] sm:$0xff] }
 0x957   : > { %v10304_v61 = vpop.f32.mrf.mxu1 }
 0x959   : > { %v4768_v48 = vpop.f32.mrf.mxu1 }
 0x95f   : > { %v10269_v21 = vpop.f32.mrf.mxu0 }
 0x960   : > { %v4680_v45 = vadd.f32 %v10269_v21, %v4569_v35  ;;  %v5293_v21 = vsub.f32 %v12398_v60, %v14851_v0  ;;  %v5282_v35 = vand.u32 4294901760, %v5281_v62  ;;  %v12477_v62 = vand.u32 4294901760, %v5085_v41 }
 0x961   : > { %v4672_v1 = vpop.f32.mrf.mxu0 }
 0x962   : > { %v4673_v63 = vadd.f32 %v4672_v1, %v4563_v33  ;;  %v4777_v6 = vadd.f32 %v10304_v61, %v4680_v45  ;;  %v5288_v61 = vand.u32 4294901760, %v5287_v27  ;;  %v5294_v1 = vand.u32 4294901760, %v5293_v21  ;;  %5283 = vmatprep.subr.mxu1 %v5282_v35  ;;  %v5082_v27 = vld [vmem:[#allocation8 + $0x108] sm:$0xff] }
 0x963   : > { %v12487_v21 = vand.u32 4294901760, %v5082_v27 }
 0x964   : > { %v4769_v17 = vadd.f32 %v4768_v48, %v4673_v63  ;;  %5289 = vmatpush1.msra.mxu1 %v5288_v61 }
 0x965   : > { %5295 = vmatprep.subr.mxu1 %v5294_v1 }
 0x979   : > { %v10374_v8 = vpop.f32.mrf.mxu1 }
 0x97b   : > { %v4988_v34 = vpop.f32.mrf.mxu1 }
 0x980   : > { %v10339_v36 = vpop.f32.mrf.mxu0 }
 0x981   : > { %v4902_v13 = vadd.f32 %v10339_v36, %v4777_v6 }
 0x982   : > { %v4895_v52 = vpop.f32.mrf.mxu0 }
 0x983   : > { %v4995_v46 = vadd.f32 %v10374_v8, %v4902_v13  ;;  %v4896_v4 = vadd.f32 %v4895_v52, %v4769_v17  ;;  %v5097_v13 = vld [vmem:[#allocation8 + $0x180] sm:$0xff]  ;;  %v5094_v52 = vld [vmem:[#allocation8 + $0x168] sm:$0xff] }
 0x984   : > { %v12438_v17 = vand.u32 4294901760, %v5097_v13 }
 0x985   : > { %v4999_v54 = vadd.f32 %v10496_v32, %v4995_v46  ;;  %v4989_v43 = vadd.f32 %v4988_v34, %v4896_v4  ;;  %v12442_v4 = vand.u32 4294901760, %v5094_v52  ;;  %v5093_v34 = vld [vmem:[#allocation8 + $0x160] sm:$0xff] }
 0x986   : > { %v12447_v32 = vand.u32 4294901760, %v5093_v34  ;;  %5150 = vmatpush1.msra.mxu0 %v12438_v17 }
 0x987   : > { %v4998_v10 = vadd.f32 %v10497_v29, %v4989_v43  ;;  %v12354_v39 = vadd.f32 %v9008_v37, %v4999_v54  ;;  %v5090_v54 = vld [vmem:[#allocation8 + $0x148] sm:$0xff]  ;;  %v12451_v43 = vsub.f32 %v5094_v52, %v12442_v4  ;;  %5152 = vmatprep.subr.mxu0 %v12442_v4  ;;  %v5077_v52 = vld [vmem:[#allocation8 + $0xe0] sm:$0xff] }
 0x988   : > { %v12453_v29 = vand.u32 4294901760, %v5090_v54  ;;  %v12458_v50 = vsub.f32 %v5093_v34, %v12447_v32  ;;  %5154 = vmatpush1.msra.mxu0 %v12447_v32 }
 0x989   : > { %15267 = vst [vmem:[#allocation24_spill] sm:$0xff] %v12354_v39  ;;  %5013 = vadd.xlane.f32.xlu1 %v12354_v39  ;;  %v12357_v58 = vadd.f32 %v9008_v37, %v4998_v10  ;;  %v12445_v37 = vsub.f32 %v5097_v13, %v12438_v17  ;;  %v5089_v10 = vld [vmem:[#allocation8 + $0x140] sm:$0xff]  ;;  %v14848_v2 = vand.u32 4294901760, %v12451_v43  ;;  %v12503_v13 = vsub.f32 %v5082_v27, %v12487_v21 }
 0x98a   : > { %v12460_v42 = vand.u32 4294901760, %v5089_v10  ;;  %v12465_v16 = vsub.f32 %v5090_v54, %v12453_v29  ;;  %5156 = vmatprep.subr.mxu0 %v12453_v29  ;;  %v14846_v24 = vand.u32 4294901760, %v12458_v50 }
 0x98b   : > { %15268 = vst [vmem:[#allocation26_spill] sm:$0xff] %v12357_v58  ;;  %5011 = vadd.xlane.f32.xlu0 %v12357_v58  ;;  %v14849_v19 = vand.u32 4294901760, %v12445_v37  ;;  %v5305_v56 = vsub.f32 %v12451_v43, %v14848_v2  ;;  %v14850_v27 = vand.u32 4294901760, %v12503_v13 }
 0x98c   : > { %v12475_v5 = vsub.f32 %v5089_v10, %v12460_v42  ;;  %5158 = vmatpush1.msra.mxu0 %v12460_v42  ;;  %v14844_v31 = vand.u32 4294901760, %v12465_v16  ;;  %v5311_v61 = vsub.f32 %v12458_v50, %v14846_v24  ;;  %v12510_v10 = vand.u32 4294901760, %v5081_v57 }
 0x98d   : > { %v5299_v53 = vsub.f32 %v12445_v37, %v14849_v19  ;;  %5160 = vmatprep.subr.mxu0 %v12467_v14  ;;  %v5341_v24 = vsub.f32 %v12503_v13, %v14850_v27 }
 0x98e   : > { %v14843_v1 = vand.u32 4294901760, %v12475_v5  ;;  %5162 = vmatpush1.msra.mxu0 %v12477_v62 }
 0x98f   : > { %v5300_v35 = vand.u32 4294901760, %v5299_v53  ;;  %5164 = vmatprep.subr.mxu0 %v12487_v21 }
 0x990   : > { %v5323_v34 = vsub.f32 %v12475_v5, %v14843_v1  ;;  %5166 = vmatpush1.msra.mxu0 %v12510_v10 }
 0x991   : > { %5301 = vmatpush1.msra.mxu1 %v5300_v35  ;;  %v5073_v35 = vld [vmem:[#allocation8 + $0xc0] sm:$0xff] }
 0xa12   : > { %v5014_v33 = vpop.xlane.xlu1 %5013 }
 0xa13   : > { %v5016_v63 = vmul.f32 0.0078125, %v5014_v33  ;;  %v12495_v33 = vsub.f32 %v5085_v41, %v12477_v62 }
 0xa14   : > { %v5012_v45 = vpop.xlane.xlu0 %5011 }
 0xa15   : > { %v5015_v48 = vmul.f32 0.0078125, %v5012_v45  ;;  %v12434_v8 = vsub.f32 %v12354_v39, %v5016_v63  ;;  %v5078_v45 = vld [vmem:[#allocation8 + $0xe8] sm:$0xff]  ;;  %v5306_v63 = vand.u32 4294901760, %v5305_v56  ;;  %v14847_v54 = vand.u32 4294901760, %v12495_v33  ;;  %v5061_v39 = vld [vmem:[#allocation8 + $0x60] sm:$0xff] }
 0xa16   : > { %v12516_v56 = vand.u32 4294901760, %v5078_v45 }
 0xa17   : > { %v12431_v6 = vsub.f32 %v12357_v58, %v5015_v48  ;;  %v5020_v46 = vmul.f32 %v12434_v8, %v12434_v8  ;;  %v5317_v48 = vsub.f32 %v12465_v16, %v14844_v31  ;;  %5307 = vmatprep.subr.mxu1 %v5306_v63  ;;  %v5335_v1 = vsub.f32 %v12495_v33, %v14847_v54  ;;  %v5069_v54 = vld [vmem:[#allocation8 + $0xa0] sm:$0xff] }
 0xa18   : > { %v12522_v31 = vsub.f32 %v5081_v57, %v12510_v10  ;;  %v12524_v63 = vand.u32 4294901760, %v5077_v52  ;;  %5168 = vmatprep.subr.mxu0 %v12516_v56  ;;  %v12590_v58 = vand.u32 4294901760, %v5065_v11 }
 0xa19   : > { %v5019_v36 = vmul.f32 %v12431_v6, %v12431_v6  ;;  %v5318_v41 = vand.u32 4294901760, %v5317_v48  ;;  %v5070_v48 = vld [vmem:[#allocation8 + $0xa8] sm:$0xff]  ;;  %v5336_v57 = vand.u32 4294901760, %v5335_v1 }
 0xa1a   : > { %v14853_v2 = vand.u32 4294901760, %v12522_v31  ;;  %v12538_v19 = vsub.f32 %v5077_v52, %v12524_v63  ;;  %5170 = vmatpush1.msra.mxu0 %v12524_v63  ;;  %v12547_v20 = vand.u32 4294901760, %v5070_v48  ;;  %15276 = vst [vmem:[#allocation34_spill] sm:$0xff] %v12590_v58 }
 0xa1b   : > { %5021 = vadd.xlane.f32.xlu0 %v5019_v36  ;;  %v14845_v36 = vand.u32 4294901760, %v12485_v18 }
 0xa1c   : > { %15270 = vst [vmem:[#allocation30_spill] sm:$0xff] %v12538_v19  ;;  %v5347_v1 = vsub.f32 %v12522_v31, %v14853_v2  ;;  %v14861_v52 = vand.u32 4294901760, %v12538_v19 }
 0xa1d   : > { %v5329_v53 = vsub.f32 %v12485_v18, %v14845_v36 }
 0xa1e   : > { %v5359_v25 = vsub.f32 %v12538_v19, %v14861_v52  ;;  %v5058_v19 = vld [vmem:[#allocation8 + $0x48] sm:$0xff] }
 0xa1f   : > { %5023 = vadd.xlane.f32.xlu0 %v5020_v46  ;;  %v5312_v46 = vand.u32 4294901760, %v5311_v61  ;;  %v5324_v61 = vand.u32 4294901760, %v5323_v34  ;;  %v5330_v36 = vand.u32 4294901760, %v5329_v53  ;;  %v12533_v34 = vand.u32 4294901760, %v5074_v15  ;;  %v5066_v53 = vld [vmem:[#allocation8 + $0x88] sm:$0xff] }
 0xa20   : > { %v12567_v2 = vand.u32 4294901760, %v5066_v53  ;;  %v5360_v52 = vand.u32 4294901760, %v5359_v25  ;;  %v5057_v25 = vld [vmem:[#allocation8 + $0x40] sm:$0xff] }
 0xa21   : > { %5313 = vmatpush1.msra.mxu1 %v5312_v46  ;;  %v12531_v46 = vsub.f32 %v5078_v45, %v12516_v56  ;;  %v5342_v45 = vand.u32 4294901760, %v5341_v24  ;;  %v12545_v0 = vsub.f32 %v5074_v15, %v12533_v34  ;;  %5172 = vmatprep.subr.mxu0 %v12533_v34  ;;  %v12557_v24 = vand.u32 4294901760, %v5069_v54 }
 0xa22   : > { %5319 = vmatprep.subr.mxu1 %v5318_v41  ;;  %v12540_v41 = vand.u32 4294901760, %v5073_v35 }
 0xa23   : > { %15269 = vst [vmem:[#allocation28_spill] sm:$0xff] %v12531_v46  ;;  %5325 = vmatpush1.msra.mxu1 %v5324_v61  ;;  %v14857_v27 = vand.u32 4294901760, %v12531_v46  ;;  %15271 = vst [vmem:[#allocation32_spill] sm:$0xff] %v12545_v0  ;;  %v14865_v15 = vand.u32 4294901760, %v12545_v0  ;;  %v12575_v40 = vsub.f32 %v5069_v54, %v12557_v24 }
 0xa24   : > { %5331 = vmatprep.subr.mxu1 %v5330_v36  ;;  %v12555_v61 = vsub.f32 %v5073_v35, %v12540_v41  ;;  %5174 = vmatpush1.msra.mxu0 %v12540_v41  ;;  %v5348_v35 = vand.u32 4294901760, %v5347_v1  ;;  %v12583_v1 = vsub.f32 %v5066_v53, %v12567_v2 }
 0xa25   : > { %5337 = vmatpush1.msra.mxu1 %v5336_v57  ;;  %v5353_v36 = vsub.f32 %v12531_v46, %v14857_v27  ;;  %v12565_v57 = vsub.f32 %v5070_v48, %v12547_v20  ;;  %5176 = vmatprep.subr.mxu0 %v12547_v20  ;;  %15274 = vst [vmem:[#allocation22_spill] sm:$0xff] %v12575_v40  ;;  %v5062_v27 = vld [vmem:[#allocation8 + $0x68] sm:$0xff] }
 0xa26   : > { %15272 = vst [vmem:[#allocation27_spill] sm:$0xff] %v12555_v61  ;;  %5343 = vmatprep.subr.mxu1 %v5342_v45  ;;  %v14870_v45 = vand.u32 4294901760, %v12555_v61  ;;  %5178 = vmatpush1.msra.mxu0 %v12557_v24  ;;  %v5365_v44 = vsub.f32 %v12545_v0, %v14865_v15  ;;  %15275 = vst [vmem:[#allocation23_spill] sm:$0xff] %v12583_v1  ;;  %v14881_v0 = vand.u32 4294901760, %v12583_v1  ;;  %v12596_v46 = vand.u32 4294901760, %v5062_v27 }
 0xa27   : > { %15273 = vst [vmem:[#allocation29_spill] sm:$0xff] %v12565_v57  ;;  %v5354_v48 = vand.u32 4294901760, %v5353_v36  ;;  %v14873_v12 = vand.u32 4294901760, %v12565_v57  ;;  %5180 = vmatprep.subr.mxu0 %v12567_v2  ;;  %5349 = vmatpush1.msra.mxu1 %v5348_v35  ;;  %v14876_v36 = vand.u32 4294901760, %v12575_v40 }
 0xa28   : > { %v5371_v54 = vsub.f32 %v12555_v61, %v14870_v45  ;;  %v5366_v15 = vand.u32 4294901760, %v5365_v44  ;;  %15277 = vst [vmem:[#allocation35_spill] sm:$0xff] %v12596_v46  ;;  %v12602_v61 = vsub.f32 %v5065_v11, %v12590_v58  ;;  %v5054_v44 = vld [vmem:[#allocation8 + $0x28] sm:$0xff]  ;;  %5182 = vmatpush1.msra.mxu0 %v12590_v58 }
 0xa29   : > { %5355 = vmatprep.subr.mxu1 %v5354_v48  ;;  %v5377_v53 = vsub.f32 %v12565_v57, %v14873_v12  ;;  %v5383_v45 = vsub.f32 %v12575_v40, %v14876_v36  ;;  %v12604_v48 = vand.u32 4294901760, %v5061_v39  ;;  %v5389_v57 = vsub.f32 %v12583_v1, %v14881_v0  ;;  %v5053_v36 = vld [vmem:[#allocation8 + $0x20] sm:$0xff]  ;;  %5184 = vmatprep.subr.mxu0 %v12596_v46 }
 0xa2a   : > { %5361 = vmatpush1.msra.mxu1 %v5360_v52  ;;  %v5372_v35 = vand.u32 4294901760, %v5371_v54  ;;  %15278 = vst [vmem:[#allocation36_spill] sm:$0xff] %v12602_v61  ;;  %v12611_v52 = vsub.f32 %v5062_v27, %v12596_v46  ;;  %v12613_v54 = vand.u32 4294901760, %v5058_v19  ;;  %v14886_v40 = vand.u32 4294901760, %v12602_v61 }
 0xa2b   : > { %15279 = vst [vmem:[#allocation37_spill] sm:$0xff] %v12604_v48  ;;  %5367 = vmatprep.subr.mxu1 %v5366_v15  ;;  %v5378_v12 = vand.u32 4294901760, %v5377_v53  ;;  %v5384_v11 = vand.u32 4294901760, %v5383_v45  ;;  %v12618_v58 = vsub.f32 %v5061_v39, %v12604_v48  ;;  %v12620_v15 = vand.u32 4294901760, %v5057_v25  ;;  %v5050_v53 = vld [vmem:[#allocation8 + $0x8] sm:$0xff]  ;;  %5186 = vmatpush1.msra.mxu0 %v12604_v48  ;;  %v5049_v45 = vld [vmem:[#allocation8] sm:$0xff] }
 0xa2c   : > { %15280 = vst [vmem:[#allocation38_spill] sm:$0xff] %v12611_v52  ;;  %15281 = vst [vmem:[#allocation25_spill] sm:$0xff] %v12613_v54  ;;  %5373 = vmatpush1.msra.mxu1 %v5372_v35  ;;  %v5390_v27 = vand.u32 4294901760, %v5389_v57  ;;  %v14893_v0 = vand.u32 4294901760, %v12611_v52  ;;  %v12625_v1 = vsub.f32 %v5058_v19, %v12613_v54  ;;  %v12627_v46 = vand.u32 4294901760, %v5054_v44  ;;  %5188 = vmatprep.subr.mxu0 %v12613_v54 }
 0xa2d   : > { %15282 = vst [vmem:[#allocation19_spill] sm:$0xff] %v12618_v58  ;;  %15283 = vst [vmem:[#allocation20_spill] sm:$0xff] %v12620_v15  ;;  %5379 = vmatprep.subr.mxu1 %v5378_v12  ;;  %v5395_v39 = vsub.f32 %v12602_v61, %v14886_v40  ;;  %v12635_v35 = vsub.f32 %v5057_v25, %v12620_v15  ;;  %v12637_v12 = vand.u32 4294901760, %v5053_v36  ;;  %5190 = vmatpush1.msra.mxu0 %v12620_v15 }
 0xa2e   : > { %15284 = vst [vmem:[#allocation21_spill] sm:$0xff] %v12625_v1  ;;  %5385 = vmatpush1.msra.mxu1 %v5384_v11  ;;  %v5401_v19 = vsub.f32 %v12611_v52, %v14893_v0  ;;  %v14900_v57 = vand.u32 4294901760, %v12625_v1  ;;  %v12645_v11 = vsub.f32 %v5054_v44, %v12627_v46  ;;  %v12647_v40 = vand.u32 4294901760, %v5050_v53  ;;  %5192 = vmatprep.subr.mxu0 %v12627_v46 }
 0xa2f   : > { %15285 = vst [vmem:[#allocation31_spill] sm:$0xff] %v12637_v12  ;;  %5391 = vmatprep.subr.mxu1 %v5390_v27  ;;  %v5396_v25 = vand.u32 4294901760, %v5395_v39  ;;  %v15286_v61 = vand.u32 4294901760, %v12618_v58  ;;  %v14906_v27 = vand.u32 4294901760, %v12635_v35  ;;  %v12655_v54 = vsub.f32 %v5053_v36, %v12637_v12  ;;  %5194 = vmatpush1.msra.mxu0 %v12637_v12 }
 0xa30   : > { %v5402_v0 = vand.u32 4294901760, %v5401_v19  ;;  %v5413_v44 = vsub.f32 %v12625_v1, %v14900_v57  ;;  %v14903_v52 = vand.u32 4294901760, %v12645_v11  ;;  %v12663_v39 = vsub.f32 %v5050_v53, %v12647_v40  ;;  %5196 = vmatprep.subr.mxu0 %v12647_v40 }
 0xa31   : > { %v5407_v15 = vsub.f32 %v12618_v58, %v15286_v61  ;;  %5397 = vmatpush1.msra.mxu1 %v5396_v25  ;;  %v5419_v36 = vsub.f32 %v12635_v35, %v14906_v27  ;;  %v14905_v58 = vand.u32 4294901760, %v12655_v54  ;;  %v12670_v19 = vand.u32 4294901760, %v5049_v45 }
 0xa32   : > { %5403 = vmatprep.subr.mxu1 %v5402_v0  ;;  %v5414_v12 = vand.u32 4294901760, %v5413_v44  ;;  %v5425_v57 = vsub.f32 %v12645_v11, %v14903_v52  ;;  %v14904_v53 = vand.u32 4294901760, %v12663_v39 }
 0xa33   : > { %v5408_v61 = vand.u32 4294901760, %v5407_v15  ;;  %v5420_v1 = vand.u32 4294901760, %v5419_v36  ;;  %v5431_v15 = vsub.f32 %v12655_v54, %v14905_v58  ;;  %v12680_v25 = vsub.f32 %v5049_v45, %v12670_v19  ;;  %5198 = vmatpush1.msra.mxu0 %v12670_v19 }
 0xa34   : > { %v5426_v0 = vand.u32 4294901760, %v5425_v57  ;;  %v5437_v44 = vsub.f32 %v12663_v39, %v14904_v53  ;;  %5495 = vmatprep.subr.mxu0 %v12373_v59 }
 0xa35   : > { %5409 = vmatpush1.msra.mxu1 %v5408_v61  ;;  %v5432_v61 = vand.u32 4294901760, %v5431_v15  ;;  %v14907_v36 = vand.u32 4294901760, %v12680_v25 }
 0xa36   : > { %5415 = vmatprep.subr.mxu1 %v5414_v12  ;;  %v5438_v52 = vand.u32 4294901760, %v5437_v44  ;;  %v9009_v44 = vld [vmem:[%s14742_s6] ss:$0 sm:$0xff] }
 0xa37   : > { %5421 = vmatpush1.msra.mxu1 %v5420_v1  ;;  %v5443_v45 = vsub.f32 %v12680_v25, %v14907_v36  ;;  %v15301_v36 = vld [vmem:[#allocation27_spill] sm:$0xff] }
 0xa38   : > { %5427 = vmatprep.subr.mxu1 %v5426_v0 }
 0xa39   : > { %5433 = vmatpush1.msra.mxu1 %v5432_v61  ;;  %v5444_v12 = vand.u32 4294901760, %v5443_v45 }
 0xa3a   : > { %5439 = vmatprep.subr.mxu1 %v5438_v52  ;;  %v9010_v52 = vld [vmem:[%s14743_s7] ss:$0 sm:$0xff] }
 0xa3b   : > { %5445 = vmatpush1.msra.mxu1 %v5444_v12 }
 0xa3c   : > { %5639 = vmatprep.subr.mxu1 %v12360_v51 }
 0xaa4   : > { %v5022_v57 = vpop.xlane.xlu0 %5021 }
 0xaa5   : > { %v5025_v53 = vmul.f32 0.0078125, %v5022_v57 }
 0xaa7   : > { %v5027_v58 = vadd.f32 1e-05, %v5025_v53 }
 0xaa8   : > { %v5024_v27 = vpop.xlane.xlu0 %5023 }
 0xaa9   : > { %10492 = vrsqrt.f32 %v5027_v58  ;;  %v5026_v1 = vmul.f32 0.0078125, %v5024_v27 }
 0xaab   : > { %v5028_v15 = vadd.f32 1e-05, %v5026_v1 }
 0xaad   : > { %10494 = vrsqrt.f32 %v5028_v15 }
 0xab6   : > { %v10493_v0 = vpop.eup %10492 }
 0xab7   : > { %v5031_v61 = vmul.f32 %v10493_v0, %v12431_v6 }
 0xab9   : > { %v5039_v45 = vmul.f32 %v9009_v44, %v5031_v61 }
 0xaba   : > { %v10495_v12 = vpop.eup %10494 }
 0xabb   : > { %v5047_v57 = vadd.f32 %v9010_v52, %v5039_v45  ;;  %v5032_v53 = vmul.f32 %v10495_v12, %v12434_v8 }
 0xabd   : > { %v12700_v58 = vand.u32 4294901760, %v5047_v57  ;;  %v5040_v27 = vmul.f32 %v9009_v44, %v5032_v53  ;;  %v15296_v53 = vld [vmem:[#allocation28_spill] sm:$0xff] }
 0xabf   : > { %15287 = vst [vmem:[#allocation33_spill] sm:$0xff] %v12700_v58  ;;  %v5048_v1 = vadd.f32 %v9010_v52, %v5040_v27  ;;  %5480 = vmatmul.mubr.f32.vlgmr.msra.gmra.mxu1 %v12700_v58  ;;  %v12704_v15 = vsub.f32 %v5047_v57, %v12700_v58  ;;  %v15295_v57 = vld [vmem:[#allocation34_spill] sm:$0xff]  ;;  %v15297_v27 = vld [vmem:[#allocation35_spill] sm:$0xff] }
 0xac0   : > { %5641 = vmatpush1.msra.mxu1 %v12362_v47  ;;  %5485 = vmatprep.mubr.f32.mxu1 %v15265_v49  ;;  %v15305_v58 = vld [vmem:[#allocation31_spill] sm:$0xff] }
 0xac1   : > { %15288 = vst [vmem:[#allocation39_spill] sm:$0xff] %v12704_v15  ;;  %v12708_v6 = vand.u32 4294901760, %v5048_v1  ;;  %5643 = vmatprep.subr.mxu1 %v12364_v7  ;;  %v12712_v0 = vand.u32 4294901760, %v12704_v15 }
 0xac2   : > { %5645 = vmatpush1.msra.mxu1 %v12366_v30 }
 0xac3   : > { %15289 = vst [vmem:[#allocation40_spill] sm:$0xff] %v12708_v6  ;;  %15290 = vst [vmem:[#allocation41_spill] sm:$0xff] %v12712_v0  ;;  %5647 = vmatprep.subr.mxu1 %v12368_v9  ;;  %5487 = vmatmul.mubr.f32.gmra.mxu1 %v12708_v6  ;;  %v5235_v8 = vsub.f32 %v12704_v15, %v12712_v0  ;;  %v12720_v44 = vsub.f32 %v5048_v1, %v12708_v6  ;;  %v15298_v1 = vld [vmem:[#allocation30_spill] sm:$0xff] }
 0xac4   : > { %5649 = vmatpush1.msra.mxu1 %v12370_v38  ;;  %5734 = vmatprep.mubr.f32.mxu1 %v15265_v49  ;;  %v15304_v6 = vld [vmem:[#allocation22_spill] sm:$0xff] }
 0xac5   : > { %15291 = vst [vmem:[#allocation42_spill] sm:$0xff] %v12720_v44  ;;  %5651 = vmatprep.subr.mxu1 %v12381_v3  ;;  %v12725_v61 = vand.u32 4294901760, %v5235_v8  ;;  %v12728_v52 = vand.u32 4294901760, %v12720_v44  ;;  %v15299_v8 = vld [vmem:[#allocation32_spill] sm:$0xff] }
 0xac6   : > { %5653 = vmatpush1.msra.mxu1 %v12438_v17 }
 0xac7   : > { %15292 = vst [vmem:[#allocation43_spill] sm:$0xff] %v12725_v61  ;;  %15293 = vst [vmem:[#allocation44_spill] sm:$0xff] %v12728_v52  ;;  %5655 = vmatprep.subr.mxu1 %v12442_v4  ;;  %5237 = vmatmul.mubr.f32.vlgmr.msra.gmra.mxu0 %v12725_v61  ;;  %v5246_v45 = vsub.f32 %v12720_v44, %v12728_v52  ;;  %v15303_v61 = vld [vmem:[#allocation29_spill] sm:$0xff] }
 0xac8   : > { %5498 = vmatpush1.msra.mxu0 %v12376_v22  ;;  %5657 = vmatpush1.msra.mxu1 %v12447_v32 }
 0xac9   : > { %5501 = vmatprep.subr.mxu0 %v12379_v28  ;;  %5659 = vmatprep.subr.mxu1 %v12453_v29  ;;  %v12739_v12 = vand.u32 4294901760, %v5246_v45  ;;  %v15300_v45 = vld [vmem:[#allocation25_spill] sm:$0xff] }
 0xaca   : > { %5504 = vmatpush1.msra.mxu0 %v12385_v55  ;;  %5661 = vmatpush1.msra.mxu1 %v12460_v42 }
 0xacb   : > { %15294 = vst [vmem:[#allocation45_spill] sm:$0xff] %v12739_v12  ;;  %5242 = vmatprep.mubr.f32.mxu0 %v15265_v49  ;;  %5507 = vmatprep.subr.mxu0 %v12388_v23 }
 0xacc   : > { %5663 = vmatprep.subr.mxu1 %v12467_v14  ;;  %5248 = vmatmul.mubr.f32.gmra.mxu0 %v12739_v12  ;;  %v15302_v12 = vld [vmem:[#allocation20_spill] sm:$0xff] }
 0xacd   : > { %5510 = vmatpush1.msra.mxu0 %v12391_v26  ;;  %5665 = vmatpush1.msra.mxu1 %v12477_v62 }
 0xace   : > { %5513 = vmatprep.subr.mxu0 %v12398_v60  ;;  %5667 = vmatprep.subr.mxu1 %v12487_v21 }
 0xacf   : > { %5516 = vmatpush1.msra.mxu0 %v12445_v37  ;;  %5669 = vmatpush1.msra.mxu1 %v12510_v10 }
 0xad0   : > { %5519 = vmatprep.subr.mxu0 %v12451_v43  ;;  %5671 = vmatprep.subr.mxu1 %v12516_v56 }
 0xad1   : > { %5522 = vmatpush1.msra.mxu0 %v12458_v50  ;;  %5673 = vmatpush1.msra.mxu1 %v12524_v63 }
 0xad2   : > { %5525 = vmatprep.subr.mxu0 %v12465_v16  ;;  %5675 = vmatprep.subr.mxu1 %v12533_v34 }
 0xad3   : > { %5528 = vmatpush1.msra.mxu0 %v12475_v5  ;;  %5677 = vmatpush1.msra.mxu1 %v12540_v41 }
 0xad4   : > { %5531 = vmatprep.subr.mxu0 %v12485_v18  ;;  %5679 = vmatprep.subr.mxu1 %v12547_v20 }
 0xad5   : > { %5534 = vmatpush1.msra.mxu0 %v12495_v33  ;;  %5681 = vmatpush1.msra.mxu1 %v12557_v24 }
 0xad6   : > { %5537 = vmatprep.subr.mxu0 %v12503_v13  ;;  %5683 = vmatprep.subr.mxu1 %v12567_v2 }
 0xad7   : > { %5540 = vmatpush1.msra.mxu0 %v12522_v31  ;;  %5685 = vmatpush1.msra.mxu1 %v15295_v57 }
 0xad8   : > { %5543 = vmatprep.subr.mxu0 %v15296_v53  ;;  %5687 = vmatprep.subr.mxu1 %v15297_v27  ;;  %v15306_v27 = vld [vmem:[#allocation23_spill] sm:$0xff] }
 0xad9   : > { %5546 = vmatpush1.msra.mxu0 %v15298_v1  ;;  %5689 = vmatpush1.msra.mxu1 %v12604_v48  ;;  %v15307_v48 = vld [vmem:[#allocation36_spill] sm:$0xff] }
 0xada   : > { %5549 = vmatprep.subr.mxu0 %v15299_v8  ;;  %5691 = vmatprep.subr.mxu1 %v15300_v45  ;;  %v15308_v45 = vld [vmem:[#allocation38_spill] sm:$0xff] }
 0xadb   : > { %5552 = vmatpush1.msra.mxu0 %v15301_v36  ;;  %5693 = vmatpush1.msra.mxu1 %v15302_v12 }
 0xadc   : > { %5555 = vmatprep.subr.mxu0 %v15303_v61  ;;  %5695 = vmatprep.subr.mxu1 %v12627_v46  ;;  %v15309_v61 = vld [vmem:[#allocation19_spill] sm:$0xff] }
 0xadd   : > { %5558 = vmatpush1.msra.mxu0 %v15304_v6  ;;  %5697 = vmatpush1.msra.mxu1 %v15305_v58  ;;  %v15310_v6 = vld [vmem:[#allocation21_spill] sm:$0xff] }
 0xade   : > { %5561 = vmatprep.subr.mxu0 %v15306_v27  ;;  %5699 = vmatprep.subr.mxu1 %v12647_v40 }
 0xadf   : > { %5564 = vmatpush1.msra.mxu0 %v15307_v48  ;;  %5701 = vmatpush1.msra.mxu1 %v12670_v19 }
 0xae0   : > { %5567 = vmatprep.subr.mxu0 %v15308_v45  ;;  %5738 = vmatmul.mubr.f32.vlgmr.msra.gmra.mxu1 %v12712_v0  ;;  %v5071_v0 = vld [vmem:[#allocation8 + $0xb0] sm:$0xff] }
 0xae1   : > { %5929 = vmatprep.subr.mxu1 %v12360_v51  ;;  %5570 = vmatpush1.msra.mxu0 %v15309_v61  ;;  %v15311_v51 = vand.u32 4294901760, %v12373_v59  ;;  %v15315_v59 = vand.u32 4294901760, %v12388_v23  ;;  %v15318_v23 = vand.u32 4294901760, %v12445_v37 }
 0xae2   : > { %5931 = vmatpush1.msra.mxu1 %v12362_v47  ;;  %5573 = vmatprep.subr.mxu0 %v15310_v6  ;;  %v15312_v47 = vand.u32 4294901760, %v12376_v22 }
 0xae3   : > { %5933 = vmatprep.subr.mxu1 %v12364_v7  ;;  %5576 = vmatpush1.msra.mxu0 %v12635_v35  ;;  %v15313_v7 = vand.u32 4294901760, %v12379_v28  ;;  %v5108_v28 = vld [vmem:[#allocation8 + $0x1d8] sm:$0xff] }
 0xae4   : > { %5743 = vmatprep.mubr.f32.mxu1 %v15265_v49  ;;  %5935 = vmatpush1.msra.mxu1 %v12366_v30  ;;  %v5112_v30 = vld [vmem:[#allocation8 + $0x1f8] sm:$0xff] }
 0xae5   : > { %5579 = vmatprep.subr.mxu0 %v12645_v11  ;;  %5747 = vmatmul.mubr.f32.gmra.mxu1 %v12728_v52  ;;  %v12822_v22 = vand.u32 4294901760, %v5112_v30 }
 0xae6   : > { %5937 = vmatprep.subr.mxu1 %v12368_v9  ;;  %5582 = vmatpush1.msra.mxu0 %v12655_v54  ;;  %v15314_v9 = vand.u32 4294901760, %v12385_v55  ;;  %v15317_v55 = vand.u32 4294901760, %v12398_v60 }
 0xae7   : > { %5939 = vmatpush1.msra.mxu1 %v12370_v38  ;;  %5585 = vmatprep.subr.mxu0 %v12663_v39  ;;  %v5111_v38 = vld [vmem:[#allocation8 + $0x1f0] sm:$0xff] }
 0xae8   : > { %5941 = vmatprep.subr.mxu1 %v12381_v3  ;;  %5588 = vmatpush1.msra.mxu0 %v12680_v25  ;;  %v15316_v3 = vand.u32 4294901760, %v12391_v26  ;;  %v15319_v26 = vand.u32 4294901760, %v12451_v43 }
 0xae9   : > { %5621 = vmatprep.mubr.f32.mxu0 %v15265_v49  ;;  %5943 = vmatpush1.msra.mxu1 %v12438_v17  ;;  %v5107_v17 = vld [vmem:[#allocation8 + $0x1d0] sm:$0xff] }
 0xaea   : > { %5624 = vmatmul.mubr.f32.vlgmr.msra.gmra.mxu0 %v12704_v15  ;;  %5756 = vmatprep.subr.mxu0 %v15311_v51  ;;  %v12843_v60 = vand.u32 4294901760, %v5107_v17  ;;  %v5099_v51 = vld [vmem:[#allocation8 + $0x190] sm:$0xff]  ;;  %v15361_v15 = vand.u32 4294901760, %v15309_v61 }
 0xaeb   : > { %5945 = vmatprep.subr.mxu1 %v12442_v4  ;;  %5760 = vmatpush1.msra.mxu0 %v15312_v47  ;;  %v12830_v4 = vand.u32 4294901760, %v5111_v38 }
 0xaec   : > { %5947 = vmatpush1.msra.mxu1 %v12447_v32  ;;  %5764 = vmatprep.subr.mxu0 %v15313_v7  ;;  %v5104_v32 = vld [vmem:[#allocation8 + $0x1b8] sm:$0xff] }
 0xaed   : > { %5949 = vmatprep.subr.mxu1 %v12453_v29  ;;  %5629 = vmatprep.mubr.f32.mxu0 %v15265_v49  ;;  %v12835_v29 = vand.u32 4294901760, %v5108_v28  ;;  %v12848_v37 = vand.u32 4294901760, %v5104_v32  ;;  %v12854_v43 = vsub.f32 %v5111_v38, %v12830_v4  ;;  %v5096_v7 = vld [vmem:[#allocation8 + $0x178] sm:$0xff]  ;;  %v12871_v38 = vsub.f32 %v5107_v17, %v12843_v60 }
 0xaee   : > { %5768 = vmatpush1.msra.mxu0 %v15314_v9  ;;  %5951 = vmatpush1.msra.mxu1 %v12460_v42  ;;  %v5103_v42 = vld [vmem:[#allocation8 + $0x1b0] sm:$0xff] }
 0xaef   : > { %5632 = vmatmul.mubr.f32.gmra.mxu0 %v12720_v44  ;;  %5772 = vmatprep.subr.mxu0 %v15315_v59  ;;  %15323 = vst [vmem:[#allocation28_spill] sm:$0xff] %v12854_v43  ;;  %v12856_v47 = vand.u32 4294901760, %v5103_v42  ;;  %15327 = vst [vmem:[#allocation32_spill] sm:$0xff] %v12871_v38  ;;  %v15328_v59 = vand.u32 4294901760, %v12495_v33  ;;  %v14916_v17 = vand.u32 4294901760, %v12854_v43  ;;  %v5088_v33 = vld [vmem:[#allocation8 + $0x138] sm:$0xff] }
 0xaf0   : > { %5953 = vmatprep.subr.mxu1 %v12467_v14  ;;  %5776 = vmatpush1.msra.mxu0 %v15316_v3  ;;  %v12841_v14 = vsub.f32 %v5112_v30, %v12822_v22  ;;  %v15330_v3 = vand.u32 4294901760, %v12503_v13 }
 0xaf1   : > { %5955 = vmatpush1.msra.mxu1 %v12477_v62  ;;  %5780 = vmatprep.subr.mxu0 %v15317_v55  ;;  %v5100_v62 = vld [vmem:[#allocation8 + $0x198] sm:$0xff]  ;;  %v12888_v55 = vsub.f32 %v5103_v42, %v12856_v47  ;;  %v15334_v42 = vand.u32 4294901760, %v15296_v53 }
 0xaf2   : > { %5957 = vmatprep.subr.mxu1 %v12487_v21  ;;  %5784 = vmatpush1.msra.mxu0 %v15318_v23  ;;  %15320 = vst [vmem:[#allocation34_spill] sm:$0xff] %v12841_v14  ;;  %v15321_v21 = vand.u32 4294901760, %v12458_v50  ;;  %v12862_v50 = vsub.f32 %v5108_v28, %v12835_v29  ;;  %v12864_v30 = vand.u32 4294901760, %v5100_v62  ;;  %v14915_v9 = vand.u32 4294901760, %v12841_v14 }
 0xaf3   : > { %5959 = vmatpush1.msra.mxu1 %v12510_v10  ;;  %5788 = vmatprep.subr.mxu0 %v15319_v26  ;;  %v15322_v10 = vand.u32 4294901760, %v12465_v16  ;;  %v15326_v16 = vand.u32 4294901760, %v12485_v18  ;;  %v12879_v28 = vsub.f32 %v5104_v32, %v12848_v37  ;;  %v5091_v18 = vld [vmem:[#allocation8 + $0x150] sm:$0xff]  ;;  %15331 = vst [vmem:[#allocation20_spill] sm:$0xff] %v12888_v55  ;;  %v15332_v32 = vand.u32 4294901760, %v12522_v31 }
 0xaf4   : > { %5961 = vmatprep.subr.mxu1 %v12516_v56  ;;  %5792 = vmatpush1.msra.mxu0 %v15321_v21  ;;  %v15324_v56 = vand.u32 4294901760, %v12475_v5  ;;  %15325 = vst [vmem:[#allocation30_spill] sm:$0xff] %v12862_v50  ;;  %v5092_v5 = vld [vmem:[#allocation8 + $0x158] sm:$0xff]  ;;  %v14917_v23 = vand.u32 4294901760, %v12862_v50  ;;  %v5087_v26 = vld [vmem:[#allocation8 + $0x130] sm:$0xff]  ;;  %v14918_v31 = vand.u32 4294901760, %v12871_v38 }
 0xaf5   : > { %5963 = vmatpush1.msra.mxu1 %v12524_v63  ;;  %5796 = vmatprep.subr.mxu0 %v15322_v10  ;;  %v5095_v63 = vld [vmem:[#allocation8 + $0x170] sm:$0xff]  ;;  %15329 = vst [vmem:[#allocation27_spill] sm:$0xff] %v12879_v28  ;;  %v12899_v13 = vand.u32 4294901760, %v5092_v5  ;;  %v5084_v10 = vld [vmem:[#allocation8 + $0x118] sm:$0xff]  ;;  %v14919_v53 = vand.u32 4294901760, %v12879_v28 }
 0xaf6   : > { %5965 = vmatprep.subr.mxu1 %v12533_v34  ;;  %5800 = vmatpush1.msra.mxu0 %v15324_v56  ;;  %v12873_v34 = vand.u32 4294901760, %v5099_v51  ;;  %v15336_v56 = vld [vmem:[#allocation35_spill] sm:$0xff] }
 0xaf7   : > { %5967 = vmatpush1.msra.mxu1 %v12540_v41  ;;  %5804 = vmatprep.subr.mxu0 %v15326_v16  ;;  %v12881_v41 = vand.u32 4294901760, %v5096_v7 }
 0xaf8   : > { %5969 = vmatprep.subr.mxu1 %v12547_v20  ;;  %5808 = vmatpush1.msra.mxu0 %v15328_v59  ;;  %v12890_v20 = vand.u32 4294901760, %v5095_v63  ;;  %v12911_v21 = vsub.f32 %v5099_v51, %v12873_v34  ;;  %v12922_v59 = vand.u32 4294901760, %v5088_v33  ;;  %v15340_v51 = vand.u32 4294901760, %v15299_v8 }
 0xaf9   : > { %5971 = vmatpush1.msra.mxu1 %v12557_v24  ;;  %5812 = vmatprep.subr.mxu0 %v15330_v3  ;;  %v12897_v24 = vsub.f32 %v5100_v62, %v12864_v30  ;;  %v12913_v62 = vand.u32 4294901760, %v5091_v18  ;;  %v12920_v16 = vsub.f32 %v5096_v7, %v12881_v41  ;;  %v15339_v3 = vld [vmem:[#allocation37_spill] sm:$0xff]  ;;  %v5083_v7 = vld [vmem:[#allocation8 + $0x110] sm:$0xff]  ;;  %v6173_v8 = vsub.f32 %v12862_v50, %v14917_v23 }
 0xafa   : > { %5973 = vmatprep.subr.mxu1 %v12567_v2  ;;  %5816 = vmatpush1.msra.mxu0 %v15332_v32  ;;  %v12907_v2 = vsub.f32 %v12841_v14, %v14915_v9  ;;  %15335 = vst [vmem:[#allocation23_spill] sm:$0xff] %v12911_v21  ;;  %v6167_v32 = vsub.f32 %v12854_v43, %v14916_v17  ;;  %v15343_v9 = vand.u32 4294901760, %v15301_v36  ;;  %v12946_v17 = vand.u32 4294901760, %v5084_v10 }
 0xafb   : > { %15333 = vst [vmem:[#allocation31_spill] sm:$0xff] %v12897_v24  ;;  %5975 = vmatpush1.msra.mxu1 %v15295_v57  ;;  %5820 = vmatprep.subr.mxu0 %v15334_v42  ;;  %v15337_v57 = vand.u32 4294901760, %v15298_v1  ;;  %15338 = vst [vmem:[#allocation36_spill] sm:$0xff] %v12920_v16  ;;  %v12932_v1 = vsub.f32 %v5095_v63, %v12890_v20  ;;  %v15345_v63 = vld [vmem:[#allocation29_spill] sm:$0xff]  ;;  %v6179_v36 = vsub.f32 %v12871_v38, %v14918_v31 }
 0xafc   : > { %5977 = vmatprep.subr.mxu1 %v15336_v56  ;;  %v12934_v56 = vand.u32 4294901760, %v5087_v26  ;;  %v15346_v42 = vand.u32 4294901760, %v15345_v63  ;;  %v12957_v23 = vsub.f32 %v5091_v18, %v12913_v62  ;;  %v12971_v63 = vand.u32 4294901760, %v5083_v7  ;;  %v5080_v31 = vld [vmem:[#allocation8 + $0xf8] sm:$0xff]  ;;  %6024 = vmatprep.mubr.f32.mxu1 %v15265_v49 }
 0xafd   : > { %5824 = vmatpush1.msra.mxu0 %v15337_v57  ;;  %5979 = vmatpush1.msra.mxu1 %v15339_v3  ;;  %15341 = vst [vmem:[#allocation38_spill] sm:$0xff] %v12932_v1  ;;  %v15342_v57 = vld [vmem:[#allocation25_spill] sm:$0xff]  ;;  %v6168_v18 = vand.u32 4294901760, %v6167_v32 }
 0xafe   : > { %5828 = vmatprep.subr.mxu0 %v15340_v51  ;;  %5981 = vmatprep.subr.mxu1 %v15342_v57  ;;  %v12944_v51 = vsub.f32 %v5092_v5, %v12899_v13  ;;  %v6162_v57 = vand.u32 4294901760, %v12907_v2  ;;  %15347 = vst [vmem:[#allocation21_spill] sm:$0xff] %v12957_v23  ;;  %v15348_v5 = vld [vmem:[#allocation22_spill] sm:$0xff]  ;;  %v12983_v2 = vsub.f32 %v5087_v26, %v12934_v56  ;;  %v5075_v26 = vld [vmem:[#allocation8 + $0xd0] sm:$0xff] }
 0xaff   : > { %5832 = vmatpush1.msra.mxu0 %v15343_v9  ;;  %5983 = vmatpush1.msra.mxu1 %v15302_v12  ;;  %v14920_v9 = vand.u32 4294901760, %v12911_v21  ;;  %v15349_v3 = vand.u32 4294901760, %v15348_v5  ;;  %v12965_v12 = vsub.f32 %v12879_v28, %v14919_v53  ;;  %v5079_v53 = vld [vmem:[#allocation8 + $0xf0] sm:$0xff]  ;;  %v13018_v44 = vsub.f32 %v5083_v7, %v12971_v63 }
 0xb00   : > { %15344 = vst [vmem:[#allocation19_spill] sm:$0xff] %v12944_v51  ;;  %5836 = vmatprep.subr.mxu0 %v15346_v42  ;;  %5985 = vmatprep.subr.mxu1 %v12627_v46  ;;  %v12969_v42 = vsub.f32 %v5088_v33, %v12922_v59  ;;  %v15351_v46 = vand.u32 4294901760, %v15306_v27  ;;  %15353 = vst [vmem:[#allocation37_spill] sm:$0xff] %v12983_v2  ;;  %v15354_v33 = vand.u32 4294901760, %v15307_v48  ;;  %v15355_v27 = vand.u32 4294901760, %v12897_v24 }
 0xb01   : > { %5840 = vmatpush1.msra.mxu0 %v15349_v3  ;;  %5987 = vmatpush1.msra.mxu1 %v15305_v58  ;;  %v15352_v3 = vand.u32 4294901760, %v12888_v55  ;;  %v6174_v58 = vand.u32 4294901760, %v6173_v8  ;;  %v13002_v48 = vsub.f32 %v12911_v21, %v14920_v9  ;;  %v13005_v8 = vand.u32 4294901760, %v5080_v31  ;;  %15360 = vst [vmem:[#allocation29_spill] sm:$0xff] %v13018_v44  ;;  %v5072_v9 = vld [vmem:[#allocation8 + $0xb8] sm:$0xff] }
 0xb02   : > { %15350 = vst [vmem:[#allocation35_spill] sm:$0xff] %v12969_v42  ;;  %5844 = vmatprep.subr.mxu0 %v15351_v46  ;;  %5989 = vmatprep.subr.mxu1 %v12647_v40  ;;  %v12991_v32 = vsub.f32 %v12897_v24, %v15355_v27  ;;  %v6180_v40 = vand.u32 4294901760, %v6179_v36  ;;  %v15357_v27 = vand.u32 4294901760, %v15308_v45  ;;  %v15359_v46 = vand.u32 4294901760, %v12920_v16 }
 0xb03   : > { %v12979_v5 = vsub.f32 %v12888_v55, %v15352_v3  ;;  %5848 = vmatpush1.msra.mxu0 %v15354_v33  ;;  %v12995_v3 = vsub.f32 %v5084_v10, %v12946_v17  ;;  %5991 = vmatpush1.msra.mxu1 %v12670_v19  ;;  %v5076_v33 = vld [vmem:[#allocation8 + $0xd8] sm:$0xff]  ;;  %v6186_v19 = vand.u32 4294901760, %v12965_v12  ;;  %v13029_v52 = vand.u32 4294901760, %v5079_v53 }
 0xb04   : > { %5852 = vmatprep.subr.mxu0 %v15357_v27  ;;  %v15358_v10 = vld [vmem:[#allocation33_spill] sm:$0xff]  ;;  %v13014_v36 = vsub.f32 %v12920_v16, %v15359_v46  ;;  %6163 = vmatprep.subr.mxu1 %v6162_v57  ;;  %v15362_v27 = vand.u32 4294901760, %v12932_v1  ;;  %v15363_v7 = vand.u32 4294901760, %v15310_v6  ;;  %v6198_v57 = vand.u32 4294901760, %v12991_v32 }
 0xb05   : > { %15356 = vst [vmem:[#allocation25_spill] sm:$0xff] %v12995_v3  ;;  %6026 = vmatmul.mubr.f32.vlgmr.msra.gmra.mxu1 %v15358_v10  ;;  %5856 = vmatpush1.msra.mxu0 %v15361_v15  ;;  %v6192_v45 = vand.u32 4294901760, %v12979_v5  ;;  %v15364_v15 = vand.u32 4294901760, %v12944_v51  ;;  %v15365_v46 = vand.u32 4294901760, %v12635_v35  ;;  %v15366_v6 = vand.u32 4294901760, %v12957_v23  ;;  %v5068_v5 = vld [vmem:[#allocation8 + $0x98] sm:$0xff] }
 0xb06   : > { %v13026_v12 = vsub.f32 %v12932_v1, %v15362_v27  ;;  %6169 = vmatpush1.msra.mxu1 %v6168_v18  ;;  %5860 = vmatprep.subr.mxu0 %v15363_v7  ;;  %v13040_v27 = vand.u32 4294901760, %v5076_v33  ;;  %v6204_v18 = vand.u32 4294901760, %v13002_v48  ;;  %v13051_v7 = vsub.f32 %v5080_v31, %v13005_v8 }
 0xb07   : > { %v13037_v61 = vsub.f32 %v12944_v51, %v15364_v15  ;;  %6175 = vmatprep.subr.mxu1 %v6174_v58  ;;  %5864 = vmatpush1.msra.mxu0 %v15365_v46  ;;  %v13048_v32 = vsub.f32 %v12957_v23, %v15366_v6  ;;  %v13053_v15 = vand.u32 4294901760, %v5075_v26  ;;  %v6210_v58 = vand.u32 4294901760, %v13014_v36  ;;  %v5067_v23 = vld [vmem:[#allocation8 + $0x90] sm:$0xff]  ;;  %v5064_v46 = vld [vmem:[#allocation8 + $0x78] sm:$0xff] }
 0xb08   : > { %15367 = vst [vmem:[#allocation22_spill] sm:$0xff] %v13051_v7  ;;  %6031 = vmatprep.mubr.f32.mxu1 %v15265_v49  ;;  %6181 = vmatpush1.msra.mxu1 %v6180_v40  ;;  %v15368_v35 = vand.u32 4294901760, %v12969_v42  ;;  %v13063_v6 = vand.u32 4294901760, %v5072_v9  ;;  %v15370_v31 = vand.u32 4294901760, %v12645_v11  ;;  %v15371_v51 = vld [vmem:[#allocation40_spill] sm:$0xff]  ;;  %v6216_v1 = vand.u32 4294901760, %v13026_v12 }
 0xb09   : > { %6033 = vmatmul.mubr.f32.gmra.mxu1 %v15371_v51  ;;  %v15372_v40 = vand.u32 4294901760, %v12983_v2  ;;  %6187 = vmatprep.subr.mxu1 %v6186_v19  ;;  %v15374_v16 = vand.u32 4294901760, %v12655_v54  ;;  %v6222_v11 = vand.u32 4294901760, %v13037_v61  ;;  %v15377_v21 = vand.u32 4294901760, %v12663_v39 }
 0xb0a   : > { %v13060_v48 = vsub.f32 %v12969_v42, %v15368_v35  ;;  %15369 = vst [vmem:[#allocation46_spill] sm:$0xff] %v13063_v6  ;;  %5868 = vmatprep.subr.mxu0 %v15370_v31  ;;  %v13075_v35 = vsub.f32 %v5079_v53, %v13029_v52  ;;  %v13077_v42 = vand.u32 4294901760, %v5071_v0  ;;  %v15375_v31 = vand.u32 4294901760, %v12995_v3  ;;  %v5063_v53 = vld [vmem:[#allocation8 + $0x70] sm:$0xff]  ;;  %6193 = vmatpush1.msra.mxu1 %v6192_v45 }
 0xb0b   : > { %v13072_v36 = vsub.f32 %v12983_v2, %v15372_v40  ;;  %5872 = vmatpush1.msra.mxu0 %v15374_v16  ;;  %v13088_v40 = vsub.f32 %v5076_v33, %v13040_v27  ;;  %v13090_v2 = vand.u32 4294901760, %v5068_v5  ;;  %v6228_v54 = vand.u32 4294901760, %v13048_v32  ;;  %6199 = vmatprep.subr.mxu1 %v6198_v57  ;;  %v5052_v16 = vld [vmem:[#allocation8 + $0x18] sm:$0xff] }
 0xb0c   : > { %15373 = vst [vmem:[#allocation47_spill] sm:$0xff] %v13075_v35  ;;  %v13085_v12 = vsub.f32 %v12995_v3, %v15375_v31  ;;  %5876 = vmatprep.subr.mxu0 %v15377_v21  ;;  %v13097_v19 = vsub.f32 %v5075_v26, %v13053_v15  ;;  %v13099_v61 = vand.u32 4294901760, %v5067_v23  ;;  %v5060_v31 = vld [vmem:[#allocation8 + $0x58] sm:$0xff]  ;;  %v15378_v33 = vand.u32 4294901760, %v12680_v25  ;;  %v5059_v26 = vld [vmem:[#allocation8 + $0x50] sm:$0xff]  ;;  %5913 = vmatprep.mubr.f32.mxu0 %v15265_v49 }
 0xb0d   : > { %15376 = vst [vmem:[#allocation48_spill] sm:$0xff] %v13088_v40  ;;  %v6234_v3 = vand.u32 4294901760, %v13060_v48  ;;  %v15379_v45 = vand.u32 4294901760, %v13018_v44  ;;  %v13110_v21 = vsub.f32 %v5072_v9, %v13063_v6  ;;  %v13112_v32 = vand.u32 4294901760, %v5064_v46  ;;  %6205 = vmatpush1.msra.mxu1 %v6204_v18  ;;  %v5055_v25 = vld [vmem:[#allocation8 + $0x30] sm:$0xff]  ;;  %6382 = vmatprep.mubr.f32.mxu1 %v15265_v49 }
 0xb0e   : > { %5880 = vmatpush1.msra.mxu0 %v15378_v33  ;;  %v6240_v57 = vand.u32 4294901760, %v13072_v36  ;;  %v13118_v48 = vsub.f32 %v5071_v0, %v13077_v42  ;;  %v13120_v33 = vand.u32 4294901760, %v5063_v53  ;;  %v6246_v9 = vand.u32 4294901760, %v13085_v12  ;;  %6211 = vmatprep.subr.mxu1 %v6210_v58 }
 0xb0f   : > { %v13107_v39 = vsub.f32 %v13018_v44, %v15379_v45  ;;  %v5056_v45 = vld [vmem:[#allocation8 + $0x38] sm:$0xff]  ;;  %5915 = vmatmul.mubr.f32.vlgmr.msra.gmra.mxu0 %v15358_v10  ;;  %6040 = vmatprep.subr.mxu0 %v12822_v22  ;;  %v13127_v18 = vsub.f32 %v5068_v5, %v13090_v2  ;;  %v13129_v36 = vand.u32 4294901760, %v5060_v31  ;;  %v15380_v0 = vand.u32 4294901760, %v13051_v7 }
 0xb10   : > { %6042 = vmatpush1.msra.mxu0 %v12830_v4  ;;  %v13137_v55 = vsub.f32 %v5067_v23, %v13099_v61  ;;  %v13139_v12 = vand.u32 4294901760, %v5059_v26  ;;  %6217 = vmatpush1.msra.mxu1 %v6216_v1  ;;  %v13145_v28 = vsub.f32 %v5064_v46, %v13112_v32  ;;  %v13147_v38 = vand.u32 4294901760, %v5056_v45 }
 0xb11   : > { %v6257_v44 = vsub.f32 %v13051_v7, %v15380_v0  ;;  %6044 = vmatprep.subr.mxu0 %v12835_v29  ;;  %v6252_v5 = vand.u32 4294901760, %v13107_v39  ;;  %v5051_v0 = vld [vmem:[#allocation8 + $0x10] sm:$0xff]  ;;  %6223 = vmatprep.subr.mxu1 %v6222_v11  ;;  %v15383_v23 = vand.u32 4294901760, %v13075_v35  ;;  %v13155_v7 = vsub.f32 %v5063_v53, %v13120_v33 }
 0xb12   : > { %15381 = vst [vmem:[#allocation49_spill] sm:$0xff] %v13139_v12  ;;  %15382 = vst [vmem:[#allocation50_spill] sm:$0xff] %v13145_v28  ;;  %5920 = vmatprep.mubr.f32.mxu0 %v15265_v49  ;;  %v13157_v39 = vand.u32 4294901760, %v5055_v25  ;;  %6046 = vmatpush1.msra.mxu0 %v12843_v60  ;;  %v15384_v46 = vand.u32 4294901760, %v13088_v40  ;;  %v13165_v50 = vsub.f32 %v5060_v31, %v13129_v36  ;;  %v15385_v53 = vand.u32 4294901760, %v13097_v19 }
 0xb13   : > { %v6263_v24 = vsub.f32 %v13075_v35, %v15383_v23  ;;  %6229 = vmatpush1.msra.mxu1 %v6228_v54  ;;  %v13167_v23 = vand.u32 4294901760, %v5052_v16  ;;  %5922 = vmatmul.mubr.f32.gmra.mxu0 %v15371_v51  ;;  %v13176_v35 = vsub.f32 %v5059_v26, %v13139_v12  ;;  %v6258_v31 = vand.u32 4294901760, %v6257_v44 }
 0xb14   : > { %v6269_v11 = vsub.f32 %v13088_v40, %v15384_v46  ;;  %6048 = vmatprep.subr.mxu0 %v12848_v37  ;;  %v6275_v1 = vsub.f32 %v13097_v19, %v15385_v53  ;;  %v13178_v46 = vand.u32 4294901760, %v5051_v0  ;;  %6235 = vmatprep.subr.mxu1 %v6234_v3  ;;  %v15386_v58 = vand.u32 4294901760, %v13110_v21 }
 0xb15   : > { %6050 = vmatpush1.msra.mxu0 %v12856_v47  ;;  %v13186_v14 = vsub.f32 %v5056_v45, %v13147_v38  ;;  %6241 = vmatpush1.msra.mxu1 %v6240_v57  ;;  %v6264_v26 = vand.u32 4294901760, %v6263_v24  ;;  %v15387_v53 = vand.u32 4294901760, %v13118_v48  ;;  %v13194_v44 = vsub.f32 %v5055_v25, %v13157_v39 }
 0xb16   : > { %v6281_v40 = vsub.f32 %v13110_v21, %v15386_v58  ;;  %6052 = vmatprep.subr.mxu0 %v12864_v30  ;;  %6247 = vmatprep.subr.mxu1 %v6246_v9  ;;  %v6270_v58 = vand.u32 4294901760, %v6269_v11  ;;  %v15388_v45 = vand.u32 4294901760, %v13127_v18  ;;  %v13202_v24 = vsub.f32 %v5052_v16, %v13167_v23 }
 0xb17   : > { %v6287_v3 = vsub.f32 %v13118_v48, %v15387_v53  ;;  %6054 = vmatpush1.msra.mxu0 %v12873_v34  ;;  %6253 = vmatpush1.msra.mxu1 %v6252_v5  ;;  %v6276_v53 = vand.u32 4294901760, %v6275_v1  ;;  %v15389_v25 = vand.u32 4294901760, %v13137_v55  ;;  %v13210_v11 = vsub.f32 %v5051_v0, %v13178_v46 }
 0xb18   : > { %v6293_v57 = vsub.f32 %v13127_v18, %v15388_v45  ;;  %6056 = vmatprep.subr.mxu0 %v12881_v41  ;;  %6259 = vmatprep.subr.mxu1 %v6258_v31  ;;  %v6282_v45 = vand.u32 4294901760, %v6281_v40  ;;  %v15390_v16 = vand.u32 4294901760, %v13145_v28  ;;  %v15392_v31 = vand.u32 4294901760, %v13165_v50 }
 0xb19   : > { %v6299_v9 = vsub.f32 %v13137_v55, %v15389_v25  ;;  %6058 = vmatpush1.msra.mxu0 %v12890_v20  ;;  %6265 = vmatpush1.msra.mxu1 %v6264_v26  ;;  %v6288_v1 = vand.u32 4294901760, %v6287_v3  ;;  %v15391_v25 = vand.u32 4294901760, %v13155_v7  ;;  %v15393_v3 = vand.u32 4294901760, %v13176_v35 }
 0xb1a   : > { %v6305_v5 = vsub.f32 %v13145_v28, %v15390_v16  ;;  %6060 = vmatprep.subr.mxu0 %v12899_v13  ;;  %6271 = vmatprep.subr.mxu1 %v6270_v58  ;;  %v6294_v40 = vand.u32 4294901760, %v6293_v57  ;;  %v6317_v16 = vsub.f32 %v13165_v50, %v15392_v31  ;;  %v14963_v0 = vand.u32 4294901760, %v13210_v11 }
 0xb1b   : > { %v6311_v54 = vsub.f32 %v13155_v7, %v15391_v25  ;;  %6062 = vmatpush1.msra.mxu0 %v12913_v62  ;;  %6277 = vmatpush1.msra.mxu1 %v6276_v53  ;;  %v6300_v26 = vand.u32 4294901760, %v6299_v9  ;;  %v6323_v25 = vsub.f32 %v13176_v35, %v15393_v3  ;;  %v15394_v57 = vand.u32 4294901760, %v13186_v14 }
 0xb1c   : > { %6064 = vmatprep.subr.mxu0 %v12922_v59  ;;  %6283 = vmatprep.subr.mxu1 %v6282_v45  ;;  %v6306_v58 = vand.u32 4294901760, %v6305_v5  ;;  %v15395_v9 = vand.u32 4294901760, %v13194_v44  ;;  %v6318_v3 = vand.u32 4294901760, %v6317_v16  ;;  %v15396_v45 = vand.u32 4294901760, %v13202_v24 }
 0xb1d   : > { %6066 = vmatpush1.msra.mxu0 %v12934_v56  ;;  %v6329_v31 = vsub.f32 %v13186_v14, %v15394_v57  ;;  %6289 = vmatpush1.msra.mxu1 %v6288_v1  ;;  %v6312_v53 = vand.u32 4294901760, %v6311_v54  ;;  %v6324_v57 = vand.u32 4294901760, %v6323_v25  ;;  %v6347_v54 = vsub.f32 %v13210_v11, %v14963_v0  ;;  %v15398_v25 = vld [vmem:[#allocation34_spill] sm:$0xff]  ;;  %v15414_v0 = vld [vmem:[#allocation29_spill] sm:$0xff] }
 0xb1e   : > { %6068 = vmatprep.subr.mxu0 %v12946_v17  ;;  %v6335_v43 = vsub.f32 %v13194_v44, %v15395_v9  ;;  %6295 = vmatprep.subr.mxu1 %v6294_v40  ;;  %v6341_v5 = vsub.f32 %v13202_v24, %v15396_v45  ;;  %v15402_v9 = vld [vmem:[#allocation45_spill] sm:$0xff]  ;;  %v15404_v45 = vld [vmem:[#allocation20_spill] sm:$0xff] }
 0xb1f   : > { %6070 = vmatpush1.msra.mxu0 %v12971_v63  ;;  %6301 = vmatpush1.msra.mxu1 %v6300_v26  ;;  %v6330_v1 = vand.u32 4294901760, %v6329_v31  ;;  %v6348_v26 = vand.u32 4294901760, %v6347_v54  ;;  %v15400_v31 = vld [vmem:[#allocation30_spill] sm:$0xff]  ;;  %v15407_v54 = vld [vmem:[#allocation36_spill] sm:$0xff] }
 0xb20   : > { %6072 = vmatprep.subr.mxu0 %v13005_v8  ;;  %6307 = vmatprep.subr.mxu1 %v6306_v58  ;;  %v6336_v40 = vand.u32 4294901760, %v6335_v43  ;;  %v6342_v16 = vand.u32 4294901760, %v6341_v5  ;;  %v15397_v43 = vld [vmem:[#allocation43_spill] sm:$0xff]  ;;  %v15399_v58 = vld [vmem:[#allocation28_spill] sm:$0xff] }
 0xb21   : > { %6074 = vmatpush1.msra.mxu0 %v13029_v52  ;;  %6313 = vmatpush1.msra.mxu1 %v6312_v53  ;;  %v15401_v53 = vld [vmem:[#allocation32_spill] sm:$0xff]  ;;  %v15405_v5 = vld [vmem:[#allocation31_spill] sm:$0xff] }
 0xb22   : > { %6076 = vmatprep.subr.mxu0 %v13040_v27  ;;  %6319 = vmatprep.subr.mxu1 %v6318_v3  ;;  %v15403_v3 = vld [vmem:[#allocation27_spill] sm:$0xff] }
 0xb23   : > { %6078 = vmatpush1.msra.mxu0 %v13053_v15  ;;  %6325 = vmatpush1.msra.mxu1 %v6324_v57  ;;  %v15406_v57 = vld [vmem:[#allocation23_spill] sm:$0xff] }
 0xb24   : > { %6080 = vmatprep.subr.mxu0 %v13063_v6  ;;  %6331 = vmatprep.subr.mxu1 %v6330_v1  ;;  %v15408_v1 = vld [vmem:[#allocation38_spill] sm:$0xff] }
 0xb25   : > { %6082 = vmatpush1.msra.mxu0 %v13077_v42  ;;  %6337 = vmatpush1.msra.mxu1 %v6336_v40  ;;  %v15409_v40 = vld [vmem:[#allocation19_spill] sm:$0xff] }
 0xb26   : > { %6084 = vmatprep.subr.mxu0 %v13090_v2  ;;  %6343 = vmatprep.subr.mxu1 %v6342_v16  ;;  %v15410_v16 = vld [vmem:[#allocation21_spill] sm:$0xff] }
 0xb27   : > { %6086 = vmatpush1.msra.mxu0 %v13099_v61  ;;  %6349 = vmatpush1.msra.mxu1 %v6348_v26  ;;  %v15411_v26 = vld [vmem:[#allocation35_spill] sm:$0xff] }
 0xb28   : > { %6088 = vmatprep.subr.mxu0 %v13112_v32  ;;  %6384 = vmatmul.mubr.f32.vlgmr.msra.gmra.mxu1 %v15358_v10  ;;  %v15416_v10 = vld [vmem:[#allocation47_spill] sm:$0xff] }
 0xb29   : > { %6543 = vmatprep.subr.mxu1 %v12822_v22  ;;  %6090 = vmatpush1.msra.mxu0 %v13120_v33 }
 0xb2a   : > { %6545 = vmatpush1.msra.mxu1 %v12830_v4  ;;  %6092 = vmatprep.subr.mxu0 %v13129_v36 }
 0xb2b   : > { %6547 = vmatprep.subr.mxu1 %v12835_v29  ;;  %6094 = vmatpush1.msra.mxu0 %v13139_v12 }
 0xb2c   : > { %6389 = vmatprep.mubr.f32.mxu1 %v15265_v49  ;;  %6549 = vmatpush1.msra.mxu1 %v12843_v60 }
 0xb2d   : > { %6096 = vmatprep.subr.mxu0 %v13147_v38  ;;  %6391 = vmatmul.mubr.f32.gmra.mxu1 %v15371_v51  ;;  %v15415_v51 = vld [vmem:[#allocation22_spill] sm:$0xff] }
 0xb2e   : > { %6551 = vmatprep.subr.mxu1 %v12848_v37  ;;  %6098 = vmatpush1.msra.mxu0 %v13157_v39 }
 0xb2f   : > { %6553 = vmatpush1.msra.mxu1 %v12856_v47  ;;  %6100 = vmatprep.subr.mxu0 %v13167_v23 }
 0xb30   : > { %6555 = vmatprep.subr.mxu1 %v12864_v30  ;;  %6102 = vmatpush1.msra.mxu0 %v13178_v46 }
 0xb31   : > { %6135 = vmatprep.mubr.f32.mxu0 %v15265_v49  ;;  %6557 = vmatpush1.msra.mxu1 %v12873_v34 }
 0xb32   : > { %6141 = vmatmul.mubr.f32.vlgmr.msra.gmra.mxu0 %v15397_v43  ;;  %6399 = vmatprep.subr.mxu0 %v15398_v25  ;;  %v15412_v43 = vld [vmem:[#allocation37_spill] sm:$0xff] }
 0xb33   : > { %6559 = vmatprep.subr.mxu1 %v12881_v41  ;;  %6402 = vmatpush1.msra.mxu0 %v15399_v58 }
 0xb34   : > { %6561 = vmatpush1.msra.mxu1 %v12890_v20  ;;  %6405 = vmatprep.subr.mxu0 %v15400_v31 }
 0xb35   : > { %6563 = vmatprep.subr.mxu1 %v12899_v13  ;;  %6146 = vmatprep.mubr.f32.mxu0 %v15265_v49 }
 0xb36   : > { %6408 = vmatpush1.msra.mxu0 %v15401_v53  ;;  %6565 = vmatpush1.msra.mxu1 %v12913_v62 }
 0xb37   : > { %6152 = vmatmul.mubr.f32.gmra.mxu0 %v15402_v9  ;;  %6411 = vmatprep.subr.mxu0 %v15403_v3  ;;  %v15413_v9 = vld [vmem:[#allocation25_spill] sm:$0xff] }
 0xb38   : > { %6567 = vmatprep.subr.mxu1 %v12922_v59  ;;  %6414 = vmatpush1.msra.mxu0 %v15404_v45 }
 0xb39   : > { %6569 = vmatpush1.msra.mxu1 %v12934_v56  ;;  %6417 = vmatprep.subr.mxu0 %v15405_v5 }
 0xb3a   : > { %6571 = vmatprep.subr.mxu1 %v12946_v17  ;;  %6420 = vmatpush1.msra.mxu0 %v15406_v57 }
 0xb3b   : > { %6573 = vmatpush1.msra.mxu1 %v12971_v63  ;;  %6423 = vmatprep.subr.mxu0 %v15407_v54 }
 0xb3c   : > { %6575 = vmatprep.subr.mxu1 %v13005_v8  ;;  %6426 = vmatpush1.msra.mxu0 %v15408_v1 }
 0xb3d   : > { %6577 = vmatpush1.msra.mxu1 %v13029_v52  ;;  %6429 = vmatprep.subr.mxu0 %v15409_v40 }
 0xb3e   : > { %6579 = vmatprep.subr.mxu1 %v13040_v27  ;;  %6432 = vmatpush1.msra.mxu0 %v15410_v16 }
 0xb3f   : > { %6581 = vmatpush1.msra.mxu1 %v13053_v15  ;;  %6435 = vmatprep.subr.mxu0 %v15411_v26 }
 0xb40   : > { %6583 = vmatprep.subr.mxu1 %v13063_v6  ;;  %6438 = vmatpush1.msra.mxu0 %v15412_v43  ;;  %v15417_v6 = vld [vmem:[#allocation48_spill] sm:$0xff] }
 0xb41   : > { %6585 = vmatpush1.msra.mxu1 %v13077_v42  ;;  %6441 = vmatprep.subr.mxu0 %v15413_v9 }
 0xb42   : > { %6587 = vmatprep.subr.mxu1 %v13090_v2  ;;  %6444 = vmatpush1.msra.mxu0 %v15414_v0 }
 0xb43   : > { %6589 = vmatpush1.msra.mxu1 %v13099_v61  ;;  %6447 = vmatprep.subr.mxu0 %v15415_v51 }
 0xb44   : > { %6591 = vmatprep.subr.mxu1 %v13112_v32  ;;  %6450 = vmatpush1.msra.mxu0 %v15416_v10 }
 0xb45   : > { %6593 = vmatpush1.msra.mxu1 %v13120_v33  ;;  %6453 = vmatprep.subr.mxu0 %v15417_v6 }
 0xb46   : > { %6595 = vmatprep.subr.mxu1 %v13129_v36  ;;  %6456 = vmatpush1.msra.mxu0 %v13097_v19 }
 0xb47   : > { %6597 = vmatpush1.msra.mxu1 %v13139_v12  ;;  %6459 = vmatprep.subr.mxu0 %v13110_v21  ;;  %v15418_v12 = vld [vmem:[#allocation41_spill] sm:$0xff] }
 0xb48   : > { %6599 = vmatprep.subr.mxu1 %v13147_v38  ;;  %6462 = vmatpush1.msra.mxu0 %v13118_v48 }
 0xb49   : > { %6601 = vmatpush1.msra.mxu1 %v13157_v39  ;;  %6465 = vmatprep.subr.mxu0 %v13127_v18 }
 0xb4a   : > { %6603 = vmatprep.subr.mxu1 %v13167_v23  ;;  %6468 = vmatpush1.msra.mxu0 %v13137_v55 }
 0xb4b   : > { %6605 = vmatpush1.msra.mxu1 %v13178_v46  ;;  %6638 = vmatprep.mubr.f32.mxu1 %v15265_v49 }
 0xb4c   : > { %6471 = vmatprep.subr.mxu0 %v13145_v28  ;;  %6642 = vmatmul.mubr.f32.vlgmr.msra.gmra.mxu1 %v15418_v12  ;;  %v15419_v28 = vld [vmem:[#allocation44_spill] sm:$0xff]  ;;  %v6980_v12 = vld [vmem:[#allocation10 + $0xe8] sm:$0xff] }
 0xb4d   : > { %6833 = vmatprep.subr.mxu1 %v12822_v22  ;;  %6474 = vmatpush1.msra.mxu0 %v13155_v7  ;;  %v15420_v22 = vld [vmem:[#allocation39_spill] sm:$0xff] }
 0xb4e   : > { %6835 = vmatpush1.msra.mxu1 %v12830_v4  ;;  %6477 = vmatprep.subr.mxu0 %v13165_v50  ;;  %v15421_v4 = vand.u32 4294901760, %v15398_v25  ;;  %v15428_v25 = vand.u32 4294901760, %v15405_v5  ;;  %v6979_v5 = vld [vmem:[#allocation10 + $0xe0] sm:$0xff] }
 0xb4f   : > { %6837 = vmatprep.subr.mxu1 %v12835_v29  ;;  %6480 = vmatpush1.msra.mxu0 %v13176_v35  ;;  %v15422_v29 = vand.u32 4294901760, %v15399_v58 }
 0xb50   : > { %6647 = vmatprep.mubr.f32.mxu1 %v15265_v49  ;;  %6839 = vmatpush1.msra.mxu1 %v12843_v60  ;;  %v15423_v60 = vand.u32 4294901760, %v15400_v31  ;;  %v6964_v31 = vld [vmem:[#allocation10 + $0x68] sm:$0xff] }
 0xb51   : > { %6483 = vmatprep.subr.mxu0 %v13186_v14  ;;  %6651 = vmatmul.mubr.f32.gmra.mxu1 %v15419_v28  ;;  %v15426_v28 = vand.u32 4294901760, %v15403_v3 }
 0xb52   : > { %6841 = vmatprep.subr.mxu1 %v12848_v37  ;;  %6486 = vmatpush1.msra.mxu0 %v13194_v44  ;;  %v15424_v37 = vand.u32 4294901760, %v15401_v53  ;;  %v15430_v53 = vand.u32 4294901760, %v15406_v57  ;;  %v6963_v57 = vld [vmem:[#allocation10 + $0x60] sm:$0xff] }
 0xb53   : > { %6843 = vmatpush1.msra.mxu1 %v12856_v47  ;;  %6489 = vmatprep.subr.mxu0 %v13202_v24  ;;  %v6982_v47 = vld [vmem:[#allocation10 + $0xf8] sm:$0xff] }
 0xb54   : > { %6845 = vmatprep.subr.mxu1 %v12864_v30  ;;  %6492 = vmatpush1.msra.mxu0 %v13210_v11  ;;  %v6966_v30 = vld [vmem:[#allocation10 + $0x78] sm:$0xff] }
 0xb55   : > { %6525 = vmatprep.mubr.f32.mxu0 %v15265_v49  ;;  %6847 = vmatpush1.msra.mxu1 %v12873_v34  ;;  %v15425_v34 = vld [vmem:[#allocation42_spill] sm:$0xff]  ;;  %v13373_v58 = vand.u32 4294901760, %v6966_v30 }
 0xb56   : > { %6528 = vmatmul.mubr.f32.vlgmr.msra.gmra.mxu0 %v15420_v22  ;;  %6660 = vmatprep.subr.mxu0 %v15421_v4  ;;  %v15432_v22 = vand.u32 4294901760, %v15408_v1  ;;  %v15433_v4 = vand.u32 4294901760, %v15409_v40  ;;  %v13410_v40 = vand.u32 4294901760, %v6979_v5 }
 0xb57   : > { %6849 = vmatprep.subr.mxu1 %v12881_v41  ;;  %6664 = vmatpush1.msra.mxu0 %v15422_v29  ;;  %v6981_v41 = vld [vmem:[#allocation10 + $0xf0] sm:$0xff]  ;;  %v6978_v29 = vld [vmem:[#allocation10 + $0xd8] sm:$0xff] }
 0xb58   : > { %6851 = vmatpush1.msra.mxu1 %v12890_v20  ;;  %6668 = vmatprep.subr.mxu0 %v15423_v60  ;;  %v6965_v20 = vld [vmem:[#allocation10 + $0x70] sm:$0xff]  ;;  %v6962_v60 = vld [vmem:[#allocation10 + $0x58] sm:$0xff] }
 0xb59   : > { %6853 = vmatprep.subr.mxu1 %v12899_v13  ;;  %6533 = vmatprep.mubr.f32.mxu0 %v15265_v49  ;;  %v15427_v13 = vand.u32 4294901760, %v15404_v45  ;;  %v13380_v3 = vand.u32 4294901760, %v6965_v20  ;;  %v13385_v45 = vand.u32 4294901760, %v6980_v12 }
 0xb5a   : > { %6672 = vmatpush1.msra.mxu0 %v15424_v37  ;;  %6855 = vmatpush1.msra.mxu1 %v12913_v62  ;;  %v13371_v62 = vand.u32 4294901760, %v6982_v47  ;;  %v15437_v37 = vand.u32 4294901760, %v15411_v26  ;;  %v15442_v26 = vand.u32 4294901760, %v15413_v9 }
 0xb5b   : > { %6536 = vmatmul.mubr.f32.gmra.mxu0 %v15425_v34  ;;  %6676 = vmatprep.subr.mxu0 %v15426_v28  ;;  %v15440_v34 = vand.u32 4294901760, %v15412_v43  ;;  %v15443_v43 = vand.u32 4294901760, %v15414_v0 }
 0xb5c   : > { %6857 = vmatprep.subr.mxu1 %v12922_v59  ;;  %6680 = vmatpush1.msra.mxu0 %v15427_v13  ;;  %15429 = vst [vmem:[#allocation43_spill] sm:$0xff] %v13371_v62  ;;  %v13378_v59 = vand.u32 4294901760, %v6981_v41 }
 0xb5d   : > { %6859 = vmatpush1.msra.mxu1 %v12934_v56  ;;  %6684 = vmatprep.subr.mxu0 %v15428_v25  ;;  %v15431_v56 = vand.u32 4294901760, %v15407_v54  ;;  %v13399_v54 = vsub.f32 %v6966_v30, %v13373_v58  ;;  %v15439_v30 = vld [vmem:[#allocation46_spill] sm:$0xff]  ;;  %v6976_v25 = vld [vmem:[#allocation10 + $0xc8] sm:$0xff] }
 0xb5e   : > { %6861 = vmatprep.subr.mxu1 %v12946_v17  ;;  %6688 = vmatpush1.msra.mxu0 %v15430_v53  ;;  %v13390_v17 = vand.u32 4294901760, %v6964_v31  ;;  %v13405_v1 = vsub.f32 %v6981_v41, %v13378_v59  ;;  %v13426_v41 = vand.u32 4294901760, %v6978_v29 }
 0xb5f   : > { %6863 = vmatpush1.msra.mxu1 %v12971_v63  ;;  %6692 = vmatprep.subr.mxu0 %v15431_v56  ;;  %v13396_v63 = vsub.f32 %v6982_v47, %v13371_v62  ;;  %v13416_v47 = vsub.f32 %v6980_v12, %v13385_v45  ;;  %v14974_v13 = vand.u32 4294901760, %v13399_v54  ;;  %v13433_v12 = vand.u32 4294901760, %v6962_v60  ;;  %v6960_v56 = vld [vmem:[#allocation10 + $0x48] sm:$0xff] }
 0xb60   : > { %6865 = vmatprep.subr.mxu1 %v13005_v8  ;;  %6696 = vmatpush1.msra.mxu0 %v15432_v22  ;;  %v15435_v8 = vand.u32 4294901760, %v15410_v16  ;;  %v6977_v16 = vld [vmem:[#allocation10 + $0xd0] sm:$0xff]  ;;  %v13424_v28 = vsub.f32 %v6964_v31, %v13390_v17  ;;  %v14972_v31 = vand.u32 4294901760, %v13405_v1  ;;  %v15445_v22 = vand.u32 4294901760, %v15415_v51  ;;  %v6975_v51 = vld [vmem:[#allocation10 + $0xc0] sm:$0xff] }
 0xb61   : > { %6867 = vmatpush1.msra.mxu1 %v13029_v52  ;;  %6700 = vmatprep.subr.mxu0 %v15433_v4  ;;  %15434 = vst [vmem:[#allocation34_spill] sm:$0xff] %v13396_v63  ;;  %v13408_v52 = vsub.f32 %v6965_v20, %v13380_v3  ;;  %15438 = vst [vmem:[#allocation30_spill] sm:$0xff] %v13416_v47  ;;  %v14976_v20 = vand.u32 4294901760, %v13396_v63  ;;  %v13443_v9 = vand.u32 4294901760, %v6977_v16 }
 0xb62   : > { %6869 = vmatprep.subr.mxu1 %v13040_v27  ;;  %6704 = vmatpush1.msra.mxu0 %v15435_v8  ;;  %v13418_v27 = vand.u32 4294901760, %v6963_v57  ;;  %15441 = vst [vmem:[#allocation32_spill] sm:$0xff] %v13424_v28  ;;  %v14971_v8 = vand.u32 4294901760, %v13424_v28 }
 0xb63   : > { %15436 = vst [vmem:[#allocation28_spill] sm:$0xff] %v13408_v52  ;;  %6871 = vmatpush1.msra.mxu1 %v13053_v15  ;;  %6708 = vmatprep.subr.mxu0 %v15437_v37  ;;  %v6961_v15 = vld [vmem:[#allocation10 + $0x50] sm:$0xff]  ;;  %v14969_v53 = vand.u32 4294901760, %v13408_v52  ;;  %v13459_v37 = vsub.f32 %v6978_v29, %v13426_v41  ;;  %v13477_v29 = vsub.f32 %v6962_v60, %v13433_v12 }
 0xb64   : > { %6873 = vmatprep.subr.mxu1 %v15439_v30  ;;  %6712 = vmatpush1.msra.mxu0 %v15440_v34  ;;  %v13450_v0 = vsub.f32 %v6963_v57, %v13418_v27  ;;  %v13452_v4 = vand.u32 4294901760, %v6961_v15  ;;  %v15449_v57 = vand.u32 4294901760, %v15417_v6  ;;  %v13479_v30 = vand.u32 4294901760, %v6960_v56  ;;  %v6959_v34 = vld [vmem:[#allocation10 + $0x40] sm:$0xff] }
 0xb65   : > { %6875 = vmatpush1.msra.mxu1 %v13077_v42  ;;  %6716 = vmatprep.subr.mxu0 %v15442_v26  ;;  %v13441_v42 = vsub.f32 %v6979_v5, %v13410_v40  ;;  %v15447_v5 = vand.u32 4294901760, %v15416_v10  ;;  %15448 = vst [vmem:[#allocation20_spill] sm:$0xff] %v13459_v37  ;;  %v13474_v10 = vsub.f32 %v13399_v54, %v14974_v13  ;;  %15450 = vst [vmem:[#allocation31_spill] sm:$0xff] %v13477_v29  ;;  %v15464_v13 = vld [vmem:[#allocation33_spill] sm:$0xff] }
 0xb66   : > { %6877 = vmatprep.subr.mxu1 %v13090_v2  ;;  %6720 = vmatpush1.msra.mxu0 %v15443_v43  ;;  %v14970_v2 = vand.u32 4294901760, %v13416_v47  ;;  %15446 = vst [vmem:[#allocation27_spill] sm:$0xff] %v13450_v0  ;;  %v15451_v6 = vand.u32 4294901760, %v13097_v19  ;;  %v13492_v26 = vsub.f32 %v13408_v52, %v14969_v53  ;;  %v13496_v43 = vsub.f32 %v6977_v16, %v13443_v9  ;;  %v6974_v53 = vld [vmem:[#allocation10 + $0xb8] sm:$0xff] }
 0xb67   : > { %15444 = vst [vmem:[#allocation45_spill] sm:$0xff] %v13441_v42  ;;  %6879 = vmatpush1.msra.mxu1 %v13099_v61  ;;  %6724 = vmatprep.subr.mxu0 %v15445_v22  ;;  %v13461_v61 = vand.u32 4294901760, %v6976_v25  ;;  %v14973_v60 = vand.u32 4294901760, %v13441_v42  ;;  %v15453_v22 = vld [vmem:[#allocation49_spill] sm:$0xff]  ;;  %v15454_v19 = vand.u32 4294901760, %v13110_v21  ;;  %v15456_v16 = vand.u32 4294901760, %v13118_v48 }
 0xb68   : > { %6881 = vmatprep.subr.mxu1 %v13112_v32  ;;  %6728 = vmatpush1.msra.mxu0 %v15447_v5  ;;  %v13469_v32 = vsub.f32 %v13396_v63, %v14976_v20  ;;  %15452 = vst [vmem:[#allocation23_spill] sm:$0xff] %v13496_v43  ;;  %v14975_v5 = vand.u32 4294901760, %v13450_v0  ;;  %v13518_v21 = vsub.f32 %v13424_v28, %v14971_v8  ;;  %v7147_v48 = vand.u32 4294901760, %v13474_v10 }
 0xb69   : > { %6883 = vmatpush1.msra.mxu1 %v13120_v33  ;;  %6732 = vmatprep.subr.mxu0 %v15449_v57  ;;  %v13487_v33 = vsub.f32 %v13405_v1, %v14972_v31  ;;  %v13508_v57 = vsub.f32 %v6961_v15, %v13452_v4  ;;  %v13524_v15 = vand.u32 4294901760, %v6959_v34  ;;  %v13533_v8 = vsub.f32 %v6960_v56, %v13479_v30 }
 0xb6a   : > { %6885 = vmatprep.subr.mxu1 %v13129_v36  ;;  %6736 = vmatpush1.msra.mxu0 %v15451_v6  ;;  %v13504_v36 = vsub.f32 %v13416_v47, %v14970_v2  ;;  %v13510_v6 = vand.u32 4294901760, %v6975_v51  ;;  %v15458_v2 = vand.u32 4294901760, %v13127_v18  ;;  %v13542_v18 = vsub.f32 %v13441_v42, %v14973_v60 }
 0xb6b   : > { %6887 = vmatpush1.msra.mxu1 %v15453_v22  ;;  %6740 = vmatprep.subr.mxu0 %v15454_v19  ;;  %15455 = vst [vmem:[#allocation36_spill] sm:$0xff] %v13508_v57  ;;  %v14977_v22 = vand.u32 4294901760, %v13459_v37  ;;  %v13522_v19 = vsub.f32 %v6976_v25, %v13461_v61  ;;  %15459 = vst [vmem:[#allocation19_spill] sm:$0xff] %v13533_v8  ;;  %v15460_v25 = vand.u32 4294901760, %v13137_v55  ;;  %v7266_v31 = vand.u32 4294901760, %v13487_v33  ;;  %v6973_v33 = vld [vmem:[#allocation10 + $0xb0] sm:$0xff] }
 0xb6c   : > { %6889 = vmatprep.subr.mxu1 %v13147_v38  ;;  %6744 = vmatpush1.msra.mxu0 %v15456_v16  ;;  %v7259_v38 = vand.u32 4294901760, %v13469_v32  ;;  %v14978_v16 = vand.u32 4294901760, %v13477_v29  ;;  %v6958_v32 = vld [vmem:[#allocation10 + $0x38] sm:$0xff]  ;;  %v13553_v55 = vsub.f32 %v13450_v0, %v14975_v5  ;;  %v13557_v10 = vsub.f32 %v6975_v51, %v13510_v6  ;;  %v6957_v51 = vld [vmem:[#allocation10 + $0x30] sm:$0xff]  ;;  %v6972_v5 = vld [vmem:[#allocation10 + $0xa8] sm:$0xff] }
 0xb6d   : > { %15457 = vst [vmem:[#allocation38_spill] sm:$0xff] %v13522_v19  ;;  %6891 = vmatpush1.msra.mxu1 %v13157_v39  ;;  %6748 = vmatprep.subr.mxu0 %v15458_v2  ;;  %v14981_v39 = vand.u32 4294901760, %v13496_v43  ;;  %v13545_v2 = vand.u32 4294901760, %v6974_v53  ;;  %v13570_v20 = vsub.f32 %v6959_v34, %v13524_v15  ;;  %v15466_v56 = vand.u32 4294901760, %v13155_v7  ;;  %v15472_v0 = vld [vmem:[#allocation40_spill] sm:$0xff] }
 0xb6e   : > { %6893 = vmatprep.subr.mxu1 %v13167_v23  ;;  %6752 = vmatpush1.msra.mxu0 %v15460_v25  ;;  %v7154_v23 = vand.u32 4294901760, %v13492_v26  ;;  %15461 = vst [vmem:[#allocation21_spill] sm:$0xff] %v13557_v10  ;;  %v15462_v25 = vld [vmem:[#allocation50_spill] sm:$0xff]  ;;  %v13566_v26 = vsub.f32 %v13459_v37, %v14977_v22  ;;  %v13582_v22 = vand.u32 4294901760, %v6958_v32  ;;  %v15467_v34 = vand.u32 4294901760, %v13165_v50 }
 0xb6f   : > { %6895 = vmatpush1.msra.mxu1 %v13178_v46  ;;  %6928 = vmatprep.mubr.f32.mxu1 %v15265_v49  ;;  %v15463_v60 = vand.u32 4294901760, %v15462_v25  ;;  %v7273_v46 = vand.u32 4294901760, %v13504_v36  ;;  %15465 = vst [vmem:[#allocation35_spill] sm:$0xff] %v13570_v20  ;;  %v13579_v36 = vsub.f32 %v13477_v29, %v14978_v16  ;;  %v7280_v7 = vand.u32 4294901760, %v13542_v18  ;;  %v6956_v25 = vld [vmem:[#allocation10 + $0x28] sm:$0xff] }
 0xb70   : > { %6930 = vmatmul.mubr.f32.vlgmr.msra.gmra.mxu1 %v15464_v13  ;;  %6817 = vmatprep.mubr.f32.mxu0 %v15265_v49  ;;  %v13596_v16 = vand.u32 4294901760, %v6973_v33  ;;  %v15469_v29 = vand.u32 4294901760, %v13176_v35  ;;  %v7168_v50 = vand.u32 4294901760, %v13553_v55  ;;  %v15471_v37 = vand.u32 4294901760, %v13186_v14  ;;  %v6970_v55 = vld [vmem:[#allocation10 + $0x98] sm:$0xff] }
 0xb71   : > { %6756 = vmatprep.subr.mxu0 %v15463_v60  ;;  %6935 = vmatprep.mubr.f32.mxu1 %v15265_v49  ;;  %v7161_v60 = vand.u32 4294901760, %v13518_v21  ;;  %v13591_v21 = vsub.f32 %v13496_v43, %v14981_v39  ;;  %v13607_v43 = vand.u32 4294901760, %v6957_v51  ;;  %v7287_v35 = vand.u32 4294901760, %v13566_v26  ;;  %v6955_v39 = vld [vmem:[#allocation10 + $0x20] sm:$0xff] }
 0xb72   : > { %6760 = vmatpush1.msra.mxu0 %v15466_v56  ;;  %v13594_v56 = vsub.f32 %v6974_v53, %v13545_v2  ;;  %9369 = vmatprep.subr.mxu1 %v7259_v38  ;;  %v6971_v53 = vld [vmem:[#allocation10 + $0xa0] sm:$0xff]  ;;  %v7175_v14 = vand.u32 4294901760, %v13579_v36  ;;  %v13630_v42 = vsub.f32 %v6958_v32, %v13582_v22  ;;  %v15479_v32 = vand.u32 4294901760, %v13210_v11 }
 0xb73   : > { %6764 = vmatprep.subr.mxu0 %v15467_v34  ;;  %v15470_v34 = vand.u32 4294901760, %v13508_v57  ;;  %9370 = vmatpush3.msra.mxu1 %v7147_v48  ;;  %v13639_v48 = vsub.f32 %v6973_v33, %v13596_v16  ;;  %v13641_v36 = vand.u32 4294901760, %v6971_v53  ;;  %v6969_v33 = vld [vmem:[#allocation10 + $0x90] sm:$0xff] }
 0xb74   : > { %15468 = vst [vmem:[#allocation37_spill] sm:$0xff] %v13594_v56  ;;  %6768 = vmatpush1.msra.mxu0 %v15469_v29  ;;  %6937 = vmatmul.mubr.f32.gmra.mxu1 %v15472_v0  ;;  %v15473_v29 = vand.u32 4294901760, %v13522_v19  ;;  %15476 = vst [vmem:[#allocation25_spill] sm:$0xff] %v13630_v42 }
 0xb75   : > { %v13604_v18 = vsub.f32 %v13508_v57, %v15470_v34  ;;  %6772 = vmatprep.subr.mxu0 %v15471_v37  ;;  %v13619_v34 = vand.u32 4294901760, %v6972_v5  ;;  %v15474_v57 = vand.u32 4294901760, %v13194_v44  ;;  %v15475_v37 = vand.u32 4294901760, %v13533_v8  ;;  %9371 = vmatprep.subr.mxu1 %v7266_v31  ;;  %15478 = vst [vmem:[#allocation29_spill] sm:$0xff] %v13639_v48 }
 0xb76   : > { %v13616_v38 = vsub.f32 %v13522_v19, %v15473_v29  ;;  %v13632_v29 = vand.u32 4294901760, %v6956_v25  ;;  %v15477_v19 = vand.u32 4294901760, %v13202_v24  ;;  %v7294_v44 = vand.u32 4294901760, %v13591_v21  ;;  %9372 = vmatpush3.msra.mxu1 %v7154_v23 }
 0xb77   : > { %6776 = vmatpush1.msra.mxu0 %v15474_v57  ;;  %v13627_v26 = vsub.f32 %v13533_v8, %v15475_v37  ;;  %v6954_v37 = vld [vmem:[#allocation10 + $0x18] sm:$0xff]  ;;  %v7182_v8 = vand.u32 4294901760, %v13604_v18  ;;  %v15480_v24 = vand.u32 4294901760, %v13557_v10  ;;  %v13654_v21 = vand.u32 4294901760, %v6955_v39  ;;  %9373 = vmatprep.subr.mxu1 %v7273_v46 }
 0xb78   : > { %6780 = vmatprep.subr.mxu0 %v15477_v19  ;;  %v13652_v19 = vsub.f32 %v6957_v51, %v13607_v43  ;;  %v7301_v11 = vand.u32 4294901760, %v13616_v38  ;;  %v15481_v23 = vand.u32 4294901760, %v13570_v20  ;;  %v6953_v51 = vld [vmem:[#allocation10 + $0x10] sm:$0xff]  ;;  %9374 = vmatpush3.msra.mxu1 %v7161_v60  ;;  %v13672_v46 = vsub.f32 %v6956_v25, %v13632_v29 }
 0xb79   : > { %6784 = vmatpush1.msra.mxu0 %v15479_v32  ;;  %v13649_v31 = vsub.f32 %v13557_v10, %v15480_v24  ;;  %v13664_v32 = vsub.f32 %v6972_v5, %v13619_v34  ;;  %v13666_v24 = vand.u32 4294901760, %v6970_v55  ;;  %v7189_v57 = vand.u32 4294901760, %v13627_v26  ;;  %9375 = vmatprep.subr.mxu1 %v7280_v7 }
 0xb7a   : > { %6819 = vmatmul.mubr.f32.vlgmr.msra.gmra.mxu0 %v15464_v13  ;;  %v13661_v18 = vsub.f32 %v13570_v20, %v15481_v23  ;;  %15483 = vst [vmem:[#allocation47_spill] sm:$0xff] %v13672_v46  ;;  %v13674_v38 = vand.u32 4294901760, %v6954_v37  ;;  %v6968_v23 = vld [vmem:[#allocation10 + $0x88] sm:$0xff]  ;;  %9331 = vmatprep.subr.mxu0 %v13371_v62  ;;  %v15484_v5 = vand.u32 4294901760, %v13594_v56  ;;  %v13682_v60 = vsub.f32 %v6971_v53, %v13641_v36 }
 0xb7b   : > { %15482 = vst [vmem:[#allocation22_spill] sm:$0xff] %v13664_v32  ;;  %6824 = vmatprep.mubr.f32.mxu0 %v15265_v49  ;;  %v13684_v26 = vand.u32 4294901760, %v6969_v33  ;;  %v6952_v13 = vld [vmem:[#allocation10 + $0x8] sm:$0xff]  ;;  %9376 = vmatpush3.msra.mxu1 %v7168_v50  ;;  %v7308_v25 = vand.u32 4294901760, %v13649_v31  ;;  %v13690_v10 = vsub.f32 %v6955_v39, %v13654_v21  ;;  %v13692_v28 = vand.u32 4294901760, %v6953_v51  ;;  %v6951_v31 = vld [vmem:[#allocation10] sm:$0xff] }
 0xb7c   : > { %v7314_v20 = vsub.f32 %v13594_v56, %v15484_v5  ;;  %15485 = vst [vmem:[#allocation48_spill] sm:$0xff] %v13682_v60  ;;  %9332 = vmatpush3.msra.mxu0 %v13373_v58  ;;  %v6967_v5 = vld [vmem:[#allocation10 + $0x80] sm:$0xff]  ;;  %9377 = vmatprep.subr.mxu1 %v7287_v35  ;;  %v7196_v53 = vand.u32 4294901760, %v13661_v18  ;;  %v13698_v50 = vsub.f32 %v6970_v55, %v13666_v24  ;;  %v13700_v56 = vand.u32 4294901760, %v6968_v23 }
 0xb7d   : > { %15486 = vst [vmem:[#allocation41_spill] sm:$0xff] %v13690_v10  ;;  %15487 = vst [vmem:[#allocation44_spill] sm:$0xff] %v13692_v28  ;;  %9378 = vmatpush3.msra.mxu1 %v7175_v14  ;;  %9333 = vmatprep.subr.mxu0 %v13378_v59  ;;  %v15490_v39 = vand.u32 4294901760, %v13630_v42  ;;  %v13708_v35 = vsub.f32 %v6954_v37, %v13674_v38  ;;  %v13710_v18 = vand.u32 4294901760, %v6952_v13  ;;  %v15493_v55 = vand.u32 4294901760, %v13639_v48 }
 0xb7e   : > { %6826 = vmatmul.mubr.f32.gmra.mxu0 %v15472_v0  ;;  %15488 = vst [vmem:[#allocation39_spill] sm:$0xff] %v13698_v50  ;;  %15489 = vst [vmem:[#allocation42_spill] sm:$0xff] %v13700_v56  ;;  %9379 = vmatprep.subr.mxu1 %v7294_v44  ;;  %v13718_v47 = vsub.f32 %v6969_v33, %v13684_v26  ;;  %v15496_v37 = vand.u32 4294901760, %v13652_v19  ;;  %v7315_v33 = vand.u32 4294901760, %v7314_v20  ;;  %v15499_v49 = vand.u32 4294901760, %v13664_v32 }
 0xb7f   : > { %v7202_v7 = vsub.f32 %v13630_v42, %v15490_v39  ;;  %15491 = vst [vmem:[#allocation46_spill] sm:$0xff] %v13708_v35  ;;  %15492 = vst [vmem:[#allocation49_spill] sm:$0xff] %v13710_v18  ;;  %9334 = vmatpush3.msra.mxu0 %v13380_v3  ;;  %v7321_v14 = vsub.f32 %v13639_v48, %v15493_v55  ;;  %v13720_v39 = vand.u32 4294901760, %v6967_v5  ;;  %9380 = vmatpush3.msra.mxu1 %v7182_v8 }
 0xb80   : > { %15494 = vst [vmem:[#allocation50_spill] sm:$0xff] %v13718_v47  ;;  %9335 = vmatprep.subr.mxu0 %v13385_v45  ;;  %v7209_v44 = vsub.f32 %v13652_v19, %v15496_v37  ;;  %v13728_v42 = vsub.f32 %v6953_v51, %v13692_v28  ;;  %v13730_v55 = vand.u32 4294901760, %v6951_v31  ;;  %9381 = vmatprep.subr.mxu1 %v7301_v11  ;;  %v15501_v37 = vand.u32 4294901760, %v13672_v46 }
 0xb81   : > { %15495 = vst [vmem:[#allocation33_spill] sm:$0xff] %v13720_v39  ;;  %9336 = vmatpush3.msra.mxu0 %v13390_v17  ;;  %v7328_v8 = vsub.f32 %v13664_v32, %v15499_v49  ;;  %v13738_v52 = vsub.f32 %v6968_v23, %v13700_v56  ;;  %9382 = vmatpush3.msra.mxu1 %v7189_v57  ;;  %v7203_v51 = vand.u32 4294901760, %v7202_v7  ;;  %v7322_v49 = vand.u32 4294901760, %v7321_v14 }
 0xb82   : > { %15497 = vst [vmem:[#allocation40_spill] sm:$0xff] %v13728_v42  ;;  %15498 = vst [vmem:[#allocation51_spill] sm:$0xff] %v13730_v55  ;;  %9337 = vmatprep.subr.mxu0 %v13410_v40  ;;  %v7216_v11 = vsub.f32 %v13672_v46, %v15501_v37  ;;  %v13746_v20 = vsub.f32 %v6952_v13, %v13710_v18  ;;  %9383 = vmatprep.subr.mxu1 %v7308_v25  ;;  %v15503_v23 = vand.u32 4294901760, %v13682_v60 }
 0xb83   : > { %15500 = vst [vmem:[#allocation52_spill] sm:$0xff] %v13738_v52  ;;  %9338 = vmatpush3.msra.mxu0 %v13418_v27  ;;  %v13754_v7 = vsub.f32 %v6967_v5, %v13720_v39  ;;  %9384 = vmatpush3.msra.mxu1 %v7196_v53  ;;  %v7210_v37 = vand.u32 4294901760, %v7209_v44  ;;  %v15505_v13 = vand.u32 4294901760, %v13690_v10  ;;  %v13762_v14 = vsub.f32 %v6951_v31, %v13730_v55 }
 0xb84   : > { %15502 = vst [vmem:[#allocation53_spill] sm:$0xff] %v13746_v20  ;;  %v7335_v57 = vsub.f32 %v13682_v60, %v15503_v23  ;;  %9339 = vmatprep.subr.mxu0 %v13426_v41  ;;  %9385 = vmatprep.subr.mxu1 %v7315_v33  ;;  %v7329_v23 = vand.u32 4294901760, %v7328_v8  ;;  %v15507_v5 = vand.u32 4294901760, %v13698_v50  ;;  %v7217_v44 = vand.u32 4294901760, %v7216_v11 }
 0xb85   : > { %15504 = vst [vmem:[#allocation54_spill] sm:$0xff] %v13754_v7  ;;  %v7223_v25 = vsub.f32 %v13690_v10, %v15505_v13  ;;  %15506 = vst [vmem:[#allocation55_spill] sm:$0xff] %v13762_v14  ;;  %9340 = vmatpush3.msra.mxu0 %v13433_v12  ;;  %9386 = vmatpush3.msra.mxu1 %v7203_v51  ;;  %v15508_v13 = vand.u32 4294901760, %v13708_v35  ;;  %v15509_v8 = vand.u32 4294901760, %v13718_v47  ;;  %v15510_v11 = vand.u32 4294901760, %v13728_v42 }
 0xb86   : > { %v7342_v53 = vsub.f32 %v13698_v50, %v15507_v5  ;;  %9341 = vmatprep.subr.mxu0 %v13443_v9  ;;  %9387 = vmatprep.subr.mxu1 %v7322_v49  ;;  %v7336_v33 = vand.u32 4294901760, %v7335_v57  ;;  %v15012_v31 = vand.u32 4294901760, %v13762_v14  ;;  %v15511_v57 = vand.u32 4294901760, %v13738_v52 }
 0xb87   : > { %v7230_v0 = vsub.f32 %v13708_v35, %v15508_v13  ;;  %9342 = vmatpush3.msra.mxu0 %v13452_v4  ;;  %v7349_v5 = vsub.f32 %v13718_v47, %v15509_v8  ;;  %9388 = vmatpush3.msra.mxu1 %v7210_v37  ;;  %v7224_v51 = vand.u32 4294901760, %v7223_v25  ;;  %v7237_v13 = vsub.f32 %v13728_v42, %v15510_v11 }
 0xb88   : > { %9343 = vmatprep.subr.mxu0 %v13461_v61  ;;  %9389 = vmatprep.subr.mxu1 %v7329_v23  ;;  %v7343_v49 = vand.u32 4294901760, %v7342_v53  ;;  %v7356_v8 = vsub.f32 %v13738_v52, %v15511_v57  ;;  %v15512_v25 = vand.u32 4294901760, %v13746_v20  ;;  %v15513_v23 = vand.u32 4294901760, %v13754_v7 }
 0xb89   : > { %9344 = vmatpush3.msra.mxu0 %v13479_v30  ;;  %9390 = vmatpush3.msra.mxu1 %v7217_v44  ;;  %v7231_v37 = vand.u32 4294901760, %v7230_v0  ;;  %v7350_v11 = vand.u32 4294901760, %v7349_v5  ;;  %v7238_v57 = vand.u32 4294901760, %v7237_v13  ;;  %v7251_v0 = vsub.f32 %v13762_v14, %v15012_v31  ;;  %v5238_v13 = vpop.f32.mrf.mxu0 }
 0xb8a   : > { %9345 = vmatprep.subr.mxu0 %v13510_v6  ;;  %v7244_v48 = vsub.f32 %v13746_v20, %v15512_v25  ;;  %9391 = vmatprep.subr.mxu1 %v7336_v33  ;;  %v7363_v53 = vsub.f32 %v13754_v7, %v15513_v23  ;;  %v7357_v44 = vand.u32 4294901760, %v7356_v8  ;;  %v15514_v23 = vld [vmem:[#allocation18_spill] sm:$0xff] }
 0xb8b   : > { %9346 = vmatpush3.msra.mxu0 %v13524_v15  ;;  %9392 = vmatpush3.msra.mxu1 %v7224_v51  ;;  %v7252_v51 = vand.u32 4294901760, %v7251_v0  ;;  %v5240_v8 = vpop.f32.mrf.mxu0  ;;  %v5121_v0 = vsub.s32 1, %v15514_v23 }
 0xb8c   : > { %9347 = vmatprep.subr.mxu0 %v13545_v2  ;;  %9393 = vmatprep.subr.mxu1 %v7343_v49  ;;  %v7245_v33 = vand.u32 4294901760, %v7244_v48  ;;  %v7364_v5 = vand.u32 4294901760, %v7363_v53  ;;  %v5481_v48 = vpop.f32.mrf.mxu1  ;;  %v5117_v53 = vsub.s32 0, %v15514_v23 }
 0xb8d   : > { %9348 = vmatpush3.msra.mxu0 %v13582_v22  ;;  %9394 = vmatpush3.msra.mxu1 %v7231_v37  ;;  %v5249_v25 = vpop.f32.mrf.mxu0 }
 0xb8e   : > { %9349 = vmatprep.subr.mxu0 %v13596_v16  ;;  %9395 = vmatprep.subr.mxu1 %v7350_v11  ;;  %v5483_v49 = vpop.f32.mrf.mxu1 }
 0xb8f   : > { %9350 = vmatpush3.msra.mxu0 %v13607_v43  ;;  %9396 = vmatpush3.msra.mxu1 %v7238_v57  ;;  %v13821_v57 = vld [vmem:[%s14745_s9] sm:$0xf] }
 0xb90   : > { %9351 = vmatprep.subr.mxu0 %v13619_v34  ;;  %9397 = vmatprep.subr.mxu1 %v7357_v44  ;;  %v5488_v37 = vpop.f32.mrf.mxu1  ;;  %15515 = vst [vmem:[#allocation56_spill] sm:$0xff] %v13821_v57  ;;  %v5122_v31 = vrot.slane %v13821_v57, %v5121_v0 }
 0xb91   : > { %9352 = vmatpush3.msra.mxu0 %v13632_v29  ;;  %9398 = vmatpush3.msra.mxu1 %v7245_v33  ;;  %v5251_v33 = vpop.f32.mrf.mxu0 }
 0xb92   : > { %9353 = vmatprep.subr.mxu0 %v13641_v36  ;;  %9399 = vmatprep.subr.mxu1 %v7364_v5  ;;  %v5490_v11 = vpop.f32.mrf.mxu1  ;;  %v5118_v5 = vrot.slane %v13821_v57, %v5117_v53  ;;  %v5241_v20 = vadd.f32 %v5240_v8, %v5122_v31  ;;  %v5252_v10 = vadd.f32 %v5251_v33, %v5122_v31 }
 0xb93   : > { %9354 = vmatpush3.msra.mxu0 %v13654_v21  ;;  %9400 = vmatpush3.msra.mxu1 %v7252_v51 }
 0xb94   : > { %9355 = vmatprep.subr.mxu0 %v13666_v24  ;;  %9445 = vmatprep.subr.mxu1 %v13371_v62  ;;  %v5239_v14 = vadd.f32 %v5238_v13, %v5118_v5  ;;  %v5250_v47 = vadd.f32 %v5249_v25, %v5118_v5 }
 0xb95   : > { %9356 = vmatpush3.msra.mxu0 %v13674_v38 }
 0xb96   : > { %9357 = vmatprep.subr.mxu0 %v13684_v26  ;;  %v5482_v42 = vadd.f32 %v5481_v48, %v5239_v14  ;;  %v5489_v60 = vadd.f32 %v5488_v37, %v5250_v47 }
 0xb97   : > { %9358 = vmatpush3.msra.mxu0 %v13692_v28 }
 0xb98   : > { %9359 = vmatprep.subr.mxu0 %v13700_v56  ;;  %v5491_v56 = vadd.f32 %v5490_v11, %v5252_v10 }
 0xb99   : > { %9360 = vmatpush3.msra.mxu0 %v13710_v18 }
 0xb9a   : > { %9361 = vmatprep.subr.mxu0 %v13720_v39 }
 0xb9b   : > { %9362 = vmatpush3.msra.mxu0 %v13730_v55  ;;  %v5484_v55 = vadd.f32 %v5483_v49, %v5241_v20 }
 0xb9c   : > { %9407 = vmatprep.subr.mxu0 %v13396_v63 }
 0xba0   : > { %v5739_v44 = vpop.f32.mrf.mxu1 }
 0xba2   : > { %v5741_v63 = vpop.f32.mrf.mxu1 }
 0xba5   : > { %v5748_v52 = vpop.f32.mrf.mxu1 }
 0xba7   : > { %v5750_v62 = vpop.f32.mrf.mxu1 }
 0xbaa   : > { %v5625_v51 = vpop.f32.mrf.mxu0 }
 0xbab   : > { %v5626_v50 = vadd.f32 %v5625_v51, %v5482_v42 }
 0xbac   : > { %v5627_v7 = vpop.f32.mrf.mxu0 }
 0xbad   : > { %v5628_v23 = vadd.f32 %v5627_v7, %v5484_v55  ;;  %v5740_v53 = vadd.f32 %v5739_v44, %v5626_v50 }
 0xbaf   : > { %v5633_v35 = vpop.f32.mrf.mxu0  ;;  %v5742_v32 = vadd.f32 %v5741_v63, %v5628_v23 }
 0xbb0   : > { %v5634_v46 = vadd.f32 %v5633_v35, %v5489_v60 }
 0xbb1   : > { %v5635_v18 = vpop.f32.mrf.mxu0 }
 0xbb2   : > { %v5636_v8 = vadd.f32 %v5635_v18, %v5491_v56  ;;  %v5749_v25 = vadd.f32 %v5748_v52, %v5634_v46 }
 0xbb4   : > { %v5751_v7 = vadd.f32 %v5750_v62, %v5636_v8 }
 0xbc5   : > { %v6027_v39 = vpop.f32.mrf.mxu1 }
 0xbc7   : > { %v6029_v57 = vpop.f32.mrf.mxu1 }
 0xbc9   : > { %v6034_v5 = vpop.f32.mrf.mxu1 }
 0xbcb   : > { %v6036_v49 = vpop.f32.mrf.mxu1 }
 0xbcf   : > { %v5916_v0 = vpop.f32.mrf.mxu0 }
 0xbd0   : > { %v5917_v13 = vadd.f32 %v5916_v0, %v5740_v53 }
 0xbd1   : > { %v5918_v28 = vpop.f32.mrf.mxu0 }
 0xbd2   : > { %v6028_v14 = vadd.f32 %v6027_v39, %v5917_v13  ;;  %v5919_v48 = vadd.f32 %v5918_v28, %v5742_v32 }
 0xbd3   : > { %v5923_v31 = vpop.f32.mrf.mxu0 }
 0xbd4   : > { %v6943_v42 = vmax.f32 %v6028_v14, 0.0  ;;  %v6030_v20 = vadd.f32 %v6029_v57, %v5919_v48  ;;  %v5924_v55 = vadd.f32 %v5923_v31, %v5749_v25  ;;  %v15519_v48 = vld [vmem:[#allocation28_spill] sm:$0xff]  ;;  %v15523_v31 = vld [vmem:[#allocation27_spill] sm:$0xff] }
 0xbd5   : > { %v5925_v60 = vpop.f32.mrf.mxu0 }
 0xbd6   : > { %v13826_v47 = vand.u32 4294901760, %v6943_v42  ;;  %v6944_v50 = vmax.f32 %v6030_v20, 0.0  ;;  %v6035_v10 = vadd.f32 %v6034_v5, %v5924_v55  ;;  %v5926_v35 = vadd.f32 %v5925_v60, %v5751_v7  ;;  %v15520_v5 = vld [vmem:[#allocation30_spill] sm:$0xff]  ;;  %v15522_v20 = vld [vmem:[#allocation45_spill] sm:$0xff]  ;;  %v15524_v55 = vld [vmem:[#allocation20_spill] sm:$0xff] }
 0xbd7   : > { %v15525_v7 = vld [vmem:[#allocation31_spill] sm:$0xff]  ;;  %v15527_v60 = vld [vmem:[#allocation36_spill] sm:$0xff] }
 0xbd8   : > { %15516 = vst [vmem:[#allocation57_spill] sm:$0xff] %v13826_v47  ;;  %v13829_v63 = vsub.f32 %v6943_v42, %v13826_v47  ;;  %v13831_v56 = vand.u32 4294901760, %v6944_v50  ;;  %v6947_v28 = vmax.f32 %v6035_v10, 0.0  ;;  %v6037_v52 = vadd.f32 %v6036_v49, %v5926_v35  ;;  %v15521_v42 = vld [vmem:[#allocation32_spill] sm:$0xff]  ;;  %v15528_v10 = vld [vmem:[#allocation38_spill] sm:$0xff]  ;;  %v15529_v35 = vld [vmem:[#allocation19_spill] sm:$0xff] }
 0xbd9   : > { %v15530_v49 = vld [vmem:[#allocation21_spill] sm:$0xff] }
 0xbda   : > { %v7119_v32 = vand.u32 4294901760, %v13829_v63  ;;  %v7112_v46 = vsub.f32 %v6944_v50, %v13831_v56  ;;  %7367 = vmatprep.mubr.f32.mxu1 %v13831_v56  ;;  %v13836_v62 = vand.u32 4294901760, %v6947_v28  ;;  %v6948_v18 = vmax.f32 %v6037_v52, 0.0  ;;  %v15526_v50 = vld [vmem:[#allocation23_spill] sm:$0xff]  ;;  %v15532_v52 = vld [vmem:[#allocation37_spill] sm:$0xff] }
 0xbdb   : > { %7369 = vmatmul.mubr.f32.vlgmr.msra.gmra.mxu1 %v13826_v47  ;;  %v15547_v47 = vld [vmem:[#allocation50_spill] sm:$0xff] }
 0xbdc   : > { %15517 = vst [vmem:[#allocation58_spill] sm:$0xff] %v13836_v62  ;;  %9446 = vmatpush3.msra.mxu1 %v13373_v58  ;;  %v7113_v39 = vand.u32 4294901760, %v7112_v46  ;;  %v7120_v37 = vsub.f32 %v13829_v63, %v7119_v32  ;;  %v13844_v11 = vsub.f32 %v6947_v28, %v13836_v62  ;;  %v13846_v23 = vand.u32 4294901760, %v6948_v18  ;;  %v15531_v28 = vld [vmem:[#allocation35_spill] sm:$0xff] }
 0xbdd   : > { %9447 = vmatprep.subr.mxu1 %v13378_v59 }
 0xbde   : > { %15518 = vst [vmem:[#allocation59_spill] sm:$0xff] %v13846_v23  ;;  %9448 = vmatpush3.msra.mxu1 %v13380_v3  ;;  %v7114_v57 = vsub.f32 %v7112_v46, %v7113_v39  ;;  %v13851_v44 = vsub.f32 %v6948_v18, %v13846_v23  ;;  %7374 = vmatprep.mubr.f32.mxu1 %v13846_v23  ;;  %v15052_v33 = vand.u32 4294901760, %v13844_v11  ;;  %v7121_v53 = vand.u32 4294901760, %v7120_v37  ;;  %v15534_v18 = vld [vmem:[#allocation29_spill] sm:$0xff]  ;;  %v15536_v37 = vld [vmem:[#allocation22_spill] sm:$0xff] }
 0xbdf   : > { %9449 = vmatprep.subr.mxu1 %v13385_v45  ;;  %7376 = vmatmul.mubr.f32.gmra.mxu1 %v13836_v62  ;;  %v15545_v62 = vld [vmem:[#allocation43_spill] sm:$0xff]  ;;  %v15546_v23 = vld [vmem:[#allocation46_spill] sm:$0xff] }
 0xbe0   : > { %v7115_v51 = vand.u32 4294901760, %v7114_v57  ;;  %9450 = vmatpush3.msra.mxu1 %v13390_v17  ;;  %7627 = vmatprep.mubr.f32.mxu1 %v7113_v39  ;;  %v7128_v0 = vand.u32 4294901760, %v13851_v44  ;;  %v7135_v8 = vsub.f32 %v13844_v11, %v15052_v33  ;;  %v15535_v39 = vld [vmem:[#allocation44_spill] sm:$0xff]  ;;  %v15537_v57 = vld [vmem:[#allocation42_spill] sm:$0xff]  ;;  %v15544_v33 = vld [vmem:[#allocation39_spill] sm:$0xff] }
 0xbe1   : > { %9451 = vmatprep.subr.mxu1 %v13410_v40 }
 0xbe2   : > { %7116 = vmatprep.mubr.f32.mxu0 %v7115_v51  ;;  %9452 = vmatpush3.msra.mxu1 %v13418_v27  ;;  %v7129_v13 = vsub.f32 %v13851_v44, %v7128_v0  ;;  %v7136_v25 = vand.u32 4294901760, %v7135_v8  ;;  %v15538_v51 = vld [vmem:[#allocation47_spill] sm:$0xff]  ;;  %v15541_v8 = vld [vmem:[#allocation33_spill] sm:$0xff] }
 0xbe3   : > { %7122 = vmatmul.mubr.f32.vlgmr.msra.gmra.mxu0 %v7121_v53  ;;  %9453 = vmatprep.subr.mxu1 %v13426_v41  ;;  %v15539_v53 = vld [vmem:[#allocation49_spill] sm:$0xff] }
 0xbe4   : > { %9408 = vmatpush3.msra.mxu0 %v13399_v54  ;;  %9454 = vmatpush3.msra.mxu1 %v13433_v12  ;;  %v7130_v14 = vand.u32 4294901760, %v7129_v13  ;;  %v15540_v13 = vld [vmem:[#allocation48_spill] sm:$0xff] }
 0xbe5   : > { %9409 = vmatprep.subr.mxu0 %v13405_v1  ;;  %9455 = vmatprep.subr.mxu1 %v13443_v9 }
 0xbe6   : > { %9410 = vmatpush3.msra.mxu0 %v15519_v48  ;;  %9456 = vmatpush3.msra.mxu1 %v13452_v4 }
 0xbe7   : > { %7131 = vmatprep.mubr.f32.mxu0 %v7130_v14  ;;  %9411 = vmatprep.subr.mxu0 %v15520_v5  ;;  %v15542_v14 = vld [vmem:[#allocation41_spill] sm:$0xff] }
 0xbe8   : > { %9457 = vmatprep.subr.mxu1 %v13461_v61  ;;  %7137 = vmatmul.mubr.f32.gmra.mxu0 %v7136_v25  ;;  %v15543_v25 = vld [vmem:[#allocation51_spill] sm:$0xff] }
 0xbe9   : > { %9458 = vmatpush3.msra.mxu1 %v13479_v30  ;;  %9412 = vmatpush3.msra.mxu0 %v15521_v42 }
 0xbea   : > { %7511 = vmatprep.mubr.f32.mxu0 %v7112_v46  ;;  %9413 = vmatprep.subr.mxu0 %v15522_v20  ;;  %v15533_v46 = vld [vmem:[#allocation25_spill] sm:$0xff] }
 0xbeb   : > { %9459 = vmatprep.subr.mxu1 %v13510_v6  ;;  %9414 = vmatpush3.msra.mxu0 %v15523_v31 }
 0xbec   : > { %9460 = vmatpush3.msra.mxu1 %v13524_v15  ;;  %9415 = vmatprep.subr.mxu0 %v15524_v55 }
 0xbed   : > { %9461 = vmatprep.subr.mxu1 %v13545_v2  ;;  %9416 = vmatpush3.msra.mxu0 %v15525_v7 }
 0xbee   : > { %9462 = vmatpush3.msra.mxu1 %v13582_v22  ;;  %9417 = vmatprep.subr.mxu0 %v15526_v50 }
 0xbef   : > { %9463 = vmatprep.subr.mxu1 %v13596_v16  ;;  %9418 = vmatpush3.msra.mxu0 %v15527_v60 }
 0xbf0   : > { %9464 = vmatpush3.msra.mxu1 %v13607_v43  ;;  %9419 = vmatprep.subr.mxu0 %v15528_v10 }
 0xbf1   : > { %9465 = vmatprep.subr.mxu1 %v13619_v34  ;;  %9420 = vmatpush3.msra.mxu0 %v15529_v35 }
 0xbf2   : > { %9466 = vmatpush3.msra.mxu1 %v13632_v29  ;;  %9421 = vmatprep.subr.mxu0 %v15530_v49 }
 0xbf3   : > { %9467 = vmatprep.subr.mxu1 %v13641_v36  ;;  %9422 = vmatpush3.msra.mxu0 %v15531_v28 }
 0xbf4   : > { %9468 = vmatpush3.msra.mxu1 %v13654_v21  ;;  %9423 = vmatprep.subr.mxu0 %v15532_v52 }
 0xbf5   : > { %9469 = vmatprep.subr.mxu1 %v13666_v24  ;;  %9424 = vmatpush3.msra.mxu0 %v15533_v46 }
 0xbf6   : > { %9470 = vmatpush3.msra.mxu1 %v13674_v38  ;;  %9425 = vmatprep.subr.mxu0 %v15534_v18 }
 0xbf7   : > { %9471 = vmatprep.subr.mxu1 %v13684_v26  ;;  %9426 = vmatpush3.msra.mxu0 %v13652_v19 }
 0xbf8   : > { %9472 = vmatpush3.msra.mxu1 %v15535_v39  ;;  %9427 = vmatprep.subr.mxu0 %v15536_v37 }
 0xbf9   : > { %9473 = vmatprep.subr.mxu1 %v15537_v57  ;;  %9428 = vmatpush3.msra.mxu0 %v15538_v51 }
 0xbfa   : > { %9474 = vmatpush3.msra.mxu1 %v15539_v53  ;;  %9429 = vmatprep.subr.mxu0 %v15540_v13 }
 0xbfb   : > { %9475 = vmatprep.subr.mxu1 %v15541_v8  ;;  %9430 = vmatpush3.msra.mxu0 %v15542_v14  ;;  %v15548_v8 = vld [vmem:[#allocation40_spill] sm:$0xff] }
 0xbfc   : > { %9476 = vmatpush3.msra.mxu1 %v15543_v25  ;;  %9431 = vmatprep.subr.mxu0 %v15544_v33  ;;  %v15549_v25 = vld [vmem:[#allocation52_spill] sm:$0xff]  ;;  %v15550_v33 = vand.u32 4294901760, %v13844_v11 }
 0xbfd   : > { %7631 = vmatmul.mubr.f32.vlgmr.msra.gmra.mxu1 %v7119_v32  ;;  %9521 = vmatprep.subr.mxu1 %v15545_v62  ;;  %v15551_v32 = vld [vmem:[#allocation53_spill] sm:$0xff]  ;;  %v15552_v62 = vld [vmem:[#allocation54_spill] sm:$0xff] }
 0xbfe   : > { %9432 = vmatpush3.msra.mxu0 %v15546_v23  ;;  %7638 = vmatprep.mubr.f32.mxu1 %v7128_v0 }
 0xbff   : > { %9522 = vmatpush3.msra.mxu1 %v13373_v58  ;;  %9433 = vmatprep.subr.mxu0 %v15547_v47  ;;  %v7014_v58 = vld [vmem:[#allocation10 + $0x1f8] sm:$0xff] }
 0xc00   : > { %9523 = vmatprep.subr.mxu1 %v13378_v59  ;;  %9434 = vmatpush3.msra.mxu0 %v15548_v8  ;;  %v6998_v59 = vld [vmem:[#allocation10 + $0x178] sm:$0xff]  ;;  %v13936_v0 = vand.u32 4294901760, %v7014_v58 }
 0xc01   : > { %9524 = vmatpush3.msra.mxu1 %v13380_v3  ;;  %9435 = vmatprep.subr.mxu0 %v15549_v25  ;;  %v15553_v3 = vld [vmem:[#allocation55_spill] sm:$0xff] }
 0xc02   : > { %7642 = vmatmul.mubr.f32.gmra.mxu1 %v15550_v33  ;;  %9525 = vmatprep.subr.mxu1 %v13385_v45  ;;  %v15554_v33 = vld [vmem:[#allocation34_spill] sm:$0xff]  ;;  %15556 = vst [vmem:[#allocation28_spill] sm:$0xff] %v13936_v0 }
 0xc03   : > { %9436 = vmatpush3.msra.mxu0 %v15551_v32  ;;  %9526 = vmatpush3.msra.mxu1 %v13390_v17  ;;  %v15555_v45 = vand.u32 4294901760, %v15554_v33  ;;  %v7013_v17 = vld [vmem:[#allocation10 + $0x1f0] sm:$0xff] }
 0xc04   : > { %7919 = vmatprep.mubr.f32.mxu1 %v13831_v56  ;;  %9437 = vmatprep.subr.mxu0 %v15552_v62  ;;  %v13940_v62 = vand.u32 4294901760, %v6998_v59  ;;  %v13948_v33 = vand.u32 4294901760, %v7013_v17 }
 0xc05   : > { %9527 = vmatprep.subr.mxu1 %v13410_v40  ;;  %9438 = vmatpush3.msra.mxu0 %v15553_v3  ;;  %v15558_v40 = vand.u32 4294901760, %v13399_v54  ;;  %v15562_v54 = vand.u32 4294901760, %v15520_v5  ;;  %v15566_v5 = vand.u32 4294901760, %v15522_v20  ;;  %v7010_v20 = vld [vmem:[#allocation10 + $0x1d8] sm:$0xff] }
 0xc06   : > { %9528 = vmatpush3.msra.mxu1 %v13418_v27  ;;  %7514 = vmatmul.mubr.f32.vlgmr.msra.gmra.mxu0 %v13829_v63  ;;  %15557 = vst [vmem:[#allocation30_spill] sm:$0xff] %v13940_v62  ;;  %v6997_v27 = vld [vmem:[#allocation10 + $0x170] sm:$0xff]  ;;  %v15559_v63 = vand.u32 4294901760, %v13405_v1  ;;  %v13960_v1 = vsub.f32 %v6998_v59, %v13940_v62 }
 0xc07   : > { %9483 = vmatprep.subr.mxu0 %v15555_v45  ;;  %9529 = vmatprep.subr.mxu1 %v13426_v41  ;;  %v15560_v45 = vand.u32 4294901760, %v15519_v48  ;;  %v13954_v41 = vsub.f32 %v7014_v58, %v13936_v0  ;;  %v7011_v48 = vld [vmem:[#allocation10 + $0x1e0] sm:$0xff] }
 0xc08   : > { %7520 = vmatprep.mubr.f32.mxu0 %v13851_v44  ;;  %9484 = vmatpush3.msra.mxu0 %v15558_v40  ;;  %15563 = vst [vmem:[#allocation45_spill] sm:$0xff] %v13960_v1  ;;  %v7012_v44 = vld [vmem:[#allocation10 + $0x1e8] sm:$0xff]  ;;  %v6995_v58 = vld [vmem:[#allocation10 + $0x160] sm:$0xff] }
 0xc09   : > { %9530 = vmatpush3.msra.mxu1 %v13433_v12  ;;  %9485 = vmatprep.subr.mxu0 %v15559_v63  ;;  %15561 = vst [vmem:[#allocation32_spill] sm:$0xff] %v13954_v41  ;;  %v13962_v12 = vand.u32 4294901760, %v6997_v27  ;;  %v13983_v59 = vand.u32 4294901760, %v7012_v44  ;;  %v15570_v40 = vld [vmem:[#allocation18_spill] sm:$0xff]  ;;  %v15571_v63 = vand.u32 4294901760, %v15524_v55  ;;  %v14008_v55 = vand.u32 4294901760, %v7010_v20 }
 0xc0a   : > { %9531 = vmatprep.subr.mxu1 %v13443_v9  ;;  %9486 = vmatpush3.msra.mxu0 %v15560_v45  ;;  %v15564_v9 = vand.u32 4294901760, %v15521_v42  ;;  %v15567_v42 = vand.u32 4294901760, %v15523_v31  ;;  %v13991_v31 = vand.u32 4294901760, %v7011_v48  ;;  %v15572_v45 = vand.u32 4294901760, %v15525_v7  ;;  %v7009_v7 = vld [vmem:[#allocation10 + $0x1d0] sm:$0xff] }
 0xc0b   : > { %9532 = vmatpush3.msra.mxu1 %v13452_v4  ;;  %7523 = vmatmul.mubr.f32.gmra.mxu0 %v13844_v11  ;;  %v6996_v4 = vld [vmem:[#allocation10 + $0x168] sm:$0xff]  ;;  %v13970_v11 = vsub.f32 %v7013_v17, %v13948_v33  ;;  %15569 = vst [vmem:[#allocation31_spill] sm:$0xff] %v13983_v59 }
 0xc0c   : > { %9487 = vmatprep.subr.mxu0 %v15562_v54  ;;  %9533 = vmatprep.subr.mxu1 %v13461_v61  ;;  %v15061_v61 = vand.u32 4294901760, %v13954_v41  ;;  %v13985_v17 = vand.u32 4294901760, %v6996_v4  ;;  %v13998_v54 = vand.u32 4294901760, %v6995_v58 }
 0xc0d   : > { %9488 = vmatpush3.msra.mxu0 %v15564_v9  ;;  %7808 = vmatprep.mubr.f32.mxu0 %v13831_v56  ;;  %15565 = vst [vmem:[#allocation27_spill] sm:$0xff] %v13970_v11  ;;  %v15059_v56 = vand.u32 4294901760, %v13960_v1  ;;  %v6994_v9 = vld [vmem:[#allocation10 + $0x158] sm:$0xff] }
 0xc0e   : > { %9534 = vmatpush3.msra.mxu1 %v13479_v30  ;;  %9489 = vmatprep.subr.mxu0 %v15566_v5  ;;  %v13981_v30 = vsub.f32 %v6997_v27, %v13962_v12  ;;  %v15060_v27 = vand.u32 4294901760, %v13970_v11  ;;  %v15573_v5 = vand.u32 4294901760, %v15526_v50 }
 0xc0f   : > { %9535 = vmatprep.subr.mxu1 %v13510_v6  ;;  %9490 = vmatpush3.msra.mxu0 %v15567_v42  ;;  %v5125_v6 = vsub.s32 2, %v15570_v40  ;;  %v14016_v50 = vsub.f32 %v13960_v1, %v15059_v56  ;;  %v14020_v42 = vsub.f32 %v7012_v44, %v13983_v59  ;;  %v14034_v56 = vand.u32 4294901760, %v6994_v9  ;;  %v6988_v1 = vld [vmem:[#allocation10 + $0x128] sm:$0xff] }
 0xc10   : > { %9536 = vmatpush3.msra.mxu1 %v13524_v15  ;;  %15568 = vst [vmem:[#allocation20_spill] sm:$0xff] %v13981_v30  ;;  %9491 = vmatprep.subr.mxu0 %v15571_v63  ;;  %v5129_v15 = vsub.s32 3, %v15570_v40  ;;  %v14023_v40 = vsub.f32 %v6996_v4, %v13985_v17  ;;  %v6993_v63 = vld [vmem:[#allocation10 + $0x150] sm:$0xff]  ;;  %v15580_v4 = vand.u32 4294901760, %v15529_v35  ;;  %v14074_v35 = vpop.f32.mrf.mxu1 }
 0xc11   : > { %9537 = vmatprep.subr.mxu1 %v13545_v2  ;;  %9492 = vmatpush3.msra.mxu0 %v15572_v45  ;;  %v14006_v2 = vsub.f32 %v13954_v41, %v15061_v61  ;;  %15575 = vst [vmem:[#allocation23_spill] sm:$0xff] %v14020_v42  ;;  %v7008_v45 = vld [vmem:[#allocation10 + $0x1c8] sm:$0xff]  ;;  %v7006_v61 = vld [vmem:[#allocation10 + $0x1b8] sm:$0xff] }
 0xc12   : > { %9538 = vmatpush3.msra.mxu1 %v13582_v22  ;;  %9493 = vmatprep.subr.mxu0 %v15573_v5  ;;  %v15574_v22 = vand.u32 4294901760, %v15527_v60  ;;  %15576 = vst [vmem:[#allocation36_spill] sm:$0xff] %v14023_v40  ;;  %v15577_v5 = vld [vmem:[#allocation56_spill] sm:$0xff] }
 0xc13   : > { %9539 = vmatprep.subr.mxu1 %v13596_v16  ;;  %v15064_v16 = vand.u32 4294901760, %v13981_v30  ;;  %v14026_v60 = vrot.slane %v15577_v5, %v5125_v6  ;;  %v14037_v44 = vrot.slane %v15577_v5, %v5129_v15  ;;  %v6992_v6 = vld [vmem:[#allocation10 + $0x148] sm:$0xff]  ;;  %v15582_v15 = vand.u32 4294901760, %v15530_v49  ;;  %v6990_v49 = vld [vmem:[#allocation10 + $0x138] sm:$0xff] }
 0xc14   : > { %9494 = vmatpush3.msra.mxu0 %v15574_v22  ;;  %9540 = vmatpush3.msra.mxu1 %v13607_v43  ;;  %v15578_v43 = vand.u32 4294901760, %v15528_v10  ;;  %v14032_v22 = vsub.f32 %v7011_v48, %v13991_v31  ;;  %v14045_v10 = vsub.f32 %v13970_v11, %v15060_v27  ;;  %v14050_v48 = vand.u32 4294901760, %v7009_v7 }
 0xc15   : > { %9541 = vmatprep.subr.mxu1 %v13619_v34  ;;  %v14048_v34 = vsub.f32 %v6995_v58, %v13998_v54  ;;  %v14059_v5 = vand.u32 4294901760, %v6993_v63  ;;  %v6991_v58 = vld [vmem:[#allocation10 + $0x140] sm:$0xff]  ;;  %v15584_v27 = vand.u32 4294901760, %v15531_v28  ;;  %v15585_v11 = vand.u32 4294901760, %v15532_v52  ;;  %v7005_v52 = vld [vmem:[#allocation10 + $0x1b0] sm:$0xff] }
 0xc16   : > { %9495 = vmatprep.subr.mxu0 %v15578_v43  ;;  %15579 = vst [vmem:[#allocation38_spill] sm:$0xff] %v14032_v22  ;;  %9542 = vmatpush3.msra.mxu1 %v13632_v29  ;;  %v7007_v43 = vld [vmem:[#allocation10 + $0x1c0] sm:$0xff]  ;;  %v14057_v29 = vsub.f32 %v7010_v20, %v14008_v55  ;;  %v14081_v28 = vsub.f32 %v6994_v9, %v14034_v56  ;;  %v15592_v9 = vand.u32 4294901760, %v15534_v18  ;;  %v14123_v20 = vand.u32 4294901760, %v6990_v49  ;;  %v15609_v18 = vld [vmem:[#allocation33_spill] sm:$0xff] }
 0xc17   : > { %9496 = vmatpush3.msra.mxu0 %v15580_v4  ;;  %15581 = vst [vmem:[#allocation19_spill] sm:$0xff] %v14048_v34  ;;  %9543 = vmatprep.subr.mxu1 %v13641_v36  ;;  %v14061_v4 = vand.u32 4294901760, %v7008_v45  ;;  %v14070_v36 = vsub.f32 %v13981_v30, %v15064_v16  ;;  %v14085_v16 = vand.u32 4294901760, %v7007_v43  ;;  %v15604_v30 = vand.u32 4294901760, %v15538_v51 }
 0xc18   : > { %9497 = vmatprep.subr.mxu0 %v15582_v15  ;;  %15583 = vst [vmem:[#allocation21_spill] sm:$0xff] %v14057_v29  ;;  %9544 = vmatpush3.msra.mxu1 %v13654_v21  ;;  %15586 = vst [vmem:[#allocation35_spill] sm:$0xff] %v14081_v28  ;;  %v15589_v15 = vand.u32 4294901760, %v15533_v46  ;;  %v14095_v21 = vand.u32 4294901760, %v6991_v58  ;;  %v14102_v46 = vsub.f32 %v6993_v63, %v14059_v5  ;;  %v15598_v63 = vand.u32 4294901760, %v14023_v40 }
 0xc19   : > { %9498 = vmatpush3.msra.mxu0 %v15584_v27  ;;  %9545 = vmatprep.subr.mxu1 %v13666_v24  ;;  %v14083_v27 = vand.u32 4294901760, %v6992_v6  ;;  %15588 = vst [vmem:[#allocation25_spill] sm:$0xff] %v14085_v16  ;;  %v14093_v24 = vsub.f32 %v7009_v7, %v14050_v48  ;;  %v15596_v7 = vand.u32 4294901760, %v13652_v19  ;;  %15599 = vst [vmem:[#allocation49_spill] sm:$0xff] %v14123_v20  ;;  %v14127_v19 = vpop.f32.mrf.mxu0  ;;  %v15610_v51 = vand.u32 4294901760, %v14057_v29 }
 0xc1a   : > { %9499 = vmatprep.subr.mxu0 %v15585_v11  ;;  %9546 = vmatpush3.msra.mxu1 %v13674_v38  ;;  %15591 = vst [vmem:[#allocation44_spill] sm:$0xff] %v14095_v21  ;;  %15593 = vst [vmem:[#allocation22_spill] sm:$0xff] %v14102_v46  ;;  %v14105_v38 = vsub.f32 %v7008_v45, %v14061_v4  ;;  %v14121_v45 = vsub.f32 %v14023_v40, %v15598_v63  ;;  %v14125_v11 = vpop.f32.mrf.mxu1  ;;  %v15620_v41 = vand.u32 4294901760, %v14006_v2 }
 0xc1b   : > { %15587 = vst [vmem:[#allocation37_spill] sm:$0xff] %v14083_v27  ;;  %9500 = vmatpush3.msra.mxu0 %v15589_v15  ;;  %15590 = vst [vmem:[#allocation29_spill] sm:$0xff] %v14093_v24  ;;  %9547 = vmatprep.subr.mxu1 %v13684_v26  ;;  %v14107_v15 = vand.u32 4294901760, %v7006_v61  ;;  %v15597_v26 = vand.u32 4294901760, %v14020_v42  ;;  %v14139_v63 = vsub.f32 %v6992_v6, %v14083_v27  ;;  %v14156_v6 = vand.u32 4294901760, %v7005_v52 }
 0xc1c   : > { %9501 = vmatprep.subr.mxu0 %v15592_v9  ;;  %15594 = vst [vmem:[#allocation42_spill] sm:$0xff] %v14105_v38  ;;  %9548 = vmatpush3.msra.mxu1 %v15535_v39  ;;  %v15600_v39 = vand.u32 4294901760, %v15536_v37  ;;  %v14142_v40 = vsub.f32 %v7007_v43, %v14085_v16  ;;  %v15605_v37 = vand.u32 4294901760, %v14048_v34  ;;  %v15608_v43 = vand.u32 4294901760, %v15540_v13 }
 0xc1d   : > { %15595 = vst [vmem:[#allocation47_spill] sm:$0xff] %v14107_v15  ;;  %9502 = vmatpush3.msra.mxu0 %v15596_v7  ;;  %v14116_v9 = vsub.f32 %v14020_v42, %v15597_v26  ;;  %9549 = vmatprep.subr.mxu1 %v15537_v57  ;;  %v15601_v7 = vand.u32 4294901760, %v14032_v22  ;;  %15602 = vst [vmem:[#allocation48_spill] sm:$0xff] %v14139_v63  ;;  %v6989_v42 = vld [vmem:[#allocation10 + $0x130] sm:$0xff]  ;;  %v15626_v2 = vand.u32 4294901760, %v14102_v46 }
 0xc1e   : > { %9503 = vmatprep.subr.mxu0 %v15600_v39  ;;  %15603 = vst [vmem:[#allocation41_spill] sm:$0xff] %v14142_v40  ;;  %9550 = vmatpush3.msra.mxu1 %v15539_v53  ;;  %v14150_v57 = vsub.f32 %v14048_v34, %v15605_v37  ;;  %15607 = vst [vmem:[#allocation46_spill] sm:$0xff] %v14156_v6  ;;  %v14164_v53 = vsub.f32 %v14057_v29, %v15610_v51  ;;  %v15613_v34 = vld [vmem:[#allocation51_spill] sm:$0xff]  ;;  %v14179_v51 = vand.u32 4294901760, %v6989_v42  ;;  %v14183_v37 = vpop.f32.mrf.mxu0 }
 0xc1f   : > { %v14135_v26 = vsub.f32 %v14032_v22, %v15601_v7  ;;  %9504 = vmatpush3.msra.mxu0 %v15604_v30  ;;  %v14154_v7 = vsub.f32 %v6991_v58, %v14095_v21  ;;  %9551 = vmatprep.subr.mxu1 %v15609_v18  ;;  %v14169_v39 = vsub.f32 %v7006_v61, %v14107_v15  ;;  %v15612_v58 = vand.u32 4294901760, %v15542_v14  ;;  %v14181_v30 = vpop.f32.mrf.mxu1  ;;  %v15616_v61 = vld [vmem:[#allocation39_spill] sm:$0xff]  ;;  %v15618_v14 = vld [vmem:[#allocation57_spill] sm:$0xff]  ;;  %v15641_v21 = vld [vmem:[#allocation54_spill] sm:$0xff] }
 0xc20   : > { %9505 = vmatprep.subr.mxu0 %v15608_v43  ;;  %9552 = vmatpush3.msra.mxu1 %v15613_v34  ;;  %v8191_v13 = vand.u32 4294901760, %v14116_v9  ;;  %v8079_v18 = vand.u32 4294901760, %v14121_v45  ;;  %v14177_v43 = vsub.f32 %v6990_v49, %v14123_v20  ;;  %15615 = vst [vmem:[#allocation52_spill] sm:$0xff] %v14179_v51  ;;  %v15617_v29 = vand.u32 4294901760, %v15616_v61  ;;  %v7004_v22 = vld [vmem:[#allocation10 + $0x1a8] sm:$0xff] }
 0xc21   : > { %15606 = vst [vmem:[#allocation43_spill] sm:$0xff] %v14154_v7  ;;  %15611 = vst [vmem:[#allocation50_spill] sm:$0xff] %v14169_v39  ;;  %9506 = vmatpush3.msra.mxu0 %v15612_v58  ;;  %7921 = vmatmul.mubr.f32.vlgmr.msra.gmra.mxu1 %v15618_v14  ;;  %v8198_v34 = vand.u32 4294901760, %v14135_v26  ;;  %v15619_v9 = vand.u32 4294901760, %v14081_v28  ;;  %v8086_v61 = vand.u32 4294901760, %v14150_v57  ;;  %v15622_v26 = vand.u32 4294901760, %v14093_v24 }
 0xc22   : > { %15614 = vst [vmem:[#allocation40_spill] sm:$0xff] %v14177_v43  ;;  %9507 = vmatprep.subr.mxu0 %v15617_v29  ;;  %9597 = vmatprep.subr.mxu1 %v15620_v41  ;;  %v15621_v29 = vand.u32 4294901760, %v15546_v23  ;;  %v14208_v49 = vsub.f32 %v7005_v52, %v14156_v6  ;;  %v7003_v58 = vld [vmem:[#allocation10 + $0x1a0] sm:$0xff]  ;;  %v15625_v41 = vand.u32 4294901760, %v14016_v50  ;;  %v8205_v23 = vand.u32 4294901760, %v14164_v53  ;;  %v14239_v52 = vpop.f32.mrf.mxu0 }
 0xc23   : > { %v14192_v45 = vsub.f32 %v14081_v28, %v15619_v9  ;;  %v14204_v20 = vsub.f32 %v14093_v24, %v15622_v26  ;;  %v15624_v28 = vld [vmem:[#allocation59_spill] sm:$0xff]  ;;  %v14217_v57 = vsub.f32 %v14102_v46, %v15626_v2  ;;  %v6987_v9 = vld [vmem:[#allocation10 + $0x120] sm:$0xff]  ;;  %v15628_v24 = vand.u32 4294901760, %v15547_v47 }
 0xc24   : > { %9508 = vmatpush3.msra.mxu0 %v15621_v29  ;;  %15623 = vst [vmem:[#allocation53_spill] sm:$0xff] %v14208_v49  ;;  %7926 = vmatprep.mubr.f32.mxu1 %v15624_v28  ;;  %v15627_v29 = vand.u32 4294901760, %v14105_v38  ;;  %v15629_v50 = vand.u32 4294901760, %v14045_v10  ;;  %v14233_v2 = vand.u32 4294901760, %v7004_v22  ;;  %v14235_v46 = vand.u32 4294901760, %v6988_v1  ;;  %v14297_v27 = vpop.f32.mrf.mxu0 }
 0xc25   : > { %9598 = vmatpush3.msra.mxu1 %v15625_v41  ;;  %9509 = vmatprep.subr.mxu0 %v15628_v24  ;;  %v14231_v41 = vsub.f32 %v6989_v42, %v14179_v51  ;;  %v15631_v47 = vand.u32 4294901760, %v15548_v8  ;;  %v15632_v10 = vand.u32 4294901760, %v14070_v36  ;;  %v8093_v24 = vand.u32 4294901760, %v14192_v45 }
 0xc26   : > { %v14222_v26 = vsub.f32 %v14105_v38, %v15627_v29  ;;  %9599 = vmatprep.subr.mxu1 %v15629_v50  ;;  %v7002_v29 = vld [vmem:[#allocation10 + $0x198] sm:$0xff]  ;;  %v14237_v38 = vpop.f32.mrf.mxu1  ;;  %v15633_v42 = vand.u32 4294901760, %v14139_v63  ;;  %v15634_v53 = vand.u32 4294901760, %v14142_v40  ;;  %v14256_v6 = vand.u32 4294901760, %v7003_v58 }
 0xc27   : > { %15630 = vst [vmem:[#allocation55_spill] sm:$0xff] %v14231_v41  ;;  %9510 = vmatpush3.msra.mxu0 %v15631_v47  ;;  %9600 = vmatpush3.msra.mxu1 %v15632_v10  ;;  %v15635_v8 = vand.u32 4294901760, %v15549_v25  ;;  %v15636_v47 = vld [vmem:[#allocation58_spill] sm:$0xff]  ;;  %v8212_v36 = vand.u32 4294901760, %v14204_v20  ;;  %v15637_v45 = vand.u32 4294901760, %v14154_v7  ;;  %v15638_v25 = vand.u32 4294901760, %v15551_v32 }
 0xc28   : > { %v14249_v50 = vsub.f32 %v14139_v63, %v15633_v42  ;;  %v14254_v51 = vsub.f32 %v14142_v40, %v15634_v53  ;;  %7928 = vmatmul.mubr.f32.gmra.mxu1 %v15636_v47  ;;  %v14268_v63 = vand.u32 4294901760, %v6987_v9  ;;  %v6986_v53 = vld [vmem:[#allocation10 + $0x118] sm:$0xff]  ;;  %v14270_v40 = vpop.f32.mrf.mxu1  ;;  %9601 = vmatprep.subr.mxu1 %v8191_v13  ;;  %v15639_v15 = vand.u32 4294901760, %v14169_v39  ;;  %v7001_v42 = vld [vmem:[#allocation10 + $0x190] sm:$0xff] }
 0xc29   : > { %9511 = vmatprep.subr.mxu0 %v15635_v8  ;;  %v14265_v10 = vsub.f32 %v14154_v7, %v15637_v45  ;;  %v8100_v8 = vand.u32 4294901760, %v14217_v57  ;;  %v14281_v7 = vand.u32 4294901760, %v7002_v29  ;;  %9602 = vmatpush3.msra.mxu1 %v8079_v18  ;;  %v15642_v16 = vand.u32 4294901760, %v15641_v21  ;;  %v6985_v20 = vld [vmem:[#allocation10 + $0x110] sm:$0xff] }
 0xc2a   : > { %9512 = vmatpush3.msra.mxu0 %v15638_v25  ;;  %v14279_v45 = vsub.f32 %v14169_v39, %v15639_v15  ;;  %v15643_v13 = vand.u32 4294901760, %v14177_v43  ;;  %v14292_v25 = vsub.f32 %v7004_v22, %v14233_v2  ;;  %v14295_v15 = vsub.f32 %v6988_v1, %v14235_v46  ;;  %v7000_v39 = vld [vmem:[#allocation10 + $0x188] sm:$0xff]  ;;  %9603 = vmatprep.subr.mxu1 %v8198_v34 }
 0xc2b   : > { %15640 = vst [vmem:[#allocation34_spill] sm:$0xff] %v14281_v7  ;;  %9513 = vmatprep.subr.mxu0 %v15642_v16  ;;  %v15645_v16 = vand.u32 4294901760, %v15553_v3  ;;  %v8107_v21 = vand.u32 4294901760, %v14249_v50  ;;  %v8226_v18 = vand.u32 4294901760, %v14254_v51  ;;  %v14306_v22 = vand.u32 4294901760, %v6986_v53  ;;  %9604 = vmatpush3.msra.mxu1 %v8086_v61  ;;  %v6984_v51 = vld [vmem:[#allocation10 + $0x108] sm:$0xff] }
 0xc2c   : > { %v14288_v32 = vsub.f32 %v14177_v43, %v15643_v13  ;;  %15644 = vst [vmem:[#allocation18_spill] sm:$0xff] %v14295_v15  ;;  %v14304_v13 = vsub.f32 %v7003_v58, %v14256_v6  ;;  %v8114_v1 = vand.u32 4294901760, %v14265_v10  ;;  %v15648_v57 = vand.u32 4294901760, %v14208_v49  ;;  %v6999_v58 = vld [vmem:[#allocation10 + $0x180] sm:$0xff]  ;;  %v6529_v43 = vpop.f32.mrf.mxu0  ;;  %9605 = vmatprep.subr.mxu1 %v8205_v23 }
 0xc2d   : > { %9514 = vmatpush3.msra.mxu0 %v15645_v16  ;;  %15647 = vst [vmem:[#allocation33_spill] sm:$0xff] %v14306_v22  ;;  %v14316_v3 = vsub.f32 %v6987_v9, %v14268_v63  ;;  %v14318_v50 = vand.u32 4294901760, %v7001_v42  ;;  %v14320_v16 = vpop.f32.mrf.mxu1  ;;  %v14325_v61 = vsub.f32 %v7002_v29, %v14281_v7  ;;  %v14327_v10 = vand.u32 4294901760, %v6985_v20  ;;  %9606 = vmatpush3.msra.mxu1 %v8093_v24 }
 0xc2e   : > { %15646 = vst [vmem:[#allocation56_spill] sm:$0xff] %v14304_v13  ;;  %7810 = vmatmul.mubr.f32.vlgmr.msra.gmra.mxu0 %v15618_v14  ;;  %v14313_v34 = vsub.f32 %v14208_v49, %v15648_v57  ;;  %9559 = vmatprep.subr.mxu0 %v13936_v0  ;;  %v8233_v14 = vand.u32 4294901760, %v14279_v45  ;;  %v14329_v57 = vand.u32 4294901760, %v7000_v39  ;;  %v8121_v9 = vand.u32 4294901760, %v14288_v32  ;;  %v6983_v45 = vld [vmem:[#allocation10 + $0x100] sm:$0xff] }
 0xc2f   : > { %15649 = vst [vmem:[#allocation51_spill] sm:$0xff] %v14316_v3  ;;  %15650 = vst [vmem:[#allocation39_spill] sm:$0xff] %v14327_v10  ;;  %7815 = vmatprep.mubr.f32.mxu0 %v15624_v28  ;;  %9560 = vmatpush3.msra.mxu0 %v13940_v62  ;;  %v15651_v49 = vand.u32 4294901760, %v14231_v41  ;;  %v14344_v28 = vsub.f32 %v6986_v53, %v14306_v22  ;;  %v14346_v62 = vand.u32 4294901760, %v6984_v51  ;;  %v14348_v32 = vand.u32 4294901760, %v6999_v58  ;;  %v14358_v7 = vpop.f32.mrf.mxu1  ;;  %v6531_v53 = vpop.f32.mrf.mxu0 }
 0xc30   : > { %9561 = vmatprep.subr.mxu0 %v13948_v33  ;;  %9607 = vmatprep.subr.mxu1 %v8212_v36  ;;  %v8240_v29 = vand.u32 4294901760, %v14313_v34  ;;  %v14356_v23 = vsub.f32 %v7001_v42, %v14318_v50  ;;  %v14366_v36 = vsub.f32 %v7000_v39, %v14329_v57  ;;  %v14368_v34 = vand.u32 4294901760, %v6983_v45 }
 0xc31   : > { %v14337_v0 = vsub.f32 %v14231_v41, %v15651_v49  ;;  %v6143_v49 = vadd.f32 %v14127_v19, %v14026_v60  ;;  %9562 = vmatpush3.msra.mxu0 %v13962_v12  ;;  %9608 = vmatpush3.msra.mxu1 %v8100_v8  ;;  %v14363_v19 = vsub.f32 %v6985_v20, %v14327_v10  ;;  %v15652_v24 = vand.u32 4294901760, %v14222_v26 }
 0xc32   : > { %7817 = vmatmul.mubr.f32.gmra.mxu0 %v15636_v47  ;;  %v6145_v42 = vadd.f32 %v14183_v37, %v14037_v44  ;;  %9563 = vmatprep.subr.mxu0 %v13983_v59  ;;  %v15653_v8 = vand.u32 4294901760, %v14292_v25  ;;  %v15654_v41 = vand.u32 4294901760, %v14295_v15  ;;  %v15655_v37 = vand.u32 4294901760, %v14304_v13 }
 0xc33   : > { %9609 = vmatprep.subr.mxu1 %v15652_v24  ;;  %v8128_v47 = vand.u32 4294901760, %v14337_v0  ;;  %9564 = vmatpush3.msra.mxu0 %v13985_v17  ;;  %v14388_v24 = vsub.f32 %v6984_v51, %v14346_v62  ;;  %v14391_v0 = vsub.f32 %v6999_v58, %v14348_v32  ;;  %v6537_v51 = vpop.f32.mrf.mxu0  ;;  %v15659_v58 = vand.u32 4294901760, %v14325_v61 }
 0xc34   : > { %v8246_v20 = vsub.f32 %v14292_v25, %v15653_v8  ;;  %v8134_v39 = vsub.f32 %v14295_v15, %v15654_v41  ;;  %9610 = vmatpush3.msra.mxu1 %v8107_v21  ;;  %v8253_v59 = vsub.f32 %v14304_v13, %v15655_v37  ;;  %v6154_v8 = vadd.f32 %v14239_v52, %v14026_v60  ;;  %v14401_v13 = vpop.f32.mrf.mxu1 }
 0xc35   : > { %15656 = vst [vmem:[#allocation57_spill] sm:$0xff] %v14388_v24  ;;  %15657 = vst [vmem:[#allocation59_spill] sm:$0xff] %v14391_v0  ;;  %v6386_v41 = vadd.f32 %v14074_v35, %v6143_v49  ;;  %9565 = vmatprep.subr.mxu0 %v13991_v31  ;;  %9611 = vmatprep.subr.mxu1 %v8226_v18  ;;  %v15658_v21 = vand.u32 4294901760, %v14316_v3  ;;  %v8260_v60 = vsub.f32 %v14325_v61, %v15659_v58 }
 0xc36   : > { %9566 = vmatpush3.msra.mxu0 %v13998_v54  ;;  %9612 = vmatpush3.msra.mxu1 %v8114_v1  ;;  %v14410_v18 = vsub.f32 %v6983_v45, %v14368_v34  ;;  %v6156_v49 = vadd.f32 %v14297_v27, %v14037_v44  ;;  %v6388_v26 = vadd.f32 %v14125_v11, %v6145_v42  ;;  %v8247_v1 = vand.u32 4294901760, %v8246_v20  ;;  %v6539_v42 = vpop.f32.mrf.mxu0 }
 0xc37   : > { %v8141_v37 = vsub.f32 %v14316_v3, %v15658_v21  ;;  %v6530_v21 = vadd.f32 %v6529_v43, %v6386_v41  ;;  %9567 = vmatprep.subr.mxu0 %v14008_v55  ;;  %9613 = vmatprep.subr.mxu1 %v8233_v14  ;;  %v6931_v3 = vpop.f32.mrf.mxu1  ;;  %v8135_v58 = vand.u32 4294901760, %v8134_v39  ;;  %v15660_v52 = vand.u32 4294901760, %v14344_v28 }
 0xc38   : > { %9568 = vmatpush3.msra.mxu0 %v14034_v56  ;;  %9614 = vmatpush3.msra.mxu1 %v8121_v9  ;;  %v15129_v35 = vand.u32 4294901760, %v14388_v24  ;;  %v15132_v44 = vand.u32 4294901760, %v14391_v0  ;;  %v6532_v27 = vadd.f32 %v6531_v53, %v6388_v26  ;;  %v6393_v11 = vadd.f32 %v14181_v30, %v6154_v8 }
 0xc39   : > { %v8148_v45 = vsub.f32 %v14344_v28, %v15660_v52  ;;  %9569 = vmatprep.subr.mxu0 %v14050_v48  ;;  %9615 = vmatprep.subr.mxu1 %v8240_v29  ;;  %v8254_v43 = vand.u32 4294901760, %v8253_v59  ;;  %v15661_v14 = vand.u32 4294901760, %v14356_v23  ;;  %v8142_v20 = vand.u32 4294901760, %v8141_v37  ;;  %v6933_v37 = vpop.f32.mrf.mxu1 }
 0xc3a   : > { %9570 = vmatpush3.msra.mxu0 %v14059_v5  ;;  %9616 = vmatpush3.msra.mxu1 %v8128_v47  ;;  %v15662_v39 = vand.u32 4294901760, %v14363_v19  ;;  %v15663_v53 = vand.u32 4294901760, %v14366_v36  ;;  %v15135_v29 = vand.u32 4294901760, %v14410_v18  ;;  %v6538_v59 = vadd.f32 %v6537_v51, %v6393_v11  ;;  %v6820_v52 = vpop.f32.mrf.mxu0  ;;  %v15666_v11 = vld [vmem:[#allocation44_spill] sm:$0xff] }
 0xc3b   : > { %v8267_v9 = vsub.f32 %v14356_v23, %v15661_v14  ;;  %v6395_v26 = vadd.f32 %v14237_v38, %v6156_v49  ;;  %9571 = vmatprep.subr.mxu0 %v14061_v4  ;;  %9617 = vmatprep.subr.mxu1 %v8247_v1  ;;  %v6644_v8 = vadd.f32 %v14270_v40, %v6530_v21  ;;  %v8261_v47 = vand.u32 4294901760, %v8260_v60  ;;  %v15664_v14 = vld [vmem:[#allocation37_spill] sm:$0xff] }
 0xc3c   : > { %v8155_v41 = vsub.f32 %v14363_v19, %v15662_v39  ;;  %v8274_v30 = vsub.f32 %v14366_v36, %v15663_v53  ;;  %9572 = vmatpush3.msra.mxu0 %v15664_v14  ;;  %9618 = vmatpush3.msra.mxu1 %v8135_v58  ;;  %v8149_v39 = vand.u32 4294901760, %v8148_v45  ;;  %v8162_v53 = vsub.f32 %v14388_v24, %v15129_v35  ;;  %v15665_v1 = vld [vmem:[#allocation25_spill] sm:$0xff]  ;;  %v6822_v21 = vpop.f32.mrf.mxu0 }
 0xc3d   : > { %v8281_v38 = vsub.f32 %v14391_v0, %v15132_v44  ;;  %v6540_v51 = vadd.f32 %v6539_v42, %v6395_v26  ;;  %v6821_v49 = vadd.f32 %v6820_v52, %v6644_v8  ;;  %9573 = vmatprep.subr.mxu0 %v15665_v1  ;;  %9619 = vmatprep.subr.mxu1 %v8254_v43  ;;  %v8268_v60 = vand.u32 4294901760, %v8267_v9  ;;  %v15667_v44 = vld [vmem:[#allocation47_spill] sm:$0xff]  ;;  %v6938_v26 = vpop.f32.mrf.mxu1  ;;  %v15669_v0 = vld [vmem:[#allocation46_spill] sm:$0xff] }
 0xc3e   : > { %v6646_v40 = vadd.f32 %v14320_v16, %v6532_v27  ;;  %9574 = vmatpush3.msra.mxu0 %v15666_v11  ;;  %9620 = vmatpush3.msra.mxu1 %v8142_v20  ;;  %v8156_v58 = vand.u32 4294901760, %v8155_v41  ;;  %v8169_v45 = vsub.f32 %v14410_v18, %v15135_v29  ;;  %v6653_v42 = vadd.f32 %v14358_v7, %v6538_v59  ;;  %v6827_v16 = vpop.f32.mrf.mxu0  ;;  %v15668_v27 = vld [vmem:[#allocation49_spill] sm:$0xff]  ;;  %v15691_v29 = vld [vmem:[#allocation48_spill] sm:$0xff] }
 0xc3f   : > { %v6932_v35 = vadd.f32 %v6931_v3, %v6821_v49  ;;  %9575 = vmatprep.subr.mxu0 %v15667_v44  ;;  %9621 = vmatprep.subr.mxu1 %v8261_v47  ;;  %v8275_v43 = vand.u32 4294901760, %v8274_v30  ;;  %v8163_v9 = vand.u32 4294901760, %v8162_v53  ;;  %v8282_v20 = vand.u32 4294901760, %v8281_v38  ;;  %v15670_v47 = vld [vmem:[#allocation52_spill] sm:$0xff] }
 0xc40   : > { %v6823_v24 = vadd.f32 %v6822_v21, %v6646_v40  ;;  %9576 = vmatpush3.msra.mxu0 %v15668_v27  ;;  %9622 = vmatpush3.msra.mxu1 %v8149_v39  ;;  %v6828_v52 = vadd.f32 %v6827_v16, %v6653_v42  ;;  %v6655_v3 = vadd.f32 %v14401_v13, %v6540_v51  ;;  %v6829_v49 = vpop.f32.mrf.mxu0  ;;  %v8170_v7 = vand.u32 4294901760, %v8169_v45  ;;  %v15673_v21 = vld [vmem:[#allocation34_spill] sm:$0xff] }
 0xc41   : > { %v6945_v41 = vmax.f32 %v6932_v35, 0.0  ;;  %9577 = vmatprep.subr.mxu0 %v15669_v0  ;;  %9623 = vmatprep.subr.mxu1 %v8268_v60  ;;  %v15676_v16 = vld [vmem:[#allocation30_spill] sm:$0xff] }
 0xc42   : > { %v6934_v8 = vadd.f32 %v6933_v37, %v6823_v24  ;;  %9578 = vmatpush3.msra.mxu0 %v15670_v47  ;;  %9624 = vmatpush3.msra.mxu1 %v8156_v58  ;;  %v6939_v40 = vadd.f32 %v6938_v26, %v6828_v52  ;;  %v6830_v39 = vadd.f32 %v6829_v49, %v6655_v3  ;;  %v6940_v24 = vpop.f32.mrf.mxu1  ;;  %v15674_v58 = vld [vmem:[#allocation28_spill] sm:$0xff] }
 0xc43   : > { %v14457_v30 = vand.u32 4294901760, %v6945_v41  ;;  %9579 = vmatprep.subr.mxu0 %v14233_v2  ;;  %9625 = vmatprep.subr.mxu1 %v8275_v43 }
 0xc44   : > { %v6946_v59 = vmax.f32 %v6934_v8, 0.0  ;;  %9580 = vmatpush3.msra.mxu0 %v14235_v46  ;;  %9626 = vmatpush3.msra.mxu1 %v8163_v9  ;;  %v6949_v37 = vmax.f32 %v6939_v40, 0.0  ;;  %v6941_v53 = vadd.f32 %v6940_v24, %v6830_v39  ;;  %v15677_v8 = vld [vmem:[#allocation31_spill] sm:$0xff]  ;;  %v15678_v40 = vld [vmem:[#allocation32_spill] sm:$0xff] }
 0xc45   : > { %15671 = vst [vmem:[#allocation58_spill] sm:$0xff] %v14457_v30  ;;  %v14462_v35 = vsub.f32 %v6945_v41, %v14457_v30  ;;  %9581 = vmatprep.subr.mxu0 %v14256_v6  ;;  %9627 = vmatprep.subr.mxu1 %v8282_v20 }
 0xc46   : > { %v14464_v13 = vand.u32 4294901760, %v6946_v59  ;;  %9582 = vmatpush3.msra.mxu0 %v14268_v63  ;;  %9628 = vmatpush3.msra.mxu1 %v8170_v7  ;;  %v14469_v51 = vand.u32 4294901760, %v6949_v37  ;;  %v6950_v60 = vmax.f32 %v6941_v53, 0.0  ;;  %v15680_v53 = vld [vmem:[#allocation27_spill] sm:$0xff] }
 0xc47   : > { %9583 = vmatprep.subr.mxu0 %v15673_v21  ;;  %9673 = vmatprep.subr.mxu1 %v15674_v58  ;;  %v15138_v45 = vand.u32 4294901760, %v14462_v35 }
 0xc48   : > { %v8030_v38 = vsub.f32 %v6946_v59, %v14464_v13  ;;  %15672 = vst [vmem:[#allocation54_spill] sm:$0xff] %v14469_v51  ;;  %8285 = vmatprep.mubr.f32.mxu1 %v14464_v13  ;;  %9584 = vmatpush3.msra.mxu0 %v14306_v22  ;;  %v14476_v42 = vand.u32 4294901760, %v6950_v60  ;;  %v14481_v26 = vsub.f32 %v6949_v37, %v14469_v51  ;;  %v15679_v37 = vld [vmem:[#allocation45_spill] sm:$0xff] }
 0xc49   : > { %8287 = vmatmul.mubr.f32.vlgmr.msra.gmra.mxu1 %v14457_v30  ;;  %9585 = vmatprep.subr.mxu0 %v14318_v50  ;;  %v8038_v41 = vsub.f32 %v14462_v35, %v15138_v45  ;;  %v15694_v45 = vld [vmem:[#allocation50_spill] sm:$0xff]  ;;  %v15697_v30 = vld [vmem:[#allocation55_spill] sm:$0xff] }
 0xc4a   : > { %15675 = vst [vmem:[#allocation37_spill] sm:$0xff] %v14476_v42  ;;  %v8031_v43 = vand.u32 4294901760, %v8030_v38  ;;  %9674 = vmatpush3.msra.mxu1 %v15676_v16  ;;  %9586 = vmatpush3.msra.mxu0 %v14327_v10  ;;  %v14486_v9 = vsub.f32 %v6950_v60, %v14476_v42  ;;  %v15136_v49 = vand.u32 4294901760, %v14481_v26  ;;  %v15681_v60 = vld [vmem:[#allocation20_spill] sm:$0xff] }
 0xc4b   : > { %9675 = vmatprep.subr.mxu1 %v13948_v33  ;;  %9587 = vmatprep.subr.mxu0 %v14329_v57  ;;  %v8039_v59 = vand.u32 4294901760, %v8038_v41  ;;  %v15683_v41 = vld [vmem:[#allocation36_spill] sm:$0xff] }
 0xc4c   : > { %v8032_v20 = vsub.f32 %v8030_v38, %v8031_v43  ;;  %9676 = vmatpush3.msra.mxu1 %v13962_v12  ;;  %8292 = vmatprep.mubr.f32.mxu1 %v14476_v42  ;;  %v15137_v3 = vand.u32 4294901760, %v14486_v9  ;;  %v8053_v24 = vsub.f32 %v14481_v26, %v15136_v49  ;;  %v15692_v49 = vld [vmem:[#allocation41_spill] sm:$0xff] }
 0xc4d   : > { %9677 = vmatprep.subr.mxu1 %v15677_v8  ;;  %9588 = vmatpush3.msra.mxu0 %v14346_v62  ;;  %v15696_v42 = vld [vmem:[#allocation53_spill] sm:$0xff] }
 0xc4e   : > { %v8033_v52 = vand.u32 4294901760, %v8032_v20  ;;  %8294 = vmatmul.mubr.f32.gmra.mxu1 %v14469_v51  ;;  %9589 = vmatprep.subr.mxu0 %v14348_v32  ;;  %v8047_v7 = vsub.f32 %v14486_v9, %v15137_v3  ;;  %v15682_v20 = vld [vmem:[#allocation23_spill] sm:$0xff]  ;;  %v15695_v51 = vld [vmem:[#allocation40_spill] sm:$0xff] }
 0xc4f   : > { %9678 = vmatpush3.msra.mxu1 %v13985_v17  ;;  %8545 = vmatprep.mubr.f32.mxu1 %v8031_v43  ;;  %v8054_v43 = vand.u32 4294901760, %v8053_v24  ;;  %v15688_v24 = vld [vmem:[#allocation29_spill] sm:$0xff]  ;;  %v15693_v3 = vld [vmem:[#allocation43_spill] sm:$0xff] }
 0xc50   : > { %9679 = vmatprep.subr.mxu1 %v13991_v31  ;;  %9590 = vmatpush3.msra.mxu0 %v14368_v34  ;;  %v8048_v39 = vand.u32 4294901760, %v8047_v7  ;;  %v15685_v7 = vld [vmem:[#allocation19_spill] sm:$0xff] }
 0xc51   : > { %9680 = vmatpush3.msra.mxu1 %v13998_v54  ;;  %8034 = vmatprep.mubr.f32.mxu0 %v8033_v52  ;;  %v15684_v52 = vld [vmem:[#allocation38_spill] sm:$0xff] }
 0xc52   : > { %9635 = vmatprep.subr.mxu0 %v15678_v40  ;;  %9681 = vmatprep.subr.mxu1 %v14008_v55 }
 0xc53   : > { %8040 = vmatmul.mubr.f32.vlgmr.msra.gmra.mxu0 %v8039_v59  ;;  %9682 = vmatpush3.msra.mxu1 %v14034_v56  ;;  %v15686_v59 = vld [vmem:[#allocation21_spill] sm:$0xff] }
 0xc54   : > { %9636 = vmatpush3.msra.mxu0 %v15679_v37  ;;  %9683 = vmatprep.subr.mxu1 %v14050_v48 }
 0xc55   : > { %9637 = vmatprep.subr.mxu0 %v15680_v53  ;;  %9684 = vmatpush3.msra.mxu1 %v14059_v5 }
 0xc56   : > { %9638 = vmatpush3.msra.mxu0 %v15681_v60  ;;  %8049 = vmatprep.mubr.f32.mxu0 %v8048_v39  ;;  %v15687_v39 = vld [vmem:[#allocation35_spill] sm:$0xff] }
 0xc57   : > { %9639 = vmatprep.subr.mxu0 %v15682_v20  ;;  %9685 = vmatprep.subr.mxu1 %v14061_v4 }
 0xc58   : > { %8055 = vmatmul.mubr.f32.gmra.mxu0 %v8054_v43  ;;  %9686 = vmatpush3.msra.mxu1 %v15664_v14  ;;  %v15690_v43 = vld [vmem:[#allocation42_spill] sm:$0xff] }
 0xc59   : > { %9640 = vmatpush3.msra.mxu0 %v15683_v41  ;;  %8429 = vmatprep.mubr.f32.mxu0 %v8030_v38  ;;  %v15689_v38 = vld [vmem:[#allocation22_spill] sm:$0xff] }
 0xc5a   : > { %9641 = vmatprep.subr.mxu0 %v15684_v52  ;;  %9687 = vmatprep.subr.mxu1 %v15665_v1 }
 0xc5b   : > { %9642 = vmatpush3.msra.mxu0 %v15685_v7  ;;  %9688 = vmatpush3.msra.mxu1 %v15666_v11 }
 0xc5c   : > { %9643 = vmatprep.subr.mxu0 %v15686_v59  ;;  %9689 = vmatprep.subr.mxu1 %v15667_v44 }
 0xc5d   : > { %9644 = vmatpush3.msra.mxu0 %v15687_v39  ;;  %9690 = vmatpush3.msra.mxu1 %v15668_v27 }
 0xc5e   : > { %9645 = vmatprep.subr.mxu0 %v15688_v24  ;;  %9691 = vmatprep.subr.mxu1 %v15669_v0 }
 0xc5f   : > { %9646 = vmatpush3.msra.mxu0 %v15689_v38  ;;  %9692 = vmatpush3.msra.mxu1 %v15670_v47 }
 0xc60   : > { %9647 = vmatprep.subr.mxu0 %v15690_v43  ;;  %9693 = vmatprep.subr.mxu1 %v14233_v2 }
 0xc61   : > { %9648 = vmatpush3.msra.mxu0 %v15691_v29  ;;  %9694 = vmatpush3.msra.mxu1 %v14235_v46 }
 0xc62   : > { %9649 = vmatprep.subr.mxu0 %v15692_v49  ;;  %9695 = vmatprep.subr.mxu1 %v14256_v6 }
 0xc63   : > { %9650 = vmatpush3.msra.mxu0 %v15693_v3  ;;  %9696 = vmatpush3.msra.mxu1 %v14268_v63 }
 0xc64   : > { %9651 = vmatprep.subr.mxu0 %v15694_v45  ;;  %9697 = vmatprep.subr.mxu1 %v15673_v21  ;;  %v15698_v21 = vld [vmem:[#allocation56_spill] sm:$0xff] }
 0xc65   : > { %9652 = vmatpush3.msra.mxu0 %v15695_v51  ;;  %9698 = vmatpush3.msra.mxu1 %v14306_v22  ;;  %v15699_v22 = vld [vmem:[#allocation51_spill] sm:$0xff] }
 0xc66   : > { %9653 = vmatprep.subr.mxu0 %v15696_v42  ;;  %9699 = vmatprep.subr.mxu1 %v14318_v50 }
 0xc67   : > { %9654 = vmatpush3.msra.mxu0 %v15697_v30  ;;  %9700 = vmatpush3.msra.mxu1 %v14327_v10  ;;  %v15700_v10 = vand.u32 4294901760, %v14462_v35 }
 0xc68   : > { %9655 = vmatprep.subr.mxu0 %v14292_v25  ;;  %9701 = vmatprep.subr.mxu1 %v14329_v57 }
 0xc69   : > { %9656 = vmatpush3.msra.mxu0 %v14295_v15  ;;  %9702 = vmatpush3.msra.mxu1 %v14346_v62  ;;  %v15701_v15 = vand.u32 4294901760, %v14486_v9 }
 0xc6a   : > { %9657 = vmatprep.subr.mxu0 %v15698_v21  ;;  %9703 = vmatprep.subr.mxu1 %v14348_v32 }
 0xc6b   : > { %9658 = vmatpush3.msra.mxu0 %v15699_v22  ;;  %9704 = vmatpush3.msra.mxu1 %v14368_v34 }
 0xc6c   : > { %9659 = vmatprep.subr.mxu0 %v14325_v61  ;;  %8549 = vmatmul.mubr.f32.vlgmr.msra.gmra.mxu1 %v15700_v10  ;;  %v15702_v10 = vand.u32 4294901760, %v14481_v26 }
 0xc6d   : > { %9749 = vmatprep.subr.mxu1 %v15674_v58  ;;  %9660 = vmatpush3.msra.mxu0 %v14344_v28  ;;  %v15703_v58 = vld [vmem:[#allocation57_spill] sm:$0xff] }
 0xc6e   : > { %8556 = vmatprep.mubr.f32.mxu1 %v15701_v15  ;;  %9750 = vmatpush3.msra.mxu1 %v15676_v16  ;;  %v15704_v15 = vld [vmem:[#allocation59_spill] sm:$0xff] }
 0xc6f   : > { %9661 = vmatprep.subr.mxu0 %v14356_v23  ;;  %9751 = vmatprep.subr.mxu1 %v13948_v33  ;;  %v15705_v33 = vand.u32 4294901760, %v15678_v40 }
 0xc70   : > { %9662 = vmatpush3.msra.mxu0 %v14363_v19  ;;  %9752 = vmatpush3.msra.mxu1 %v13962_v12  ;;  %v15706_v12 = vand.u32 4294901760, %v15679_v37 }
 0xc71   : > { %9663 = vmatprep.subr.mxu0 %v14366_v36  ;;  %8560 = vmatmul.mubr.f32.gmra.mxu1 %v15702_v10 }
 0xc72   : > { %9753 = vmatprep.subr.mxu1 %v15677_v8  ;;  %9664 = vmatpush3.msra.mxu0 %v15703_v58 }
 0xc73   : > { %9754 = vmatpush3.msra.mxu1 %v13985_v17  ;;  %8837 = vmatprep.mubr.f32.mxu1 %v14464_v13  ;;  %v15707_v17 = vand.u32 4294901760, %v15680_v53 }
 0xc74   : > { %9665 = vmatprep.subr.mxu0 %v15704_v15  ;;  %9755 = vmatprep.subr.mxu1 %v13991_v31  ;;  %v15708_v31 = vand.u32 4294901760, %v15681_v60 }
 0xc75   : > { %9666 = vmatpush3.msra.mxu0 %v14410_v18  ;;  %9756 = vmatpush3.msra.mxu1 %v13998_v54  ;;  %v15709_v54 = vand.u32 4294901760, %v15682_v20 }
 0xc76   : > { %8432 = vmatmul.mubr.f32.vlgmr.msra.gmra.mxu0 %v14462_v35  ;;  %9711 = vmatprep.subr.mxu0 %v15705_v33  ;;  %v15722_v35 = vld [vmem:[#allocation34_spill] sm:$0xff] }
 0xc77   : > { %9757 = vmatprep.subr.mxu1 %v14008_v55  ;;  %8438 = vmatprep.mubr.f32.mxu0 %v14486_v9  ;;  %v15710_v55 = vand.u32 4294901760, %v15683_v41 }
 0xc78   : > { %9712 = vmatpush3.msra.mxu0 %v15706_v12  ;;  %9758 = vmatpush3.msra.mxu1 %v14034_v56  ;;  %v15711_v56 = vand.u32 4294901760, %v15684_v52 }
 0xc79   : > { %9713 = vmatprep.subr.mxu0 %v15707_v17  ;;  %9759 = vmatprep.subr.mxu1 %v14050_v48  ;;  %v15712_v48 = vand.u32 4294901760, %v15685_v7 }
 0xc7a   : > { %9714 = vmatpush3.msra.mxu0 %v15708_v31  ;;  %9760 = vmatpush3.msra.mxu1 %v14059_v5  ;;  %v15713_v5 = vand.u32 4294901760, %v15686_v59 }
 0xc7b   : > { %8441 = vmatmul.mubr.f32.gmra.mxu0 %v14481_v26  ;;  %9715 = vmatprep.subr.mxu0 %v15709_v54  ;;  %v15736_v26 = vld [vmem:[#allocation37_spill] sm:$0xff] }
 0xc7c   : > { %9761 = vmatprep.subr.mxu1 %v14061_v4  ;;  %9716 = vmatpush3.msra.mxu0 %v15710_v55  ;;  %v15714_v4 = vand.u32 4294901760, %v15687_v39 }
 0xc7d   : > { %8726 = vmatprep.mubr.f32.mxu0 %v14464_v13  ;;  %9762 = vmatpush3.msra.mxu1 %v15664_v14  ;;  %v15715_v14 = vand.u32 4294901760, %v15688_v24  ;;  %v15727_v13 = vld [vmem:[#allocation39_spill] sm:$0xff] }
 0xc7e   : > { %9717 = vmatprep.subr.mxu0 %v15711_v56  ;;  %9763 = vmatprep.subr.mxu1 %v15665_v1  ;;  %v15716_v1 = vand.u32 4294901760, %v15689_v38 }
 0xc7f   : > { %9718 = vmatpush3.msra.mxu0 %v15712_v48  ;;  %9764 = vmatpush3.msra.mxu1 %v15666_v11  ;;  %v15717_v11 = vand.u32 4294901760, %v15690_v43 }
 0xc80   : > { %9719 = vmatprep.subr.mxu0 %v15713_v5  ;;  %9765 = vmatprep.subr.mxu1 %v15667_v44  ;;  %v15718_v44 = vand.u32 4294901760, %v15691_v29  ;;  %v15724_v29 = vld [vmem:[#allocation33_spill] sm:$0xff] }
 0xc81   : > { %9720 = vmatpush3.msra.mxu0 %v15714_v4  ;;  %9766 = vmatpush3.msra.mxu1 %v15668_v27  ;;  %v15719_v27 = vand.u32 4294901760, %v15692_v49 }
 0xc82   : > { %9721 = vmatprep.subr.mxu0 %v15715_v14  ;;  %9767 = vmatprep.subr.mxu1 %v15669_v0  ;;  %v15720_v0 = vand.u32 4294901760, %v15693_v3 }
 0xc83   : > { %9722 = vmatpush3.msra.mxu0 %v15716_v1  ;;  %9768 = vmatpush3.msra.mxu1 %v15670_v47  ;;  %v15721_v47 = vand.u32 4294901760, %v15694_v45  ;;  %v15729_v45 = vld [vmem:[#allocation18_spill] sm:$0xff] }
 0xc84   : > { %9723 = vmatprep.subr.mxu0 %v15717_v11  ;;  %9769 = vmatprep.subr.mxu1 %v14233_v2  ;;  %v15723_v2 = vand.u32 4294901760, %v15695_v51  ;;  %v15730_v51 = vand.u32 4294901760, %v15729_v45 }
 0xc85   : > { %9724 = vmatpush3.msra.mxu0 %v15718_v44  ;;  %9770 = vmatpush3.msra.mxu1 %v14235_v46  ;;  %v15725_v46 = vand.u32 4294901760, %v15696_v42  ;;  %v15731_v42 = vand.u32 4294901760, %v15698_v21  ;;  %v15742_v21 = vand.u32 4294901760, %v15704_v15 }
 0xc86   : > { %9725 = vmatprep.subr.mxu0 %v15719_v27  ;;  %9771 = vmatprep.subr.mxu1 %v14256_v6  ;;  %v15726_v6 = vand.u32 4294901760, %v15697_v30  ;;  %v15734_v30 = vld [vmem:[#allocation58_spill] sm:$0xff] }
 0xc87   : > { %9726 = vmatpush3.msra.mxu0 %v15720_v0  ;;  %9772 = vmatpush3.msra.mxu1 %v14268_v63  ;;  %v15728_v63 = vand.u32 4294901760, %v14292_v25  ;;  %v15733_v25 = vand.u32 4294901760, %v14325_v61  ;;  %v15741_v61 = vand.u32 4294901760, %v15703_v58 }
 0xc88   : > { %9727 = vmatprep.subr.mxu0 %v15721_v47  ;;  %9773 = vmatprep.subr.mxu1 %v15722_v35 }
 0xc89   : > { %9728 = vmatpush3.msra.mxu0 %v15723_v2  ;;  %9774 = vmatpush3.msra.mxu1 %v15724_v29 }
 0xc8a   : > { %9729 = vmatprep.subr.mxu0 %v15725_v46  ;;  %9775 = vmatprep.subr.mxu1 %v14318_v50  ;;  %v15732_v50 = vand.u32 4294901760, %v15699_v22  ;;  %v15739_v22 = vand.u32 4294901760, %v14366_v36 }
 0xc8b   : > { %9730 = vmatpush3.msra.mxu0 %v15726_v6  ;;  %9776 = vmatpush3.msra.mxu1 %v15727_v13 }
 0xc8c   : > { %9731 = vmatprep.subr.mxu0 %v15728_v63  ;;  %9777 = vmatprep.subr.mxu1 %v14329_v57  ;;  %v15735_v57 = vand.u32 4294901760, %v14344_v28  ;;  %v15743_v28 = vand.u32 4294901760, %v14410_v18 }
 0xc8d   : > { %9732 = vmatpush3.msra.mxu0 %v15730_v51  ;;  %9778 = vmatpush3.msra.mxu1 %v14346_v62  ;;  %v15737_v62 = vand.u32 4294901760, %v14356_v23 }
 0xc8e   : > { %9733 = vmatprep.subr.mxu0 %v15731_v42  ;;  %9779 = vmatprep.subr.mxu1 %v14348_v32  ;;  %v15738_v32 = vand.u32 4294901760, %v14363_v19 }
 0xc8f   : > { %9734 = vmatpush3.msra.mxu0 %v15732_v50  ;;  %9780 = vmatpush3.msra.mxu1 %v14368_v34  ;;  %v15740_v34 = vld [vmem:[#allocation54_spill] sm:$0xff] }
 0xc90   : > { %9735 = vmatprep.subr.mxu0 %v15733_v25  ;;  %8839 = vmatmul.mubr.f32.vlgmr.msra.gmra.mxu1 %v15734_v30 }
 0xc91   : > { %9736 = vmatpush3.msra.mxu0 %v15735_v57  ;;  %8844 = vmatprep.mubr.f32.mxu1 %v15736_v26 }
 0xc92   : > { %9737 = vmatprep.subr.mxu0 %v15737_v62 }
 0xc93   : > { %9738 = vmatpush3.msra.mxu0 %v15738_v32 }
 0xc94   : > { %9739 = vmatprep.subr.mxu0 %v15739_v22  ;;  %8846 = vmatmul.mubr.f32.gmra.mxu1 %v15740_v34 }
 0xc95   : > { %9740 = vmatpush3.msra.mxu0 %v15741_v61 }
 0xc96   : > { %9741 = vmatprep.subr.mxu0 %v15742_v21 }
 0xc97   : > { %9742 = vmatpush3.msra.mxu0 %v15743_v28 }
 0xc98   : > { %8728 = vmatmul.mubr.f32.vlgmr.msra.gmra.mxu0 %v15734_v30 }
 0xc99   : > { %8733 = vmatprep.mubr.f32.mxu0 %v15736_v26 }
 0xc9b   : > { %v9401_v23 = vpop.f32.mrf.mxu1 }
 0xc9c   : > { %8735 = vmatmul.mubr.f32.gmra.mxu0 %v15740_v34 }
 0xc9d   : > { %v9402_v19 = vpop.f32.mrf.mxu1 }
 0xc9e   : > { %v9403_v55 = vadd.f32 %v9402_v19, %v9401_v23 }
 0xc9f   : > { %v9404_v16 = vpop.f32.mrf.mxu1 }
 0xca1   : > { %v9405_v8 = vpop.f32.mrf.mxu1 }
 0xca2   : > { %v9406_v11 = vadd.f32 %v9405_v8, %v9404_v16 }
 0xca3   : > { %v9363_v36 = vpop.f32.mrf.mxu0 }
 0xca5   : > { %v9364_v9 = vpop.f32.mrf.mxu0 }
 0xca6   : > { %v9365_v54 = vadd.f32 %v9364_v9, %v9363_v36 }
 0xca8   : > { %v9366_v3 = vpop.f32.mrf.mxu0  ;;  %v7371_v4 = vadd.f32 %v9403_v55, %v9365_v54  ;;  %v15744_v54 = vld [vmem:[#allocation26_spill] sm:$0xff] }
 0xcaa   : > { %v9367_v40 = vpop.f32.mrf.mxu0 }
 0xcab   : > { %v9368_v14 = vadd.f32 %v9367_v40, %v9366_v3 }
 0xcad   : > { %v7378_v47 = vadd.f32 %v9406_v11, %v9368_v14 }
 0xcbd   : > { %v9477_v49 = vpop.f32.mrf.mxu1 }
 0xcbf   : > { %v9478_v37 = vpop.f32.mrf.mxu1 }
 0xcc0   : > { %v9479_v35 = vadd.f32 %v9478_v37, %v9477_v49 }
 0xcc2   : > { %v9480_v60 = vpop.f32.mrf.mxu1 }
 0xcc4   : > { %v9481_v20 = vpop.f32.mrf.mxu1 }
 0xcc5   : > { %v9482_v63 = vadd.f32 %v9481_v20, %v9480_v60 }
 0xcc6   : > { %v9439_v53 = vpop.f32.mrf.mxu0 }
 0xcc8   : > { %v9440_v18 = vpop.f32.mrf.mxu0 }
 0xcc9   : > { %v9441_v56 = vadd.f32 %v9440_v18, %v9439_v53 }
 0xccb   : > { %v9442_v41 = vpop.f32.mrf.mxu0  ;;  %v7516_v44 = vadd.f32 %v9441_v56, %v7371_v4  ;;  %v15745_v4 = vld [vmem:[#allocation24_spill] sm:$0xff] }
 0xccd   : > { %v9443_v7 = vpop.f32.mrf.mxu0  ;;  %v7633_v13 = vadd.f32 %v9479_v35, %v7516_v44 }
 0xcce   : > { %v9444_v27 = vadd.f32 %v9443_v7, %v9442_v41 }
 0xcd0   : > { %v7525_v6 = vadd.f32 %v9444_v27, %v7378_v47 }
 0xcd2   : > { %v7644_v30 = vadd.f32 %v9482_v63, %v7525_v6 }
 0xce1   : > { %v9553_v52 = vpop.f32.mrf.mxu1 }
 0xce3   : > { %v9554_v59 = vpop.f32.mrf.mxu1 }
 0xce4   : > { %v9555_v25 = vadd.f32 %v9554_v59, %v9553_v52 }
 0xce8   : > { %v9556_v24 = vpop.f32.mrf.mxu1 }
 0xcea   : > { %v9557_v43 = vpop.f32.mrf.mxu1 }
 0xceb   : > { %v9558_v34 = vadd.f32 %v9557_v43, %v9556_v24 }
 0xcee   : > { %v9515_v39 = vpop.f32.mrf.mxu0 }
 0xcf0   : > { %v9516_v38 = vpop.f32.mrf.mxu0 }
 0xcf1   : > { %v9517_v2 = vadd.f32 %v9516_v38, %v9515_v39 }
 0xcf2   : > { %v9518_v10 = vpop.f32.mrf.mxu0 }
 0xcf3   : > { %v7812_v45 = vadd.f32 %v9517_v2, %v7633_v13 }
 0xcf4   : > { %v9519_v15 = vpop.f32.mrf.mxu0 }
 0xcf5   : > { %v9520_v51 = vadd.f32 %v9519_v15, %v9518_v10  ;;  %v7923_v62 = vadd.f32 %v9555_v25, %v7812_v45 }
 0xcf7   : > { %v7819_v26 = vadd.f32 %v9520_v51, %v7644_v30 }
 0xcf9   : > { %v7930_v19 = vadd.f32 %v9558_v34, %v7819_v26 }
 0xd09   : > { %v9629_v58 = vpop.f32.mrf.mxu1 }
 0xd0b   : > { %v9630_v33 = vpop.f32.mrf.mxu1 }
 0xd0c   : > { %v9631_v23 = vadd.f32 %v9630_v33, %v9629_v58 }
 0xd0e   : > { %v9632_v17 = vpop.f32.mrf.mxu1 }
 0xd10   : > { %v9633_v48 = vpop.f32.mrf.mxu1 }
 0xd11   : > { %v9634_v49 = vadd.f32 %v9633_v48, %v9632_v17  ;;  %v9011_v17 = vld [vmem:[%s14747_s11] ss:$0 sm:$0xff] }
 0xd13   : > { %v9591_v12 = vpop.f32.mrf.mxu0 }
 0xd15   : > { %v9592_v31 = vpop.f32.mrf.mxu0 }
 0xd16   : > { %v9593_v57 = vadd.f32 %v9592_v31, %v9591_v12 }
 0xd18   : > { %v9594_v5 = vpop.f32.mrf.mxu0  ;;  %v8042_v61 = vadd.f32 %v9593_v57, %v7923_v62 }
 0xd1a   : > { %v9595_v0 = vpop.f32.mrf.mxu0  ;;  %v8289_v8 = vadd.f32 %v9631_v23, %v8042_v61 }
 0xd1b   : > { %v9596_v21 = vadd.f32 %v9595_v0, %v9594_v5 }
 0xd1d   : > { %v8057_v9 = vadd.f32 %v9596_v21, %v7930_v19 }
 0xd1f   : > { %v8296_v18 = vadd.f32 %v9634_v49, %v8057_v9 }
 0xd2c   : > { %v9705_v1 = vpop.f32.mrf.mxu1 }
 0xd2e   : > { %v9706_v29 = vpop.f32.mrf.mxu1 }
 0xd2f   : > { %v9707_v60 = vadd.f32 %v9706_v29, %v9705_v1 }
 0xd31   : > { %v9708_v42 = vpop.f32.mrf.mxu1 }
 0xd33   : > { %v9709_v32 = vpop.f32.mrf.mxu1 }
 0xd34   : > { %v9710_v24 = vadd.f32 %v9709_v32, %v9708_v42 }
 0xd36   : > { %v9667_v46 = vpop.f32.mrf.mxu0 }
 0xd38   : > { %v9668_v50 = vpop.f32.mrf.mxu0 }
 0xd39   : > { %v9669_v36 = vadd.f32 %v9668_v50, %v9667_v46 }
 0xd3b   : > { %v9670_v22 = vpop.f32.mrf.mxu0  ;;  %v8434_v40 = vadd.f32 %v9669_v36, %v8289_v8 }
 0xd3d   : > { %v9671_v16 = vpop.f32.mrf.mxu0  ;;  %v8551_v7 = vadd.f32 %v9707_v60, %v8434_v40 }
 0xd3e   : > { %v9672_v37 = vadd.f32 %v9671_v16, %v9670_v22 }
 0xd40   : > { %v8443_v52 = vadd.f32 %v9672_v37, %v8296_v18 }
 0xd42   : > { %v8562_v33 = vadd.f32 %v9710_v24, %v8443_v52 }
 0xd50   : > { %v9781_v28 = vpop.f32.mrf.mxu1 }
 0xd52   : > { %v9782_v3 = vpop.f32.mrf.mxu1 }
 0xd53   : > { %v9783_v38 = vadd.f32 %v9782_v3, %v9781_v28 }
 0xd54   : > { %v9784_v20 = vpop.f32.mrf.mxu1 }
 0xd56   : > { %v9785_v10 = vpop.f32.mrf.mxu1 }
 0xd57   : > { %v9786_v31 = vadd.f32 %v9785_v10, %v9784_v20 }
 0xd58   : > { %v9743_v53 = vpop.f32.mrf.mxu0 }
 0xd5a   : > { %v9744_v41 = vpop.f32.mrf.mxu0 }
 0xd5b   : > { %v9745_v59 = vadd.f32 %v9744_v41, %v9743_v53 }
 0xd5c   : > { %v9746_v39 = vpop.f32.mrf.mxu0 }
 0xd5d   : > { %v8730_v43 = vadd.f32 %v9745_v59, %v8551_v7 }
 0xd5e   : > { %v9747_v58 = vpop.f32.mrf.mxu0 }
 0xd5f   : > { %v8841_v15 = vadd.f32 %v9783_v38, %v8730_v43  ;;  %v9748_v12 = vadd.f32 %v9747_v58, %v9746_v39 }
 0xd61   : > { %v8851_v55 = vadd.f32 %v8841_v15, %v15744_v54  ;;  %v8737_v56 = vadd.f32 %v9748_v12, %v8562_v33 }
 0xd63   : > { %v8860_v48 = vadd.f32 %v9011_v17, %v8851_v55  ;;  %v8848_v5 = vadd.f32 %v9786_v31, %v8737_v56 }
 0xd65   : > { %8862 = vst [vmem:[%s489_s26] sm:$0xff] %v8860_v48  ;;  %v8852_v14 = vadd.f32 %v8848_v5, %v15745_v4 }
 0xd67   : > { %v8861_v1 = vadd.f32 %v9011_v17, %v8852_v14 }
 0xd69   : > { %8863 = vst [vmem:[%s489_s26 + $0x8] sm:$0xff] %v8861_v1 }
 0xd6a   : > { %10643 = shalt.err (!%p10640_p2)
}
 0xd6b   : > { %s10644_s15 = scalar_lea.hbm %s14691_s16, 256  ;;  %s10648_s29 = scalar_lea.hbm %s14748_s12, 512 }
 0xd6c   : > { %p10645_p3 = scmp.ne.s32.totalorder %s14691_s16, %s10644_s15  ;;  %p10649_p0 = scmp.lt.s32.totalorder %s14691_s16, %s14748_s12 }
 0xd6d   : > { %p10650_p11 = scmp.lt.s32.totalorder %s10648_s29, %s10644_s15 }
 0xd6e   : > { %p10646_p4 = pnand %p10645_p3, %p15746_p7 }
 0xd6f   : > { %p10651_p6 = por %p10650_p11, %p10649_p0 }
 0xd70   : > { %p10647_p8 = pneg %p10646_p4 }
 0xd72   : > { %p10652_p12 = pnand %p10651_p6, %p10647_p8 }
 0xd74   : > { %10655 = shalt.err (!%p10652_p12)
}
 0xd75   : > { %s10718_s13 = smov 128   ;;  %s10719_s19 = smov 8  }
 0xd76   : > { %10393 = dma.vmem_to_hbm [thread:$0]  (%p15746_p7), %s14693_s14, 256, %s14691_s16, %s8865_s30, %s10718_s13, %s10718_s13, %s10719_s19  }
 0xd77 PF: > { %s15747_s25 = sld [smem:[#allocation16_spill]]  ;;  %p15750_p13 = scmp.ge.s32.totalorder %s10702_s24, 2 }
 0xd78   : > { %s15748_s10 = sld [smem:[#allocation17_spill]] }
 0xd7d   : > { %s8893_s4 = sand.u32 1, %s15747_s25  }
 0xd7e   : > { %p15749_p9 = scmp.ne.s32.totalorder %s15748_s10, 0  ;;  %s8894_s17 = scalar_lea.sflag [#allocation4], %s8893_s4 }
 0xd80   : > { %p10413_p5 = pnand %p15750_p13, %p15749_p9 }
 0xd82   : > { %p10414_p10 = pneg %p10413_p5 }
 0xd84   : > { %10685 = dma.done.wait (%p10414_p10), %s8894_s17, 256  }
 0xd85   : > { %10687 = vsyncadd (%p10414_p10), %s8894_s17, 4294967040  ;;  %p27_p1 = scmp.ge.s32.totalorder %s10879_s18, 4   ;;  %s15751_s21 = smov %s10694_s22 }
 0xd86   : > { %s15752_s22 = smov %s10698_s23  ;;  %s15753_s23 = smov %s10895_s28 }
 0xd87   : > { %s15754_s24 = smov %s10879_s18  ;;  %29 = sbr.rel (!%p27_p1) target bundleno = 12 (0xc), region = 129 }
 0xd8c   :  { %8899 = vsyncpa [#allocation3], 1 }
 0xd8d   :  { %8901 = vsyncpa [#allocation3 + $0x1], 1 }
 0xd8e   :  { %8902 = vsyncpa [#allocation6], 1 }
 0xd8f   :  { %8903 = vsyncpa [#allocation9], 1 }
 0xd90   :  { %8904 = vsyncpa [#allocation4], 1 }
 0xd91   :  { %8906 = vsyncpa [#allocation4 + $0x1], 1 }

</bundles_post_ra>
